<compile_context>
chip_gen: v7x
topology: tpu7x:2x2x1
jax: 0.10.0
libtpu: 0.0.40
codegen_flags: <defaults>
</compile_context>

<pallas_src>
import numpy as np
import jax
import jax.numpy as jnp
from jax.experimental import pallas as pl
from jax.experimental.pallas import tpu as pltpu


# ----------------------------- fused kernel -----------------------------

def _make_kernel(layer_dims):
    """layer_dims: tuple of (H, W, Cin, Cout) per ConvBlock (static)."""
    n = len(layer_dims)

    def conv_block(xt, w_ref, gamma, beta, H, W, Cout):
        # xt: (Cin, R) f32, R = B*H*W, positions (b, h, w) row-major on lanes.
        Cin, R = xt.shape
        log2w = W.bit_length() - 1                      # W, H are powers of two
        ri = jax.lax.broadcasted_iota(jnp.int32, (1, R), 1)
        ww = jnp.bitwise_and(ri, W - 1)                 # w coordinate per lane
        hh = jnp.bitwise_and(jnp.right_shift(ri, log2w), H - 1)  # h coordinate

        acc = jnp.zeros((Cout, R), jnp.float32)
        # Implicit GEMM: 25 lane-rolled, masked copies of the VMEM-resident
        # activation; each hits the MXU with bf16 operands / f32 accumulation.
        for kh in range(5):
            dh = kh - 2
            for kw in range(5):
                dw = kw - 2
                s = dh * W + dw                         # row-space shift
                if s == 0:
                    piece = xt
                else:
                    piece = pltpu.roll(xt, (-s) % R, axis=1)
                    valid = ((hh + dh >= 0) & (hh + dh < H) &
                             (ww + dw >= 0) & (ww + dw < W))
                    piece = jnp.where(valid, piece, 0.0)   # conv zero padding
                wk = w_ref[kh * 5 + kw].astype(jnp.bfloat16)   # (Cout, Cin)
                acc = acc + jnp.dot(wk, piece.astype(jnp.bfloat16),
                                    preferred_element_type=jnp.float32)

        # BatchNorm2d, training-mode batch statistics (two-pass, f32).
        inv_n = 1.0 / float(R)
        mean = jnp.sum(acc, axis=1, keepdims=True) * inv_n
        cent = acc - mean
        var = jnp.sum(cent * cent, axis=1, keepdims=True) * inv_n
        y = cent * jax.lax.rsqrt(var + 1e-5) * gamma + beta
        y = jnp.where(y > 0, y, 0.2 * y)                # LeakyReLU(0.2)

        # MaxPool(2x2): pairwise maxima via lane rolls; the result is only read
        # at (h even, w even) lanes downstream.
        y = jnp.maximum(y, pltpu.roll(y, R - 1, axis=1))   # (w, w+1)
        y = jnp.maximum(y, pltpu.roll(y, R - W, axis=1))   # (h, h+1)
        return y                                           # (Cout, R)

    def kernel(*refs):
        ximg_ref, erep_ref, wcrep_ref = refs[0:3]
        w_refs = refs[3:3 + n]
        g_refs = refs[3 + n:3 + 2 * n]
        b_refs = refs[3 + 2 * n:3 + 3 * n]
        sel_refs = refs[3 + 3 * n:3 + 4 * n - 1]
        wdfull_ref = refs[3 + 4 * n - 1]
        selb_ref = refs[3 + 4 * n]
        o_ref = refs[3 + 4 * n + 1]

        # class path: y[b, h*W+w] = relu(<emb[b], Wcd[h*W+w, :]>), computed as
        # a row-wise dot in the transposed layout (no one-hot matmul).
        y_row = jnp.sum(erep_ref[...] * wcrep_ref[...], axis=0, keepdims=True)
        y_row = jnp.maximum(y_row, 0.0)                    # (1, R0)

        ximg = ximg_ref[...]                               # (Cin0, R0), last row 0
        cin0 = ximg.shape[0]
        ch = jax.lax.broadcasted_iota(jnp.int32, (cin0, 1), 0)
        is_cls = (ch == cin0 - 1).astype(jnp.float32)      # (Cin0, 1)
        xt = ximg + is_cls * y_row                         # channel "concat"

        for i, (H, W, _, Cout) in enumerate(layer_dims):
            xt = conv_block(xt, w_refs[i], g_refs[i][...], b_refs[i][...],
                            H, W, Cout)
            if i + 1 < n:
                # compact pooled (h even, w even) lanes for the next layer
                xt = jnp.dot(xt, sel_refs[i][...],
                             preferred_element_type=jnp.float32)

        # head: NCHW flatten folded into wdfull; per-batch sum via 0/1 matmul.
        contrib = jnp.sum(xt * wdfull_ref[...], axis=0, keepdims=True)  # (1, Rl)
        logits = jnp.dot(contrib, selb_ref[...],
                         preferred_element_type=jnp.float32)            # (1, B)
        o_ref[...] = 1.0 / (1.0 + jnp.exp(-logits))                      # sigmoid

    return kernel


# ----------------------------- forward wrapper -----------------------------

def discriminator_forward(images_nchw, class_indexes, params, cfg):
    B, Cimg, H, W = images_nchw.shape
    assert H == W == cfg["image_size"]
    assert (H & (H - 1)) == 0, "image_size must be a power of two"
    steps = cfg["d_resize_steps"]
    f32 = jnp.float32

    # static per-layer geometry: (H, W, Cin, Cout)
    layer_dims = []
    cin, cout, side = Cimg + 1, cfg["d_initial_filters"], H
    for _ in range(steps):
        layer_dims.append((side, side, cin, cout))
        cin, cout, side = cout, cout * 2, side // 2
    layer_dims = tuple(layer_dims)
    last_H, last_W, _, last_C = layer_dims[-1]
    min_map = last_H // 2
    HW = H * W
    R0 = B * HW

    # --- data-dependent inputs (tiny XLA glue; no im2col amplification) ---
    ximg_t = jnp.transpose(images_nchw, (1, 0, 2, 3)).reshape(Cimg, R0)
    ximg_t = jnp.concatenate([ximg_t, jnp.zeros((1, R0), f32)], 0).astype(f32)

    emb = jnp.take(params["embedding"], class_indexes, axis=0)        # (B, E)
    erep_t = jnp.transpose(jnp.repeat(emb, HW, axis=0)).astype(f32)   # (E, R0)
    wcrep_t = jnp.tile(jnp.transpose(params["class_dense_w"]), (1, B)).astype(f32)

    w_in, g_in, b_in = [], [], []
    for i, (_, _, ci, co) in enumerate(layer_dims):
        w = params[f"conv{i}_w"]                                      # (co, ci, 5, 5)
        w_in.append(jnp.transpose(w, (2, 3, 0, 1)).reshape(25, co, ci).astype(f32))
        g_in.append(params[f"bn{i}_gamma"].reshape(co, 1).astype(f32))
        b_in.append(params[f"bn{i}_beta"].reshape(co, 1).astype(f32))

    # --- static 0/1 selection & head-weight constants (host-built once) ---
    sel_in = []
    for i in range(steps - 1):
        Hi, Wi, _, _ = layer_dims[i]
        Ri, Hn, Wn = B * Hi * Wi, Hi // 2, Wi // 2
        Rn = B * Hn * Wn
        q = np.arange(Rn)
        b_ = q // (Hn * Wn)
        hb = (q % (Hn * Wn)) // Wn
        wb = q % Wn
        src = b_ * Hi * Wi + (2 * hb) * Wi + 2 * wb
        sel = np.zeros((Ri, Rn), np.float32)
        sel[src, q] = 1.0
        sel_in.append(jnp.asarray(sel))

    R_last = B * last_H * last_W
    r = np.arange(R_last)
    h2 = (r % (last_H * last_W)) // last_W
    w2 = r % last_W
    dense_w = np.asarray(params["dense_w"]).reshape(-1)               # (C*mm*mm,)
    cc = np.arange(last_C)
    idx = cc[:, None] * (min_map * min_map) + ((h2 // 2) * min_map + (w2 // 2))[None, :]
    pooled_here = ((h2 % 2) == 0) & ((w2 % 2) == 0)
    wdfull_t = np.where(pooled_here[None, :], dense_w[idx], 0.0).astype(np.float32)
    selb = np.zeros((R_last, B), np.float32)
    selb[r, r // (last_H * last_W)] = 1.0

    inputs = ([ximg_t, erep_t, wcrep_t] + w_in + g_in + b_in + sel_in
              + [jnp.asarray(wdfull_t), jnp.asarray(selb)])

    # advisory cost estimate for the XLA scheduler
    flops = 2 * R0 * cfg["embedding_size"]
    for (Hi, Wi, ci, co) in layer_dims:
        flops += 2 * (B * Hi * Wi) * (25 * ci) * co
    for i, s in enumerate(sel_in):
        flops += 2 * layer_dims[i][3] * int(s.shape[0]) * int(s.shape[1])
    flops += 2 * R_last * last_C + 2 * R_last * B
    transcendentals = sum(d[3] for d in layer_dims) + B
    bytes_accessed = sum(int(np.prod(x.shape)) * 4 for x in inputs) + 4 * B

    vspec = pl.BlockSpec(memory_space=pltpu.MemorySpace.VMEM)
    out = pl.pallas_call(
        _make_kernel(layer_dims),
        out_shape=jax.ShapeDtypeStruct((1, B), f32),
        in_specs=[vspec] * len(inputs),
        out_specs=vspec,
        cost_estimate=pl.CostEstimate(flops=int(flops),
                                      transcendentals=int(transcendentals),
                                      bytes_accessed=int(bytes_accessed)),
    )(*inputs)
    return jnp.transpose(out)                                          # (B, 1)


# ----------------------------- parameter init -----------------------------

def init_params(cfg, key):
    keys = jax.random.split(key, 4 + cfg["d_resize_steps"])
    p = {}
    emb = cfg["embedding_size"]
    img = cfg["image_size"]
    p["embedding"] = 0.02 * jax.random.normal(keys[0], (cfg["num_classes"], emb),
                                              jnp.float32)
    # PyTorch Linear weight layout (out_features, in_features), no bias
    p["class_dense_w"] = 0.02 * jax.random.normal(keys[1], (img * img, emb),
                                                  jnp.float32)
    in_ch = cfg["input_channels"] + 1
    out_ch = cfg["d_initial_filters"]
    for i in range(cfg["d_resize_steps"]):
        p[f"conv{i}_w"] = 0.02 * jax.random.normal(keys[2 + i],
                                                   (out_ch, in_ch, 5, 5),
                                                   jnp.float32)
        p[f"bn{i}_gamma"] = jnp.ones((out_ch,), jnp.float32)
        p[f"bn{i}_beta"] = jnp.zeros((out_ch,), jnp.float32)
        in_ch = out_ch
        out_ch *= 2
    min_map = img // (2 ** cfg["d_resize_steps"])
    last_ch = out_ch // 2
    p["dense_w"] = 0.02 * jax.random.normal(keys[2 + cfg["d_resize_steps"]],
                                            (1, min_map * min_map * last_ch),
                                            jnp.float32)
    return p


# ----------------------------- main -----------------------------

if __name__ == "__main__":
    cfg = dict(
        image_size=16,
        input_channels=3,
        embedding_size=8,
        d_resize_steps=2,
        d_initial_filters=8,
        num_classes=10,
    )
    B = 2

    key = jax.random.PRNGKey(0)
    k_img, k_cls, k_par = jax.random.split(key, 3)
    images = jax.random.normal(k_img, (B, cfg["input_channels"],
                                       cfg["image_size"], cfg["image_size"]),
                               jnp.float32)                    # NCHW like PyTorch
    class_indexes = jax.random.randint(k_cls, (B,), 0, cfg["num_classes"],
                                       dtype=jnp.int32)
    params = init_params(cfg, k_par)

    out = discriminator_forward(images, class_indexes, params, cfg)
    out = jax.block_until_ready(out)
    assert out.shape == (B, 1)
    assert bool(jnp.all(jnp.isfinite(out)))
    assert bool(jnp.all((out >= 0.0) & (out <= 1.0)))
    print("KERNEL_OK")
</pallas_src>

<mosaic_0001>
module attributes {stable_mosaic.version = 11 : i64} {
  func.func @kernel(%arg0: memref<4x512xf32, #tpu.memory_space<vmem>>, %arg1: memref<8x512xf32, #tpu.memory_space<vmem>>, %arg2: memref<8x512xf32, #tpu.memory_space<vmem>>, %arg3: memref<25x8x4xf32, #tpu.memory_space<vmem>>, %arg4: memref<25x16x8xf32, #tpu.memory_space<vmem>>, %arg5: memref<8x1xf32, #tpu.memory_space<vmem>>, %arg6: memref<16x1xf32, #tpu.memory_space<vmem>>, %arg7: memref<8x1xf32, #tpu.memory_space<vmem>>, %arg8: memref<16x1xf32, #tpu.memory_space<vmem>>, %arg9: memref<512x128xf32, #tpu.memory_space<vmem>>, %arg10: memref<16x128xf32, #tpu.memory_space<vmem>>, %arg11: memref<128x2xf32, #tpu.memory_space<vmem>>, %arg12: memref<1x2xf32, #tpu.memory_space<vmem>>) attributes {dimension_semantics = [], scalar_prefetch = 0 : i64, scratch_operands = 0 : i64, tpu.core_type = #tpu.core_type<tc>} {
    %c0 = arith.constant 0 : index
    %c0_0 = arith.constant 0 : index
    %0 = vector.load %arg1[%c0, %c0_0] : memref<8x512xf32, #tpu.memory_space<vmem>>, vector<8x512xf32>
    %c0_1 = arith.constant 0 : index
    %c0_2 = arith.constant 0 : index
    %1 = vector.load %arg2[%c0_1, %c0_2] : memref<8x512xf32, #tpu.memory_space<vmem>>, vector<8x512xf32>
    %2 = arith.mulf %0, %1 : vector<8x512xf32>
    %cst = arith.constant dense<0.000000e+00> : vector<512xf32>
    %3 = vector.multi_reduction <add>, %2, %cst [0] : vector<8x512xf32> to vector<512xf32>
    %4 = vector.shape_cast %3 : vector<512xf32> to vector<1x512xf32>
    %cst_3 = arith.constant 0.000000e+00 : f32
    %5 = vector.broadcast %cst_3 : f32 to vector<1x512xf32>
    %6 = arith.maximumf %4, %5 : vector<1x512xf32>
    %c0_4 = arith.constant 0 : index
    %c0_5 = arith.constant 0 : index
    %7 = vector.load %arg0[%c0_4, %c0_5] : memref<4x512xf32, #tpu.memory_space<vmem>>, vector<4x512xf32>
    %8 = tpu.iota {dimensions = array<i32: 0>} : vector<4x1xi32>
    %c3_i32 = arith.constant 3 : i32
    %9 = vector.broadcast %c3_i32 : i32 to vector<4x1xi32>
    %10 = arith.cmpi eq, %8, %9 : vector<4x1xi32>
    %11 = arith.extui %10 : vector<4x1xi1> to vector<4x1xi32>
    %12 = arith.sitofp %11 : vector<4x1xi32> to vector<4x1xf32>
    %13 = vector.broadcast %12 : vector<4x1xf32> to vector<4x512xf32>
    %14 = vector.broadcast %6 : vector<1x512xf32> to vector<4x512xf32>
    %15 = arith.mulf %13, %14 : vector<4x512xf32>
    %16 = arith.addf %7, %15 : vector<4x512xf32>
    %c0_6 = arith.constant 0 : index
    %c0_7 = arith.constant 0 : index
    %17 = vector.load %arg5[%c0_6, %c0_7] : memref<8x1xf32, #tpu.memory_space<vmem>>, vector<8x1xf32>
    %c0_8 = arith.constant 0 : index
    %c0_9 = arith.constant 0 : index
    %18 = vector.load %arg7[%c0_8, %c0_9] : memref<8x1xf32, #tpu.memory_space<vmem>>, vector<8x1xf32>
    %19 = tpu.iota {dimensions = array<i32: 1>} : vector<1x512xi32>
    %c15_i32 = arith.constant 15 : i32
    %20 = vector.broadcast %c15_i32 : i32 to vector<1x512xi32>
    %21 = arith.andi %19, %20 : vector<1x512xi32>
    %c4_i32 = arith.constant 4 : i32
    %22 = vector.broadcast %c4_i32 : i32 to vector<1x512xi32>
    %23 = arith.shrsi %19, %22 : vector<1x512xi32>
    %c15_i32_10 = arith.constant 15 : i32
    %24 = vector.broadcast %c15_i32_10 : i32 to vector<1x512xi32>
    %25 = arith.andi %23, %24 : vector<1x512xi32>
    %cst_11 = arith.constant 0.000000e+00 : f32
    %26 = vector.broadcast %cst_11 : f32 to vector<8x512xf32>
    %c34_i32 = arith.constant 34 : i32
    %27 = tpu.dynamic_rotate %16 by %c34_i32 dim 1 : vector<4x512xf32>, i32 -> vector<4x512xf32>
    %c-2_i32 = arith.constant -2 : i32
    %28 = vector.broadcast %c-2_i32 : i32 to vector<1x512xi32>
    %29 = arith.addi %25, %28 : vector<1x512xi32>
    %c0_i32 = arith.constant 0 : i32
    %30 = vector.broadcast %c0_i32 : i32 to vector<1x512xi32>
    %31 = arith.cmpi sge, %29, %30 : vector<1x512xi32>
    %c-2_i32_12 = arith.constant -2 : i32
    %32 = vector.broadcast %c-2_i32_12 : i32 to vector<1x512xi32>
    %33 = arith.addi %25, %32 : vector<1x512xi32>
    %c16_i32 = arith.constant 16 : i32
    %34 = vector.broadcast %c16_i32 : i32 to vector<1x512xi32>
    %35 = arith.cmpi slt, %33, %34 : vector<1x512xi32>
    %36 = arith.andi %31, %35 : vector<1x512xi1>
    %c-2_i32_13 = arith.constant -2 : i32
    %37 = vector.broadcast %c-2_i32_13 : i32 to vector<1x512xi32>
    %38 = arith.addi %21, %37 : vector<1x512xi32>
    %c0_i32_14 = arith.constant 0 : i32
    %39 = vector.broadcast %c0_i32_14 : i32 to vector<1x512xi32>
    %40 = arith.cmpi sge, %38, %39 : vector<1x512xi32>
    %41 = arith.andi %36, %40 : vector<1x512xi1>
    %c-2_i32_15 = arith.constant -2 : i32
    %42 = vector.broadcast %c-2_i32_15 : i32 to vector<1x512xi32>
    %43 = arith.addi %21, %42 : vector<1x512xi32>
    %c16_i32_16 = arith.constant 16 : i32
    %44 = vector.broadcast %c16_i32_16 : i32 to vector<1x512xi32>
    %45 = arith.cmpi slt, %43, %44 : vector<1x512xi32>
    %46 = arith.andi %41, %45 : vector<1x512xi1>
    %cst_17 = arith.constant 0.000000e+00 : f32
    %47 = vector.shape_cast %46 : vector<1x512xi1> to vector<1x512xi1>
    %48 = vector.broadcast %47 : vector<1x512xi1> to vector<4x512xi1>
    %49 = vector.broadcast %cst_17 : f32 to vector<4x512xf32>
    %50 = arith.select %48, %27, %49 : vector<4x512xi1>, vector<4x512xf32>
    %c0_18 = arith.constant 0 : index
    %c0_19 = arith.constant 0 : index
    %c0_20 = arith.constant 0 : index
    %51 = vector.load %arg3[%c0_18, %c0_19, %c0_20] : memref<25x8x4xf32, #tpu.memory_space<vmem>>, vector<1x8x4xf32>
    %52 = vector.shape_cast %51 : vector<1x8x4xf32> to vector<8x4xf32>
    %53 = arith.truncf %52 : vector<8x4xf32> to vector<8x4xbf16>
    %54 = arith.truncf %50 : vector<4x512xf32> to vector<4x512xbf16>
    %cst_21 = arith.constant dense<0.000000e+00> : vector<8x512xf32>
    %55 = tpu.matmul %53, %54, %cst_21 {dimension_numbers = #tpu.dot_dimension_numbers<[1], [0], [0], [1], [0, 0, 1, 1], [], []>} : vector<8x4xbf16>, vector<4x512xbf16>, vector<8x512xf32> -> vector<8x512xf32>
    %56 = arith.addf %26, %55 : vector<8x512xf32>
    %c33_i32 = arith.constant 33 : i32
    %57 = tpu.dynamic_rotate %16 by %c33_i32 dim 1 : vector<4x512xf32>, i32 -> vector<4x512xf32>
    %c-2_i32_22 = arith.constant -2 : i32
    %58 = vector.broadcast %c-2_i32_22 : i32 to vector<1x512xi32>
    %59 = arith.addi %25, %58 : vector<1x512xi32>
    %c0_i32_23 = arith.constant 0 : i32
    %60 = vector.broadcast %c0_i32_23 : i32 to vector<1x512xi32>
    %61 = arith.cmpi sge, %59, %60 : vector<1x512xi32>
    %c-2_i32_24 = arith.constant -2 : i32
    %62 = vector.broadcast %c-2_i32_24 : i32 to vector<1x512xi32>
    %63 = arith.addi %25, %62 : vector<1x512xi32>
    %c16_i32_25 = arith.constant 16 : i32
    %64 = vector.broadcast %c16_i32_25 : i32 to vector<1x512xi32>
    %65 = arith.cmpi slt, %63, %64 : vector<1x512xi32>
    %66 = arith.andi %61, %65 : vector<1x512xi1>
    %c-1_i32 = arith.constant -1 : i32
    %67 = vector.broadcast %c-1_i32 : i32 to vector<1x512xi32>
    %68 = arith.addi %21, %67 : vector<1x512xi32>
    %c0_i32_26 = arith.constant 0 : i32
    %69 = vector.broadcast %c0_i32_26 : i32 to vector<1x512xi32>
    %70 = arith.cmpi sge, %68, %69 : vector<1x512xi32>
    %71 = arith.andi %66, %70 : vector<1x512xi1>
    %c-1_i32_27 = arith.constant -1 : i32
    %72 = vector.broadcast %c-1_i32_27 : i32 to vector<1x512xi32>
    %73 = arith.addi %21, %72 : vector<1x512xi32>
    %c16_i32_28 = arith.constant 16 : i32
    %74 = vector.broadcast %c16_i32_28 : i32 to vector<1x512xi32>
    %75 = arith.cmpi slt, %73, %74 : vector<1x512xi32>
    %76 = arith.andi %71, %75 : vector<1x512xi1>
    %cst_29 = arith.constant 0.000000e+00 : f32
    %77 = vector.shape_cast %76 : vector<1x512xi1> to vector<1x512xi1>
    %78 = vector.broadcast %77 : vector<1x512xi1> to vector<4x512xi1>
    %79 = vector.broadcast %cst_29 : f32 to vector<4x512xf32>
    %80 = arith.select %78, %57, %79 : vector<4x512xi1>, vector<4x512xf32>
    %c1 = arith.constant 1 : index
    %c0_30 = arith.constant 0 : index
    %c0_31 = arith.constant 0 : index
    %81 = vector.load %arg3[%c1, %c0_30, %c0_31] : memref<25x8x4xf32, #tpu.memory_space<vmem>>, vector<1x8x4xf32>
    %82 = vector.shape_cast %81 : vector<1x8x4xf32> to vector<8x4xf32>
    %83 = arith.truncf %82 : vector<8x4xf32> to vector<8x4xbf16>
    %84 = arith.truncf %80 : vector<4x512xf32> to vector<4x512xbf16>
    %cst_32 = arith.constant dense<0.000000e+00> : vector<8x512xf32>
    %85 = tpu.matmul %83, %84, %cst_32 {dimension_numbers = #tpu.dot_dimension_numbers<[1], [0], [0], [1], [0, 0, 1, 1], [], []>} : vector<8x4xbf16>, vector<4x512xbf16>, vector<8x512xf32> -> vector<8x512xf32>
    %86 = arith.addf %56, %85 : vector<8x512xf32>
    %c32_i32 = arith.constant 32 : i32
    %87 = tpu.dynamic_rotate %16 by %c32_i32 dim 1 : vector<4x512xf32>, i32 -> vector<4x512xf32>
    %c-2_i32_33 = arith.constant -2 : i32
    %88 = vector.broadcast %c-2_i32_33 : i32 to vector<1x512xi32>
    %89 = arith.addi %25, %88 : vector<1x512xi32>
    %c0_i32_34 = arith.constant 0 : i32
    %90 = vector.broadcast %c0_i32_34 : i32 to vector<1x512xi32>
    %91 = arith.cmpi sge, %89, %90 : vector<1x512xi32>
    %c-2_i32_35 = arith.constant -2 : i32
    %92 = vector.broadcast %c-2_i32_35 : i32 to vector<1x512xi32>
    %93 = arith.addi %25, %92 : vector<1x512xi32>
    %c16_i32_36 = arith.constant 16 : i32
    %94 = vector.broadcast %c16_i32_36 : i32 to vector<1x512xi32>
    %95 = arith.cmpi slt, %93, %94 : vector<1x512xi32>
    %96 = arith.andi %91, %95 : vector<1x512xi1>
    %c0_i32_37 = arith.constant 0 : i32
    %97 = vector.broadcast %c0_i32_37 : i32 to vector<1x512xi32>
    %98 = arith.addi %21, %97 : vector<1x512xi32>
    %c0_i32_38 = arith.constant 0 : i32
    %99 = vector.broadcast %c0_i32_38 : i32 to vector<1x512xi32>
    %100 = arith.cmpi sge, %98, %99 : vector<1x512xi32>
    %101 = arith.andi %96, %100 : vector<1x512xi1>
    %c0_i32_39 = arith.constant 0 : i32
    %102 = vector.broadcast %c0_i32_39 : i32 to vector<1x512xi32>
    %103 = arith.addi %21, %102 : vector<1x512xi32>
    %c16_i32_40 = arith.constant 16 : i32
    %104 = vector.broadcast %c16_i32_40 : i32 to vector<1x512xi32>
    %105 = arith.cmpi slt, %103, %104 : vector<1x512xi32>
    %106 = arith.andi %101, %105 : vector<1x512xi1>
    %cst_41 = arith.constant 0.000000e+00 : f32
    %107 = vector.shape_cast %106 : vector<1x512xi1> to vector<1x512xi1>
    %108 = vector.broadcast %107 : vector<1x512xi1> to vector<4x512xi1>
    %109 = vector.broadcast %cst_41 : f32 to vector<4x512xf32>
    %110 = arith.select %108, %87, %109 : vector<4x512xi1>, vector<4x512xf32>
    %c2 = arith.constant 2 : index
    %c0_42 = arith.constant 0 : index
    %c0_43 = arith.constant 0 : index
    %111 = vector.load %arg3[%c2, %c0_42, %c0_43] : memref<25x8x4xf32, #tpu.memory_space<vmem>>, vector<1x8x4xf32>
    %112 = vector.shape_cast %111 : vector<1x8x4xf32> to vector<8x4xf32>
    %113 = arith.truncf %112 : vector<8x4xf32> to vector<8x4xbf16>
    %114 = arith.truncf %110 : vector<4x512xf32> to vector<4x512xbf16>
    %cst_44 = arith.constant dense<0.000000e+00> : vector<8x512xf32>
    %115 = tpu.matmul %113, %114, %cst_44 {dimension_numbers = #tpu.dot_dimension_numbers<[1], [0], [0], [1], [0, 0, 1, 1], [], []>} : vector<8x4xbf16>, vector<4x512xbf16>, vector<8x512xf32> -> vector<8x512xf32>
    %116 = arith.addf %86, %115 : vector<8x512xf32>
    %c31_i32 = arith.constant 31 : i32
    %117 = tpu.dynamic_rotate %16 by %c31_i32 dim 1 : vector<4x512xf32>, i32 -> vector<4x512xf32>
    %c-2_i32_45 = arith.constant -2 : i32
    %118 = vector.broadcast %c-2_i32_45 : i32 to vector<1x512xi32>
    %119 = arith.addi %25, %118 : vector<1x512xi32>
    %c0_i32_46 = arith.constant 0 : i32
    %120 = vector.broadcast %c0_i32_46 : i32 to vector<1x512xi32>
    %121 = arith.cmpi sge, %119, %120 : vector<1x512xi32>
    %c-2_i32_47 = arith.constant -2 : i32
    %122 = vector.broadcast %c-2_i32_47 : i32 to vector<1x512xi32>
    %123 = arith.addi %25, %122 : vector<1x512xi32>
    %c16_i32_48 = arith.constant 16 : i32
    %124 = vector.broadcast %c16_i32_48 : i32 to vector<1x512xi32>
    %125 = arith.cmpi slt, %123, %124 : vector<1x512xi32>
    %126 = arith.andi %121, %125 : vector<1x512xi1>
    %c1_i32 = arith.constant 1 : i32
    %127 = vector.broadcast %c1_i32 : i32 to vector<1x512xi32>
    %128 = arith.addi %21, %127 : vector<1x512xi32>
    %c0_i32_49 = arith.constant 0 : i32
    %129 = vector.broadcast %c0_i32_49 : i32 to vector<1x512xi32>
    %130 = arith.cmpi sge, %128, %129 : vector<1x512xi32>
    %131 = arith.andi %126, %130 : vector<1x512xi1>
    %c1_i32_50 = arith.constant 1 : i32
    %132 = vector.broadcast %c1_i32_50 : i32 to vector<1x512xi32>
    %133 = arith.addi %21, %132 : vector<1x512xi32>
    %c16_i32_51 = arith.constant 16 : i32
    %134 = vector.broadcast %c16_i32_51 : i32 to vector<1x512xi32>
    %135 = arith.cmpi slt, %133, %134 : vector<1x512xi32>
    %136 = arith.andi %131, %135 : vector<1x512xi1>
    %cst_52 = arith.constant 0.000000e+00 : f32
    %137 = vector.shape_cast %136 : vector<1x512xi1> to vector<1x512xi1>
    %138 = vector.broadcast %137 : vector<1x512xi1> to vector<4x512xi1>
    %139 = vector.broadcast %cst_52 : f32 to vector<4x512xf32>
    %140 = arith.select %138, %117, %139 : vector<4x512xi1>, vector<4x512xf32>
    %c3 = arith.constant 3 : index
    %c0_53 = arith.constant 0 : index
    %c0_54 = arith.constant 0 : index
    %141 = vector.load %arg3[%c3, %c0_53, %c0_54] : memref<25x8x4xf32, #tpu.memory_space<vmem>>, vector<1x8x4xf32>
    %142 = vector.shape_cast %141 : vector<1x8x4xf32> to vector<8x4xf32>
    %143 = arith.truncf %142 : vector<8x4xf32> to vector<8x4xbf16>
    %144 = arith.truncf %140 : vector<4x512xf32> to vector<4x512xbf16>
    %cst_55 = arith.constant dense<0.000000e+00> : vector<8x512xf32>
    %145 = tpu.matmul %143, %144, %cst_55 {dimension_numbers = #tpu.dot_dimension_numbers<[1], [0], [0], [1], [0, 0, 1, 1], [], []>} : vector<8x4xbf16>, vector<4x512xbf16>, vector<8x512xf32> -> vector<8x512xf32>
    %146 = arith.addf %116, %145 : vector<8x512xf32>
    %c30_i32 = arith.constant 30 : i32
    %147 = tpu.dynamic_rotate %16 by %c30_i32 dim 1 : vector<4x512xf32>, i32 -> vector<4x512xf32>
    %c-2_i32_56 = arith.constant -2 : i32
    %148 = vector.broadcast %c-2_i32_56 : i32 to vector<1x512xi32>
    %149 = arith.addi %25, %148 : vector<1x512xi32>
    %c0_i32_57 = arith.constant 0 : i32
    %150 = vector.broadcast %c0_i32_57 : i32 to vector<1x512xi32>
    %151 = arith.cmpi sge, %149, %150 : vector<1x512xi32>
    %c-2_i32_58 = arith.constant -2 : i32
    %152 = vector.broadcast %c-2_i32_58 : i32 to vector<1x512xi32>
    %153 = arith.addi %25, %152 : vector<1x512xi32>
    %c16_i32_59 = arith.constant 16 : i32
    %154 = vector.broadcast %c16_i32_59 : i32 to vector<1x512xi32>
    %155 = arith.cmpi slt, %153, %154 : vector<1x512xi32>
    %156 = arith.andi %151, %155 : vector<1x512xi1>
    %c2_i32 = arith.constant 2 : i32
    %157 = vector.broadcast %c2_i32 : i32 to vector<1x512xi32>
    %158 = arith.addi %21, %157 : vector<1x512xi32>
    %c0_i32_60 = arith.constant 0 : i32
    %159 = vector.broadcast %c0_i32_60 : i32 to vector<1x512xi32>
    %160 = arith.cmpi sge, %158, %159 : vector<1x512xi32>
    %161 = arith.andi %156, %160 : vector<1x512xi1>
    %c2_i32_61 = arith.constant 2 : i32
    %162 = vector.broadcast %c2_i32_61 : i32 to vector<1x512xi32>
    %163 = arith.addi %21, %162 : vector<1x512xi32>
    %c16_i32_62 = arith.constant 16 : i32
    %164 = vector.broadcast %c16_i32_62 : i32 to vector<1x512xi32>
    %165 = arith.cmpi slt, %163, %164 : vector<1x512xi32>
    %166 = arith.andi %161, %165 : vector<1x512xi1>
    %cst_63 = arith.constant 0.000000e+00 : f32
    %167 = vector.shape_cast %166 : vector<1x512xi1> to vector<1x512xi1>
    %168 = vector.broadcast %167 : vector<1x512xi1> to vector<4x512xi1>
    %169 = vector.broadcast %cst_63 : f32 to vector<4x512xf32>
    %170 = arith.select %168, %147, %169 : vector<4x512xi1>, vector<4x512xf32>
    %c4 = arith.constant 4 : index
    %c0_64 = arith.constant 0 : index
    %c0_65 = arith.constant 0 : index
    %171 = vector.load %arg3[%c4, %c0_64, %c0_65] : memref<25x8x4xf32, #tpu.memory_space<vmem>>, vector<1x8x4xf32>
    %172 = vector.shape_cast %171 : vector<1x8x4xf32> to vector<8x4xf32>
    %173 = arith.truncf %172 : vector<8x4xf32> to vector<8x4xbf16>
    %174 = arith.truncf %170 : vector<4x512xf32> to vector<4x512xbf16>
    %cst_66 = arith.constant dense<0.000000e+00> : vector<8x512xf32>
    %175 = tpu.matmul %173, %174, %cst_66 {dimension_numbers = #tpu.dot_dimension_numbers<[1], [0], [0], [1], [0, 0, 1, 1], [], []>} : vector<8x4xbf16>, vector<4x512xbf16>, vector<8x512xf32> -> vector<8x512xf32>
    %176 = arith.addf %146, %175 : vector<8x512xf32>
    %c18_i32 = arith.constant 18 : i32
    %177 = tpu.dynamic_rotate %16 by %c18_i32 dim 1 : vector<4x512xf32>, i32 -> vector<4x512xf32>
    %c-1_i32_67 = arith.constant -1 : i32
    %178 = vector.broadcast %c-1_i32_67 : i32 to vector<1x512xi32>
    %179 = arith.addi %25, %178 : vector<1x512xi32>
    %c0_i32_68 = arith.constant 0 : i32
    %180 = vector.broadcast %c0_i32_68 : i32 to vector<1x512xi32>
    %181 = arith.cmpi sge, %179, %180 : vector<1x512xi32>
    %c-1_i32_69 = arith.constant -1 : i32
    %182 = vector.broadcast %c-1_i32_69 : i32 to vector<1x512xi32>
    %183 = arith.addi %25, %182 : vector<1x512xi32>
    %c16_i32_70 = arith.constant 16 : i32
    %184 = vector.broadcast %c16_i32_70 : i32 to vector<1x512xi32>
    %185 = arith.cmpi slt, %183, %184 : vector<1x512xi32>
    %186 = arith.andi %181, %185 : vector<1x512xi1>
    %c-2_i32_71 = arith.constant -2 : i32
    %187 = vector.broadcast %c-2_i32_71 : i32 to vector<1x512xi32>
    %188 = arith.addi %21, %187 : vector<1x512xi32>
    %c0_i32_72 = arith.constant 0 : i32
    %189 = vector.broadcast %c0_i32_72 : i32 to vector<1x512xi32>
    %190 = arith.cmpi sge, %188, %189 : vector<1x512xi32>
    %191 = arith.andi %186, %190 : vector<1x512xi1>
    %c-2_i32_73 = arith.constant -2 : i32
    %192 = vector.broadcast %c-2_i32_73 : i32 to vector<1x512xi32>
    %193 = arith.addi %21, %192 : vector<1x512xi32>
    %c16_i32_74 = arith.constant 16 : i32
    %194 = vector.broadcast %c16_i32_74 : i32 to vector<1x512xi32>
    %195 = arith.cmpi slt, %193, %194 : vector<1x512xi32>
    %196 = arith.andi %191, %195 : vector<1x512xi1>
    %cst_75 = arith.constant 0.000000e+00 : f32
    %197 = vector.shape_cast %196 : vector<1x512xi1> to vector<1x512xi1>
    %198 = vector.broadcast %197 : vector<1x512xi1> to vector<4x512xi1>
    %199 = vector.broadcast %cst_75 : f32 to vector<4x512xf32>
    %200 = arith.select %198, %177, %199 : vector<4x512xi1>, vector<4x512xf32>
    %c5 = arith.constant 5 : index
    %c0_76 = arith.constant 0 : index
    %c0_77 = arith.constant 0 : index
    %201 = vector.load %arg3[%c5, %c0_76, %c0_77] : memref<25x8x4xf32, #tpu.memory_space<vmem>>, vector<1x8x4xf32>
    %202 = vector.shape_cast %201 : vector<1x8x4xf32> to vector<8x4xf32>
    %203 = arith.truncf %202 : vector<8x4xf32> to vector<8x4xbf16>
    %204 = arith.truncf %200 : vector<4x512xf32> to vector<4x512xbf16>
    %cst_78 = arith.constant dense<0.000000e+00> : vector<8x512xf32>
    %205 = tpu.matmul %203, %204, %cst_78 {dimension_numbers = #tpu.dot_dimension_numbers<[1], [0], [0], [1], [0, 0, 1, 1], [], []>} : vector<8x4xbf16>, vector<4x512xbf16>, vector<8x512xf32> -> vector<8x512xf32>
    %206 = arith.addf %176, %205 : vector<8x512xf32>
    %c17_i32 = arith.constant 17 : i32
    %207 = tpu.dynamic_rotate %16 by %c17_i32 dim 1 : vector<4x512xf32>, i32 -> vector<4x512xf32>
    %c-1_i32_79 = arith.constant -1 : i32
    %208 = vector.broadcast %c-1_i32_79 : i32 to vector<1x512xi32>
    %209 = arith.addi %25, %208 : vector<1x512xi32>
    %c0_i32_80 = arith.constant 0 : i32
    %210 = vector.broadcast %c0_i32_80 : i32 to vector<1x512xi32>
    %211 = arith.cmpi sge, %209, %210 : vector<1x512xi32>
    %c-1_i32_81 = arith.constant -1 : i32
    %212 = vector.broadcast %c-1_i32_81 : i32 to vector<1x512xi32>
    %213 = arith.addi %25, %212 : vector<1x512xi32>
    %c16_i32_82 = arith.constant 16 : i32
    %214 = vector.broadcast %c16_i32_82 : i32 to vector<1x512xi32>
    %215 = arith.cmpi slt, %213, %214 : vector<1x512xi32>
    %216 = arith.andi %211, %215 : vector<1x512xi1>
    %c-1_i32_83 = arith.constant -1 : i32
    %217 = vector.broadcast %c-1_i32_83 : i32 to vector<1x512xi32>
    %218 = arith.addi %21, %217 : vector<1x512xi32>
    %c0_i32_84 = arith.constant 0 : i32
    %219 = vector.broadcast %c0_i32_84 : i32 to vector<1x512xi32>
    %220 = arith.cmpi sge, %218, %219 : vector<1x512xi32>
    %221 = arith.andi %216, %220 : vector<1x512xi1>
    %c-1_i32_85 = arith.constant -1 : i32
    %222 = vector.broadcast %c-1_i32_85 : i32 to vector<1x512xi32>
    %223 = arith.addi %21, %222 : vector<1x512xi32>
    %c16_i32_86 = arith.constant 16 : i32
    %224 = vector.broadcast %c16_i32_86 : i32 to vector<1x512xi32>
    %225 = arith.cmpi slt, %223, %224 : vector<1x512xi32>
    %226 = arith.andi %221, %225 : vector<1x512xi1>
    %cst_87 = arith.constant 0.000000e+00 : f32
    %227 = vector.shape_cast %226 : vector<1x512xi1> to vector<1x512xi1>
    %228 = vector.broadcast %227 : vector<1x512xi1> to vector<4x512xi1>
    %229 = vector.broadcast %cst_87 : f32 to vector<4x512xf32>
    %230 = arith.select %228, %207, %229 : vector<4x512xi1>, vector<4x512xf32>
    %c6 = arith.constant 6 : index
    %c0_88 = arith.constant 0 : index
    %c0_89 = arith.constant 0 : index
    %231 = vector.load %arg3[%c6, %c0_88, %c0_89] : memref<25x8x4xf32, #tpu.memory_space<vmem>>, vector<1x8x4xf32>
    %232 = vector.shape_cast %231 : vector<1x8x4xf32> to vector<8x4xf32>
    %233 = arith.truncf %232 : vector<8x4xf32> to vector<8x4xbf16>
    %234 = arith.truncf %230 : vector<4x512xf32> to vector<4x512xbf16>
    %cst_90 = arith.constant dense<0.000000e+00> : vector<8x512xf32>
    %235 = tpu.matmul %233, %234, %cst_90 {dimension_numbers = #tpu.dot_dimension_numbers<[1], [0], [0], [1], [0, 0, 1, 1], [], []>} : vector<8x4xbf16>, vector<4x512xbf16>, vector<8x512xf32> -> vector<8x512xf32>
    %236 = arith.addf %206, %235 : vector<8x512xf32>
    %c16_i32_91 = arith.constant 16 : i32
    %237 = tpu.dynamic_rotate %16 by %c16_i32_91 dim 1 : vector<4x512xf32>, i32 -> vector<4x512xf32>
    %c-1_i32_92 = arith.constant -1 : i32
    %238 = vector.broadcast %c-1_i32_92 : i32 to vector<1x512xi32>
    %239 = arith.addi %25, %238 : vector<1x512xi32>
    %c0_i32_93 = arith.constant 0 : i32
    %240 = vector.broadcast %c0_i32_93 : i32 to vector<1x512xi32>
    %241 = arith.cmpi sge, %239, %240 : vector<1x512xi32>
    %c-1_i32_94 = arith.constant -1 : i32
    %242 = vector.broadcast %c-1_i32_94 : i32 to vector<1x512xi32>
    %243 = arith.addi %25, %242 : vector<1x512xi32>
    %c16_i32_95 = arith.constant 16 : i32
    %244 = vector.broadcast %c16_i32_95 : i32 to vector<1x512xi32>
    %245 = arith.cmpi slt, %243, %244 : vector<1x512xi32>
    %246 = arith.andi %241, %245 : vector<1x512xi1>
    %c0_i32_96 = arith.constant 0 : i32
    %247 = vector.broadcast %c0_i32_96 : i32 to vector<1x512xi32>
    %248 = arith.addi %21, %247 : vector<1x512xi32>
    %c0_i32_97 = arith.constant 0 : i32
    %249 = vector.broadcast %c0_i32_97 : i32 to vector<1x512xi32>
    %250 = arith.cmpi sge, %248, %249 : vector<1x512xi32>
    %251 = arith.andi %246, %250 : vector<1x512xi1>
    %c0_i32_98 = arith.constant 0 : i32
    %252 = vector.broadcast %c0_i32_98 : i32 to vector<1x512xi32>
    %253 = arith.addi %21, %252 : vector<1x512xi32>
    %c16_i32_99 = arith.constant 16 : i32
    %254 = vector.broadcast %c16_i32_99 : i32 to vector<1x512xi32>
    %255 = arith.cmpi slt, %253, %254 : vector<1x512xi32>
    %256 = arith.andi %251, %255 : vector<1x512xi1>
    %cst_100 = arith.constant 0.000000e+00 : f32
    %257 = vector.shape_cast %256 : vector<1x512xi1> to vector<1x512xi1>
    %258 = vector.broadcast %257 : vector<1x512xi1> to vector<4x512xi1>
    %259 = vector.broadcast %cst_100 : f32 to vector<4x512xf32>
    %260 = arith.select %258, %237, %259 : vector<4x512xi1>, vector<4x512xf32>
    %c7 = arith.constant 7 : index
    %c0_101 = arith.constant 0 : index
    %c0_102 = arith.constant 0 : index
    %261 = vector.load %arg3[%c7, %c0_101, %c0_102] : memref<25x8x4xf32, #tpu.memory_space<vmem>>, vector<1x8x4xf32>
    %262 = vector.shape_cast %261 : vector<1x8x4xf32> to vector<8x4xf32>
    %263 = arith.truncf %262 : vector<8x4xf32> to vector<8x4xbf16>
    %264 = arith.truncf %260 : vector<4x512xf32> to vector<4x512xbf16>
    %cst_103 = arith.constant dense<0.000000e+00> : vector<8x512xf32>
    %265 = tpu.matmul %263, %264, %cst_103 {dimension_numbers = #tpu.dot_dimension_numbers<[1], [0], [0], [1], [0, 0, 1, 1], [], []>} : vector<8x4xbf16>, vector<4x512xbf16>, vector<8x512xf32> -> vector<8x512xf32>
    %266 = arith.addf %236, %265 : vector<8x512xf32>
    %c15_i32_104 = arith.constant 15 : i32
    %267 = tpu.dynamic_rotate %16 by %c15_i32_104 dim 1 : vector<4x512xf32>, i32 -> vector<4x512xf32>
    %c-1_i32_105 = arith.constant -1 : i32
    %268 = vector.broadcast %c-1_i32_105 : i32 to vector<1x512xi32>
    %269 = arith.addi %25, %268 : vector<1x512xi32>
    %c0_i32_106 = arith.constant 0 : i32
    %270 = vector.broadcast %c0_i32_106 : i32 to vector<1x512xi32>
    %271 = arith.cmpi sge, %269, %270 : vector<1x512xi32>
    %c-1_i32_107 = arith.constant -1 : i32
    %272 = vector.broadcast %c-1_i32_107 : i32 to vector<1x512xi32>
    %273 = arith.addi %25, %272 : vector<1x512xi32>
    %c16_i32_108 = arith.constant 16 : i32
    %274 = vector.broadcast %c16_i32_108 : i32 to vector<1x512xi32>
    %275 = arith.cmpi slt, %273, %274 : vector<1x512xi32>
    %276 = arith.andi %271, %275 : vector<1x512xi1>
    %c1_i32_109 = arith.constant 1 : i32
    %277 = vector.broadcast %c1_i32_109 : i32 to vector<1x512xi32>
    %278 = arith.addi %21, %277 : vector<1x512xi32>
    %c0_i32_110 = arith.constant 0 : i32
    %279 = vector.broadcast %c0_i32_110 : i32 to vector<1x512xi32>
    %280 = arith.cmpi sge, %278, %279 : vector<1x512xi32>
    %281 = arith.andi %276, %280 : vector<1x512xi1>
    %c1_i32_111 = arith.constant 1 : i32
    %282 = vector.broadcast %c1_i32_111 : i32 to vector<1x512xi32>
    %283 = arith.addi %21, %282 : vector<1x512xi32>
    %c16_i32_112 = arith.constant 16 : i32
    %284 = vector.broadcast %c16_i32_112 : i32 to vector<1x512xi32>
    %285 = arith.cmpi slt, %283, %284 : vector<1x512xi32>
    %286 = arith.andi %281, %285 : vector<1x512xi1>
    %cst_113 = arith.constant 0.000000e+00 : f32
    %287 = vector.shape_cast %286 : vector<1x512xi1> to vector<1x512xi1>
    %288 = vector.broadcast %287 : vector<1x512xi1> to vector<4x512xi1>
    %289 = vector.broadcast %cst_113 : f32 to vector<4x512xf32>
    %290 = arith.select %288, %267, %289 : vector<4x512xi1>, vector<4x512xf32>
    %c8 = arith.constant 8 : index
    %c0_114 = arith.constant 0 : index
    %c0_115 = arith.constant 0 : index
    %291 = vector.load %arg3[%c8, %c0_114, %c0_115] : memref<25x8x4xf32, #tpu.memory_space<vmem>>, vector<1x8x4xf32>
    %292 = vector.shape_cast %291 : vector<1x8x4xf32> to vector<8x4xf32>
    %293 = arith.truncf %292 : vector<8x4xf32> to vector<8x4xbf16>
    %294 = arith.truncf %290 : vector<4x512xf32> to vector<4x512xbf16>
    %cst_116 = arith.constant dense<0.000000e+00> : vector<8x512xf32>
    %295 = tpu.matmul %293, %294, %cst_116 {dimension_numbers = #tpu.dot_dimension_numbers<[1], [0], [0], [1], [0, 0, 1, 1], [], []>} : vector<8x4xbf16>, vector<4x512xbf16>, vector<8x512xf32> -> vector<8x512xf32>
    %296 = arith.addf %266, %295 : vector<8x512xf32>
    %c14_i32 = arith.constant 14 : i32
    %297 = tpu.dynamic_rotate %16 by %c14_i32 dim 1 : vector<4x512xf32>, i32 -> vector<4x512xf32>
    %c-1_i32_117 = arith.constant -1 : i32
    %298 = vector.broadcast %c-1_i32_117 : i32 to vector<1x512xi32>
    %299 = arith.addi %25, %298 : vector<1x512xi32>
    %c0_i32_118 = arith.constant 0 : i32
    %300 = vector.broadcast %c0_i32_118 : i32 to vector<1x512xi32>
    %301 = arith.cmpi sge, %299, %300 : vector<1x512xi32>
    %c-1_i32_119 = arith.constant -1 : i32
    %302 = vector.broadcast %c-1_i32_119 : i32 to vector<1x512xi32>
    %303 = arith.addi %25, %302 : vector<1x512xi32>
    %c16_i32_120 = arith.constant 16 : i32
    %304 = vector.broadcast %c16_i32_120 : i32 to vector<1x512xi32>
    %305 = arith.cmpi slt, %303, %304 : vector<1x512xi32>
    %306 = arith.andi %301, %305 : vector<1x512xi1>
    %c2_i32_121 = arith.constant 2 : i32
    %307 = vector.broadcast %c2_i32_121 : i32 to vector<1x512xi32>
    %308 = arith.addi %21, %307 : vector<1x512xi32>
    %c0_i32_122 = arith.constant 0 : i32
    %309 = vector.broadcast %c0_i32_122 : i32 to vector<1x512xi32>
    %310 = arith.cmpi sge, %308, %309 : vector<1x512xi32>
    %311 = arith.andi %306, %310 : vector<1x512xi1>
    %c2_i32_123 = arith.constant 2 : i32
    %312 = vector.broadcast %c2_i32_123 : i32 to vector<1x512xi32>
    %313 = arith.addi %21, %312 : vector<1x512xi32>
    %c16_i32_124 = arith.constant 16 : i32
    %314 = vector.broadcast %c16_i32_124 : i32 to vector<1x512xi32>
    %315 = arith.cmpi slt, %313, %314 : vector<1x512xi32>
    %316 = arith.andi %311, %315 : vector<1x512xi1>
    %cst_125 = arith.constant 0.000000e+00 : f32
    %317 = vector.shape_cast %316 : vector<1x512xi1> to vector<1x512xi1>
    %318 = vector.broadcast %317 : vector<1x512xi1> to vector<4x512xi1>
    %319 = vector.broadcast %cst_125 : f32 to vector<4x512xf32>
    %320 = arith.select %318, %297, %319 : vector<4x512xi1>, vector<4x512xf32>
    %c9 = arith.constant 9 : index
    %c0_126 = arith.constant 0 : index
    %c0_127 = arith.constant 0 : index
    %321 = vector.load %arg3[%c9, %c0_126, %c0_127] : memref<25x8x4xf32, #tpu.memory_space<vmem>>, vector<1x8x4xf32>
    %322 = vector.shape_cast %321 : vector<1x8x4xf32> to vector<8x4xf32>
    %323 = arith.truncf %322 : vector<8x4xf32> to vector<8x4xbf16>
    %324 = arith.truncf %320 : vector<4x512xf32> to vector<4x512xbf16>
    %cst_128 = arith.constant dense<0.000000e+00> : vector<8x512xf32>
    %325 = tpu.matmul %323, %324, %cst_128 {dimension_numbers = #tpu.dot_dimension_numbers<[1], [0], [0], [1], [0, 0, 1, 1], [], []>} : vector<8x4xbf16>, vector<4x512xbf16>, vector<8x512xf32> -> vector<8x512xf32>
    %326 = arith.addf %296, %325 : vector<8x512xf32>
    %c2_i32_129 = arith.constant 2 : i32
    %327 = tpu.dynamic_rotate %16 by %c2_i32_129 dim 1 : vector<4x512xf32>, i32 -> vector<4x512xf32>
    %c0_i32_130 = arith.constant 0 : i32
    %328 = vector.broadcast %c0_i32_130 : i32 to vector<1x512xi32>
    %329 = arith.addi %25, %328 : vector<1x512xi32>
    %c0_i32_131 = arith.constant 0 : i32
    %330 = vector.broadcast %c0_i32_131 : i32 to vector<1x512xi32>
    %331 = arith.cmpi sge, %329, %330 : vector<1x512xi32>
    %c0_i32_132 = arith.constant 0 : i32
    %332 = vector.broadcast %c0_i32_132 : i32 to vector<1x512xi32>
    %333 = arith.addi %25, %332 : vector<1x512xi32>
    %c16_i32_133 = arith.constant 16 : i32
    %334 = vector.broadcast %c16_i32_133 : i32 to vector<1x512xi32>
    %335 = arith.cmpi slt, %333, %334 : vector<1x512xi32>
    %336 = arith.andi %331, %335 : vector<1x512xi1>
    %c-2_i32_134 = arith.constant -2 : i32
    %337 = vector.broadcast %c-2_i32_134 : i32 to vector<1x512xi32>
    %338 = arith.addi %21, %337 : vector<1x512xi32>
    %c0_i32_135 = arith.constant 0 : i32
    %339 = vector.broadcast %c0_i32_135 : i32 to vector<1x512xi32>
    %340 = arith.cmpi sge, %338, %339 : vector<1x512xi32>
    %341 = arith.andi %336, %340 : vector<1x512xi1>
    %c-2_i32_136 = arith.constant -2 : i32
    %342 = vector.broadcast %c-2_i32_136 : i32 to vector<1x512xi32>
    %343 = arith.addi %21, %342 : vector<1x512xi32>
    %c16_i32_137 = arith.constant 16 : i32
    %344 = vector.broadcast %c16_i32_137 : i32 to vector<1x512xi32>
    %345 = arith.cmpi slt, %343, %344 : vector<1x512xi32>
    %346 = arith.andi %341, %345 : vector<1x512xi1>
    %cst_138 = arith.constant 0.000000e+00 : f32
    %347 = vector.shape_cast %346 : vector<1x512xi1> to vector<1x512xi1>
    %348 = vector.broadcast %347 : vector<1x512xi1> to vector<4x512xi1>
    %349 = vector.broadcast %cst_138 : f32 to vector<4x512xf32>
    %350 = arith.select %348, %327, %349 : vector<4x512xi1>, vector<4x512xf32>
    %c10 = arith.constant 10 : index
    %c0_139 = arith.constant 0 : index
    %c0_140 = arith.constant 0 : index
    %351 = vector.load %arg3[%c10, %c0_139, %c0_140] : memref<25x8x4xf32, #tpu.memory_space<vmem>>, vector<1x8x4xf32>
    %352 = vector.shape_cast %351 : vector<1x8x4xf32> to vector<8x4xf32>
    %353 = arith.truncf %352 : vector<8x4xf32> to vector<8x4xbf16>
    %354 = arith.truncf %350 : vector<4x512xf32> to vector<4x512xbf16>
    %cst_141 = arith.constant dense<0.000000e+00> : vector<8x512xf32>
    %355 = tpu.matmul %353, %354, %cst_141 {dimension_numbers = #tpu.dot_dimension_numbers<[1], [0], [0], [1], [0, 0, 1, 1], [], []>} : vector<8x4xbf16>, vector<4x512xbf16>, vector<8x512xf32> -> vector<8x512xf32>
    %356 = arith.addf %326, %355 : vector<8x512xf32>
    %c1_i32_142 = arith.constant 1 : i32
    %357 = tpu.dynamic_rotate %16 by %c1_i32_142 dim 1 : vector<4x512xf32>, i32 -> vector<4x512xf32>
    %c0_i32_143 = arith.constant 0 : i32
    %358 = vector.broadcast %c0_i32_143 : i32 to vector<1x512xi32>
    %359 = arith.addi %25, %358 : vector<1x512xi32>
    %c0_i32_144 = arith.constant 0 : i32
    %360 = vector.broadcast %c0_i32_144 : i32 to vector<1x512xi32>
    %361 = arith.cmpi sge, %359, %360 : vector<1x512xi32>
    %c0_i32_145 = arith.constant 0 : i32
    %362 = vector.broadcast %c0_i32_145 : i32 to vector<1x512xi32>
    %363 = arith.addi %25, %362 : vector<1x512xi32>
    %c16_i32_146 = arith.constant 16 : i32
    %364 = vector.broadcast %c16_i32_146 : i32 to vector<1x512xi32>
    %365 = arith.cmpi slt, %363, %364 : vector<1x512xi32>
    %366 = arith.andi %361, %365 : vector<1x512xi1>
    %c-1_i32_147 = arith.constant -1 : i32
    %367 = vector.broadcast %c-1_i32_147 : i32 to vector<1x512xi32>
    %368 = arith.addi %21, %367 : vector<1x512xi32>
    %c0_i32_148 = arith.constant 0 : i32
    %369 = vector.broadcast %c0_i32_148 : i32 to vector<1x512xi32>
    %370 = arith.cmpi sge, %368, %369 : vector<1x512xi32>
    %371 = arith.andi %366, %370 : vector<1x512xi1>
    %c-1_i32_149 = arith.constant -1 : i32
    %372 = vector.broadcast %c-1_i32_149 : i32 to vector<1x512xi32>
    %373 = arith.addi %21, %372 : vector<1x512xi32>
    %c16_i32_150 = arith.constant 16 : i32
    %374 = vector.broadcast %c16_i32_150 : i32 to vector<1x512xi32>
    %375 = arith.cmpi slt, %373, %374 : vector<1x512xi32>
    %376 = arith.andi %371, %375 : vector<1x512xi1>
    %cst_151 = arith.constant 0.000000e+00 : f32
    %377 = vector.shape_cast %376 : vector<1x512xi1> to vector<1x512xi1>
    %378 = vector.broadcast %377 : vector<1x512xi1> to vector<4x512xi1>
    %379 = vector.broadcast %cst_151 : f32 to vector<4x512xf32>
    %380 = arith.select %378, %357, %379 : vector<4x512xi1>, vector<4x512xf32>
    %c11 = arith.constant 11 : index
    %c0_152 = arith.constant 0 : index
    %c0_153 = arith.constant 0 : index
    %381 = vector.load %arg3[%c11, %c0_152, %c0_153] : memref<25x8x4xf32, #tpu.memory_space<vmem>>, vector<1x8x4xf32>
    %382 = vector.shape_cast %381 : vector<1x8x4xf32> to vector<8x4xf32>
    %383 = arith.truncf %382 : vector<8x4xf32> to vector<8x4xbf16>
    %384 = arith.truncf %380 : vector<4x512xf32> to vector<4x512xbf16>
    %cst_154 = arith.constant dense<0.000000e+00> : vector<8x512xf32>
    %385 = tpu.matmul %383, %384, %cst_154 {dimension_numbers = #tpu.dot_dimension_numbers<[1], [0], [0], [1], [0, 0, 1, 1], [], []>} : vector<8x4xbf16>, vector<4x512xbf16>, vector<8x512xf32> -> vector<8x512xf32>
    %386 = arith.addf %356, %385 : vector<8x512xf32>
    %c12 = arith.constant 12 : index
    %c0_155 = arith.constant 0 : index
    %c0_156 = arith.constant 0 : index
    %387 = vector.load %arg3[%c12, %c0_155, %c0_156] : memref<25x8x4xf32, #tpu.memory_space<vmem>>, vector<1x8x4xf32>
    %388 = vector.shape_cast %387 : vector<1x8x4xf32> to vector<8x4xf32>
    %389 = arith.truncf %388 : vector<8x4xf32> to vector<8x4xbf16>
    %390 = arith.truncf %16 : vector<4x512xf32> to vector<4x512xbf16>
    %cst_157 = arith.constant dense<0.000000e+00> : vector<8x512xf32>
    %391 = tpu.matmul %389, %390, %cst_157 {dimension_numbers = #tpu.dot_dimension_numbers<[1], [0], [0], [1], [0, 0, 1, 1], [], []>} : vector<8x4xbf16>, vector<4x512xbf16>, vector<8x512xf32> -> vector<8x512xf32>
    %392 = arith.addf %386, %391 : vector<8x512xf32>
    %c511_i32 = arith.constant 511 : i32
    %393 = tpu.dynamic_rotate %16 by %c511_i32 dim 1 : vector<4x512xf32>, i32 -> vector<4x512xf32>
    %c0_i32_158 = arith.constant 0 : i32
    %394 = vector.broadcast %c0_i32_158 : i32 to vector<1x512xi32>
    %395 = arith.addi %25, %394 : vector<1x512xi32>
    %c0_i32_159 = arith.constant 0 : i32
    %396 = vector.broadcast %c0_i32_159 : i32 to vector<1x512xi32>
    %397 = arith.cmpi sge, %395, %396 : vector<1x512xi32>
    %c0_i32_160 = arith.constant 0 : i32
    %398 = vector.broadcast %c0_i32_160 : i32 to vector<1x512xi32>
    %399 = arith.addi %25, %398 : vector<1x512xi32>
    %c16_i32_161 = arith.constant 16 : i32
    %400 = vector.broadcast %c16_i32_161 : i32 to vector<1x512xi32>
    %401 = arith.cmpi slt, %399, %400 : vector<1x512xi32>
    %402 = arith.andi %397, %401 : vector<1x512xi1>
    %c1_i32_162 = arith.constant 1 : i32
    %403 = vector.broadcast %c1_i32_162 : i32 to vector<1x512xi32>
    %404 = arith.addi %21, %403 : vector<1x512xi32>
    %c0_i32_163 = arith.constant 0 : i32
    %405 = vector.broadcast %c0_i32_163 : i32 to vector<1x512xi32>
    %406 = arith.cmpi sge, %404, %405 : vector<1x512xi32>
    %407 = arith.andi %402, %406 : vector<1x512xi1>
    %c1_i32_164 = arith.constant 1 : i32
    %408 = vector.broadcast %c1_i32_164 : i32 to vector<1x512xi32>
    %409 = arith.addi %21, %408 : vector<1x512xi32>
    %c16_i32_165 = arith.constant 16 : i32
    %410 = vector.broadcast %c16_i32_165 : i32 to vector<1x512xi32>
    %411 = arith.cmpi slt, %409, %410 : vector<1x512xi32>
    %412 = arith.andi %407, %411 : vector<1x512xi1>
    %cst_166 = arith.constant 0.000000e+00 : f32
    %413 = vector.shape_cast %412 : vector<1x512xi1> to vector<1x512xi1>
    %414 = vector.broadcast %413 : vector<1x512xi1> to vector<4x512xi1>
    %415 = vector.broadcast %cst_166 : f32 to vector<4x512xf32>
    %416 = arith.select %414, %393, %415 : vector<4x512xi1>, vector<4x512xf32>
    %c13 = arith.constant 13 : index
    %c0_167 = arith.constant 0 : index
    %c0_168 = arith.constant 0 : index
    %417 = vector.load %arg3[%c13, %c0_167, %c0_168] : memref<25x8x4xf32, #tpu.memory_space<vmem>>, vector<1x8x4xf32>
    %418 = vector.shape_cast %417 : vector<1x8x4xf32> to vector<8x4xf32>
    %419 = arith.truncf %418 : vector<8x4xf32> to vector<8x4xbf16>
    %420 = arith.truncf %416 : vector<4x512xf32> to vector<4x512xbf16>
    %cst_169 = arith.constant dense<0.000000e+00> : vector<8x512xf32>
    %421 = tpu.matmul %419, %420, %cst_169 {dimension_numbers = #tpu.dot_dimension_numbers<[1], [0], [0], [1], [0, 0, 1, 1], [], []>} : vector<8x4xbf16>, vector<4x512xbf16>, vector<8x512xf32> -> vector<8x512xf32>
    %422 = arith.addf %392, %421 : vector<8x512xf32>
    %c510_i32 = arith.constant 510 : i32
    %423 = tpu.dynamic_rotate %16 by %c510_i32 dim 1 : vector<4x512xf32>, i32 -> vector<4x512xf32>
    %c0_i32_170 = arith.constant 0 : i32
    %424 = vector.broadcast %c0_i32_170 : i32 to vector<1x512xi32>
    %425 = arith.addi %25, %424 : vector<1x512xi32>
    %c0_i32_171 = arith.constant 0 : i32
    %426 = vector.broadcast %c0_i32_171 : i32 to vector<1x512xi32>
    %427 = arith.cmpi sge, %425, %426 : vector<1x512xi32>
    %c0_i32_172 = arith.constant 0 : i32
    %428 = vector.broadcast %c0_i32_172 : i32 to vector<1x512xi32>
    %429 = arith.addi %25, %428 : vector<1x512xi32>
    %c16_i32_173 = arith.constant 16 : i32
    %430 = vector.broadcast %c16_i32_173 : i32 to vector<1x512xi32>
    %431 = arith.cmpi slt, %429, %430 : vector<1x512xi32>
    %432 = arith.andi %427, %431 : vector<1x512xi1>
    %c2_i32_174 = arith.constant 2 : i32
    %433 = vector.broadcast %c2_i32_174 : i32 to vector<1x512xi32>
    %434 = arith.addi %21, %433 : vector<1x512xi32>
    %c0_i32_175 = arith.constant 0 : i32
    %435 = vector.broadcast %c0_i32_175 : i32 to vector<1x512xi32>
    %436 = arith.cmpi sge, %434, %435 : vector<1x512xi32>
    %437 = arith.andi %432, %436 : vector<1x512xi1>
    %c2_i32_176 = arith.constant 2 : i32
    %438 = vector.broadcast %c2_i32_176 : i32 to vector<1x512xi32>
    %439 = arith.addi %21, %438 : vector<1x512xi32>
    %c16_i32_177 = arith.constant 16 : i32
    %440 = vector.broadcast %c16_i32_177 : i32 to vector<1x512xi32>
    %441 = arith.cmpi slt, %439, %440 : vector<1x512xi32>
    %442 = arith.andi %437, %441 : vector<1x512xi1>
    %cst_178 = arith.constant 0.000000e+00 : f32
    %443 = vector.shape_cast %442 : vector<1x512xi1> to vector<1x512xi1>
    %444 = vector.broadcast %443 : vector<1x512xi1> to vector<4x512xi1>
    %445 = vector.broadcast %cst_178 : f32 to vector<4x512xf32>
    %446 = arith.select %444, %423, %445 : vector<4x512xi1>, vector<4x512xf32>
    %c14 = arith.constant 14 : index
    %c0_179 = arith.constant 0 : index
    %c0_180 = arith.constant 0 : index
    %447 = vector.load %arg3[%c14, %c0_179, %c0_180] : memref<25x8x4xf32, #tpu.memory_space<vmem>>, vector<1x8x4xf32>
    %448 = vector.shape_cast %447 : vector<1x8x4xf32> to vector<8x4xf32>
    %449 = arith.truncf %448 : vector<8x4xf32> to vector<8x4xbf16>
    %450 = arith.truncf %446 : vector<4x512xf32> to vector<4x512xbf16>
    %cst_181 = arith.constant dense<0.000000e+00> : vector<8x512xf32>
    %451 = tpu.matmul %449, %450, %cst_181 {dimension_numbers = #tpu.dot_dimension_numbers<[1], [0], [0], [1], [0, 0, 1, 1], [], []>} : vector<8x4xbf16>, vector<4x512xbf16>, vector<8x512xf32> -> vector<8x512xf32>
    %452 = arith.addf %422, %451 : vector<8x512xf32>
    %c498_i32 = arith.constant 498 : i32
    %453 = tpu.dynamic_rotate %16 by %c498_i32 dim 1 : vector<4x512xf32>, i32 -> vector<4x512xf32>
    %c1_i32_182 = arith.constant 1 : i32
    %454 = vector.broadcast %c1_i32_182 : i32 to vector<1x512xi32>
    %455 = arith.addi %25, %454 : vector<1x512xi32>
    %c0_i32_183 = arith.constant 0 : i32
    %456 = vector.broadcast %c0_i32_183 : i32 to vector<1x512xi32>
    %457 = arith.cmpi sge, %455, %456 : vector<1x512xi32>
    %c1_i32_184 = arith.constant 1 : i32
    %458 = vector.broadcast %c1_i32_184 : i32 to vector<1x512xi32>
    %459 = arith.addi %25, %458 : vector<1x512xi32>
    %c16_i32_185 = arith.constant 16 : i32
    %460 = vector.broadcast %c16_i32_185 : i32 to vector<1x512xi32>
    %461 = arith.cmpi slt, %459, %460 : vector<1x512xi32>
    %462 = arith.andi %457, %461 : vector<1x512xi1>
    %c-2_i32_186 = arith.constant -2 : i32
    %463 = vector.broadcast %c-2_i32_186 : i32 to vector<1x512xi32>
    %464 = arith.addi %21, %463 : vector<1x512xi32>
    %c0_i32_187 = arith.constant 0 : i32
    %465 = vector.broadcast %c0_i32_187 : i32 to vector<1x512xi32>
    %466 = arith.cmpi sge, %464, %465 : vector<1x512xi32>
    %467 = arith.andi %462, %466 : vector<1x512xi1>
    %c-2_i32_188 = arith.constant -2 : i32
    %468 = vector.broadcast %c-2_i32_188 : i32 to vector<1x512xi32>
    %469 = arith.addi %21, %468 : vector<1x512xi32>
    %c16_i32_189 = arith.constant 16 : i32
    %470 = vector.broadcast %c16_i32_189 : i32 to vector<1x512xi32>
    %471 = arith.cmpi slt, %469, %470 : vector<1x512xi32>
    %472 = arith.andi %467, %471 : vector<1x512xi1>
    %cst_190 = arith.constant 0.000000e+00 : f32
    %473 = vector.shape_cast %472 : vector<1x512xi1> to vector<1x512xi1>
    %474 = vector.broadcast %473 : vector<1x512xi1> to vector<4x512xi1>
    %475 = vector.broadcast %cst_190 : f32 to vector<4x512xf32>
    %476 = arith.select %474, %453, %475 : vector<4x512xi1>, vector<4x512xf32>
    %c15 = arith.constant 15 : index
    %c0_191 = arith.constant 0 : index
    %c0_192 = arith.constant 0 : index
    %477 = vector.load %arg3[%c15, %c0_191, %c0_192] : memref<25x8x4xf32, #tpu.memory_space<vmem>>, vector<1x8x4xf32>
    %478 = vector.shape_cast %477 : vector<1x8x4xf32> to vector<8x4xf32>
    %479 = arith.truncf %478 : vector<8x4xf32> to vector<8x4xbf16>
    %480 = arith.truncf %476 : vector<4x512xf32> to vector<4x512xbf16>
    %cst_193 = arith.constant dense<0.000000e+00> : vector<8x512xf32>
    %481 = tpu.matmul %479, %480, %cst_193 {dimension_numbers = #tpu.dot_dimension_numbers<[1], [0], [0], [1], [0, 0, 1, 1], [], []>} : vector<8x4xbf16>, vector<4x512xbf16>, vector<8x512xf32> -> vector<8x512xf32>
    %482 = arith.addf %452, %481 : vector<8x512xf32>
    %c497_i32 = arith.constant 497 : i32
    %483 = tpu.dynamic_rotate %16 by %c497_i32 dim 1 : vector<4x512xf32>, i32 -> vector<4x512xf32>
    %c1_i32_194 = arith.constant 1 : i32
    %484 = vector.broadcast %c1_i32_194 : i32 to vector<1x512xi32>
    %485 = arith.addi %25, %484 : vector<1x512xi32>
    %c0_i32_195 = arith.constant 0 : i32
    %486 = vector.broadcast %c0_i32_195 : i32 to vector<1x512xi32>
    %487 = arith.cmpi sge, %485, %486 : vector<1x512xi32>
    %c1_i32_196 = arith.constant 1 : i32
    %488 = vector.broadcast %c1_i32_196 : i32 to vector<1x512xi32>
    %489 = arith.addi %25, %488 : vector<1x512xi32>
    %c16_i32_197 = arith.constant 16 : i32
    %490 = vector.broadcast %c16_i32_197 : i32 to vector<1x512xi32>
    %491 = arith.cmpi slt, %489, %490 : vector<1x512xi32>
    %492 = arith.andi %487, %491 : vector<1x512xi1>
    %c-1_i32_198 = arith.constant -1 : i32
    %493 = vector.broadcast %c-1_i32_198 : i32 to vector<1x512xi32>
    %494 = arith.addi %21, %493 : vector<1x512xi32>
    %c0_i32_199 = arith.constant 0 : i32
    %495 = vector.broadcast %c0_i32_199 : i32 to vector<1x512xi32>
    %496 = arith.cmpi sge, %494, %495 : vector<1x512xi32>
    %497 = arith.andi %492, %496 : vector<1x512xi1>
    %c-1_i32_200 = arith.constant -1 : i32
    %498 = vector.broadcast %c-1_i32_200 : i32 to vector<1x512xi32>
    %499 = arith.addi %21, %498 : vector<1x512xi32>
    %c16_i32_201 = arith.constant 16 : i32
    %500 = vector.broadcast %c16_i32_201 : i32 to vector<1x512xi32>
    %501 = arith.cmpi slt, %499, %500 : vector<1x512xi32>
    %502 = arith.andi %497, %501 : vector<1x512xi1>
    %cst_202 = arith.constant 0.000000e+00 : f32
    %503 = vector.shape_cast %502 : vector<1x512xi1> to vector<1x512xi1>
    %504 = vector.broadcast %503 : vector<1x512xi1> to vector<4x512xi1>
    %505 = vector.broadcast %cst_202 : f32 to vector<4x512xf32>
    %506 = arith.select %504, %483, %505 : vector<4x512xi1>, vector<4x512xf32>
    %c16 = arith.constant 16 : index
    %c0_203 = arith.constant 0 : index
    %c0_204 = arith.constant 0 : index
    %507 = vector.load %arg3[%c16, %c0_203, %c0_204] : memref<25x8x4xf32, #tpu.memory_space<vmem>>, vector<1x8x4xf32>
    %508 = vector.shape_cast %507 : vector<1x8x4xf32> to vector<8x4xf32>
    %509 = arith.truncf %508 : vector<8x4xf32> to vector<8x4xbf16>
    %510 = arith.truncf %506 : vector<4x512xf32> to vector<4x512xbf16>
    %cst_205 = arith.constant dense<0.000000e+00> : vector<8x512xf32>
    %511 = tpu.matmul %509, %510, %cst_205 {dimension_numbers = #tpu.dot_dimension_numbers<[1], [0], [0], [1], [0, 0, 1, 1], [], []>} : vector<8x4xbf16>, vector<4x512xbf16>, vector<8x512xf32> -> vector<8x512xf32>
    %512 = arith.addf %482, %511 : vector<8x512xf32>
    %c496_i32 = arith.constant 496 : i32
    %513 = tpu.dynamic_rotate %16 by %c496_i32 dim 1 : vector<4x512xf32>, i32 -> vector<4x512xf32>
    %c1_i32_206 = arith.constant 1 : i32
    %514 = vector.broadcast %c1_i32_206 : i32 to vector<1x512xi32>
    %515 = arith.addi %25, %514 : vector<1x512xi32>
    %c0_i32_207 = arith.constant 0 : i32
    %516 = vector.broadcast %c0_i32_207 : i32 to vector<1x512xi32>
    %517 = arith.cmpi sge, %515, %516 : vector<1x512xi32>
    %c1_i32_208 = arith.constant 1 : i32
    %518 = vector.broadcast %c1_i32_208 : i32 to vector<1x512xi32>
    %519 = arith.addi %25, %518 : vector<1x512xi32>
    %c16_i32_209 = arith.constant 16 : i32
    %520 = vector.broadcast %c16_i32_209 : i32 to vector<1x512xi32>
    %521 = arith.cmpi slt, %519, %520 : vector<1x512xi32>
    %522 = arith.andi %517, %521 : vector<1x512xi1>
    %c0_i32_210 = arith.constant 0 : i32
    %523 = vector.broadcast %c0_i32_210 : i32 to vector<1x512xi32>
    %524 = arith.addi %21, %523 : vector<1x512xi32>
    %c0_i32_211 = arith.constant 0 : i32
    %525 = vector.broadcast %c0_i32_211 : i32 to vector<1x512xi32>
    %526 = arith.cmpi sge, %524, %525 : vector<1x512xi32>
    %527 = arith.andi %522, %526 : vector<1x512xi1>
    %c0_i32_212 = arith.constant 0 : i32
    %528 = vector.broadcast %c0_i32_212 : i32 to vector<1x512xi32>
    %529 = arith.addi %21, %528 : vector<1x512xi32>
    %c16_i32_213 = arith.constant 16 : i32
    %530 = vector.broadcast %c16_i32_213 : i32 to vector<1x512xi32>
    %531 = arith.cmpi slt, %529, %530 : vector<1x512xi32>
    %532 = arith.andi %527, %531 : vector<1x512xi1>
    %cst_214 = arith.constant 0.000000e+00 : f32
    %533 = vector.shape_cast %532 : vector<1x512xi1> to vector<1x512xi1>
    %534 = vector.broadcast %533 : vector<1x512xi1> to vector<4x512xi1>
    %535 = vector.broadcast %cst_214 : f32 to vector<4x512xf32>
    %536 = arith.select %534, %513, %535 : vector<4x512xi1>, vector<4x512xf32>
    %c17 = arith.constant 17 : index
    %c0_215 = arith.constant 0 : index
    %c0_216 = arith.constant 0 : index
    %537 = vector.load %arg3[%c17, %c0_215, %c0_216] : memref<25x8x4xf32, #tpu.memory_space<vmem>>, vector<1x8x4xf32>
    %538 = vector.shape_cast %537 : vector<1x8x4xf32> to vector<8x4xf32>
    %539 = arith.truncf %538 : vector<8x4xf32> to vector<8x4xbf16>
    %540 = arith.truncf %536 : vector<4x512xf32> to vector<4x512xbf16>
    %cst_217 = arith.constant dense<0.000000e+00> : vector<8x512xf32>
    %541 = tpu.matmul %539, %540, %cst_217 {dimension_numbers = #tpu.dot_dimension_numbers<[1], [0], [0], [1], [0, 0, 1, 1], [], []>} : vector<8x4xbf16>, vector<4x512xbf16>, vector<8x512xf32> -> vector<8x512xf32>
    %542 = arith.addf %512, %541 : vector<8x512xf32>
    %c495_i32 = arith.constant 495 : i32
    %543 = tpu.dynamic_rotate %16 by %c495_i32 dim 1 : vector<4x512xf32>, i32 -> vector<4x512xf32>
    %c1_i32_218 = arith.constant 1 : i32
    %544 = vector.broadcast %c1_i32_218 : i32 to vector<1x512xi32>
    %545 = arith.addi %25, %544 : vector<1x512xi32>
    %c0_i32_219 = arith.constant 0 : i32
    %546 = vector.broadcast %c0_i32_219 : i32 to vector<1x512xi32>
    %547 = arith.cmpi sge, %545, %546 : vector<1x512xi32>
    %c1_i32_220 = arith.constant 1 : i32
    %548 = vector.broadcast %c1_i32_220 : i32 to vector<1x512xi32>
    %549 = arith.addi %25, %548 : vector<1x512xi32>
    %c16_i32_221 = arith.constant 16 : i32
    %550 = vector.broadcast %c16_i32_221 : i32 to vector<1x512xi32>
    %551 = arith.cmpi slt, %549, %550 : vector<1x512xi32>
    %552 = arith.andi %547, %551 : vector<1x512xi1>
    %c1_i32_222 = arith.constant 1 : i32
    %553 = vector.broadcast %c1_i32_222 : i32 to vector<1x512xi32>
    %554 = arith.addi %21, %553 : vector<1x512xi32>
    %c0_i32_223 = arith.constant 0 : i32
    %555 = vector.broadcast %c0_i32_223 : i32 to vector<1x512xi32>
    %556 = arith.cmpi sge, %554, %555 : vector<1x512xi32>
    %557 = arith.andi %552, %556 : vector<1x512xi1>
    %c1_i32_224 = arith.constant 1 : i32
    %558 = vector.broadcast %c1_i32_224 : i32 to vector<1x512xi32>
    %559 = arith.addi %21, %558 : vector<1x512xi32>
    %c16_i32_225 = arith.constant 16 : i32
    %560 = vector.broadcast %c16_i32_225 : i32 to vector<1x512xi32>
    %561 = arith.cmpi slt, %559, %560 : vector<1x512xi32>
    %562 = arith.andi %557, %561 : vector<1x512xi1>
    %cst_226 = arith.constant 0.000000e+00 : f32
    %563 = vector.shape_cast %562 : vector<1x512xi1> to vector<1x512xi1>
    %564 = vector.broadcast %563 : vector<1x512xi1> to vector<4x512xi1>
    %565 = vector.broadcast %cst_226 : f32 to vector<4x512xf32>
    %566 = arith.select %564, %543, %565 : vector<4x512xi1>, vector<4x512xf32>
    %c18 = arith.constant 18 : index
    %c0_227 = arith.constant 0 : index
    %c0_228 = arith.constant 0 : index
    %567 = vector.load %arg3[%c18, %c0_227, %c0_228] : memref<25x8x4xf32, #tpu.memory_space<vmem>>, vector<1x8x4xf32>
    %568 = vector.shape_cast %567 : vector<1x8x4xf32> to vector<8x4xf32>
    %569 = arith.truncf %568 : vector<8x4xf32> to vector<8x4xbf16>
    %570 = arith.truncf %566 : vector<4x512xf32> to vector<4x512xbf16>
    %cst_229 = arith.constant dense<0.000000e+00> : vector<8x512xf32>
    %571 = tpu.matmul %569, %570, %cst_229 {dimension_numbers = #tpu.dot_dimension_numbers<[1], [0], [0], [1], [0, 0, 1, 1], [], []>} : vector<8x4xbf16>, vector<4x512xbf16>, vector<8x512xf32> -> vector<8x512xf32>
    %572 = arith.addf %542, %571 : vector<8x512xf32>
    %c494_i32 = arith.constant 494 : i32
    %573 = tpu.dynamic_rotate %16 by %c494_i32 dim 1 : vector<4x512xf32>, i32 -> vector<4x512xf32>
    %c1_i32_230 = arith.constant 1 : i32
    %574 = vector.broadcast %c1_i32_230 : i32 to vector<1x512xi32>
    %575 = arith.addi %25, %574 : vector<1x512xi32>
    %c0_i32_231 = arith.constant 0 : i32
    %576 = vector.broadcast %c0_i32_231 : i32 to vector<1x512xi32>
    %577 = arith.cmpi sge, %575, %576 : vector<1x512xi32>
    %c1_i32_232 = arith.constant 1 : i32
    %578 = vector.broadcast %c1_i32_232 : i32 to vector<1x512xi32>
    %579 = arith.addi %25, %578 : vector<1x512xi32>
    %c16_i32_233 = arith.constant 16 : i32
    %580 = vector.broadcast %c16_i32_233 : i32 to vector<1x512xi32>
    %581 = arith.cmpi slt, %579, %580 : vector<1x512xi32>
    %582 = arith.andi %577, %581 : vector<1x512xi1>
    %c2_i32_234 = arith.constant 2 : i32
    %583 = vector.broadcast %c2_i32_234 : i32 to vector<1x512xi32>
    %584 = arith.addi %21, %583 : vector<1x512xi32>
    %c0_i32_235 = arith.constant 0 : i32
    %585 = vector.broadcast %c0_i32_235 : i32 to vector<1x512xi32>
    %586 = arith.cmpi sge, %584, %585 : vector<1x512xi32>
    %587 = arith.andi %582, %586 : vector<1x512xi1>
    %c2_i32_236 = arith.constant 2 : i32
    %588 = vector.broadcast %c2_i32_236 : i32 to vector<1x512xi32>
    %589 = arith.addi %21, %588 : vector<1x512xi32>
    %c16_i32_237 = arith.constant 16 : i32
    %590 = vector.broadcast %c16_i32_237 : i32 to vector<1x512xi32>
    %591 = arith.cmpi slt, %589, %590 : vector<1x512xi32>
    %592 = arith.andi %587, %591 : vector<1x512xi1>
    %cst_238 = arith.constant 0.000000e+00 : f32
    %593 = vector.shape_cast %592 : vector<1x512xi1> to vector<1x512xi1>
    %594 = vector.broadcast %593 : vector<1x512xi1> to vector<4x512xi1>
    %595 = vector.broadcast %cst_238 : f32 to vector<4x512xf32>
    %596 = arith.select %594, %573, %595 : vector<4x512xi1>, vector<4x512xf32>
    %c19 = arith.constant 19 : index
    %c0_239 = arith.constant 0 : index
    %c0_240 = arith.constant 0 : index
    %597 = vector.load %arg3[%c19, %c0_239, %c0_240] : memref<25x8x4xf32, #tpu.memory_space<vmem>>, vector<1x8x4xf32>
    %598 = vector.shape_cast %597 : vector<1x8x4xf32> to vector<8x4xf32>
    %599 = arith.truncf %598 : vector<8x4xf32> to vector<8x4xbf16>
    %600 = arith.truncf %596 : vector<4x512xf32> to vector<4x512xbf16>
    %cst_241 = arith.constant dense<0.000000e+00> : vector<8x512xf32>
    %601 = tpu.matmul %599, %600, %cst_241 {dimension_numbers = #tpu.dot_dimension_numbers<[1], [0], [0], [1], [0, 0, 1, 1], [], []>} : vector<8x4xbf16>, vector<4x512xbf16>, vector<8x512xf32> -> vector<8x512xf32>
    %602 = arith.addf %572, %601 : vector<8x512xf32>
    %c482_i32 = arith.constant 482 : i32
    %603 = tpu.dynamic_rotate %16 by %c482_i32 dim 1 : vector<4x512xf32>, i32 -> vector<4x512xf32>
    %c2_i32_242 = arith.constant 2 : i32
    %604 = vector.broadcast %c2_i32_242 : i32 to vector<1x512xi32>
    %605 = arith.addi %25, %604 : vector<1x512xi32>
    %c0_i32_243 = arith.constant 0 : i32
    %606 = vector.broadcast %c0_i32_243 : i32 to vector<1x512xi32>
    %607 = arith.cmpi sge, %605, %606 : vector<1x512xi32>
    %c2_i32_244 = arith.constant 2 : i32
    %608 = vector.broadcast %c2_i32_244 : i32 to vector<1x512xi32>
    %609 = arith.addi %25, %608 : vector<1x512xi32>
    %c16_i32_245 = arith.constant 16 : i32
    %610 = vector.broadcast %c16_i32_245 : i32 to vector<1x512xi32>
    %611 = arith.cmpi slt, %609, %610 : vector<1x512xi32>
    %612 = arith.andi %607, %611 : vector<1x512xi1>
    %c-2_i32_246 = arith.constant -2 : i32
    %613 = vector.broadcast %c-2_i32_246 : i32 to vector<1x512xi32>
    %614 = arith.addi %21, %613 : vector<1x512xi32>
    %c0_i32_247 = arith.constant 0 : i32
    %615 = vector.broadcast %c0_i32_247 : i32 to vector<1x512xi32>
    %616 = arith.cmpi sge, %614, %615 : vector<1x512xi32>
    %617 = arith.andi %612, %616 : vector<1x512xi1>
    %c-2_i32_248 = arith.constant -2 : i32
    %618 = vector.broadcast %c-2_i32_248 : i32 to vector<1x512xi32>
    %619 = arith.addi %21, %618 : vector<1x512xi32>
    %c16_i32_249 = arith.constant 16 : i32
    %620 = vector.broadcast %c16_i32_249 : i32 to vector<1x512xi32>
    %621 = arith.cmpi slt, %619, %620 : vector<1x512xi32>
    %622 = arith.andi %617, %621 : vector<1x512xi1>
    %cst_250 = arith.constant 0.000000e+00 : f32
    %623 = vector.shape_cast %622 : vector<1x512xi1> to vector<1x512xi1>
    %624 = vector.broadcast %623 : vector<1x512xi1> to vector<4x512xi1>
    %625 = vector.broadcast %cst_250 : f32 to vector<4x512xf32>
    %626 = arith.select %624, %603, %625 : vector<4x512xi1>, vector<4x512xf32>
    %c20 = arith.constant 20 : index
    %c0_251 = arith.constant 0 : index
    %c0_252 = arith.constant 0 : index
    %627 = vector.load %arg3[%c20, %c0_251, %c0_252] : memref<25x8x4xf32, #tpu.memory_space<vmem>>, vector<1x8x4xf32>
    %628 = vector.shape_cast %627 : vector<1x8x4xf32> to vector<8x4xf32>
    %629 = arith.truncf %628 : vector<8x4xf32> to vector<8x4xbf16>
    %630 = arith.truncf %626 : vector<4x512xf32> to vector<4x512xbf16>
    %cst_253 = arith.constant dense<0.000000e+00> : vector<8x512xf32>
    %631 = tpu.matmul %629, %630, %cst_253 {dimension_numbers = #tpu.dot_dimension_numbers<[1], [0], [0], [1], [0, 0, 1, 1], [], []>} : vector<8x4xbf16>, vector<4x512xbf16>, vector<8x512xf32> -> vector<8x512xf32>
    %632 = arith.addf %602, %631 : vector<8x512xf32>
    %c481_i32 = arith.constant 481 : i32
    %633 = tpu.dynamic_rotate %16 by %c481_i32 dim 1 : vector<4x512xf32>, i32 -> vector<4x512xf32>
    %c2_i32_254 = arith.constant 2 : i32
    %634 = vector.broadcast %c2_i32_254 : i32 to vector<1x512xi32>
    %635 = arith.addi %25, %634 : vector<1x512xi32>
    %c0_i32_255 = arith.constant 0 : i32
    %636 = vector.broadcast %c0_i32_255 : i32 to vector<1x512xi32>
    %637 = arith.cmpi sge, %635, %636 : vector<1x512xi32>
    %c2_i32_256 = arith.constant 2 : i32
    %638 = vector.broadcast %c2_i32_256 : i32 to vector<1x512xi32>
    %639 = arith.addi %25, %638 : vector<1x512xi32>
    %c16_i32_257 = arith.constant 16 : i32
    %640 = vector.broadcast %c16_i32_257 : i32 to vector<1x512xi32>
    %641 = arith.cmpi slt, %639, %640 : vector<1x512xi32>
    %642 = arith.andi %637, %641 : vector<1x512xi1>
    %c-1_i32_258 = arith.constant -1 : i32
    %643 = vector.broadcast %c-1_i32_258 : i32 to vector<1x512xi32>
    %644 = arith.addi %21, %643 : vector<1x512xi32>
    %c0_i32_259 = arith.constant 0 : i32
    %645 = vector.broadcast %c0_i32_259 : i32 to vector<1x512xi32>
    %646 = arith.cmpi sge, %644, %645 : vector<1x512xi32>
    %647 = arith.andi %642, %646 : vector<1x512xi1>
    %c-1_i32_260 = arith.constant -1 : i32
    %648 = vector.broadcast %c-1_i32_260 : i32 to vector<1x512xi32>
    %649 = arith.addi %21, %648 : vector<1x512xi32>
    %c16_i32_261 = arith.constant 16 : i32
    %650 = vector.broadcast %c16_i32_261 : i32 to vector<1x512xi32>
    %651 = arith.cmpi slt, %649, %650 : vector<1x512xi32>
    %652 = arith.andi %647, %651 : vector<1x512xi1>
    %cst_262 = arith.constant 0.000000e+00 : f32
    %653 = vector.shape_cast %652 : vector<1x512xi1> to vector<1x512xi1>
    %654 = vector.broadcast %653 : vector<1x512xi1> to vector<4x512xi1>
    %655 = vector.broadcast %cst_262 : f32 to vector<4x512xf32>
    %656 = arith.select %654, %633, %655 : vector<4x512xi1>, vector<4x512xf32>
    %c21 = arith.constant 21 : index
    %c0_263 = arith.constant 0 : index
    %c0_264 = arith.constant 0 : index
    %657 = vector.load %arg3[%c21, %c0_263, %c0_264] : memref<25x8x4xf32, #tpu.memory_space<vmem>>, vector<1x8x4xf32>
    %658 = vector.shape_cast %657 : vector<1x8x4xf32> to vector<8x4xf32>
    %659 = arith.truncf %658 : vector<8x4xf32> to vector<8x4xbf16>
    %660 = arith.truncf %656 : vector<4x512xf32> to vector<4x512xbf16>
    %cst_265 = arith.constant dense<0.000000e+00> : vector<8x512xf32>
    %661 = tpu.matmul %659, %660, %cst_265 {dimension_numbers = #tpu.dot_dimension_numbers<[1], [0], [0], [1], [0, 0, 1, 1], [], []>} : vector<8x4xbf16>, vector<4x512xbf16>, vector<8x512xf32> -> vector<8x512xf32>
    %662 = arith.addf %632, %661 : vector<8x512xf32>
    %c480_i32 = arith.constant 480 : i32
    %663 = tpu.dynamic_rotate %16 by %c480_i32 dim 1 : vector<4x512xf32>, i32 -> vector<4x512xf32>
    %c2_i32_266 = arith.constant 2 : i32
    %664 = vector.broadcast %c2_i32_266 : i32 to vector<1x512xi32>
    %665 = arith.addi %25, %664 : vector<1x512xi32>
    %c0_i32_267 = arith.constant 0 : i32
    %666 = vector.broadcast %c0_i32_267 : i32 to vector<1x512xi32>
    %667 = arith.cmpi sge, %665, %666 : vector<1x512xi32>
    %c2_i32_268 = arith.constant 2 : i32
    %668 = vector.broadcast %c2_i32_268 : i32 to vector<1x512xi32>
    %669 = arith.addi %25, %668 : vector<1x512xi32>
    %c16_i32_269 = arith.constant 16 : i32
    %670 = vector.broadcast %c16_i32_269 : i32 to vector<1x512xi32>
    %671 = arith.cmpi slt, %669, %670 : vector<1x512xi32>
    %672 = arith.andi %667, %671 : vector<1x512xi1>
    %c0_i32_270 = arith.constant 0 : i32
    %673 = vector.broadcast %c0_i32_270 : i32 to vector<1x512xi32>
    %674 = arith.addi %21, %673 : vector<1x512xi32>
    %c0_i32_271 = arith.constant 0 : i32
    %675 = vector.broadcast %c0_i32_271 : i32 to vector<1x512xi32>
    %676 = arith.cmpi sge, %674, %675 : vector<1x512xi32>
    %677 = arith.andi %672, %676 : vector<1x512xi1>
    %c0_i32_272 = arith.constant 0 : i32
    %678 = vector.broadcast %c0_i32_272 : i32 to vector<1x512xi32>
    %679 = arith.addi %21, %678 : vector<1x512xi32>
    %c16_i32_273 = arith.constant 16 : i32
    %680 = vector.broadcast %c16_i32_273 : i32 to vector<1x512xi32>
    %681 = arith.cmpi slt, %679, %680 : vector<1x512xi32>
    %682 = arith.andi %677, %681 : vector<1x512xi1>
    %cst_274 = arith.constant 0.000000e+00 : f32
    %683 = vector.shape_cast %682 : vector<1x512xi1> to vector<1x512xi1>
    %684 = vector.broadcast %683 : vector<1x512xi1> to vector<4x512xi1>
    %685 = vector.broadcast %cst_274 : f32 to vector<4x512xf32>
    %686 = arith.select %684, %663, %685 : vector<4x512xi1>, vector<4x512xf32>
    %c22 = arith.constant 22 : index
    %c0_275 = arith.constant 0 : index
    %c0_276 = arith.constant 0 : index
    %687 = vector.load %arg3[%c22, %c0_275, %c0_276] : memref<25x8x4xf32, #tpu.memory_space<vmem>>, vector<1x8x4xf32>
    %688 = vector.shape_cast %687 : vector<1x8x4xf32> to vector<8x4xf32>
    %689 = arith.truncf %688 : vector<8x4xf32> to vector<8x4xbf16>
    %690 = arith.truncf %686 : vector<4x512xf32> to vector<4x512xbf16>
    %cst_277 = arith.constant dense<0.000000e+00> : vector<8x512xf32>
    %691 = tpu.matmul %689, %690, %cst_277 {dimension_numbers = #tpu.dot_dimension_numbers<[1], [0], [0], [1], [0, 0, 1, 1], [], []>} : vector<8x4xbf16>, vector<4x512xbf16>, vector<8x512xf32> -> vector<8x512xf32>
    %692 = arith.addf %662, %691 : vector<8x512xf32>
    %c479_i32 = arith.constant 479 : i32
    %693 = tpu.dynamic_rotate %16 by %c479_i32 dim 1 : vector<4x512xf32>, i32 -> vector<4x512xf32>
    %c2_i32_278 = arith.constant 2 : i32
    %694 = vector.broadcast %c2_i32_278 : i32 to vector<1x512xi32>
    %695 = arith.addi %25, %694 : vector<1x512xi32>
    %c0_i32_279 = arith.constant 0 : i32
    %696 = vector.broadcast %c0_i32_279 : i32 to vector<1x512xi32>
    %697 = arith.cmpi sge, %695, %696 : vector<1x512xi32>
    %c2_i32_280 = arith.constant 2 : i32
    %698 = vector.broadcast %c2_i32_280 : i32 to vector<1x512xi32>
    %699 = arith.addi %25, %698 : vector<1x512xi32>
    %c16_i32_281 = arith.constant 16 : i32
    %700 = vector.broadcast %c16_i32_281 : i32 to vector<1x512xi32>
    %701 = arith.cmpi slt, %699, %700 : vector<1x512xi32>
    %702 = arith.andi %697, %701 : vector<1x512xi1>
    %c1_i32_282 = arith.constant 1 : i32
    %703 = vector.broadcast %c1_i32_282 : i32 to vector<1x512xi32>
    %704 = arith.addi %21, %703 : vector<1x512xi32>
    %c0_i32_283 = arith.constant 0 : i32
    %705 = vector.broadcast %c0_i32_283 : i32 to vector<1x512xi32>
    %706 = arith.cmpi sge, %704, %705 : vector<1x512xi32>
    %707 = arith.andi %702, %706 : vector<1x512xi1>
    %c1_i32_284 = arith.constant 1 : i32
    %708 = vector.broadcast %c1_i32_284 : i32 to vector<1x512xi32>
    %709 = arith.addi %21, %708 : vector<1x512xi32>
    %c16_i32_285 = arith.constant 16 : i32
    %710 = vector.broadcast %c16_i32_285 : i32 to vector<1x512xi32>
    %711 = arith.cmpi slt, %709, %710 : vector<1x512xi32>
    %712 = arith.andi %707, %711 : vector<1x512xi1>
    %cst_286 = arith.constant 0.000000e+00 : f32
    %713 = vector.shape_cast %712 : vector<1x512xi1> to vector<1x512xi1>
    %714 = vector.broadcast %713 : vector<1x512xi1> to vector<4x512xi1>
    %715 = vector.broadcast %cst_286 : f32 to vector<4x512xf32>
    %716 = arith.select %714, %693, %715 : vector<4x512xi1>, vector<4x512xf32>
    %c23 = arith.constant 23 : index
    %c0_287 = arith.constant 0 : index
    %c0_288 = arith.constant 0 : index
    %717 = vector.load %arg3[%c23, %c0_287, %c0_288] : memref<25x8x4xf32, #tpu.memory_space<vmem>>, vector<1x8x4xf32>
    %718 = vector.shape_cast %717 : vector<1x8x4xf32> to vector<8x4xf32>
    %719 = arith.truncf %718 : vector<8x4xf32> to vector<8x4xbf16>
    %720 = arith.truncf %716 : vector<4x512xf32> to vector<4x512xbf16>
    %cst_289 = arith.constant dense<0.000000e+00> : vector<8x512xf32>
    %721 = tpu.matmul %719, %720, %cst_289 {dimension_numbers = #tpu.dot_dimension_numbers<[1], [0], [0], [1], [0, 0, 1, 1], [], []>} : vector<8x4xbf16>, vector<4x512xbf16>, vector<8x512xf32> -> vector<8x512xf32>
    %722 = arith.addf %692, %721 : vector<8x512xf32>
    %c478_i32 = arith.constant 478 : i32
    %723 = tpu.dynamic_rotate %16 by %c478_i32 dim 1 : vector<4x512xf32>, i32 -> vector<4x512xf32>
    %c2_i32_290 = arith.constant 2 : i32
    %724 = vector.broadcast %c2_i32_290 : i32 to vector<1x512xi32>
    %725 = arith.addi %25, %724 : vector<1x512xi32>
    %c0_i32_291 = arith.constant 0 : i32
    %726 = vector.broadcast %c0_i32_291 : i32 to vector<1x512xi32>
    %727 = arith.cmpi sge, %725, %726 : vector<1x512xi32>
    %c2_i32_292 = arith.constant 2 : i32
    %728 = vector.broadcast %c2_i32_292 : i32 to vector<1x512xi32>
    %729 = arith.addi %25, %728 : vector<1x512xi32>
    %c16_i32_293 = arith.constant 16 : i32
    %730 = vector.broadcast %c16_i32_293 : i32 to vector<1x512xi32>
    %731 = arith.cmpi slt, %729, %730 : vector<1x512xi32>
    %732 = arith.andi %727, %731 : vector<1x512xi1>
    %c2_i32_294 = arith.constant 2 : i32
    %733 = vector.broadcast %c2_i32_294 : i32 to vector<1x512xi32>
    %734 = arith.addi %21, %733 : vector<1x512xi32>
    %c0_i32_295 = arith.constant 0 : i32
    %735 = vector.broadcast %c0_i32_295 : i32 to vector<1x512xi32>
    %736 = arith.cmpi sge, %734, %735 : vector<1x512xi32>
    %737 = arith.andi %732, %736 : vector<1x512xi1>
    %c2_i32_296 = arith.constant 2 : i32
    %738 = vector.broadcast %c2_i32_296 : i32 to vector<1x512xi32>
    %739 = arith.addi %21, %738 : vector<1x512xi32>
    %c16_i32_297 = arith.constant 16 : i32
    %740 = vector.broadcast %c16_i32_297 : i32 to vector<1x512xi32>
    %741 = arith.cmpi slt, %739, %740 : vector<1x512xi32>
    %742 = arith.andi %737, %741 : vector<1x512xi1>
    %cst_298 = arith.constant 0.000000e+00 : f32
    %743 = vector.shape_cast %742 : vector<1x512xi1> to vector<1x512xi1>
    %744 = vector.broadcast %743 : vector<1x512xi1> to vector<4x512xi1>
    %745 = vector.broadcast %cst_298 : f32 to vector<4x512xf32>
    %746 = arith.select %744, %723, %745 : vector<4x512xi1>, vector<4x512xf32>
    %c24 = arith.constant 24 : index
    %c0_299 = arith.constant 0 : index
    %c0_300 = arith.constant 0 : index
    %747 = vector.load %arg3[%c24, %c0_299, %c0_300] : memref<25x8x4xf32, #tpu.memory_space<vmem>>, vector<1x8x4xf32>
    %748 = vector.shape_cast %747 : vector<1x8x4xf32> to vector<8x4xf32>
    %749 = arith.truncf %748 : vector<8x4xf32> to vector<8x4xbf16>
    %750 = arith.truncf %746 : vector<4x512xf32> to vector<4x512xbf16>
    %cst_301 = arith.constant dense<0.000000e+00> : vector<8x512xf32>
    %751 = tpu.matmul %749, %750, %cst_301 {dimension_numbers = #tpu.dot_dimension_numbers<[1], [0], [0], [1], [0, 0, 1, 1], [], []>} : vector<8x4xbf16>, vector<4x512xbf16>, vector<8x512xf32> -> vector<8x512xf32>
    %752 = arith.addf %722, %751 : vector<8x512xf32>
    %cst_302 = arith.constant dense<0.000000e+00> : vector<8xf32>
    %753 = vector.multi_reduction <add>, %752, %cst_302 [1] : vector<8x512xf32> to vector<8xf32>
    %754 = vector.shape_cast %753 : vector<8xf32> to vector<8x1xf32>
    %cst_303 = arith.constant 0.001953125 : f32
    %755 = vector.broadcast %cst_303 : f32 to vector<8x1xf32>
    %756 = arith.mulf %754, %755 : vector<8x1xf32>
    %757 = vector.broadcast %756 : vector<8x1xf32> to vector<8x512xf32>
    %758 = arith.subf %752, %757 : vector<8x512xf32>
    %759 = arith.mulf %758, %758 : vector<8x512xf32>
    %cst_304 = arith.constant dense<0.000000e+00> : vector<8xf32>
    %760 = vector.multi_reduction <add>, %759, %cst_304 [1] : vector<8x512xf32> to vector<8xf32>
    %761 = vector.shape_cast %760 : vector<8xf32> to vector<8x1xf32>
    %cst_305 = arith.constant 0.001953125 : f32
    %762 = vector.broadcast %cst_305 : f32 to vector<8x1xf32>
    %763 = arith.mulf %761, %762 : vector<8x1xf32>
    %cst_306 = arith.constant 9.99999974E-6 : f32
    %764 = vector.broadcast %cst_306 : f32 to vector<8x1xf32>
    %765 = arith.addf %763, %764 : vector<8x1xf32>
    %766 = math.rsqrt %765 : vector<8x1xf32>
    %767 = vector.broadcast %766 : vector<8x1xf32> to vector<8x512xf32>
    %768 = arith.mulf %758, %767 : vector<8x512xf32>
    %769 = vector.broadcast %17 : vector<8x1xf32> to vector<8x512xf32>
    %770 = arith.mulf %768, %769 : vector<8x512xf32>
    %771 = vector.broadcast %18 : vector<8x1xf32> to vector<8x512xf32>
    %772 = arith.addf %770, %771 : vector<8x512xf32>
    %cst_307 = arith.constant 0.000000e+00 : f32
    %773 = vector.broadcast %cst_307 : f32 to vector<8x512xf32>
    %774 = arith.cmpf ogt, %772, %773 : vector<8x512xf32>
    %cst_308 = arith.constant 2.000000e-01 : f32
    %775 = vector.broadcast %cst_308 : f32 to vector<8x512xf32>
    %776 = arith.mulf %775, %772 : vector<8x512xf32>
    %777 = arith.select %774, %772, %776 : vector<8x512xi1>, vector<8x512xf32>
    %c511_i32_309 = arith.constant 511 : i32
    %778 = tpu.dynamic_rotate %777 by %c511_i32_309 dim 1 : vector<8x512xf32>, i32 -> vector<8x512xf32>
    %779 = arith.maximumf %777, %778 : vector<8x512xf32>
    %c496_i32_310 = arith.constant 496 : i32
    %780 = tpu.dynamic_rotate %779 by %c496_i32_310 dim 1 : vector<8x512xf32>, i32 -> vector<8x512xf32>
    %781 = arith.maximumf %779, %780 : vector<8x512xf32>
    %c0_311 = arith.constant 0 : index
    %c0_312 = arith.constant 0 : index
    %782 = vector.load %arg9[%c0_311, %c0_312] : memref<512x128xf32, #tpu.memory_space<vmem>>, vector<512x128xf32>
    %cst_313 = arith.constant dense<0.000000e+00> : vector<8x128xf32>
    %783 = tpu.matmul %781, %782, %cst_313 {dimension_numbers = #tpu.dot_dimension_numbers<[1], [0], [0], [1], [0, 0, 1, 1], [], []>} : vector<8x512xf32>, vector<512x128xf32>, vector<8x128xf32> -> vector<8x128xf32>
    %c0_314 = arith.constant 0 : index
    %c0_315 = arith.constant 0 : index
    %784 = vector.load %arg6[%c0_314, %c0_315] : memref<16x1xf32, #tpu.memory_space<vmem>>, vector<16x1xf32>
    %c0_316 = arith.constant 0 : index
    %c0_317 = arith.constant 0 : index
    %785 = vector.load %arg8[%c0_316, %c0_317] : memref<16x1xf32, #tpu.memory_space<vmem>>, vector<16x1xf32>
    %786 = tpu.iota {dimensions = array<i32: 1>} : vector<1x128xi32>
    %c7_i32 = arith.constant 7 : i32
    %787 = vector.broadcast %c7_i32 : i32 to vector<1x128xi32>
    %788 = arith.andi %786, %787 : vector<1x128xi32>
    %c3_i32_318 = arith.constant 3 : i32
    %789 = vector.broadcast %c3_i32_318 : i32 to vector<1x128xi32>
    %790 = arith.shrsi %786, %789 : vector<1x128xi32>
    %c7_i32_319 = arith.constant 7 : i32
    %791 = vector.broadcast %c7_i32_319 : i32 to vector<1x128xi32>
    %792 = arith.andi %790, %791 : vector<1x128xi32>
    %cst_320 = arith.constant 0.000000e+00 : f32
    %793 = vector.broadcast %cst_320 : f32 to vector<16x128xf32>
    %c18_i32_321 = arith.constant 18 : i32
    %794 = tpu.dynamic_rotate %783 by %c18_i32_321 dim 1 : vector<8x128xf32>, i32 -> vector<8x128xf32>
    %c-2_i32_322 = arith.constant -2 : i32
    %795 = vector.broadcast %c-2_i32_322 : i32 to vector<1x128xi32>
    %796 = arith.addi %792, %795 : vector<1x128xi32>
    %c0_i32_323 = arith.constant 0 : i32
    %797 = vector.broadcast %c0_i32_323 : i32 to vector<1x128xi32>
    %798 = arith.cmpi sge, %796, %797 : vector<1x128xi32>
    %c-2_i32_324 = arith.constant -2 : i32
    %799 = vector.broadcast %c-2_i32_324 : i32 to vector<1x128xi32>
    %800 = arith.addi %792, %799 : vector<1x128xi32>
    %c8_i32 = arith.constant 8 : i32
    %801 = vector.broadcast %c8_i32 : i32 to vector<1x128xi32>
    %802 = arith.cmpi slt, %800, %801 : vector<1x128xi32>
    %803 = arith.andi %798, %802 : vector<1x128xi1>
    %c-2_i32_325 = arith.constant -2 : i32
    %804 = vector.broadcast %c-2_i32_325 : i32 to vector<1x128xi32>
    %805 = arith.addi %788, %804 : vector<1x128xi32>
    %c0_i32_326 = arith.constant 0 : i32
    %806 = vector.broadcast %c0_i32_326 : i32 to vector<1x128xi32>
    %807 = arith.cmpi sge, %805, %806 : vector<1x128xi32>
    %808 = arith.andi %803, %807 : vector<1x128xi1>
    %c-2_i32_327 = arith.constant -2 : i32
    %809 = vector.broadcast %c-2_i32_327 : i32 to vector<1x128xi32>
    %810 = arith.addi %788, %809 : vector<1x128xi32>
    %c8_i32_328 = arith.constant 8 : i32
    %811 = vector.broadcast %c8_i32_328 : i32 to vector<1x128xi32>
    %812 = arith.cmpi slt, %810, %811 : vector<1x128xi32>
    %813 = arith.andi %808, %812 : vector<1x128xi1>
    %cst_329 = arith.constant 0.000000e+00 : f32
    %814 = vector.shape_cast %813 : vector<1x128xi1> to vector<1x128xi1>
    %815 = vector.broadcast %814 : vector<1x128xi1> to vector<8x128xi1>
    %816 = vector.broadcast %cst_329 : f32 to vector<8x128xf32>
    %817 = arith.select %815, %794, %816 : vector<8x128xi1>, vector<8x128xf32>
    %c0_330 = arith.constant 0 : index
    %c0_331 = arith.constant 0 : index
    %c0_332 = arith.constant 0 : index
    %818 = vector.load %arg4[%c0_330, %c0_331, %c0_332] : memref<25x16x8xf32, #tpu.memory_space<vmem>>, vector<1x16x8xf32>
    %819 = vector.shape_cast %818 : vector<1x16x8xf32> to vector<16x8xf32>
    %820 = arith.truncf %819 : vector<16x8xf32> to vector<16x8xbf16>
    %821 = arith.truncf %817 : vector<8x128xf32> to vector<8x128xbf16>
    %cst_333 = arith.constant dense<0.000000e+00> : vector<16x128xf32>
    %822 = tpu.matmul %820, %821, %cst_333 {dimension_numbers = #tpu.dot_dimension_numbers<[1], [0], [0], [1], [0, 0, 1, 1], [], []>} : vector<16x8xbf16>, vector<8x128xbf16>, vector<16x128xf32> -> vector<16x128xf32>
    %823 = arith.addf %793, %822 : vector<16x128xf32>
    %c17_i32_334 = arith.constant 17 : i32
    %824 = tpu.dynamic_rotate %783 by %c17_i32_334 dim 1 : vector<8x128xf32>, i32 -> vector<8x128xf32>
    %c-2_i32_335 = arith.constant -2 : i32
    %825 = vector.broadcast %c-2_i32_335 : i32 to vector<1x128xi32>
    %826 = arith.addi %792, %825 : vector<1x128xi32>
    %c0_i32_336 = arith.constant 0 : i32
    %827 = vector.broadcast %c0_i32_336 : i32 to vector<1x128xi32>
    %828 = arith.cmpi sge, %826, %827 : vector<1x128xi32>
    %c-2_i32_337 = arith.constant -2 : i32
    %829 = vector.broadcast %c-2_i32_337 : i32 to vector<1x128xi32>
    %830 = arith.addi %792, %829 : vector<1x128xi32>
    %c8_i32_338 = arith.constant 8 : i32
    %831 = vector.broadcast %c8_i32_338 : i32 to vector<1x128xi32>
    %832 = arith.cmpi slt, %830, %831 : vector<1x128xi32>
    %833 = arith.andi %828, %832 : vector<1x128xi1>
    %c-1_i32_339 = arith.constant -1 : i32
    %834 = vector.broadcast %c-1_i32_339 : i32 to vector<1x128xi32>
    %835 = arith.addi %788, %834 : vector<1x128xi32>
    %c0_i32_340 = arith.constant 0 : i32
    %836 = vector.broadcast %c0_i32_340 : i32 to vector<1x128xi32>
    %837 = arith.cmpi sge, %835, %836 : vector<1x128xi32>
    %838 = arith.andi %833, %837 : vector<1x128xi1>
    %c-1_i32_341 = arith.constant -1 : i32
    %839 = vector.broadcast %c-1_i32_341 : i32 to vector<1x128xi32>
    %840 = arith.addi %788, %839 : vector<1x128xi32>
    %c8_i32_342 = arith.constant 8 : i32
    %841 = vector.broadcast %c8_i32_342 : i32 to vector<1x128xi32>
    %842 = arith.cmpi slt, %840, %841 : vector<1x128xi32>
    %843 = arith.andi %838, %842 : vector<1x128xi1>
    %cst_343 = arith.constant 0.000000e+00 : f32
    %844 = vector.shape_cast %843 : vector<1x128xi1> to vector<1x128xi1>
    %845 = vector.broadcast %844 : vector<1x128xi1> to vector<8x128xi1>
    %846 = vector.broadcast %cst_343 : f32 to vector<8x128xf32>
    %847 = arith.select %845, %824, %846 : vector<8x128xi1>, vector<8x128xf32>
    %c1_344 = arith.constant 1 : index
    %c0_345 = arith.constant 0 : index
    %c0_346 = arith.constant 0 : index
    %848 = vector.load %arg4[%c1_344, %c0_345, %c0_346] : memref<25x16x8xf32, #tpu.memory_space<vmem>>, vector<1x16x8xf32>
    %849 = vector.shape_cast %848 : vector<1x16x8xf32> to vector<16x8xf32>
    %850 = arith.truncf %849 : vector<16x8xf32> to vector<16x8xbf16>
    %851 = arith.truncf %847 : vector<8x128xf32> to vector<8x128xbf16>
    %cst_347 = arith.constant dense<0.000000e+00> : vector<16x128xf32>
    %852 = tpu.matmul %850, %851, %cst_347 {dimension_numbers = #tpu.dot_dimension_numbers<[1], [0], [0], [1], [0, 0, 1, 1], [], []>} : vector<16x8xbf16>, vector<8x128xbf16>, vector<16x128xf32> -> vector<16x128xf32>
    %853 = arith.addf %823, %852 : vector<16x128xf32>
    %c16_i32_348 = arith.constant 16 : i32
    %854 = tpu.dynamic_rotate %783 by %c16_i32_348 dim 1 : vector<8x128xf32>, i32 -> vector<8x128xf32>
    %c-2_i32_349 = arith.constant -2 : i32
    %855 = vector.broadcast %c-2_i32_349 : i32 to vector<1x128xi32>
    %856 = arith.addi %792, %855 : vector<1x128xi32>
    %c0_i32_350 = arith.constant 0 : i32
    %857 = vector.broadcast %c0_i32_350 : i32 to vector<1x128xi32>
    %858 = arith.cmpi sge, %856, %857 : vector<1x128xi32>
    %c-2_i32_351 = arith.constant -2 : i32
    %859 = vector.broadcast %c-2_i32_351 : i32 to vector<1x128xi32>
    %860 = arith.addi %792, %859 : vector<1x128xi32>
    %c8_i32_352 = arith.constant 8 : i32
    %861 = vector.broadcast %c8_i32_352 : i32 to vector<1x128xi32>
    %862 = arith.cmpi slt, %860, %861 : vector<1x128xi32>
    %863 = arith.andi %858, %862 : vector<1x128xi1>
    %c0_i32_353 = arith.constant 0 : i32
    %864 = vector.broadcast %c0_i32_353 : i32 to vector<1x128xi32>
    %865 = arith.addi %788, %864 : vector<1x128xi32>
    %c0_i32_354 = arith.constant 0 : i32
    %866 = vector.broadcast %c0_i32_354 : i32 to vector<1x128xi32>
    %867 = arith.cmpi sge, %865, %866 : vector<1x128xi32>
    %868 = arith.andi %863, %867 : vector<1x128xi1>
    %c0_i32_355 = arith.constant 0 : i32
    %869 = vector.broadcast %c0_i32_355 : i32 to vector<1x128xi32>
    %870 = arith.addi %788, %869 : vector<1x128xi32>
    %c8_i32_356 = arith.constant 8 : i32
    %871 = vector.broadcast %c8_i32_356 : i32 to vector<1x128xi32>
    %872 = arith.cmpi slt, %870, %871 : vector<1x128xi32>
    %873 = arith.andi %868, %872 : vector<1x128xi1>
    %cst_357 = arith.constant 0.000000e+00 : f32
    %874 = vector.shape_cast %873 : vector<1x128xi1> to vector<1x128xi1>
    %875 = vector.broadcast %874 : vector<1x128xi1> to vector<8x128xi1>
    %876 = vector.broadcast %cst_357 : f32 to vector<8x128xf32>
    %877 = arith.select %875, %854, %876 : vector<8x128xi1>, vector<8x128xf32>
    %c2_358 = arith.constant 2 : index
    %c0_359 = arith.constant 0 : index
    %c0_360 = arith.constant 0 : index
    %878 = vector.load %arg4[%c2_358, %c0_359, %c0_360] : memref<25x16x8xf32, #tpu.memory_space<vmem>>, vector<1x16x8xf32>
    %879 = vector.shape_cast %878 : vector<1x16x8xf32> to vector<16x8xf32>
    %880 = arith.truncf %879 : vector<16x8xf32> to vector<16x8xbf16>
    %881 = arith.truncf %877 : vector<8x128xf32> to vector<8x128xbf16>
    %cst_361 = arith.constant dense<0.000000e+00> : vector<16x128xf32>
    %882 = tpu.matmul %880, %881, %cst_361 {dimension_numbers = #tpu.dot_dimension_numbers<[1], [0], [0], [1], [0, 0, 1, 1], [], []>} : vector<16x8xbf16>, vector<8x128xbf16>, vector<16x128xf32> -> vector<16x128xf32>
    %883 = arith.addf %853, %882 : vector<16x128xf32>
    %c15_i32_362 = arith.constant 15 : i32
    %884 = tpu.dynamic_rotate %783 by %c15_i32_362 dim 1 : vector<8x128xf32>, i32 -> vector<8x128xf32>
    %c-2_i32_363 = arith.constant -2 : i32
    %885 = vector.broadcast %c-2_i32_363 : i32 to vector<1x128xi32>
    %886 = arith.addi %792, %885 : vector<1x128xi32>
    %c0_i32_364 = arith.constant 0 : i32
    %887 = vector.broadcast %c0_i32_364 : i32 to vector<1x128xi32>
    %888 = arith.cmpi sge, %886, %887 : vector<1x128xi32>
    %c-2_i32_365 = arith.constant -2 : i32
    %889 = vector.broadcast %c-2_i32_365 : i32 to vector<1x128xi32>
    %890 = arith.addi %792, %889 : vector<1x128xi32>
    %c8_i32_366 = arith.constant 8 : i32
    %891 = vector.broadcast %c8_i32_366 : i32 to vector<1x128xi32>
    %892 = arith.cmpi slt, %890, %891 : vector<1x128xi32>
    %893 = arith.andi %888, %892 : vector<1x128xi1>
    %c1_i32_367 = arith.constant 1 : i32
    %894 = vector.broadcast %c1_i32_367 : i32 to vector<1x128xi32>
    %895 = arith.addi %788, %894 : vector<1x128xi32>
    %c0_i32_368 = arith.constant 0 : i32
    %896 = vector.broadcast %c0_i32_368 : i32 to vector<1x128xi32>
    %897 = arith.cmpi sge, %895, %896 : vector<1x128xi32>
    %898 = arith.andi %893, %897 : vector<1x128xi1>
    %c1_i32_369 = arith.constant 1 : i32
    %899 = vector.broadcast %c1_i32_369 : i32 to vector<1x128xi32>
    %900 = arith.addi %788, %899 : vector<1x128xi32>
    %c8_i32_370 = arith.constant 8 : i32
    %901 = vector.broadcast %c8_i32_370 : i32 to vector<1x128xi32>
    %902 = arith.cmpi slt, %900, %901 : vector<1x128xi32>
    %903 = arith.andi %898, %902 : vector<1x128xi1>
    %cst_371 = arith.constant 0.000000e+00 : f32
    %904 = vector.shape_cast %903 : vector<1x128xi1> to vector<1x128xi1>
    %905 = vector.broadcast %904 : vector<1x128xi1> to vector<8x128xi1>
    %906 = vector.broadcast %cst_371 : f32 to vector<8x128xf32>
    %907 = arith.select %905, %884, %906 : vector<8x128xi1>, vector<8x128xf32>
    %c3_372 = arith.constant 3 : index
    %c0_373 = arith.constant 0 : index
    %c0_374 = arith.constant 0 : index
    %908 = vector.load %arg4[%c3_372, %c0_373, %c0_374] : memref<25x16x8xf32, #tpu.memory_space<vmem>>, vector<1x16x8xf32>
    %909 = vector.shape_cast %908 : vector<1x16x8xf32> to vector<16x8xf32>
    %910 = arith.truncf %909 : vector<16x8xf32> to vector<16x8xbf16>
    %911 = arith.truncf %907 : vector<8x128xf32> to vector<8x128xbf16>
    %cst_375 = arith.constant dense<0.000000e+00> : vector<16x128xf32>
    %912 = tpu.matmul %910, %911, %cst_375 {dimension_numbers = #tpu.dot_dimension_numbers<[1], [0], [0], [1], [0, 0, 1, 1], [], []>} : vector<16x8xbf16>, vector<8x128xbf16>, vector<16x128xf32> -> vector<16x128xf32>
    %913 = arith.addf %883, %912 : vector<16x128xf32>
    %c14_i32_376 = arith.constant 14 : i32
    %914 = tpu.dynamic_rotate %783 by %c14_i32_376 dim 1 : vector<8x128xf32>, i32 -> vector<8x128xf32>
    %c-2_i32_377 = arith.constant -2 : i32
    %915 = vector.broadcast %c-2_i32_377 : i32 to vector<1x128xi32>
    %916 = arith.addi %792, %915 : vector<1x128xi32>
    %c0_i32_378 = arith.constant 0 : i32
    %917 = vector.broadcast %c0_i32_378 : i32 to vector<1x128xi32>
    %918 = arith.cmpi sge, %916, %917 : vector<1x128xi32>
    %c-2_i32_379 = arith.constant -2 : i32
    %919 = vector.broadcast %c-2_i32_379 : i32 to vector<1x128xi32>
    %920 = arith.addi %792, %919 : vector<1x128xi32>
    %c8_i32_380 = arith.constant 8 : i32
    %921 = vector.broadcast %c8_i32_380 : i32 to vector<1x128xi32>
    %922 = arith.cmpi slt, %920, %921 : vector<1x128xi32>
    %923 = arith.andi %918, %922 : vector<1x128xi1>
    %c2_i32_381 = arith.constant 2 : i32
    %924 = vector.broadcast %c2_i32_381 : i32 to vector<1x128xi32>
    %925 = arith.addi %788, %924 : vector<1x128xi32>
    %c0_i32_382 = arith.constant 0 : i32
    %926 = vector.broadcast %c0_i32_382 : i32 to vector<1x128xi32>
    %927 = arith.cmpi sge, %925, %926 : vector<1x128xi32>
    %928 = arith.andi %923, %927 : vector<1x128xi1>
    %c2_i32_383 = arith.constant 2 : i32
    %929 = vector.broadcast %c2_i32_383 : i32 to vector<1x128xi32>
    %930 = arith.addi %788, %929 : vector<1x128xi32>
    %c8_i32_384 = arith.constant 8 : i32
    %931 = vector.broadcast %c8_i32_384 : i32 to vector<1x128xi32>
    %932 = arith.cmpi slt, %930, %931 : vector<1x128xi32>
    %933 = arith.andi %928, %932 : vector<1x128xi1>
    %cst_385 = arith.constant 0.000000e+00 : f32
    %934 = vector.shape_cast %933 : vector<1x128xi1> to vector<1x128xi1>
    %935 = vector.broadcast %934 : vector<1x128xi1> to vector<8x128xi1>
    %936 = vector.broadcast %cst_385 : f32 to vector<8x128xf32>
    %937 = arith.select %935, %914, %936 : vector<8x128xi1>, vector<8x128xf32>
    %c4_386 = arith.constant 4 : index
    %c0_387 = arith.constant 0 : index
    %c0_388 = arith.constant 0 : index
    %938 = vector.load %arg4[%c4_386, %c0_387, %c0_388] : memref<25x16x8xf32, #tpu.memory_space<vmem>>, vector<1x16x8xf32>
    %939 = vector.shape_cast %938 : vector<1x16x8xf32> to vector<16x8xf32>
    %940 = arith.truncf %939 : vector<16x8xf32> to vector<16x8xbf16>
    %941 = arith.truncf %937 : vector<8x128xf32> to vector<8x128xbf16>
    %cst_389 = arith.constant dense<0.000000e+00> : vector<16x128xf32>
    %942 = tpu.matmul %940, %941, %cst_389 {dimension_numbers = #tpu.dot_dimension_numbers<[1], [0], [0], [1], [0, 0, 1, 1], [], []>} : vector<16x8xbf16>, vector<8x128xbf16>, vector<16x128xf32> -> vector<16x128xf32>
    %943 = arith.addf %913, %942 : vector<16x128xf32>
    %c10_i32 = arith.constant 10 : i32
    %944 = tpu.dynamic_rotate %783 by %c10_i32 dim 1 : vector<8x128xf32>, i32 -> vector<8x128xf32>
    %c-1_i32_390 = arith.constant -1 : i32
    %945 = vector.broadcast %c-1_i32_390 : i32 to vector<1x128xi32>
    %946 = arith.addi %792, %945 : vector<1x128xi32>
    %c0_i32_391 = arith.constant 0 : i32
    %947 = vector.broadcast %c0_i32_391 : i32 to vector<1x128xi32>
    %948 = arith.cmpi sge, %946, %947 : vector<1x128xi32>
    %c-1_i32_392 = arith.constant -1 : i32
    %949 = vector.broadcast %c-1_i32_392 : i32 to vector<1x128xi32>
    %950 = arith.addi %792, %949 : vector<1x128xi32>
    %c8_i32_393 = arith.constant 8 : i32
    %951 = vector.broadcast %c8_i32_393 : i32 to vector<1x128xi32>
    %952 = arith.cmpi slt, %950, %951 : vector<1x128xi32>
    %953 = arith.andi %948, %952 : vector<1x128xi1>
    %c-2_i32_394 = arith.constant -2 : i32
    %954 = vector.broadcast %c-2_i32_394 : i32 to vector<1x128xi32>
    %955 = arith.addi %788, %954 : vector<1x128xi32>
    %c0_i32_395 = arith.constant 0 : i32
    %956 = vector.broadcast %c0_i32_395 : i32 to vector<1x128xi32>
    %957 = arith.cmpi sge, %955, %956 : vector<1x128xi32>
    %958 = arith.andi %953, %957 : vector<1x128xi1>
    %c-2_i32_396 = arith.constant -2 : i32
    %959 = vector.broadcast %c-2_i32_396 : i32 to vector<1x128xi32>
    %960 = arith.addi %788, %959 : vector<1x128xi32>
    %c8_i32_397 = arith.constant 8 : i32
    %961 = vector.broadcast %c8_i32_397 : i32 to vector<1x128xi32>
    %962 = arith.cmpi slt, %960, %961 : vector<1x128xi32>
    %963 = arith.andi %958, %962 : vector<1x128xi1>
    %cst_398 = arith.constant 0.000000e+00 : f32
    %964 = vector.shape_cast %963 : vector<1x128xi1> to vector<1x128xi1>
    %965 = vector.broadcast %964 : vector<1x128xi1> to vector<8x128xi1>
    %966 = vector.broadcast %cst_398 : f32 to vector<8x128xf32>
    %967 = arith.select %965, %944, %966 : vector<8x128xi1>, vector<8x128xf32>
    %c5_399 = arith.constant 5 : index
    %c0_400 = arith.constant 0 : index
    %c0_401 = arith.constant 0 : index
    %968 = vector.load %arg4[%c5_399, %c0_400, %c0_401] : memref<25x16x8xf32, #tpu.memory_space<vmem>>, vector<1x16x8xf32>
    %969 = vector.shape_cast %968 : vector<1x16x8xf32> to vector<16x8xf32>
    %970 = arith.truncf %969 : vector<16x8xf32> to vector<16x8xbf16>
    %971 = arith.truncf %967 : vector<8x128xf32> to vector<8x128xbf16>
    %cst_402 = arith.constant dense<0.000000e+00> : vector<16x128xf32>
    %972 = tpu.matmul %970, %971, %cst_402 {dimension_numbers = #tpu.dot_dimension_numbers<[1], [0], [0], [1], [0, 0, 1, 1], [], []>} : vector<16x8xbf16>, vector<8x128xbf16>, vector<16x128xf32> -> vector<16x128xf32>
    %973 = arith.addf %943, %972 : vector<16x128xf32>
    %c9_i32 = arith.constant 9 : i32
    %974 = tpu.dynamic_rotate %783 by %c9_i32 dim 1 : vector<8x128xf32>, i32 -> vector<8x128xf32>
    %c-1_i32_403 = arith.constant -1 : i32
    %975 = vector.broadcast %c-1_i32_403 : i32 to vector<1x128xi32>
    %976 = arith.addi %792, %975 : vector<1x128xi32>
    %c0_i32_404 = arith.constant 0 : i32
    %977 = vector.broadcast %c0_i32_404 : i32 to vector<1x128xi32>
    %978 = arith.cmpi sge, %976, %977 : vector<1x128xi32>
    %c-1_i32_405 = arith.constant -1 : i32
    %979 = vector.broadcast %c-1_i32_405 : i32 to vector<1x128xi32>
    %980 = arith.addi %792, %979 : vector<1x128xi32>
    %c8_i32_406 = arith.constant 8 : i32
    %981 = vector.broadcast %c8_i32_406 : i32 to vector<1x128xi32>
    %982 = arith.cmpi slt, %980, %981 : vector<1x128xi32>
    %983 = arith.andi %978, %982 : vector<1x128xi1>
    %c-1_i32_407 = arith.constant -1 : i32
    %984 = vector.broadcast %c-1_i32_407 : i32 to vector<1x128xi32>
    %985 = arith.addi %788, %984 : vector<1x128xi32>
    %c0_i32_408 = arith.constant 0 : i32
    %986 = vector.broadcast %c0_i32_408 : i32 to vector<1x128xi32>
    %987 = arith.cmpi sge, %985, %986 : vector<1x128xi32>
    %988 = arith.andi %983, %987 : vector<1x128xi1>
    %c-1_i32_409 = arith.constant -1 : i32
    %989 = vector.broadcast %c-1_i32_409 : i32 to vector<1x128xi32>
    %990 = arith.addi %788, %989 : vector<1x128xi32>
    %c8_i32_410 = arith.constant 8 : i32
    %991 = vector.broadcast %c8_i32_410 : i32 to vector<1x128xi32>
    %992 = arith.cmpi slt, %990, %991 : vector<1x128xi32>
    %993 = arith.andi %988, %992 : vector<1x128xi1>
    %cst_411 = arith.constant 0.000000e+00 : f32
    %994 = vector.shape_cast %993 : vector<1x128xi1> to vector<1x128xi1>
    %995 = vector.broadcast %994 : vector<1x128xi1> to vector<8x128xi1>
    %996 = vector.broadcast %cst_411 : f32 to vector<8x128xf32>
    %997 = arith.select %995, %974, %996 : vector<8x128xi1>, vector<8x128xf32>
    %c6_412 = arith.constant 6 : index
    %c0_413 = arith.constant 0 : index
    %c0_414 = arith.constant 0 : index
    %998 = vector.load %arg4[%c6_412, %c0_413, %c0_414] : memref<25x16x8xf32, #tpu.memory_space<vmem>>, vector<1x16x8xf32>
    %999 = vector.shape_cast %998 : vector<1x16x8xf32> to vector<16x8xf32>
    %1000 = arith.truncf %999 : vector<16x8xf32> to vector<16x8xbf16>
    %1001 = arith.truncf %997 : vector<8x128xf32> to vector<8x128xbf16>
    %cst_415 = arith.constant dense<0.000000e+00> : vector<16x128xf32>
    %1002 = tpu.matmul %1000, %1001, %cst_415 {dimension_numbers = #tpu.dot_dimension_numbers<[1], [0], [0], [1], [0, 0, 1, 1], [], []>} : vector<16x8xbf16>, vector<8x128xbf16>, vector<16x128xf32> -> vector<16x128xf32>
    %1003 = arith.addf %973, %1002 : vector<16x128xf32>
    %c8_i32_416 = arith.constant 8 : i32
    %1004 = tpu.dynamic_rotate %783 by %c8_i32_416 dim 1 : vector<8x128xf32>, i32 -> vector<8x128xf32>
    %c-1_i32_417 = arith.constant -1 : i32
    %1005 = vector.broadcast %c-1_i32_417 : i32 to vector<1x128xi32>
    %1006 = arith.addi %792, %1005 : vector<1x128xi32>
    %c0_i32_418 = arith.constant 0 : i32
    %1007 = vector.broadcast %c0_i32_418 : i32 to vector<1x128xi32>
    %1008 = arith.cmpi sge, %1006, %1007 : vector<1x128xi32>
    %c-1_i32_419 = arith.constant -1 : i32
    %1009 = vector.broadcast %c-1_i32_419 : i32 to vector<1x128xi32>
    %1010 = arith.addi %792, %1009 : vector<1x128xi32>
    %c8_i32_420 = arith.constant 8 : i32
    %1011 = vector.broadcast %c8_i32_420 : i32 to vector<1x128xi32>
    %1012 = arith.cmpi slt, %1010, %1011 : vector<1x128xi32>
    %1013 = arith.andi %1008, %1012 : vector<1x128xi1>
    %c0_i32_421 = arith.constant 0 : i32
    %1014 = vector.broadcast %c0_i32_421 : i32 to vector<1x128xi32>
    %1015 = arith.addi %788, %1014 : vector<1x128xi32>
    %c0_i32_422 = arith.constant 0 : i32
    %1016 = vector.broadcast %c0_i32_422 : i32 to vector<1x128xi32>
    %1017 = arith.cmpi sge, %1015, %1016 : vector<1x128xi32>
    %1018 = arith.andi %1013, %1017 : vector<1x128xi1>
    %c0_i32_423 = arith.constant 0 : i32
    %1019 = vector.broadcast %c0_i32_423 : i32 to vector<1x128xi32>
    %1020 = arith.addi %788, %1019 : vector<1x128xi32>
    %c8_i32_424 = arith.constant 8 : i32
    %1021 = vector.broadcast %c8_i32_424 : i32 to vector<1x128xi32>
    %1022 = arith.cmpi slt, %1020, %1021 : vector<1x128xi32>
    %1023 = arith.andi %1018, %1022 : vector<1x128xi1>
    %cst_425 = arith.constant 0.000000e+00 : f32
    %1024 = vector.shape_cast %1023 : vector<1x128xi1> to vector<1x128xi1>
    %1025 = vector.broadcast %1024 : vector<1x128xi1> to vector<8x128xi1>
    %1026 = vector.broadcast %cst_425 : f32 to vector<8x128xf32>
    %1027 = arith.select %1025, %1004, %1026 : vector<8x128xi1>, vector<8x128xf32>
    %c7_426 = arith.constant 7 : index
    %c0_427 = arith.constant 0 : index
    %c0_428 = arith.constant 0 : index
    %1028 = vector.load %arg4[%c7_426, %c0_427, %c0_428] : memref<25x16x8xf32, #tpu.memory_space<vmem>>, vector<1x16x8xf32>
    %1029 = vector.shape_cast %1028 : vector<1x16x8xf32> to vector<16x8xf32>
    %1030 = arith.truncf %1029 : vector<16x8xf32> to vector<16x8xbf16>
    %1031 = arith.truncf %1027 : vector<8x128xf32> to vector<8x128xbf16>
    %cst_429 = arith.constant dense<0.000000e+00> : vector<16x128xf32>
    %1032 = tpu.matmul %1030, %1031, %cst_429 {dimension_numbers = #tpu.dot_dimension_numbers<[1], [0], [0], [1], [0, 0, 1, 1], [], []>} : vector<16x8xbf16>, vector<8x128xbf16>, vector<16x128xf32> -> vector<16x128xf32>
    %1033 = arith.addf %1003, %1032 : vector<16x128xf32>
    %c7_i32_430 = arith.constant 7 : i32
    %1034 = tpu.dynamic_rotate %783 by %c7_i32_430 dim 1 : vector<8x128xf32>, i32 -> vector<8x128xf32>
    %c-1_i32_431 = arith.constant -1 : i32
    %1035 = vector.broadcast %c-1_i32_431 : i32 to vector<1x128xi32>
    %1036 = arith.addi %792, %1035 : vector<1x128xi32>
    %c0_i32_432 = arith.constant 0 : i32
    %1037 = vector.broadcast %c0_i32_432 : i32 to vector<1x128xi32>
    %1038 = arith.cmpi sge, %1036, %1037 : vector<1x128xi32>
    %c-1_i32_433 = arith.constant -1 : i32
    %1039 = vector.broadcast %c-1_i32_433 : i32 to vector<1x128xi32>
    %1040 = arith.addi %792, %1039 : vector<1x128xi32>
    %c8_i32_434 = arith.constant 8 : i32
    %1041 = vector.broadcast %c8_i32_434 : i32 to vector<1x128xi32>
    %1042 = arith.cmpi slt, %1040, %1041 : vector<1x128xi32>
    %1043 = arith.andi %1038, %1042 : vector<1x128xi1>
    %c1_i32_435 = arith.constant 1 : i32
    %1044 = vector.broadcast %c1_i32_435 : i32 to vector<1x128xi32>
    %1045 = arith.addi %788, %1044 : vector<1x128xi32>
    %c0_i32_436 = arith.constant 0 : i32
    %1046 = vector.broadcast %c0_i32_436 : i32 to vector<1x128xi32>
    %1047 = arith.cmpi sge, %1045, %1046 : vector<1x128xi32>
    %1048 = arith.andi %1043, %1047 : vector<1x128xi1>
    %c1_i32_437 = arith.constant 1 : i32
    %1049 = vector.broadcast %c1_i32_437 : i32 to vector<1x128xi32>
    %1050 = arith.addi %788, %1049 : vector<1x128xi32>
    %c8_i32_438 = arith.constant 8 : i32
    %1051 = vector.broadcast %c8_i32_438 : i32 to vector<1x128xi32>
    %1052 = arith.cmpi slt, %1050, %1051 : vector<1x128xi32>
    %1053 = arith.andi %1048, %1052 : vector<1x128xi1>
    %cst_439 = arith.constant 0.000000e+00 : f32
    %1054 = vector.shape_cast %1053 : vector<1x128xi1> to vector<1x128xi1>
    %1055 = vector.broadcast %1054 : vector<1x128xi1> to vector<8x128xi1>
    %1056 = vector.broadcast %cst_439 : f32 to vector<8x128xf32>
    %1057 = arith.select %1055, %1034, %1056 : vector<8x128xi1>, vector<8x128xf32>
    %c8_440 = arith.constant 8 : index
    %c0_441 = arith.constant 0 : index
    %c0_442 = arith.constant 0 : index
    %1058 = vector.load %arg4[%c8_440, %c0_441, %c0_442] : memref<25x16x8xf32, #tpu.memory_space<vmem>>, vector<1x16x8xf32>
    %1059 = vector.shape_cast %1058 : vector<1x16x8xf32> to vector<16x8xf32>
    %1060 = arith.truncf %1059 : vector<16x8xf32> to vector<16x8xbf16>
    %1061 = arith.truncf %1057 : vector<8x128xf32> to vector<8x128xbf16>
    %cst_443 = arith.constant dense<0.000000e+00> : vector<16x128xf32>
    %1062 = tpu.matmul %1060, %1061, %cst_443 {dimension_numbers = #tpu.dot_dimension_numbers<[1], [0], [0], [1], [0, 0, 1, 1], [], []>} : vector<16x8xbf16>, vector<8x128xbf16>, vector<16x128xf32> -> vector<16x128xf32>
    %1063 = arith.addf %1033, %1062 : vector<16x128xf32>
    %c6_i32 = arith.constant 6 : i32
    %1064 = tpu.dynamic_rotate %783 by %c6_i32 dim 1 : vector<8x128xf32>, i32 -> vector<8x128xf32>
    %c-1_i32_444 = arith.constant -1 : i32
    %1065 = vector.broadcast %c-1_i32_444 : i32 to vector<1x128xi32>
    %1066 = arith.addi %792, %1065 : vector<1x128xi32>
    %c0_i32_445 = arith.constant 0 : i32
    %1067 = vector.broadcast %c0_i32_445 : i32 to vector<1x128xi32>
    %1068 = arith.cmpi sge, %1066, %1067 : vector<1x128xi32>
    %c-1_i32_446 = arith.constant -1 : i32
    %1069 = vector.broadcast %c-1_i32_446 : i32 to vector<1x128xi32>
    %1070 = arith.addi %792, %1069 : vector<1x128xi32>
    %c8_i32_447 = arith.constant 8 : i32
    %1071 = vector.broadcast %c8_i32_447 : i32 to vector<1x128xi32>
    %1072 = arith.cmpi slt, %1070, %1071 : vector<1x128xi32>
    %1073 = arith.andi %1068, %1072 : vector<1x128xi1>
    %c2_i32_448 = arith.constant 2 : i32
    %1074 = vector.broadcast %c2_i32_448 : i32 to vector<1x128xi32>
    %1075 = arith.addi %788, %1074 : vector<1x128xi32>
    %c0_i32_449 = arith.constant 0 : i32
    %1076 = vector.broadcast %c0_i32_449 : i32 to vector<1x128xi32>
    %1077 = arith.cmpi sge, %1075, %1076 : vector<1x128xi32>
    %1078 = arith.andi %1073, %1077 : vector<1x128xi1>
    %c2_i32_450 = arith.constant 2 : i32
    %1079 = vector.broadcast %c2_i32_450 : i32 to vector<1x128xi32>
    %1080 = arith.addi %788, %1079 : vector<1x128xi32>
    %c8_i32_451 = arith.constant 8 : i32
    %1081 = vector.broadcast %c8_i32_451 : i32 to vector<1x128xi32>
    %1082 = arith.cmpi slt, %1080, %1081 : vector<1x128xi32>
    %1083 = arith.andi %1078, %1082 : vector<1x128xi1>
    %cst_452 = arith.constant 0.000000e+00 : f32
    %1084 = vector.shape_cast %1083 : vector<1x128xi1> to vector<1x128xi1>
    %1085 = vector.broadcast %1084 : vector<1x128xi1> to vector<8x128xi1>
    %1086 = vector.broadcast %cst_452 : f32 to vector<8x128xf32>
    %1087 = arith.select %1085, %1064, %1086 : vector<8x128xi1>, vector<8x128xf32>
    %c9_453 = arith.constant 9 : index
    %c0_454 = arith.constant 0 : index
    %c0_455 = arith.constant 0 : index
    %1088 = vector.load %arg4[%c9_453, %c0_454, %c0_455] : memref<25x16x8xf32, #tpu.memory_space<vmem>>, vector<1x16x8xf32>
    %1089 = vector.shape_cast %1088 : vector<1x16x8xf32> to vector<16x8xf32>
    %1090 = arith.truncf %1089 : vector<16x8xf32> to vector<16x8xbf16>
    %1091 = arith.truncf %1087 : vector<8x128xf32> to vector<8x128xbf16>
    %cst_456 = arith.constant dense<0.000000e+00> : vector<16x128xf32>
    %1092 = tpu.matmul %1090, %1091, %cst_456 {dimension_numbers = #tpu.dot_dimension_numbers<[1], [0], [0], [1], [0, 0, 1, 1], [], []>} : vector<16x8xbf16>, vector<8x128xbf16>, vector<16x128xf32> -> vector<16x128xf32>
    %1093 = arith.addf %1063, %1092 : vector<16x128xf32>
    %c2_i32_457 = arith.constant 2 : i32
    %1094 = tpu.dynamic_rotate %783 by %c2_i32_457 dim 1 : vector<8x128xf32>, i32 -> vector<8x128xf32>
    %c0_i32_458 = arith.constant 0 : i32
    %1095 = vector.broadcast %c0_i32_458 : i32 to vector<1x128xi32>
    %1096 = arith.addi %792, %1095 : vector<1x128xi32>
    %c0_i32_459 = arith.constant 0 : i32
    %1097 = vector.broadcast %c0_i32_459 : i32 to vector<1x128xi32>
    %1098 = arith.cmpi sge, %1096, %1097 : vector<1x128xi32>
    %c0_i32_460 = arith.constant 0 : i32
    %1099 = vector.broadcast %c0_i32_460 : i32 to vector<1x128xi32>
    %1100 = arith.addi %792, %1099 : vector<1x128xi32>
    %c8_i32_461 = arith.constant 8 : i32
    %1101 = vector.broadcast %c8_i32_461 : i32 to vector<1x128xi32>
    %1102 = arith.cmpi slt, %1100, %1101 : vector<1x128xi32>
    %1103 = arith.andi %1098, %1102 : vector<1x128xi1>
    %c-2_i32_462 = arith.constant -2 : i32
    %1104 = vector.broadcast %c-2_i32_462 : i32 to vector<1x128xi32>
    %1105 = arith.addi %788, %1104 : vector<1x128xi32>
    %c0_i32_463 = arith.constant 0 : i32
    %1106 = vector.broadcast %c0_i32_463 : i32 to vector<1x128xi32>
    %1107 = arith.cmpi sge, %1105, %1106 : vector<1x128xi32>
    %1108 = arith.andi %1103, %1107 : vector<1x128xi1>
    %c-2_i32_464 = arith.constant -2 : i32
    %1109 = vector.broadcast %c-2_i32_464 : i32 to vector<1x128xi32>
    %1110 = arith.addi %788, %1109 : vector<1x128xi32>
    %c8_i32_465 = arith.constant 8 : i32
    %1111 = vector.broadcast %c8_i32_465 : i32 to vector<1x128xi32>
    %1112 = arith.cmpi slt, %1110, %1111 : vector<1x128xi32>
    %1113 = arith.andi %1108, %1112 : vector<1x128xi1>
    %cst_466 = arith.constant 0.000000e+00 : f32
    %1114 = vector.shape_cast %1113 : vector<1x128xi1> to vector<1x128xi1>
    %1115 = vector.broadcast %1114 : vector<1x128xi1> to vector<8x128xi1>
    %1116 = vector.broadcast %cst_466 : f32 to vector<8x128xf32>
    %1117 = arith.select %1115, %1094, %1116 : vector<8x128xi1>, vector<8x128xf32>
    %c10_467 = arith.constant 10 : index
    %c0_468 = arith.constant 0 : index
    %c0_469 = arith.constant 0 : index
    %1118 = vector.load %arg4[%c10_467, %c0_468, %c0_469] : memref<25x16x8xf32, #tpu.memory_space<vmem>>, vector<1x16x8xf32>
    %1119 = vector.shape_cast %1118 : vector<1x16x8xf32> to vector<16x8xf32>
    %1120 = arith.truncf %1119 : vector<16x8xf32> to vector<16x8xbf16>
    %1121 = arith.truncf %1117 : vector<8x128xf32> to vector<8x128xbf16>
    %cst_470 = arith.constant dense<0.000000e+00> : vector<16x128xf32>
    %1122 = tpu.matmul %1120, %1121, %cst_470 {dimension_numbers = #tpu.dot_dimension_numbers<[1], [0], [0], [1], [0, 0, 1, 1], [], []>} : vector<16x8xbf16>, vector<8x128xbf16>, vector<16x128xf32> -> vector<16x128xf32>
    %1123 = arith.addf %1093, %1122 : vector<16x128xf32>
    %c1_i32_471 = arith.constant 1 : i32
    %1124 = tpu.dynamic_rotate %783 by %c1_i32_471 dim 1 : vector<8x128xf32>, i32 -> vector<8x128xf32>
    %c0_i32_472 = arith.constant 0 : i32
    %1125 = vector.broadcast %c0_i32_472 : i32 to vector<1x128xi32>
    %1126 = arith.addi %792, %1125 : vector<1x128xi32>
    %c0_i32_473 = arith.constant 0 : i32
    %1127 = vector.broadcast %c0_i32_473 : i32 to vector<1x128xi32>
    %1128 = arith.cmpi sge, %1126, %1127 : vector<1x128xi32>
    %c0_i32_474 = arith.constant 0 : i32
    %1129 = vector.broadcast %c0_i32_474 : i32 to vector<1x128xi32>
    %1130 = arith.addi %792, %1129 : vector<1x128xi32>
    %c8_i32_475 = arith.constant 8 : i32
    %1131 = vector.broadcast %c8_i32_475 : i32 to vector<1x128xi32>
    %1132 = arith.cmpi slt, %1130, %1131 : vector<1x128xi32>
    %1133 = arith.andi %1128, %1132 : vector<1x128xi1>
    %c-1_i32_476 = arith.constant -1 : i32
    %1134 = vector.broadcast %c-1_i32_476 : i32 to vector<1x128xi32>
    %1135 = arith.addi %788, %1134 : vector<1x128xi32>
    %c0_i32_477 = arith.constant 0 : i32
    %1136 = vector.broadcast %c0_i32_477 : i32 to vector<1x128xi32>
    %1137 = arith.cmpi sge, %1135, %1136 : vector<1x128xi32>
    %1138 = arith.andi %1133, %1137 : vector<1x128xi1>
    %c-1_i32_478 = arith.constant -1 : i32
    %1139 = vector.broadcast %c-1_i32_478 : i32 to vector<1x128xi32>
    %1140 = arith.addi %788, %1139 : vector<1x128xi32>
    %c8_i32_479 = arith.constant 8 : i32
    %1141 = vector.broadcast %c8_i32_479 : i32 to vector<1x128xi32>
    %1142 = arith.cmpi slt, %1140, %1141 : vector<1x128xi32>
    %1143 = arith.andi %1138, %1142 : vector<1x128xi1>
    %cst_480 = arith.constant 0.000000e+00 : f32
    %1144 = vector.shape_cast %1143 : vector<1x128xi1> to vector<1x128xi1>
    %1145 = vector.broadcast %1144 : vector<1x128xi1> to vector<8x128xi1>
    %1146 = vector.broadcast %cst_480 : f32 to vector<8x128xf32>
    %1147 = arith.select %1145, %1124, %1146 : vector<8x128xi1>, vector<8x128xf32>
    %c11_481 = arith.constant 11 : index
    %c0_482 = arith.constant 0 : index
    %c0_483 = arith.constant 0 : index
    %1148 = vector.load %arg4[%c11_481, %c0_482, %c0_483] : memref<25x16x8xf32, #tpu.memory_space<vmem>>, vector<1x16x8xf32>
    %1149 = vector.shape_cast %1148 : vector<1x16x8xf32> to vector<16x8xf32>
    %1150 = arith.truncf %1149 : vector<16x8xf32> to vector<16x8xbf16>
    %1151 = arith.truncf %1147 : vector<8x128xf32> to vector<8x128xbf16>
    %cst_484 = arith.constant dense<0.000000e+00> : vector<16x128xf32>
    %1152 = tpu.matmul %1150, %1151, %cst_484 {dimension_numbers = #tpu.dot_dimension_numbers<[1], [0], [0], [1], [0, 0, 1, 1], [], []>} : vector<16x8xbf16>, vector<8x128xbf16>, vector<16x128xf32> -> vector<16x128xf32>
    %1153 = arith.addf %1123, %1152 : vector<16x128xf32>
    %c12_485 = arith.constant 12 : index
    %c0_486 = arith.constant 0 : index
    %c0_487 = arith.constant 0 : index
    %1154 = vector.load %arg4[%c12_485, %c0_486, %c0_487] : memref<25x16x8xf32, #tpu.memory_space<vmem>>, vector<1x16x8xf32>
    %1155 = vector.shape_cast %1154 : vector<1x16x8xf32> to vector<16x8xf32>
    %1156 = arith.truncf %1155 : vector<16x8xf32> to vector<16x8xbf16>
    %1157 = arith.truncf %783 : vector<8x128xf32> to vector<8x128xbf16>
    %cst_488 = arith.constant dense<0.000000e+00> : vector<16x128xf32>
    %1158 = tpu.matmul %1156, %1157, %cst_488 {dimension_numbers = #tpu.dot_dimension_numbers<[1], [0], [0], [1], [0, 0, 1, 1], [], []>} : vector<16x8xbf16>, vector<8x128xbf16>, vector<16x128xf32> -> vector<16x128xf32>
    %1159 = arith.addf %1153, %1158 : vector<16x128xf32>
    %c127_i32 = arith.constant 127 : i32
    %1160 = tpu.dynamic_rotate %783 by %c127_i32 dim 1 : vector<8x128xf32>, i32 -> vector<8x128xf32>
    %c0_i32_489 = arith.constant 0 : i32
    %1161 = vector.broadcast %c0_i32_489 : i32 to vector<1x128xi32>
    %1162 = arith.addi %792, %1161 : vector<1x128xi32>
    %c0_i32_490 = arith.constant 0 : i32
    %1163 = vector.broadcast %c0_i32_490 : i32 to vector<1x128xi32>
    %1164 = arith.cmpi sge, %1162, %1163 : vector<1x128xi32>
    %c0_i32_491 = arith.constant 0 : i32
    %1165 = vector.broadcast %c0_i32_491 : i32 to vector<1x128xi32>
    %1166 = arith.addi %792, %1165 : vector<1x128xi32>
    %c8_i32_492 = arith.constant 8 : i32
    %1167 = vector.broadcast %c8_i32_492 : i32 to vector<1x128xi32>
    %1168 = arith.cmpi slt, %1166, %1167 : vector<1x128xi32>
    %1169 = arith.andi %1164, %1168 : vector<1x128xi1>
    %c1_i32_493 = arith.constant 1 : i32
    %1170 = vector.broadcast %c1_i32_493 : i32 to vector<1x128xi32>
    %1171 = arith.addi %788, %1170 : vector<1x128xi32>
    %c0_i32_494 = arith.constant 0 : i32
    %1172 = vector.broadcast %c0_i32_494 : i32 to vector<1x128xi32>
    %1173 = arith.cmpi sge, %1171, %1172 : vector<1x128xi32>
    %1174 = arith.andi %1169, %1173 : vector<1x128xi1>
    %c1_i32_495 = arith.constant 1 : i32
    %1175 = vector.broadcast %c1_i32_495 : i32 to vector<1x128xi32>
    %1176 = arith.addi %788, %1175 : vector<1x128xi32>
    %c8_i32_496 = arith.constant 8 : i32
    %1177 = vector.broadcast %c8_i32_496 : i32 to vector<1x128xi32>
    %1178 = arith.cmpi slt, %1176, %1177 : vector<1x128xi32>
    %1179 = arith.andi %1174, %1178 : vector<1x128xi1>
    %cst_497 = arith.constant 0.000000e+00 : f32
    %1180 = vector.shape_cast %1179 : vector<1x128xi1> to vector<1x128xi1>
    %1181 = vector.broadcast %1180 : vector<1x128xi1> to vector<8x128xi1>
    %1182 = vector.broadcast %cst_497 : f32 to vector<8x128xf32>
    %1183 = arith.select %1181, %1160, %1182 : vector<8x128xi1>, vector<8x128xf32>
    %c13_498 = arith.constant 13 : index
    %c0_499 = arith.constant 0 : index
    %c0_500 = arith.constant 0 : index
    %1184 = vector.load %arg4[%c13_498, %c0_499, %c0_500] : memref<25x16x8xf32, #tpu.memory_space<vmem>>, vector<1x16x8xf32>
    %1185 = vector.shape_cast %1184 : vector<1x16x8xf32> to vector<16x8xf32>
    %1186 = arith.truncf %1185 : vector<16x8xf32> to vector<16x8xbf16>
    %1187 = arith.truncf %1183 : vector<8x128xf32> to vector<8x128xbf16>
    %cst_501 = arith.constant dense<0.000000e+00> : vector<16x128xf32>
    %1188 = tpu.matmul %1186, %1187, %cst_501 {dimension_numbers = #tpu.dot_dimension_numbers<[1], [0], [0], [1], [0, 0, 1, 1], [], []>} : vector<16x8xbf16>, vector<8x128xbf16>, vector<16x128xf32> -> vector<16x128xf32>
    %1189 = arith.addf %1159, %1188 : vector<16x128xf32>
    %c126_i32 = arith.constant 126 : i32
    %1190 = tpu.dynamic_rotate %783 by %c126_i32 dim 1 : vector<8x128xf32>, i32 -> vector<8x128xf32>
    %c0_i32_502 = arith.constant 0 : i32
    %1191 = vector.broadcast %c0_i32_502 : i32 to vector<1x128xi32>
    %1192 = arith.addi %792, %1191 : vector<1x128xi32>
    %c0_i32_503 = arith.constant 0 : i32
    %1193 = vector.broadcast %c0_i32_503 : i32 to vector<1x128xi32>
    %1194 = arith.cmpi sge, %1192, %1193 : vector<1x128xi32>
    %c0_i32_504 = arith.constant 0 : i32
    %1195 = vector.broadcast %c0_i32_504 : i32 to vector<1x128xi32>
    %1196 = arith.addi %792, %1195 : vector<1x128xi32>
    %c8_i32_505 = arith.constant 8 : i32
    %1197 = vector.broadcast %c8_i32_505 : i32 to vector<1x128xi32>
    %1198 = arith.cmpi slt, %1196, %1197 : vector<1x128xi32>
    %1199 = arith.andi %1194, %1198 : vector<1x128xi1>
    %c2_i32_506 = arith.constant 2 : i32
    %1200 = vector.broadcast %c2_i32_506 : i32 to vector<1x128xi32>
    %1201 = arith.addi %788, %1200 : vector<1x128xi32>
    %c0_i32_507 = arith.constant 0 : i32
    %1202 = vector.broadcast %c0_i32_507 : i32 to vector<1x128xi32>
    %1203 = arith.cmpi sge, %1201, %1202 : vector<1x128xi32>
    %1204 = arith.andi %1199, %1203 : vector<1x128xi1>
    %c2_i32_508 = arith.constant 2 : i32
    %1205 = vector.broadcast %c2_i32_508 : i32 to vector<1x128xi32>
    %1206 = arith.addi %788, %1205 : vector<1x128xi32>
    %c8_i32_509 = arith.constant 8 : i32
    %1207 = vector.broadcast %c8_i32_509 : i32 to vector<1x128xi32>
    %1208 = arith.cmpi slt, %1206, %1207 : vector<1x128xi32>
    %1209 = arith.andi %1204, %1208 : vector<1x128xi1>
    %cst_510 = arith.constant 0.000000e+00 : f32
    %1210 = vector.shape_cast %1209 : vector<1x128xi1> to vector<1x128xi1>
    %1211 = vector.broadcast %1210 : vector<1x128xi1> to vector<8x128xi1>
    %1212 = vector.broadcast %cst_510 : f32 to vector<8x128xf32>
    %1213 = arith.select %1211, %1190, %1212 : vector<8x128xi1>, vector<8x128xf32>
    %c14_511 = arith.constant 14 : index
    %c0_512 = arith.constant 0 : index
    %c0_513 = arith.constant 0 : index
    %1214 = vector.load %arg4[%c14_511, %c0_512, %c0_513] : memref<25x16x8xf32, #tpu.memory_space<vmem>>, vector<1x16x8xf32>
    %1215 = vector.shape_cast %1214 : vector<1x16x8xf32> to vector<16x8xf32>
    %1216 = arith.truncf %1215 : vector<16x8xf32> to vector<16x8xbf16>
    %1217 = arith.truncf %1213 : vector<8x128xf32> to vector<8x128xbf16>
    %cst_514 = arith.constant dense<0.000000e+00> : vector<16x128xf32>
    %1218 = tpu.matmul %1216, %1217, %cst_514 {dimension_numbers = #tpu.dot_dimension_numbers<[1], [0], [0], [1], [0, 0, 1, 1], [], []>} : vector<16x8xbf16>, vector<8x128xbf16>, vector<16x128xf32> -> vector<16x128xf32>
    %1219 = arith.addf %1189, %1218 : vector<16x128xf32>
    %c122_i32 = arith.constant 122 : i32
    %1220 = tpu.dynamic_rotate %783 by %c122_i32 dim 1 : vector<8x128xf32>, i32 -> vector<8x128xf32>
    %c1_i32_515 = arith.constant 1 : i32
    %1221 = vector.broadcast %c1_i32_515 : i32 to vector<1x128xi32>
    %1222 = arith.addi %792, %1221 : vector<1x128xi32>
    %c0_i32_516 = arith.constant 0 : i32
    %1223 = vector.broadcast %c0_i32_516 : i32 to vector<1x128xi32>
    %1224 = arith.cmpi sge, %1222, %1223 : vector<1x128xi32>
    %c1_i32_517 = arith.constant 1 : i32
    %1225 = vector.broadcast %c1_i32_517 : i32 to vector<1x128xi32>
    %1226 = arith.addi %792, %1225 : vector<1x128xi32>
    %c8_i32_518 = arith.constant 8 : i32
    %1227 = vector.broadcast %c8_i32_518 : i32 to vector<1x128xi32>
    %1228 = arith.cmpi slt, %1226, %1227 : vector<1x128xi32>
    %1229 = arith.andi %1224, %1228 : vector<1x128xi1>
    %c-2_i32_519 = arith.constant -2 : i32
    %1230 = vector.broadcast %c-2_i32_519 : i32 to vector<1x128xi32>
    %1231 = arith.addi %788, %1230 : vector<1x128xi32>
    %c0_i32_520 = arith.constant 0 : i32
    %1232 = vector.broadcast %c0_i32_520 : i32 to vector<1x128xi32>
    %1233 = arith.cmpi sge, %1231, %1232 : vector<1x128xi32>
    %1234 = arith.andi %1229, %1233 : vector<1x128xi1>
    %c-2_i32_521 = arith.constant -2 : i32
    %1235 = vector.broadcast %c-2_i32_521 : i32 to vector<1x128xi32>
    %1236 = arith.addi %788, %1235 : vector<1x128xi32>
    %c8_i32_522 = arith.constant 8 : i32
    %1237 = vector.broadcast %c8_i32_522 : i32 to vector<1x128xi32>
    %1238 = arith.cmpi slt, %1236, %1237 : vector<1x128xi32>
    %1239 = arith.andi %1234, %1238 : vector<1x128xi1>
    %cst_523 = arith.constant 0.000000e+00 : f32
    %1240 = vector.shape_cast %1239 : vector<1x128xi1> to vector<1x128xi1>
    %1241 = vector.broadcast %1240 : vector<1x128xi1> to vector<8x128xi1>
    %1242 = vector.broadcast %cst_523 : f32 to vector<8x128xf32>
    %1243 = arith.select %1241, %1220, %1242 : vector<8x128xi1>, vector<8x128xf32>
    %c15_524 = arith.constant 15 : index
    %c0_525 = arith.constant 0 : index
    %c0_526 = arith.constant 0 : index
    %1244 = vector.load %arg4[%c15_524, %c0_525, %c0_526] : memref<25x16x8xf32, #tpu.memory_space<vmem>>, vector<1x16x8xf32>
    %1245 = vector.shape_cast %1244 : vector<1x16x8xf32> to vector<16x8xf32>
    %1246 = arith.truncf %1245 : vector<16x8xf32> to vector<16x8xbf16>
    %1247 = arith.truncf %1243 : vector<8x128xf32> to vector<8x128xbf16>
    %cst_527 = arith.constant dense<0.000000e+00> : vector<16x128xf32>
    %1248 = tpu.matmul %1246, %1247, %cst_527 {dimension_numbers = #tpu.dot_dimension_numbers<[1], [0], [0], [1], [0, 0, 1, 1], [], []>} : vector<16x8xbf16>, vector<8x128xbf16>, vector<16x128xf32> -> vector<16x128xf32>
    %1249 = arith.addf %1219, %1248 : vector<16x128xf32>
    %c121_i32 = arith.constant 121 : i32
    %1250 = tpu.dynamic_rotate %783 by %c121_i32 dim 1 : vector<8x128xf32>, i32 -> vector<8x128xf32>
    %c1_i32_528 = arith.constant 1 : i32
    %1251 = vector.broadcast %c1_i32_528 : i32 to vector<1x128xi32>
    %1252 = arith.addi %792, %1251 : vector<1x128xi32>
    %c0_i32_529 = arith.constant 0 : i32
    %1253 = vector.broadcast %c0_i32_529 : i32 to vector<1x128xi32>
    %1254 = arith.cmpi sge, %1252, %1253 : vector<1x128xi32>
    %c1_i32_530 = arith.constant 1 : i32
    %1255 = vector.broadcast %c1_i32_530 : i32 to vector<1x128xi32>
    %1256 = arith.addi %792, %1255 : vector<1x128xi32>
    %c8_i32_531 = arith.constant 8 : i32
    %1257 = vector.broadcast %c8_i32_531 : i32 to vector<1x128xi32>
    %1258 = arith.cmpi slt, %1256, %1257 : vector<1x128xi32>
    %1259 = arith.andi %1254, %1258 : vector<1x128xi1>
    %c-1_i32_532 = arith.constant -1 : i32
    %1260 = vector.broadcast %c-1_i32_532 : i32 to vector<1x128xi32>
    %1261 = arith.addi %788, %1260 : vector<1x128xi32>
    %c0_i32_533 = arith.constant 0 : i32
    %1262 = vector.broadcast %c0_i32_533 : i32 to vector<1x128xi32>
    %1263 = arith.cmpi sge, %1261, %1262 : vector<1x128xi32>
    %1264 = arith.andi %1259, %1263 : vector<1x128xi1>
    %c-1_i32_534 = arith.constant -1 : i32
    %1265 = vector.broadcast %c-1_i32_534 : i32 to vector<1x128xi32>
    %1266 = arith.addi %788, %1265 : vector<1x128xi32>
    %c8_i32_535 = arith.constant 8 : i32
    %1267 = vector.broadcast %c8_i32_535 : i32 to vector<1x128xi32>
    %1268 = arith.cmpi slt, %1266, %1267 : vector<1x128xi32>
    %1269 = arith.andi %1264, %1268 : vector<1x128xi1>
    %cst_536 = arith.constant 0.000000e+00 : f32
    %1270 = vector.shape_cast %1269 : vector<1x128xi1> to vector<1x128xi1>
    %1271 = vector.broadcast %1270 : vector<1x128xi1> to vector<8x128xi1>
    %1272 = vector.broadcast %cst_536 : f32 to vector<8x128xf32>
    %1273 = arith.select %1271, %1250, %1272 : vector<8x128xi1>, vector<8x128xf32>
    %c16_537 = arith.constant 16 : index
    %c0_538 = arith.constant 0 : index
    %c0_539 = arith.constant 0 : index
    %1274 = vector.load %arg4[%c16_537, %c0_538, %c0_539] : memref<25x16x8xf32, #tpu.memory_space<vmem>>, vector<1x16x8xf32>
    %1275 = vector.shape_cast %1274 : vector<1x16x8xf32> to vector<16x8xf32>
    %1276 = arith.truncf %1275 : vector<16x8xf32> to vector<16x8xbf16>
    %1277 = arith.truncf %1273 : vector<8x128xf32> to vector<8x128xbf16>
    %cst_540 = arith.constant dense<0.000000e+00> : vector<16x128xf32>
    %1278 = tpu.matmul %1276, %1277, %cst_540 {dimension_numbers = #tpu.dot_dimension_numbers<[1], [0], [0], [1], [0, 0, 1, 1], [], []>} : vector<16x8xbf16>, vector<8x128xbf16>, vector<16x128xf32> -> vector<16x128xf32>
    %1279 = arith.addf %1249, %1278 : vector<16x128xf32>
    %c120_i32 = arith.constant 120 : i32
    %1280 = tpu.dynamic_rotate %783 by %c120_i32 dim 1 : vector<8x128xf32>, i32 -> vector<8x128xf32>
    %c1_i32_541 = arith.constant 1 : i32
    %1281 = vector.broadcast %c1_i32_541 : i32 to vector<1x128xi32>
    %1282 = arith.addi %792, %1281 : vector<1x128xi32>
    %c0_i32_542 = arith.constant 0 : i32
    %1283 = vector.broadcast %c0_i32_542 : i32 to vector<1x128xi32>
    %1284 = arith.cmpi sge, %1282, %1283 : vector<1x128xi32>
    %c1_i32_543 = arith.constant 1 : i32
    %1285 = vector.broadcast %c1_i32_543 : i32 to vector<1x128xi32>
    %1286 = arith.addi %792, %1285 : vector<1x128xi32>
    %c8_i32_544 = arith.constant 8 : i32
    %1287 = vector.broadcast %c8_i32_544 : i32 to vector<1x128xi32>
    %1288 = arith.cmpi slt, %1286, %1287 : vector<1x128xi32>
    %1289 = arith.andi %1284, %1288 : vector<1x128xi1>
    %c0_i32_545 = arith.constant 0 : i32
    %1290 = vector.broadcast %c0_i32_545 : i32 to vector<1x128xi32>
    %1291 = arith.addi %788, %1290 : vector<1x128xi32>
    %c0_i32_546 = arith.constant 0 : i32
    %1292 = vector.broadcast %c0_i32_546 : i32 to vector<1x128xi32>
    %1293 = arith.cmpi sge, %1291, %1292 : vector<1x128xi32>
    %1294 = arith.andi %1289, %1293 : vector<1x128xi1>
    %c0_i32_547 = arith.constant 0 : i32
    %1295 = vector.broadcast %c0_i32_547 : i32 to vector<1x128xi32>
    %1296 = arith.addi %788, %1295 : vector<1x128xi32>
    %c8_i32_548 = arith.constant 8 : i32
    %1297 = vector.broadcast %c8_i32_548 : i32 to vector<1x128xi32>
    %1298 = arith.cmpi slt, %1296, %1297 : vector<1x128xi32>
    %1299 = arith.andi %1294, %1298 : vector<1x128xi1>
    %cst_549 = arith.constant 0.000000e+00 : f32
    %1300 = vector.shape_cast %1299 : vector<1x128xi1> to vector<1x128xi1>
    %1301 = vector.broadcast %1300 : vector<1x128xi1> to vector<8x128xi1>
    %1302 = vector.broadcast %cst_549 : f32 to vector<8x128xf32>
    %1303 = arith.select %1301, %1280, %1302 : vector<8x128xi1>, vector<8x128xf32>
    %c17_550 = arith.constant 17 : index
    %c0_551 = arith.constant 0 : index
    %c0_552 = arith.constant 0 : index
    %1304 = vector.load %arg4[%c17_550, %c0_551, %c0_552] : memref<25x16x8xf32, #tpu.memory_space<vmem>>, vector<1x16x8xf32>
    %1305 = vector.shape_cast %1304 : vector<1x16x8xf32> to vector<16x8xf32>
    %1306 = arith.truncf %1305 : vector<16x8xf32> to vector<16x8xbf16>
    %1307 = arith.truncf %1303 : vector<8x128xf32> to vector<8x128xbf16>
    %cst_553 = arith.constant dense<0.000000e+00> : vector<16x128xf32>
    %1308 = tpu.matmul %1306, %1307, %cst_553 {dimension_numbers = #tpu.dot_dimension_numbers<[1], [0], [0], [1], [0, 0, 1, 1], [], []>} : vector<16x8xbf16>, vector<8x128xbf16>, vector<16x128xf32> -> vector<16x128xf32>
    %1309 = arith.addf %1279, %1308 : vector<16x128xf32>
    %c119_i32 = arith.constant 119 : i32
    %1310 = tpu.dynamic_rotate %783 by %c119_i32 dim 1 : vector<8x128xf32>, i32 -> vector<8x128xf32>
    %c1_i32_554 = arith.constant 1 : i32
    %1311 = vector.broadcast %c1_i32_554 : i32 to vector<1x128xi32>
    %1312 = arith.addi %792, %1311 : vector<1x128xi32>
    %c0_i32_555 = arith.constant 0 : i32
    %1313 = vector.broadcast %c0_i32_555 : i32 to vector<1x128xi32>
    %1314 = arith.cmpi sge, %1312, %1313 : vector<1x128xi32>
    %c1_i32_556 = arith.constant 1 : i32
    %1315 = vector.broadcast %c1_i32_556 : i32 to vector<1x128xi32>
    %1316 = arith.addi %792, %1315 : vector<1x128xi32>
    %c8_i32_557 = arith.constant 8 : i32
    %1317 = vector.broadcast %c8_i32_557 : i32 to vector<1x128xi32>
    %1318 = arith.cmpi slt, %1316, %1317 : vector<1x128xi32>
    %1319 = arith.andi %1314, %1318 : vector<1x128xi1>
    %c1_i32_558 = arith.constant 1 : i32
    %1320 = vector.broadcast %c1_i32_558 : i32 to vector<1x128xi32>
    %1321 = arith.addi %788, %1320 : vector<1x128xi32>
    %c0_i32_559 = arith.constant 0 : i32
    %1322 = vector.broadcast %c0_i32_559 : i32 to vector<1x128xi32>
    %1323 = arith.cmpi sge, %1321, %1322 : vector<1x128xi32>
    %1324 = arith.andi %1319, %1323 : vector<1x128xi1>
    %c1_i32_560 = arith.constant 1 : i32
    %1325 = vector.broadcast %c1_i32_560 : i32 to vector<1x128xi32>
    %1326 = arith.addi %788, %1325 : vector<1x128xi32>
    %c8_i32_561 = arith.constant 8 : i32
    %1327 = vector.broadcast %c8_i32_561 : i32 to vector<1x128xi32>
    %1328 = arith.cmpi slt, %1326, %1327 : vector<1x128xi32>
    %1329 = arith.andi %1324, %1328 : vector<1x128xi1>
    %cst_562 = arith.constant 0.000000e+00 : f32
    %1330 = vector.shape_cast %1329 : vector<1x128xi1> to vector<1x128xi1>
    %1331 = vector.broadcast %1330 : vector<1x128xi1> to vector<8x128xi1>
    %1332 = vector.broadcast %cst_562 : f32 to vector<8x128xf32>
    %1333 = arith.select %1331, %1310, %1332 : vector<8x128xi1>, vector<8x128xf32>
    %c18_563 = arith.constant 18 : index
    %c0_564 = arith.constant 0 : index
    %c0_565 = arith.constant 0 : index
    %1334 = vector.load %arg4[%c18_563, %c0_564, %c0_565] : memref<25x16x8xf32, #tpu.memory_space<vmem>>, vector<1x16x8xf32>
    %1335 = vector.shape_cast %1334 : vector<1x16x8xf32> to vector<16x8xf32>
    %1336 = arith.truncf %1335 : vector<16x8xf32> to vector<16x8xbf16>
    %1337 = arith.truncf %1333 : vector<8x128xf32> to vector<8x128xbf16>
    %cst_566 = arith.constant dense<0.000000e+00> : vector<16x128xf32>
    %1338 = tpu.matmul %1336, %1337, %cst_566 {dimension_numbers = #tpu.dot_dimension_numbers<[1], [0], [0], [1], [0, 0, 1, 1], [], []>} : vector<16x8xbf16>, vector<8x128xbf16>, vector<16x128xf32> -> vector<16x128xf32>
    %1339 = arith.addf %1309, %1338 : vector<16x128xf32>
    %c118_i32 = arith.constant 118 : i32
    %1340 = tpu.dynamic_rotate %783 by %c118_i32 dim 1 : vector<8x128xf32>, i32 -> vector<8x128xf32>
    %c1_i32_567 = arith.constant 1 : i32
    %1341 = vector.broadcast %c1_i32_567 : i32 to vector<1x128xi32>
    %1342 = arith.addi %792, %1341 : vector<1x128xi32>
    %c0_i32_568 = arith.constant 0 : i32
    %1343 = vector.broadcast %c0_i32_568 : i32 to vector<1x128xi32>
    %1344 = arith.cmpi sge, %1342, %1343 : vector<1x128xi32>
    %c1_i32_569 = arith.constant 1 : i32
    %1345 = vector.broadcast %c1_i32_569 : i32 to vector<1x128xi32>
    %1346 = arith.addi %792, %1345 : vector<1x128xi32>
    %c8_i32_570 = arith.constant 8 : i32
    %1347 = vector.broadcast %c8_i32_570 : i32 to vector<1x128xi32>
    %1348 = arith.cmpi slt, %1346, %1347 : vector<1x128xi32>
    %1349 = arith.andi %1344, %1348 : vector<1x128xi1>
    %c2_i32_571 = arith.constant 2 : i32
    %1350 = vector.broadcast %c2_i32_571 : i32 to vector<1x128xi32>
    %1351 = arith.addi %788, %1350 : vector<1x128xi32>
    %c0_i32_572 = arith.constant 0 : i32
    %1352 = vector.broadcast %c0_i32_572 : i32 to vector<1x128xi32>
    %1353 = arith.cmpi sge, %1351, %1352 : vector<1x128xi32>
    %1354 = arith.andi %1349, %1353 : vector<1x128xi1>
    %c2_i32_573 = arith.constant 2 : i32
    %1355 = vector.broadcast %c2_i32_573 : i32 to vector<1x128xi32>
    %1356 = arith.addi %788, %1355 : vector<1x128xi32>
    %c8_i32_574 = arith.constant 8 : i32
    %1357 = vector.broadcast %c8_i32_574 : i32 to vector<1x128xi32>
    %1358 = arith.cmpi slt, %1356, %1357 : vector<1x128xi32>
    %1359 = arith.andi %1354, %1358 : vector<1x128xi1>
    %cst_575 = arith.constant 0.000000e+00 : f32
    %1360 = vector.shape_cast %1359 : vector<1x128xi1> to vector<1x128xi1>
    %1361 = vector.broadcast %1360 : vector<1x128xi1> to vector<8x128xi1>
    %1362 = vector.broadcast %cst_575 : f32 to vector<8x128xf32>
    %1363 = arith.select %1361, %1340, %1362 : vector<8x128xi1>, vector<8x128xf32>
    %c19_576 = arith.constant 19 : index
    %c0_577 = arith.constant 0 : index
    %c0_578 = arith.constant 0 : index
    %1364 = vector.load %arg4[%c19_576, %c0_577, %c0_578] : memref<25x16x8xf32, #tpu.memory_space<vmem>>, vector<1x16x8xf32>
    %1365 = vector.shape_cast %1364 : vector<1x16x8xf32> to vector<16x8xf32>
    %1366 = arith.truncf %1365 : vector<16x8xf32> to vector<16x8xbf16>
    %1367 = arith.truncf %1363 : vector<8x128xf32> to vector<8x128xbf16>
    %cst_579 = arith.constant dense<0.000000e+00> : vector<16x128xf32>
    %1368 = tpu.matmul %1366, %1367, %cst_579 {dimension_numbers = #tpu.dot_dimension_numbers<[1], [0], [0], [1], [0, 0, 1, 1], [], []>} : vector<16x8xbf16>, vector<8x128xbf16>, vector<16x128xf32> -> vector<16x128xf32>
    %1369 = arith.addf %1339, %1368 : vector<16x128xf32>
    %c114_i32 = arith.constant 114 : i32
    %1370 = tpu.dynamic_rotate %783 by %c114_i32 dim 1 : vector<8x128xf32>, i32 -> vector<8x128xf32>
    %c2_i32_580 = arith.constant 2 : i32
    %1371 = vector.broadcast %c2_i32_580 : i32 to vector<1x128xi32>
    %1372 = arith.addi %792, %1371 : vector<1x128xi32>
    %c0_i32_581 = arith.constant 0 : i32
    %1373 = vector.broadcast %c0_i32_581 : i32 to vector<1x128xi32>
    %1374 = arith.cmpi sge, %1372, %1373 : vector<1x128xi32>
    %c2_i32_582 = arith.constant 2 : i32
    %1375 = vector.broadcast %c2_i32_582 : i32 to vector<1x128xi32>
    %1376 = arith.addi %792, %1375 : vector<1x128xi32>
    %c8_i32_583 = arith.constant 8 : i32
    %1377 = vector.broadcast %c8_i32_583 : i32 to vector<1x128xi32>
    %1378 = arith.cmpi slt, %1376, %1377 : vector<1x128xi32>
    %1379 = arith.andi %1374, %1378 : vector<1x128xi1>
    %c-2_i32_584 = arith.constant -2 : i32
    %1380 = vector.broadcast %c-2_i32_584 : i32 to vector<1x128xi32>
    %1381 = arith.addi %788, %1380 : vector<1x128xi32>
    %c0_i32_585 = arith.constant 0 : i32
    %1382 = vector.broadcast %c0_i32_585 : i32 to vector<1x128xi32>
    %1383 = arith.cmpi sge, %1381, %1382 : vector<1x128xi32>
    %1384 = arith.andi %1379, %1383 : vector<1x128xi1>
    %c-2_i32_586 = arith.constant -2 : i32
    %1385 = vector.broadcast %c-2_i32_586 : i32 to vector<1x128xi32>
    %1386 = arith.addi %788, %1385 : vector<1x128xi32>
    %c8_i32_587 = arith.constant 8 : i32
    %1387 = vector.broadcast %c8_i32_587 : i32 to vector<1x128xi32>
    %1388 = arith.cmpi slt, %1386, %1387 : vector<1x128xi32>
    %1389 = arith.andi %1384, %1388 : vector<1x128xi1>
    %cst_588 = arith.constant 0.000000e+00 : f32
    %1390 = vector.shape_cast %1389 : vector<1x128xi1> to vector<1x128xi1>
    %1391 = vector.broadcast %1390 : vector<1x128xi1> to vector<8x128xi1>
    %1392 = vector.broadcast %cst_588 : f32 to vector<8x128xf32>
    %1393 = arith.select %1391, %1370, %1392 : vector<8x128xi1>, vector<8x128xf32>
    %c20_589 = arith.constant 20 : index
    %c0_590 = arith.constant 0 : index
    %c0_591 = arith.constant 0 : index
    %1394 = vector.load %arg4[%c20_589, %c0_590, %c0_591] : memref<25x16x8xf32, #tpu.memory_space<vmem>>, vector<1x16x8xf32>
    %1395 = vector.shape_cast %1394 : vector<1x16x8xf32> to vector<16x8xf32>
    %1396 = arith.truncf %1395 : vector<16x8xf32> to vector<16x8xbf16>
    %1397 = arith.truncf %1393 : vector<8x128xf32> to vector<8x128xbf16>
    %cst_592 = arith.constant dense<0.000000e+00> : vector<16x128xf32>
    %1398 = tpu.matmul %1396, %1397, %cst_592 {dimension_numbers = #tpu.dot_dimension_numbers<[1], [0], [0], [1], [0, 0, 1, 1], [], []>} : vector<16x8xbf16>, vector<8x128xbf16>, vector<16x128xf32> -> vector<16x128xf32>
    %1399 = arith.addf %1369, %1398 : vector<16x128xf32>
    %c113_i32 = arith.constant 113 : i32
    %1400 = tpu.dynamic_rotate %783 by %c113_i32 dim 1 : vector<8x128xf32>, i32 -> vector<8x128xf32>
    %c2_i32_593 = arith.constant 2 : i32
    %1401 = vector.broadcast %c2_i32_593 : i32 to vector<1x128xi32>
    %1402 = arith.addi %792, %1401 : vector<1x128xi32>
    %c0_i32_594 = arith.constant 0 : i32
    %1403 = vector.broadcast %c0_i32_594 : i32 to vector<1x128xi32>
    %1404 = arith.cmpi sge, %1402, %1403 : vector<1x128xi32>
    %c2_i32_595 = arith.constant 2 : i32
    %1405 = vector.broadcast %c2_i32_595 : i32 to vector<1x128xi32>
    %1406 = arith.addi %792, %1405 : vector<1x128xi32>
    %c8_i32_596 = arith.constant 8 : i32
    %1407 = vector.broadcast %c8_i32_596 : i32 to vector<1x128xi32>
    %1408 = arith.cmpi slt, %1406, %1407 : vector<1x128xi32>
    %1409 = arith.andi %1404, %1408 : vector<1x128xi1>
    %c-1_i32_597 = arith.constant -1 : i32
    %1410 = vector.broadcast %c-1_i32_597 : i32 to vector<1x128xi32>
    %1411 = arith.addi %788, %1410 : vector<1x128xi32>
    %c0_i32_598 = arith.constant 0 : i32
    %1412 = vector.broadcast %c0_i32_598 : i32 to vector<1x128xi32>
    %1413 = arith.cmpi sge, %1411, %1412 : vector<1x128xi32>
    %1414 = arith.andi %1409, %1413 : vector<1x128xi1>
    %c-1_i32_599 = arith.constant -1 : i32
    %1415 = vector.broadcast %c-1_i32_599 : i32 to vector<1x128xi32>
    %1416 = arith.addi %788, %1415 : vector<1x128xi32>
    %c8_i32_600 = arith.constant 8 : i32
    %1417 = vector.broadcast %c8_i32_600 : i32 to vector<1x128xi32>
    %1418 = arith.cmpi slt, %1416, %1417 : vector<1x128xi32>
    %1419 = arith.andi %1414, %1418 : vector<1x128xi1>
    %cst_601 = arith.constant 0.000000e+00 : f32
    %1420 = vector.shape_cast %1419 : vector<1x128xi1> to vector<1x128xi1>
    %1421 = vector.broadcast %1420 : vector<1x128xi1> to vector<8x128xi1>
    %1422 = vector.broadcast %cst_601 : f32 to vector<8x128xf32>
    %1423 = arith.select %1421, %1400, %1422 : vector<8x128xi1>, vector<8x128xf32>
    %c21_602 = arith.constant 21 : index
    %c0_603 = arith.constant 0 : index
    %c0_604 = arith.constant 0 : index
    %1424 = vector.load %arg4[%c21_602, %c0_603, %c0_604] : memref<25x16x8xf32, #tpu.memory_space<vmem>>, vector<1x16x8xf32>
    %1425 = vector.shape_cast %1424 : vector<1x16x8xf32> to vector<16x8xf32>
    %1426 = arith.truncf %1425 : vector<16x8xf32> to vector<16x8xbf16>
    %1427 = arith.truncf %1423 : vector<8x128xf32> to vector<8x128xbf16>
    %cst_605 = arith.constant dense<0.000000e+00> : vector<16x128xf32>
    %1428 = tpu.matmul %1426, %1427, %cst_605 {dimension_numbers = #tpu.dot_dimension_numbers<[1], [0], [0], [1], [0, 0, 1, 1], [], []>} : vector<16x8xbf16>, vector<8x128xbf16>, vector<16x128xf32> -> vector<16x128xf32>
    %1429 = arith.addf %1399, %1428 : vector<16x128xf32>
    %c112_i32 = arith.constant 112 : i32
    %1430 = tpu.dynamic_rotate %783 by %c112_i32 dim 1 : vector<8x128xf32>, i32 -> vector<8x128xf32>
    %c2_i32_606 = arith.constant 2 : i32
    %1431 = vector.broadcast %c2_i32_606 : i32 to vector<1x128xi32>
    %1432 = arith.addi %792, %1431 : vector<1x128xi32>
    %c0_i32_607 = arith.constant 0 : i32
    %1433 = vector.broadcast %c0_i32_607 : i32 to vector<1x128xi32>
    %1434 = arith.cmpi sge, %1432, %1433 : vector<1x128xi32>
    %c2_i32_608 = arith.constant 2 : i32
    %1435 = vector.broadcast %c2_i32_608 : i32 to vector<1x128xi32>
    %1436 = arith.addi %792, %1435 : vector<1x128xi32>
    %c8_i32_609 = arith.constant 8 : i32
    %1437 = vector.broadcast %c8_i32_609 : i32 to vector<1x128xi32>
    %1438 = arith.cmpi slt, %1436, %1437 : vector<1x128xi32>
    %1439 = arith.andi %1434, %1438 : vector<1x128xi1>
    %c0_i32_610 = arith.constant 0 : i32
    %1440 = vector.broadcast %c0_i32_610 : i32 to vector<1x128xi32>
    %1441 = arith.addi %788, %1440 : vector<1x128xi32>
    %c0_i32_611 = arith.constant 0 : i32
    %1442 = vector.broadcast %c0_i32_611 : i32 to vector<1x128xi32>
    %1443 = arith.cmpi sge, %1441, %1442 : vector<1x128xi32>
    %1444 = arith.andi %1439, %1443 : vector<1x128xi1>
    %c0_i32_612 = arith.constant 0 : i32
    %1445 = vector.broadcast %c0_i32_612 : i32 to vector<1x128xi32>
    %1446 = arith.addi %788, %1445 : vector<1x128xi32>
    %c8_i32_613 = arith.constant 8 : i32
    %1447 = vector.broadcast %c8_i32_613 : i32 to vector<1x128xi32>
    %1448 = arith.cmpi slt, %1446, %1447 : vector<1x128xi32>
    %1449 = arith.andi %1444, %1448 : vector<1x128xi1>
    %cst_614 = arith.constant 0.000000e+00 : f32
    %1450 = vector.shape_cast %1449 : vector<1x128xi1> to vector<1x128xi1>
    %1451 = vector.broadcast %1450 : vector<1x128xi1> to vector<8x128xi1>
    %1452 = vector.broadcast %cst_614 : f32 to vector<8x128xf32>
    %1453 = arith.select %1451, %1430, %1452 : vector<8x128xi1>, vector<8x128xf32>
    %c22_615 = arith.constant 22 : index
    %c0_616 = arith.constant 0 : index
    %c0_617 = arith.constant 0 : index
    %1454 = vector.load %arg4[%c22_615, %c0_616, %c0_617] : memref<25x16x8xf32, #tpu.memory_space<vmem>>, vector<1x16x8xf32>
    %1455 = vector.shape_cast %1454 : vector<1x16x8xf32> to vector<16x8xf32>
    %1456 = arith.truncf %1455 : vector<16x8xf32> to vector<16x8xbf16>
    %1457 = arith.truncf %1453 : vector<8x128xf32> to vector<8x128xbf16>
    %cst_618 = arith.constant dense<0.000000e+00> : vector<16x128xf32>
    %1458 = tpu.matmul %1456, %1457, %cst_618 {dimension_numbers = #tpu.dot_dimension_numbers<[1], [0], [0], [1], [0, 0, 1, 1], [], []>} : vector<16x8xbf16>, vector<8x128xbf16>, vector<16x128xf32> -> vector<16x128xf32>
    %1459 = arith.addf %1429, %1458 : vector<16x128xf32>
    %c111_i32 = arith.constant 111 : i32
    %1460 = tpu.dynamic_rotate %783 by %c111_i32 dim 1 : vector<8x128xf32>, i32 -> vector<8x128xf32>
    %c2_i32_619 = arith.constant 2 : i32
    %1461 = vector.broadcast %c2_i32_619 : i32 to vector<1x128xi32>
    %1462 = arith.addi %792, %1461 : vector<1x128xi32>
    %c0_i32_620 = arith.constant 0 : i32
    %1463 = vector.broadcast %c0_i32_620 : i32 to vector<1x128xi32>
    %1464 = arith.cmpi sge, %1462, %1463 : vector<1x128xi32>
    %c2_i32_621 = arith.constant 2 : i32
    %1465 = vector.broadcast %c2_i32_621 : i32 to vector<1x128xi32>
    %1466 = arith.addi %792, %1465 : vector<1x128xi32>
    %c8_i32_622 = arith.constant 8 : i32
    %1467 = vector.broadcast %c8_i32_622 : i32 to vector<1x128xi32>
    %1468 = arith.cmpi slt, %1466, %1467 : vector<1x128xi32>
    %1469 = arith.andi %1464, %1468 : vector<1x128xi1>
    %c1_i32_623 = arith.constant 1 : i32
    %1470 = vector.broadcast %c1_i32_623 : i32 to vector<1x128xi32>
    %1471 = arith.addi %788, %1470 : vector<1x128xi32>
    %c0_i32_624 = arith.constant 0 : i32
    %1472 = vector.broadcast %c0_i32_624 : i32 to vector<1x128xi32>
    %1473 = arith.cmpi sge, %1471, %1472 : vector<1x128xi32>
    %1474 = arith.andi %1469, %1473 : vector<1x128xi1>
    %c1_i32_625 = arith.constant 1 : i32
    %1475 = vector.broadcast %c1_i32_625 : i32 to vector<1x128xi32>
    %1476 = arith.addi %788, %1475 : vector<1x128xi32>
    %c8_i32_626 = arith.constant 8 : i32
    %1477 = vector.broadcast %c8_i32_626 : i32 to vector<1x128xi32>
    %1478 = arith.cmpi slt, %1476, %1477 : vector<1x128xi32>
    %1479 = arith.andi %1474, %1478 : vector<1x128xi1>
    %cst_627 = arith.constant 0.000000e+00 : f32
    %1480 = vector.shape_cast %1479 : vector<1x128xi1> to vector<1x128xi1>
    %1481 = vector.broadcast %1480 : vector<1x128xi1> to vector<8x128xi1>
    %1482 = vector.broadcast %cst_627 : f32 to vector<8x128xf32>
    %1483 = arith.select %1481, %1460, %1482 : vector<8x128xi1>, vector<8x128xf32>
    %c23_628 = arith.constant 23 : index
    %c0_629 = arith.constant 0 : index
    %c0_630 = arith.constant 0 : index
    %1484 = vector.load %arg4[%c23_628, %c0_629, %c0_630] : memref<25x16x8xf32, #tpu.memory_space<vmem>>, vector<1x16x8xf32>
    %1485 = vector.shape_cast %1484 : vector<1x16x8xf32> to vector<16x8xf32>
    %1486 = arith.truncf %1485 : vector<16x8xf32> to vector<16x8xbf16>
    %1487 = arith.truncf %1483 : vector<8x128xf32> to vector<8x128xbf16>
    %cst_631 = arith.constant dense<0.000000e+00> : vector<16x128xf32>
    %1488 = tpu.matmul %1486, %1487, %cst_631 {dimension_numbers = #tpu.dot_dimension_numbers<[1], [0], [0], [1], [0, 0, 1, 1], [], []>} : vector<16x8xbf16>, vector<8x128xbf16>, vector<16x128xf32> -> vector<16x128xf32>
    %1489 = arith.addf %1459, %1488 : vector<16x128xf32>
    %c110_i32 = arith.constant 110 : i32
    %1490 = tpu.dynamic_rotate %783 by %c110_i32 dim 1 : vector<8x128xf32>, i32 -> vector<8x128xf32>
    %c2_i32_632 = arith.constant 2 : i32
    %1491 = vector.broadcast %c2_i32_632 : i32 to vector<1x128xi32>
    %1492 = arith.addi %792, %1491 : vector<1x128xi32>
    %c0_i32_633 = arith.constant 0 : i32
    %1493 = vector.broadcast %c0_i32_633 : i32 to vector<1x128xi32>
    %1494 = arith.cmpi sge, %1492, %1493 : vector<1x128xi32>
    %c2_i32_634 = arith.constant 2 : i32
    %1495 = vector.broadcast %c2_i32_634 : i32 to vector<1x128xi32>
    %1496 = arith.addi %792, %1495 : vector<1x128xi32>
    %c8_i32_635 = arith.constant 8 : i32
    %1497 = vector.broadcast %c8_i32_635 : i32 to vector<1x128xi32>
    %1498 = arith.cmpi slt, %1496, %1497 : vector<1x128xi32>
    %1499 = arith.andi %1494, %1498 : vector<1x128xi1>
    %c2_i32_636 = arith.constant 2 : i32
    %1500 = vector.broadcast %c2_i32_636 : i32 to vector<1x128xi32>
    %1501 = arith.addi %788, %1500 : vector<1x128xi32>
    %c0_i32_637 = arith.constant 0 : i32
    %1502 = vector.broadcast %c0_i32_637 : i32 to vector<1x128xi32>
    %1503 = arith.cmpi sge, %1501, %1502 : vector<1x128xi32>
    %1504 = arith.andi %1499, %1503 : vector<1x128xi1>
    %c2_i32_638 = arith.constant 2 : i32
    %1505 = vector.broadcast %c2_i32_638 : i32 to vector<1x128xi32>
    %1506 = arith.addi %788, %1505 : vector<1x128xi32>
    %c8_i32_639 = arith.constant 8 : i32
    %1507 = vector.broadcast %c8_i32_639 : i32 to vector<1x128xi32>
    %1508 = arith.cmpi slt, %1506, %1507 : vector<1x128xi32>
    %1509 = arith.andi %1504, %1508 : vector<1x128xi1>
    %cst_640 = arith.constant 0.000000e+00 : f32
    %1510 = vector.shape_cast %1509 : vector<1x128xi1> to vector<1x128xi1>
    %1511 = vector.broadcast %1510 : vector<1x128xi1> to vector<8x128xi1>
    %1512 = vector.broadcast %cst_640 : f32 to vector<8x128xf32>
    %1513 = arith.select %1511, %1490, %1512 : vector<8x128xi1>, vector<8x128xf32>
    %c24_641 = arith.constant 24 : index
    %c0_642 = arith.constant 0 : index
    %c0_643 = arith.constant 0 : index
    %1514 = vector.load %arg4[%c24_641, %c0_642, %c0_643] : memref<25x16x8xf32, #tpu.memory_space<vmem>>, vector<1x16x8xf32>
    %1515 = vector.shape_cast %1514 : vector<1x16x8xf32> to vector<16x8xf32>
    %1516 = arith.truncf %1515 : vector<16x8xf32> to vector<16x8xbf16>
    %1517 = arith.truncf %1513 : vector<8x128xf32> to vector<8x128xbf16>
    %cst_644 = arith.constant dense<0.000000e+00> : vector<16x128xf32>
    %1518 = tpu.matmul %1516, %1517, %cst_644 {dimension_numbers = #tpu.dot_dimension_numbers<[1], [0], [0], [1], [0, 0, 1, 1], [], []>} : vector<16x8xbf16>, vector<8x128xbf16>, vector<16x128xf32> -> vector<16x128xf32>
    %1519 = arith.addf %1489, %1518 : vector<16x128xf32>
    %cst_645 = arith.constant dense<0.000000e+00> : vector<16xf32>
    %1520 = vector.multi_reduction <add>, %1519, %cst_645 [1] : vector<16x128xf32> to vector<16xf32>
    %1521 = vector.shape_cast %1520 : vector<16xf32> to vector<16x1xf32>
    %cst_646 = arith.constant 7.812500e-03 : f32
    %1522 = vector.broadcast %cst_646 : f32 to vector<16x1xf32>
    %1523 = arith.mulf %1521, %1522 : vector<16x1xf32>
    %1524 = vector.broadcast %1523 : vector<16x1xf32> to vector<16x128xf32>
    %1525 = arith.subf %1519, %1524 : vector<16x128xf32>
    %1526 = arith.mulf %1525, %1525 : vector<16x128xf32>
    %cst_647 = arith.constant dense<0.000000e+00> : vector<16xf32>
    %1527 = vector.multi_reduction <add>, %1526, %cst_647 [1] : vector<16x128xf32> to vector<16xf32>
    %1528 = vector.shape_cast %1527 : vector<16xf32> to vector<16x1xf32>
    %cst_648 = arith.constant 7.812500e-03 : f32
    %1529 = vector.broadcast %cst_648 : f32 to vector<16x1xf32>
    %1530 = arith.mulf %1528, %1529 : vector<16x1xf32>
    %cst_649 = arith.constant 9.99999974E-6 : f32
    %1531 = vector.broadcast %cst_649 : f32 to vector<16x1xf32>
    %1532 = arith.addf %1530, %1531 : vector<16x1xf32>
    %1533 = math.rsqrt %1532 : vector<16x1xf32>
    %1534 = vector.broadcast %1533 : vector<16x1xf32> to vector<16x128xf32>
    %1535 = arith.mulf %1525, %1534 : vector<16x128xf32>
    %1536 = vector.broadcast %784 : vector<16x1xf32> to vector<16x128xf32>
    %1537 = arith.mulf %1535, %1536 : vector<16x128xf32>
    %1538 = vector.broadcast %785 : vector<16x1xf32> to vector<16x128xf32>
    %1539 = arith.addf %1537, %1538 : vector<16x128xf32>
    %cst_650 = arith.constant 0.000000e+00 : f32
    %1540 = vector.broadcast %cst_650 : f32 to vector<16x128xf32>
    %1541 = arith.cmpf ogt, %1539, %1540 : vector<16x128xf32>
    %cst_651 = arith.constant 2.000000e-01 : f32
    %1542 = vector.broadcast %cst_651 : f32 to vector<16x128xf32>
    %1543 = arith.mulf %1542, %1539 : vector<16x128xf32>
    %1544 = arith.select %1541, %1539, %1543 : vector<16x128xi1>, vector<16x128xf32>
    %c127_i32_652 = arith.constant 127 : i32
    %1545 = tpu.dynamic_rotate %1544 by %c127_i32_652 dim 1 : vector<16x128xf32>, i32 -> vector<16x128xf32>
    %1546 = arith.maximumf %1544, %1545 : vector<16x128xf32>
    %c120_i32_653 = arith.constant 120 : i32
    %1547 = tpu.dynamic_rotate %1546 by %c120_i32_653 dim 1 : vector<16x128xf32>, i32 -> vector<16x128xf32>
    %1548 = arith.maximumf %1546, %1547 : vector<16x128xf32>
    %c0_654 = arith.constant 0 : index
    %c0_655 = arith.constant 0 : index
    %1549 = vector.load %arg10[%c0_654, %c0_655] : memref<16x128xf32, #tpu.memory_space<vmem>>, vector<16x128xf32>
    %1550 = arith.mulf %1548, %1549 : vector<16x128xf32>
    %cst_656 = arith.constant dense<0.000000e+00> : vector<128xf32>
    %1551 = vector.multi_reduction <add>, %1550, %cst_656 [0] : vector<16x128xf32> to vector<128xf32>
    %1552 = vector.shape_cast %1551 : vector<128xf32> to vector<1x128xf32>
    %c0_657 = arith.constant 0 : index
    %c0_658 = arith.constant 0 : index
    %1553 = vector.load %arg11[%c0_657, %c0_658] : memref<128x2xf32, #tpu.memory_space<vmem>>, vector<128x2xf32>
    %cst_659 = arith.constant dense<0.000000e+00> : vector<1x2xf32>
    %1554 = tpu.matmul %1552, %1553, %cst_659 {dimension_numbers = #tpu.dot_dimension_numbers<[1], [0], [0], [1], [0, 0, 1, 1], [], []>} : vector<1x128xf32>, vector<128x2xf32>, vector<1x2xf32> -> vector<1x2xf32>
    %cst_660 = arith.constant 0.000000e+00 : f32
    %1555 = vector.broadcast %cst_660 : f32 to vector<1x2xf32>
    %1556 = arith.subf %1555, %1554 : vector<1x2xf32>
    %1557 = math.exp %1556 : vector<1x2xf32>
    %cst_661 = arith.constant 1.000000e+00 : f32
    %1558 = vector.broadcast %cst_661 : f32 to vector<1x2xf32>
    %1559 = arith.addf %1558, %1557 : vector<1x2xf32>
    %cst_662 = arith.constant 1.000000e+00 : f32
    %1560 = vector.broadcast %cst_662 : f32 to vector<1x2xf32>
    %1561 = arith.divf %1560, %1559 : vector<1x2xf32>
    %c0_663 = arith.constant 0 : index
    %c0_664 = arith.constant 0 : index
    %1562 = vector.load %arg12[%c0_663, %c0_664] : memref<1x2xf32, #tpu.memory_space<vmem>>, vector<1x2xf32>
    tpu.vector_store %arg12[%c0_663, %c0_664], %1561 {strides = array<i32>} : memref<1x2xf32, #tpu.memory_space<vmem>>, vector<1x2xf32>,
    return
  }
}

</mosaic_0001>

<bundles_post_ra>
// kernel: tpu_custom_call.1
= control target key start
LH: loop header
LB: loop body
LE: loop exit
PB: predicated region body
PF: predicated region fallthrough
CT: control target
= control target key end

     0   :  { %v85_v11 = vlaneseq  ;;  %s9539_s0 = inlined_call_operand.vmem [shape: f32[4,512], index: 0, kind: input, shape index: {}]   ;;  %s9540_s1 = inlined_call_operand.vmem [shape: f32[8,512], index: 1, kind: input, shape index: {}]   ;;  %s9541_s2 = inlined_call_operand.vmem [shape: f32[8,512], index: 2, kind: input, shape index: {}]   ;;  %s9542_s3 = inlined_call_operand.vmem [shape: f32[25,8,4], index: 3, kind: input, shape index: {}]   ;;  %s9543_s4 = inlined_call_operand.vmem [shape: f32[25,16,8], index: 4, kind: input, shape index: {}]   ;;  %s9544_s5 = inlined_call_operand.vmem [shape: f32[8,1], index: 5, kind: input, shape index: {}]   ;;  %s9545_s6 = inlined_call_operand.vmem [shape: f32[16,1], index: 6, kind: input, shape index: {}]   ;;  %s9546_s7 = inlined_call_operand.vmem [shape: f32[8,1], index: 7, kind: input, shape index: {}]   ;;  %s9547_s8 = inlined_call_operand.vmem [shape: f32[16,1], index: 8, kind: input, shape index: {}]   ;;  %s9548_s9 = inlined_call_operand.vmem [shape: f32[512,128], index: 9, kind: input, shape index: {}]   ;;  %s9549_s10 = inlined_call_operand.vmem [shape: f32[16,128], index: 10, kind: input, shape index: {}]   ;;  %s9550_s11 = inlined_call_operand.vmem [shape: f32[128,2], index: 11, kind: input, shape index: {}]   ;;  %s9551_s12 = inlined_call_operand.hbm [shape: f32[1,2], index: 12, kind: output, shape index: {}]  }
   0x1   :  { %v43_v0 = vld [vmem:[%s9540_s1] sm:$0xff]  ;;  %v44_v1 = vld [vmem:[%s9540_s1 + $0x8] sm:$0xff]  ;;  %v45_v5 = vld [vmem:[%s9540_s1 + $0x10] sm:$0xff] }
   0x2   :  { %v47_v2 = vld [vmem:[%s9541_s2] sm:$0xff]  ;;  %v48_v3 = vld [vmem:[%s9541_s2 + $0x8] sm:$0xff]  ;;  %v46_v7 = vld [vmem:[%s9540_s1 + $0x18] sm:$0xff] }
   0x3   :  { %v51_v4 = vmul.f32 %v47_v2, %v43_v0  ;;  %v52_v6 = vmul.f32 %v48_v3, %v44_v1  ;;  %v49_v8 = vld [vmem:[%s9541_s2 + $0x10] sm:$0xff]  ;;  %v50_v9 = vld [vmem:[%s9541_s2 + $0x18] sm:$0xff] }
   0x4   :  { %v53_v12 = vmul.f32 %v49_v8, %v45_v5  ;;  %v54_v13 = vmul.f32 %v50_v9, %v46_v7 }
   0x5   :  { %v55_v10 = vrot.slane %v51_v4, 4 }
   0x6   :  { %17 = vsyncpa [#allocation3], 0  ;;  %v61_v14 = vrot.slane %v52_v6, 4  ;;  %v67_v16 = vrot.slane %v53_v12, 4  ;;  %v73_v17 = vrot.slane %v54_v13, 4  ;;  %v86_v20 = vshrl.u32 %v85_v11, 7 }
   0x7   :  { %v56_v15 = vadd.f32 %v55_v10, %v51_v4  ;;  %v9561_v36 = vmov 0.0   ;;  %v83_v46 = vld [vmem:[%s9539_s0] sm:$0xff]  ;;  %v84_v50 = vld [vmem:[%s9539_s0 + $0x8] sm:$0xff]  ;;  %s6879_s21 = smov 33   ;;  %s6880_s0 = smov 34   ;;  %v9569_v57 = vmov 0  }
   0x8   :  { %v62_v18 = vadd.f32 %v61_v14, %v52_v6  ;;  %v68_v21 = vadd.f32 %v67_v16, %v53_v12  ;;  %v74_v22 = vadd.f32 %v73_v17, %v54_v13  ;;  %vm87_vm0 = vcmp.eq.s32.totalorder %v86_v20, 3  ;;  %297 = vmatprep.mubr.bf16.mxu1 %v9569_v57  ;;  %1143 = vmatprep.mubr.bf16.mxu0 %v9569_v57  ;;  %s6882_s22 = smov 32   ;;  %s6883_s23 = smov 31  }
   0x9   :  { %v57_v19 = vrot.slane %v56_v15, 2  ;;  %v5776_v37 = vsel %vm87_vm0, 1.0, %v9561_v36  ;;  %6828 = vset.pattern.permute.xlu1 %v9569_v57  ;;  %6827 = vset.pattern.permute.xlu0 %v9569_v57  ;;  %s6884_s24 = smov 30   ;;  %s6885_s25 = smov 18   ;;  %v7108_v58 = vand.u32 127, %v85_v11 }
   0xa   :  { %v63_v23 = vrot.slane %v62_v18, 2  ;;  %v69_v25 = vrot.slane %v68_v21, 2  ;;  %v75_v26 = vrot.slane %v74_v22, 2  ;;  %s9607_s26 = smov 17   ;;  %s6887_s27 = smov 16  }
   0xb   :  { %v58_v24 = vadd.f32 %v57_v19, %v56_v15  ;;  %s6888_s28 = smov 15   ;;  %s6889_s29 = smov 14   ;;  %v109_v59 = vadd.s32 256, %v7108_v58  ;;  %v108_v61 = vadd.s32 128, %v7108_v58  ;;  %v110_v62 = vadd.s32 384, %v7108_v58 }
   0xc   :  { %v64_v27 = vadd.f32 %v63_v23, %v62_v18  ;;  %v70_v29 = vadd.f32 %v69_v25, %v68_v21  ;;  %v76_v30 = vadd.f32 %v75_v26, %v74_v22  ;;  %s6890_s30 = smov 2   ;;  %s6891_s13 = smov 1   ;;  %v115_v2 = vshra.s32 %v7108_v58, 4 }
   0xd   :  { %v59_v28 = vrot.slane %v58_v24, 1  ;;  %s6892_s14 = smov 127   ;;  %s6893_s15 = smov 126   ;;  %v117_v60 = vshra.s32 %v109_v59, 4  ;;  %v116_v0 = vshra.s32 %v108_v61, 4  ;;  %v118_v1 = vshra.s32 %v110_v62, 4 }
   0xe   :  { %v65_v31 = vrot.slane %v64_v27, 1  ;;  %v71_v33 = vrot.slane %v70_v29, 1  ;;  %v77_v34 = vrot.slane %v76_v30, 1  ;;  %s6894_s16 = smov 114   ;;  %s6895_s17 = smov 113   ;;  %v7130_v3 = vand.u32 15, %v109_v59 }
   0xf   :  { %v60_v32 = vadd.f32 %v59_v28, %v58_v24  ;;  %s6896_s18 = smov 112   ;;  %v7125_v63 = vand.u32 15, %v117_v60  ;;  %s6897_s1 = smov 111   ;;  %v7135_v5 = vand.u32 15, %v116_v0  ;;  %v7139_v6 = vand.u32 15, %v118_v1 }
  0x10   :  { %v66_v35 = vadd.f32 %v65_v31, %v64_v27  ;;  %v72_v39 = vadd.f32 %v71_v33, %v70_v29  ;;  %v78_v40 = vadd.f32 %v77_v34, %v76_v30  ;;  %v7141_v7 = vand.u32 15, %v115_v2  ;;  %s6898_s2 = smov 110   ;;  %s6899_s19 = smov 98  }
  0x11   :  { %v79_v38 = vmax.f32 %v60_v32, 0.0  ;;  %v144_v4 = vadd.s32 4294967294, %v7125_v63  ;;  %v7144_v8 = vadd.s32 4294967295, %v7130_v3  ;;  %v7146_v9 = vand.u32 15, %v110_v62  ;;  %s6900_s20 = smov 97  }
  0x12   :  { %v80_v41 = vmax.f32 %v66_v35, 0.0  ;;  %v81_v43 = vmax.f32 %v72_v39, 0.0  ;;  %v82_v44 = vmax.f32 %v78_v40, 0.0  ;;  %v7148_v10 = vand.u32 15, %v108_v61 }
  0x13   :  { %v90_v42 = vmul.f32 %v5776_v37, %v79_v38  ;;  %vm148_vm1 = vcmp.ge.s32.totalorder %v144_v4, 0  ;;  %vm152_vm2 = vcmp.lt.s32.totalorder %v144_v4, 16  ;;  %v143_v11 = vadd.s32 4294967294, %v7135_v5 }
  0x14   :  { %v91_v45 = vmul.f32 %v5776_v37, %v80_v41  ;;  %v92_v47 = vmul.f32 %v5776_v37, %v81_v43  ;;  %v93_v48 = vmul.f32 %v5776_v37, %v82_v44  ;;  %v145_v12 = vadd.s32 4294967294, %v7139_v6  ;;  %vm7160_vm3 = vmand %vm148_vm1, %vm152_vm2  ;;  %v5777_v43 = vld [vmem:[%s9542_s3 + $0x8] sm:$0xff] }
  0x15   :  { %v7157_v13 = vand.u32 15, %v7108_v58  ;;  %v142_v14 = vadd.s32 4294967294, %v7141_v7  ;;  %vm9552_vm4 = vcmp.ge.s32.totalorder %v7144_v8, 0  ;;  %v7166_v16 = vadd.s32 4294967295, %v7148_v10 }
  0x16   :  { %v98_v49 = vcombine.low %v90_v42, %v91_v45  ;;  %v99_v51 = vcombine.low %v92_v47, %v93_v48  ;;  %v7171_v17 = vadd.s32 4294967295, %v7146_v9  ;;  %vm147_vm5 = vcmp.ge.s32.totalorder %v143_v11, 0  ;;  %vm7181_vm9 = vmand %vm7160_vm3, %vm9552_vm4 }
  0x17   :  { %vm151_vm6 = vcmp.lt.s32.totalorder %v143_v11, 16  ;;  %vm149_vm7 = vcmp.ge.s32.totalorder %v145_v12, 0  ;;  %vm153_vm8 = vcmp.lt.s32.totalorder %v145_v12, 16  ;;  %v7175_v18 = vadd.s32 4294967295, %v7157_v13 }
  0x18   :  { %v7014_v52 = vadd.f32 %v98_v49, %v83_v46  ;;  %v7016_v53 = vadd.f32 %v99_v51, %v84_v50  ;;  %vm146_vm10 = vcmp.ge.s32.totalorder %v142_v14, 0  ;;  %vm150_vm11 = vcmp.lt.s32.totalorder %v142_v14, 16  ;;  %vm7185_vm12 = vmand %vm147_vm5, %vm151_vm6 }
  0x19   :  { %vm9559_vm13 = vcmp.ge.s32.totalorder %v7166_v16, 0  ;;  %v7191_v22 = vadd.s32 4294967294, %v7148_v10  ;;  %vm7195_vm14 = vmand %vm149_vm7, %vm153_vm8  ;;  %vm9553_vm15 = vcmp.ge.s32.totalorder %v7171_v17, 0  ;;  %vm204_vm0 = vcmp.lt.s32.totalorder %v7108_v58, 33 }
  0x1a   :  { %9611 = vst [vmem:[#allocation5_spill] sm:$0xff] %v7016_v53  ;;  %v7020_v54 = vcombine.high %v7014_v52, %v7014_v52  ;;  %200 = vrot.lane.b32.xlu1 %v7016_v53, %s6879_s21  ;;  %v7030_v56 = vcombine.high %v7016_v53, %v7016_v53  ;;  %vm7202_vm1 = vmand %vm146_vm10, %vm150_vm11  ;;  %v7207_v26 = vadd.s32 4294967294, %v7157_v13  ;;  %vm9560_vm2 = vcmp.ge.s32.totalorder %v7175_v18, 0 }
  0x1b   :  { %vm218_vm5 = vmand %vm7185_vm12, %vm9559_vm13  ;;  %vm137_vm6 = vcmp.lt.s32.totalorder %v7108_v58, 34  ;;  %vm9557_vm8 = vcmp.ge.s32.totalorder %v7191_v22, 0  ;;  %vm9574_vm11 = vcmask 1041408   ;;  %v7264_v47 = vadd.s32 4294967294, %v7146_v9 }
  0x1c   :  { %v7025_v55 = vpack.i.bf16 %v7020_v54, %v7014_v52  ;;  %9612 = vst [vmem:[#allocation6_spill] sm:$0xff] %v7030_v56  ;;  %vm7221_vm7 = vmand %vm7195_vm14, %vm9553_vm15  ;;  %vm9556_vm4 = vcmp.ge.s32.totalorder %v7207_v26, 0  ;;  %v243_v51 = vpack.c.bf16 %v5777_v43, %v5777_v43  ;;  %v7285_v11 = vadd.s32 4294967294, %v7130_v3 }
  0x1d   :  { %vm7237_vm10 = vmand %vm7202_vm1, %vm9560_vm2 }
  0x1e   :  { %6708 = vrot.lane.b32.xlu0 %v7025_v55, %s6879_s21  ;;  %6713 = vrot.lane.b32.xlu1 %v7025_v55, %s6880_s0 }
  0x22   :  { %202 = vrot.lane.b32.xlu0 %v7030_v56, %s6879_s21  ;;  %133 = vrot.lane.b32.xlu1 %v7016_v53, %s6880_s0 }
  0x26   :  { %135 = vrot.lane.b32.xlu0 %v7030_v56, %s6880_s0  ;;  %450 = vrot.lane.b32.xlu1 %v7030_v56, %s6882_s22 }
  0x2a   :  { %6718 = vrot.lane.b32.xlu0 %v7025_v55, %s6882_s22  ;;  %6723 = vrot.lane.b32.xlu1 %v7025_v55, %s6883_s23 }
  0x2e   :  { %448 = vrot.lane.b32.xlu0 %v7016_v53, %s6882_s22  ;;  %597 = vrot.lane.b32.xlu1 %v7016_v53, %s6883_s23  ;;  %s6901_s22 = smov 96  }
  0x32   :  { %599 = vrot.lane.b32.xlu0 %v7030_v56, %s6883_s23  ;;  %752 = vrot.lane.b32.xlu1 %v7030_v56, %s6884_s24  ;;  %s6902_s23 = smov 95  }
  0x36   :  { %6728 = vrot.lane.b32.xlu0 %v7025_v55, %s6884_s24  ;;  %6733 = vrot.lane.b32.xlu1 %v7025_v55, %s6885_s25 }
  0x3a   :  { %750 = vrot.lane.b32.xlu0 %v7016_v53, %s6884_s24  ;;  %903 = vrot.lane.b32.xlu1 %v7016_v53, %s6885_s25  ;;  %s6903_s24 = smov 94  }
  0x3e   :  { %905 = vrot.lane.b32.xlu0 %v7030_v56, %s6885_s25  ;;  %1062 = vrot.lane.b32.xlu1 %v7030_v56, %s9607_s26 }
  0x42   :  { %6738 = vrot.lane.b32.xlu0 %v7025_v55, %s9607_s26  ;;  %6743 = vrot.lane.b32.xlu1 %v7025_v55, %s6887_s27 }
  0x46   :  { %1060 = vrot.lane.b32.xlu0 %v7016_v53, %s9607_s26  ;;  %1201 = vrot.lane.b32.xlu1 %v7016_v53, %s6887_s27  ;;  %s6908_s26 = smov 8  }
  0x4a   :  { %1203 = vrot.lane.b32.xlu0 %v7030_v56, %s6887_s27  ;;  %1344 = vrot.lane.b32.xlu1 %v7030_v56, %s6888_s28 }
  0x4e   :  { %6748 = vrot.lane.b32.xlu0 %v7025_v55, %s6888_s28  ;;  %6753 = vrot.lane.b32.xlu1 %v7025_v55, %s6889_s29 }
  0x52   :  { %1342 = vrot.lane.b32.xlu0 %v7016_v53, %s6888_s28  ;;  %1483 = vrot.lane.b32.xlu1 %v7016_v53, %s6889_s29 }
  0x56   :  { %1485 = vrot.lane.b32.xlu0 %v7030_v56, %s6889_s29  ;;  %1626 = vrot.lane.b32.xlu1 %v7030_v56, %s6890_s30 }
  0x5a   :  { %6758 = vrot.lane.b32.xlu0 %v7025_v55, %s6890_s30  ;;  %6763 = vrot.lane.b32.xlu1 %v7025_v55, %s6891_s13 }
  0x5e   :  { %1624 = vrot.lane.b32.xlu0 %v7016_v53, %s6890_s30  ;;  %1777 = vrot.lane.b32.xlu1 %v7016_v53, %s6891_s13 }
  0x62   :  { %1779 = vrot.lane.b32.xlu0 %v7030_v56, %s6891_s13  ;;  %2026 = vrot.lane.b32.xlu1 %v7016_v53, %s6892_s14 }
  0x66   :  { %6768 = vrot.lane.b32.xlu0 %v7025_v55, %s6892_s14  ;;  %6773 = vrot.lane.b32.xlu1 %v7025_v55, %s6893_s15 }
  0x6a   :  { %2028 = vrot.lane.b32.xlu0 %v7030_v56, %s6892_s14  ;;  %2169 = vrot.lane.b32.xlu1 %v7030_v56, %s6893_s15 }
  0x6e   :  { %2167 = vrot.lane.b32.xlu0 %v7016_v53, %s6893_s15  ;;  %2308 = vrot.lane.b32.xlu1 %v7016_v53, %s6894_s16 }
  0x72   :  { %6778 = vrot.lane.b32.xlu0 %v7025_v55, %s6894_s16  ;;  %6783 = vrot.lane.b32.xlu1 %v7025_v55, %s6895_s17 }
  0x76   :  { %2310 = vrot.lane.b32.xlu0 %v7030_v56, %s6894_s16  ;;  %2467 = vrot.lane.b32.xlu1 %v7030_v56, %s6895_s17 }
  0x7a   :  { %2465 = vrot.lane.b32.xlu0 %v7016_v53, %s6895_s17  ;;  %2606 = vrot.lane.b32.xlu1 %v7016_v53, %s6896_s18 }
  0x7e   :  { %6788 = vrot.lane.b32.xlu0 %v7025_v55, %s6896_s18  ;;  %6793 = vrot.lane.b32.xlu1 %v7025_v55, %s6897_s1 }
  0x82   :  { %2608 = vrot.lane.b32.xlu0 %v7030_v56, %s6896_s18  ;;  %2749 = vrot.lane.b32.xlu1 %v7030_v56, %s6897_s1 }
  0x86   :  { %2747 = vrot.lane.b32.xlu0 %v7016_v53, %s6897_s1  ;;  %2888 = vrot.lane.b32.xlu1 %v7016_v53, %s6898_s2 }
  0x8a   :  { %6798 = vrot.lane.b32.xlu0 %v7025_v55, %s6898_s2  ;;  %6803 = vrot.lane.b32.xlu1 %v7025_v55, %s6899_s19 }
  0x8c   :  { %v201_v20 = vpop.permute.xlu1 %200 }
  0x8e   :  { %2890 = vrot.lane.b32.xlu0 %v7030_v56, %s6898_s2  ;;  %3031 = vrot.lane.b32.xlu1 %v7030_v56, %s6899_s19 }
  0x90   :  { %v6709_v24 = vpop.permute.xlu0 %6708  ;;  %v7210_v29 = vpop.permute.xlu1 %6713 }
  0x91   :  { %v6711_v27 = vunpack.i.h.bf16 %v6709_v24  ;;  %v6710_v28 = vunpack.i.l.bf16 %v6709_v24  ;;  %v6716_v31 = vunpack.i.h.bf16 %v7210_v29  ;;  %v6715_v32 = vunpack.i.l.bf16 %v7210_v29 }
  0x92   :  { %3029 = vrot.lane.b32.xlu0 %v7016_v53, %s6899_s19  ;;  %3186 = vrot.lane.b32.xlu1 %v7016_v53, %s6900_s20  ;;  %s6907_s19 = smov 7  }
  0x93   :  { %v206_v33 = vsel %vm204_vm0, %v6711_v27, %v201_v20  ;;  %v207_v34 = vsel %vm204_vm0, %v6710_v28, %v6711_v27  ;;  %v140_v44 = vsel %vm137_vm6, %v6715_v32, %v6716_v31 }
  0x94   :  { %v203_v37 = vpop.permute.xlu0 %202  ;;  %v238_v38 = vsel %vm218_vm5, %v207_v34, 0.0  ;;  %v134_v42 = vpop.permute.xlu1 %133  ;;  %vm167_vm5 = vmand %vm7185_vm12, %vm9557_vm8  ;;  %v239_v45 = vsel %vm7181_vm9, %v206_v33, 0.0  ;;  %vm601_vm8 = vcmp.lt.s32.totalorder %v7108_v58, 31 }
  0x95   :  { %v205_v39 = vsel %vm204_vm0, %v201_v20, %v203_v37  ;;  %v208_v40 = vsel %vm204_vm0, %v203_v37, %v6710_v28  ;;  %v245_v41 = vpack.c.bf16 %v238_v38, %v238_v38  ;;  %v187_v59 = vsel %vm167_vm5, %v140_v44, 0.0  ;;  %vm166_vm9 = vmand %vm7202_vm1, %vm9556_vm4 }
  0x96   :  { %v240_v46 = vsel %vm7221_vm7, %v205_v39, 0.0  ;;  %v237_v48 = vsel %vm7237_vm10, %v208_v40, 0.0  ;;  %6808 = vrot.lane.b32.xlu0 %v7025_v55, %s6900_s20  ;;  %6813 = vrot.lane.b32.xlu1 %v7025_v55, %s6901_s22  ;;  %v246_v60 = vpack.c.bf16 %v239_v45, %v239_v45  ;;  %vm9555_vm0 = vcmp.ge.s32.totalorder %v7264_v47, 0 }
  0x97   :  { %5778 = vmatprep.subr.msk.bf16.mxu1 %vm9574_vm11, %v245_v41  ;;  %v244_v49 = vpack.c.bf16 %v237_v48, %v237_v48  ;;  %v247_v61 = vpack.c.bf16 %v240_v46, %v240_v46  ;;  %vm9558_vm7 = vcmask 31744   ;;  %v193_v2 = vpack.c.bf16 %v187_v59, %v187_v59  ;;  %vm169_vm10 = vmand %vm7195_vm14, %vm9555_vm0 }
  0x98   :  { %v136_v50 = vpop.permute.xlu0 %135  ;;  %v451_v1 = vpop.permute.xlu1 %450  ;;  %v260_v19 = vsel %vm9574_vm11, %v246_v60, 0  ;;  %vm9554_vm5 = vcmp.ge.s32.totalorder %v7285_v11, 0  ;;  %v139_v34 = vsel %vm137_vm6, %v6716_v31, %v134_v42  ;;  %v190_v31 = vld [vmem:[%s9542_s3] sm:$0xff]  ;;  %v913_v46 = vadd.s32 4294967295, %v7135_v5 }
  0x99   :  { %v141_v62 = vsel %vm137_vm6, %v136_v50, %v6715_v32  ;;  %v254_v0 = vsel %vm9574_vm11, %v244_v49, 0  ;;  %v138_v14 = vsel %vm137_vm6, %v134_v42, %v136_v50  ;;  %vm168_vm15 = vmand %vm7160_vm3, %vm9554_vm5  ;;  %v191_v44 = vpack.c.bf16 %v190_v31, %v190_v31 }
  0x9a   :  { %266 = vmatpush1.bf16.msra.mxu1 %v254_v0  ;;  %3188 = vrot.lane.b32.xlu0 %v7030_v56, %s6900_s20  ;;  %v186_v4 = vsel %vm166_vm9, %v141_v62, 0.0  ;;  %v189_v27 = vsel %vm169_vm10, %v138_v14, 0.0  ;;  %vm452_vm9 = vcmp.lt.s32.totalorder %v7108_v58, 32  ;;  %v188_v40 = vsel %vm168_vm15, %v139_v34, 0.0  ;;  %s6914_s20 = smov 119  }
  0x9b   :  { %5780 = vmatprep.subr.msk.bf16.mxu1 %vm9574_vm11, %v247_v61  ;;  %3329 = vrot.lane.b32.xlu1 %v7030_v56, %s6901_s22  ;;  %v192_v24 = vpack.c.bf16 %v186_v4, %v186_v4  ;;  %v195_v35 = vpack.c.bf16 %v189_v27, %v189_v27  ;;  %v194_v42 = vpack.c.bf16 %v188_v40, %v188_v40  ;;  %v912_v48 = vadd.s32 4294967295, %v7141_v7 }
  0x9c   :  { %v7287_v12 = vpop.permute.xlu0 %6718  ;;  %v7297_v20 = vpop.permute.xlu1 %6723  ;;  %vm917_vm15 = vcmp.ge.s32.totalorder %v913_v46, 0  ;;  %vm921_vm6 = vcmp.lt.s32.totalorder %v913_v46, 16  ;;  %v7357_v62 = vadd.s32 1, %v7148_v10  ;;  %v7422_v46 = vadd.s32 1, %v7146_v9 }
  0x9d   :  { %5779 = vmatmul.mubr.msk.bf16.vlgmr.msra.gmra.mrb[0].mxu1 %vm9558_vm7, %v243_v51  ;;  %v6721_v30 = vunpack.i.h.bf16 %v7287_v12  ;;  %v6720_v32 = vunpack.i.l.bf16 %v7287_v12  ;;  %v351_v37 = vsel %vm9574_vm11, %v192_v24, 0  ;;  %v357_v60 = vsel %vm9574_vm11, %v194_v42, 0  ;;  %vm7367_vm0 = vmand %vm917_vm15, %vm921_vm6 }
  0x9e   :  { %307 = vmatpush1.bf16.msra.mxu1 %v260_v19  ;;  %338 = vmatprep.mubr.bf16.mxu1 %v9569_v57  ;;  %vm916_vm10 = vcmp.ge.s32.totalorder %v912_v48, 0  ;;  %vm920_vm5 = vcmp.lt.s32.totalorder %v912_v48, 16  ;;  %v6726_v14 = vunpack.i.h.bf16 %v7297_v20  ;;  %v6725_v19 = vunpack.i.l.bf16 %v7297_v20 }
  0x9f   :  { %5782 = vmatprep.subr.msk.bf16.mxu1 %vm9574_vm11, %v193_v2  ;;  %3327 = vrot.lane.b32.xlu0 %v7016_v53, %s6901_s22  ;;  %v455_v29 = vsel %vm452_vm9, %v6720_v32, %v6721_v30  ;;  %v456_v43 = vsel %vm452_vm9, %v451_v1, %v6720_v32  ;;  %v7363_v2 = vadd.s32 1, %v7157_v13  ;;  %vm7373_vm4 = vmand %vm916_vm10, %vm920_vm5  ;;  %vm9566_vm6 = vcmp.lt.s32.totalorder %v7108_v58, 17 }
  0xa0   :  { %v449_v28 = vpop.permute.xlu0 %448  ;;  %3468 = vrot.lane.b32.xlu1 %v7016_v53, %s6902_s23  ;;  %v7306_v33 = vpop.permute.xlu1 %597  ;;  %v482_v41 = vsel %vm7185_vm12, %v455_v29, 0.0  ;;  %v481_v50 = vsel %vm7202_vm1, %v456_v43, 0.0  ;;  %vm7388_vm5 = vmand %vm7367_vm0, %vm9559_vm13  ;;  %vm9635_vm10 = vcmask 31744   ;;  %vm9565_vm13 = vcmp.lt.s32.totalorder %v7108_v58, 16 }
  0xa1   :  { %v489_v49 = vpack.c.bf16 %v482_v41, %v482_v41  ;;  %v453_v59 = vsel %vm452_vm9, %v449_v28, %v451_v1  ;;  %v488_v0 = vpack.c.bf16 %v481_v50, %v481_v50  ;;  %v454_v32 = vsel %vm452_vm9, %v6721_v30, %v449_v28  ;;  %vm7400_vm9 = vmand %vm7373_vm4, %vm9560_vm2  ;;  %v5786_v30 = vld [vmem:[%s9542_s3 + $0x10] sm:$0xff] }
  0xa2   :  { %v484_v1 = vsel %vm7195_vm14, %v453_v59, 0.0  ;;  %vm9567_vm15 = vcmp.lt.s32.totalorder %v7363_v2, 16  ;;  %v604_v42 = vsel %vm601_vm8, %v6725_v19, %v6726_v14  ;;  %v483_v43 = vsel %vm7160_vm3, %v454_v32, 0.0  ;;  %v5806_v32 = vld [vmem:[%s9542_s3 + $0x30] sm:$0xff] }
  0xa3   :  { %6818 = vrot.lane.b32.xlu0 %v7025_v55, %s6902_s23  ;;  %v491_v34 = vpack.c.bf16 %v484_v1, %v484_v1  ;;  %v7433_v59 = vpack.c.bf16 %v5786_v30, %v5786_v30 }
  0xa4   :  { %v7319_v38 = vpop.permute.xlu0 %599  ;;  %6823 = vrot.lane.b32.xlu1 %v7025_v55, %s6903_s24  ;;  %v7323_v39 = vpop.permute.xlu1 %752 }
  0xa5   :  { %5781 = vmatmul.mubr.msk.bf16.vlgmr.msra.gmra.mrb[4].mxu1 %vm9558_vm7, %v243_v51 }
  0xa6   :  { %363 = vmatpush1.bf16.msra.mxu1 %v351_v37  ;;  %394 = vmatprep.mubr.bf16.mxu1 %v9569_v57  ;;  %v605_v37 = vsel %vm601_vm8, %v7319_v38, %v6725_v19 }
  0xa7   :  { %5784 = vmatprep.subr.msk.bf16.mxu1 %vm9574_vm11, %v195_v35  ;;  %3470 = vrot.lane.b32.xlu0 %v7030_v56, %s6902_s23  ;;  %v496_v35 = vsel %vm9574_vm11, %v488_v0, 0 }
  0xa8   :  { %v7333_v55 = vpop.permute.xlu0 %6728  ;;  %3611 = vrot.lane.b32.xlu1 %v7030_v56, %s6903_s24  ;;  %v7340_v45 = vpop.permute.xlu1 %6733 }
  0xab   :  { %3609 = vrot.lane.b32.xlu0 %v7016_v53, %s6903_s24  ;;  %s6906_s24 = smov 10  }
  0xac   :  { %v7347_v51 = vpop.permute.xlu0 %750  ;;  %v7353_v61 = vpop.permute.xlu1 %903 }
  0xad   :  { %5783 = vmatmul.mubr.msk.bf16.vlgmr.msra.gmra.mrb[0].mxu1 %vm9558_vm7, %v191_v44  ;;  %vm9568_vm7 = vcmp.lt.s32.totalorder %v7357_v62, 16 }
  0xae   :  { %404 = vmatpush1.bf16.msra.mxu1 %v357_v60  ;;  %435 = vmatprep.mubr.bf16.mxu1 %v9569_v57  ;;  %vm623_vm2 = vmand %vm7185_vm12, %vm9568_vm7 }
  0xaf   :  { %5787 = vmatprep.subr.msk.bf16.mxu1 %vm9574_vm11, %v489_v49 }
  0xb0   :  { %v7365_v4 = vpop.permute.xlu0 %905  ;;  %v7377_v27 = vpop.permute.xlu1 %1062 }
  0xb4   :  { %v7393_v29 = vpop.permute.xlu0 %6738  ;;  %v6744_v41 = vpop.permute.xlu1 %6743 }
  0xb5   :  { %v9563_v40 = vunpack.i.h.bf16 %v7393_v29  ;;  %v6740_v31 = vunpack.i.l.bf16 %v7393_v29  ;;  %5785 = vmatmul.mubr.msk.bf16.vlgmr.msra.gmra.mrb[4].mxu1 %vm9635_vm10, %v191_v44  ;;  %v6746_v44 = vunpack.i.h.bf16 %v6744_v41  ;;  %v6745_v48 = vunpack.i.l.bf16 %v6744_v41  ;;  %vm622_vm10 = vmand %vm7202_vm1, %vm9567_vm15 }
  0xb6   :  { %508 = vmatpush1.bf16.msra.mxu1 %v496_v35  ;;  %539 = vmatprep.mubr.bf16.mxu1 %v9569_v57  ;;  %v490_v41 = vpack.c.bf16 %v483_v43, %v483_v43  ;;  %v634_v36 = vsel %vm622_vm10, %v605_v37, 0.0 }
  0xb7   :  { %v1068_v49 = vsel %vm9566_vm6, %v7377_v27, %v6740_v31  ;;  %5789 = vmatprep.subr.msk.bf16.mxu1 %vm9574_vm11, %v491_v34  ;;  %v1067_v50 = vsel %vm9566_vm6, %v6740_v31, %v9563_v40  ;;  %v635_v34 = vsel %vm623_vm2, %v604_v42, 0.0  ;;  %v1208_v35 = vsel %vm9565_vm13, %v6745_v48, %v6746_v44  ;;  %vm7516_vm6 = vmand %vm7373_vm4, %vm9567_vm15 }
  0xb8   :  { %v1086_v60 = vsel %vm7388_vm5, %v1067_v50, 0.0  ;;  %v1085_v0 = vsel %vm7400_vm9, %v1068_v49, 0.0  ;;  %v7439_v1 = vpop.permute.xlu0 %1060  ;;  %v7453_v31 = vpop.permute.xlu1 %1201  ;;  %v7456_v49 = vadd.s32 1, %v7130_v3  ;;  %vm9564_vm2 = vcmp.lt.s32.totalorder %v7422_v46, 16 }
  0xb9   :  { %v1093_v28 = vpack.c.bf16 %v1086_v60, %v1086_v60  ;;  %v1092_v30 = vpack.c.bf16 %v1085_v0, %v1085_v0  ;;  %v1227_v42 = vsel %vm7367_vm0, %v1208_v35, 0.0  ;;  %v7464_v43 = vsel %vm9565_vm13, %v6746_v44, %v7453_v31  ;;  %vm7476_vm5 = vmand %vm7195_vm14, %vm9564_vm2 }
  0xba   :  { %v7468_v50 = vpack.c.bf16 %v5806_v32, %v5806_v32  ;;  %v642_v60 = vpack.c.bf16 %v635_v34, %v635_v34  ;;  %v1234_v0 = vpack.c.bf16 %v1227_v42, %v1227_v42  ;;  %v602_v44 = vsel %vm601_vm8, %v7306_v33, %v7319_v38 }
  0xbb   :  { %5807 = vmatprep.subr.msk.bf16.mxu0 %vm9574_vm11, %v1093_v28  ;;  %v1100_v19 = vsel %vm9574_vm11, %v1092_v30, 0  ;;  %vm9639_vm9 = vcmask 31744   ;;  %v502_v32 = vsel %vm9574_vm11, %v490_v41, 0  ;;  %vm9573_vm10 = vcmp.lt.s32.totalorder %v7456_v49, 16 }
  0xbc   :  { %9636 = vst [vmem:[#allocation7_spill] sm:$0xff] %v7468_v50  ;;  %1112 = vmatpush1.bf16.msra.mxu0 %v1100_v19  ;;  %v7470_v40 = vpop.permute.xlu0 %1203  ;;  %v7491_v37 = vpop.permute.xlu1 %1344  ;;  %v7498_v38 = vadd.s32 2, %v7148_v10  ;;  %v641_v41 = vpack.c.bf16 %v634_v36, %v634_v36  ;;  %vm9640_vm2 = vcmask 31744   ;;  %v637_v42 = vsel %vm7476_vm5, %v602_v44, 0.0  ;;  %vm7527_vm5 = vmand %vm7367_vm0, %vm9568_vm7 }
  0xbd   :  { %5788 = vmatmul.mubr.msk.bf16.vlgmr.msra.gmra.mrb[0].mxu1 %vm9639_vm9, %v7433_v59  ;;  %v1209_v34 = vsel %vm9565_vm13, %v7470_v40, %v6745_v48  ;;  %5812 = vmatprep.subr.msk.bf16.mxu0 %vm9574_vm11, %v1234_v0  ;;  %vm754_vm9 = vcmp.lt.s32.totalorder %v7108_v58, 30  ;;  %v7502_v48 = vadd.s32 2, %v7157_v13  ;;  %vm1346_vm13 = vcmp.lt.s32.totalorder %v7108_v58, 15  ;;  %vm7535_vm15 = vmand %vm7160_vm3, %vm9573_vm10 }
  0xbe   :  { %549 = vmatpush1.bf16.msra.mxu1 %v502_v32  ;;  %v1226_v28 = vsel %vm7373_vm4, %v1209_v34, 0.0  ;;  %580 = vmatprep.mubr.bf16.mxu1 %v9569_v57  ;;  %v6730_v13 = vunpack.i.l.bf16 %v7333_v55  ;;  %vm9591_vm7 = vcmp.lt.s32.totalorder %v7498_v38, 16  ;;  %v649_v19 = vsel %vm9574_vm11, %v641_v41, 0 }
  0xbf   :  { %5808 = vmatmul.mubr.msk.bf16.vlgmr.msra.gmra.mrb[0].mxu0 %vm9640_vm2, %v7468_v50  ;;  %v1233_v30 = vpack.c.bf16 %v1226_v28, %v1226_v28  ;;  %5792 = vmatprep.subr.msk.bf16.mxu1 %vm9574_vm11, %v642_v60  ;;  %vm9577_vm2 = vcmp.lt.s32.totalorder %v7108_v58, 14  ;;  %v603_v28 = vsel %vm601_vm8, %v6726_v14, %v7306_v33  ;;  %vm7555_vm8 = vmand %vm7367_vm0, %vm9591_vm7  ;;  %vm9576_vm10 = vcmp.lt.s32.totalorder %v7502_v48, 16  ;;  %v5811_v33 = vld [vmem:[%s9542_s3 + $0x38] sm:$0xff] }
  0xc0   :  { %1284 = vmatprep.mubr.bf16.mxu0 %v9569_v57  ;;  %v6749_v10 = vpop.permute.xlu0 %6748  ;;  %v6754_v32 = vpop.permute.xlu1 %6753  ;;  %v644_v57 = vpack.c.bf16 %v637_v42, %v637_v42  ;;  %v636_v44 = vsel %vm7535_vm15, %v603_v28, 0.0  ;;  %v7605_v21 = vpack.c.bf16 %v5811_v33, %v5811_v33  ;;  %vm1634_vm15 = vcmp.ge.s32.totalorder %v7135_v5, 0 }
  0xc1   :  { %v1241_v60 = vsel %vm9574_vm11, %v1233_v30, 0  ;;  %v6751_v0 = vunpack.i.h.bf16 %v6749_v10  ;;  %v6750_v35 = vunpack.i.l.bf16 %v6749_v10  ;;  %v6756_v30 = vunpack.i.h.bf16 %v6754_v32 }
  0xc2   :  { %1253 = vmatpush1.bf16.msra.mxu0 %v1241_v60  ;;  %v6755_v10 = vunpack.i.l.bf16 %v6754_v32  ;;  %vm9649_vm11 = vcmask 31744   ;;  %9654 = vst [vmem:[#allocation9_spill] sm:$0xff] %v7605_v21  ;;  %v7624_v33 = vadd.s32 2, %v7130_v3 }
  0xc3   :  { %v1350_v53 = vsel %vm1346_vm13, %v7491_v37, %v6750_v35  ;;  %v1349_v56 = vsel %vm1346_vm13, %v6750_v35, %v6751_v0  ;;  %v5791_v35 = vld [vmem:[%s9542_s3 + $0x18] sm:$0xff] }
  0xc4   :  { %v1367_v14 = vsel %vm7516_vm6, %v1350_v53, 0.0  ;;  %v1368_v41 = vsel %vm7527_vm5, %v1349_v56, 0.0  ;;  %v7567_v42 = vpop.permute.xlu0 %1342  ;;  %v1490_v60 = vsel %vm9577_vm2, %v6755_v10, %v6756_v30  ;;  %v9650_v56 = vunpack.i.h.bf16 %v7333_v55 }
  0xc5   :  { %5790 = vmatmul.mubr.msk.bf16.vlgmr.msra.gmra.mrb[4].mxu1 %vm9649_vm11, %v7433_v59  ;;  %v1374_v32 = vpack.c.bf16 %v1367_v14, %v1367_v14  ;;  %v1375_v50 = vpack.c.bf16 %v1368_v41, %v1368_v41  ;;  %v7579_v53 = vsel %vm1346_vm13, %v6751_v0, %v7567_v42  ;;  %vm776_vm11 = vmand %vm7185_vm12, %vm9591_vm7  ;;  %v7589_v59 = vpop.permute.xlu1 %1483  ;;  %v7594_v14 = vadd.s32 2, %v7146_v9 }
  0xc6   :  { %v757_v36 = vsel %vm754_vm9, %v6730_v13, %v9650_v56  ;;  %661 = vmatpush1.bf16.msra.mxu1 %v649_v19  ;;  %v9651_v0 = vmov 0   ;;  %v1509_v41 = vsel %vm7555_vm8, %v1490_v60, 0.0  ;;  %v7602_v56 = vsel %vm9577_vm2, %v6756_v30, %v7589_v59  ;;  %vm775_vm8 = vmand %vm7202_vm1, %vm9576_vm10 }
  0xc7   :  { %692 = vmatprep.mubr.bf16.mxu1 %v9651_v0  ;;  %9652 = vst [vmem:[#allocation8_spill] sm:$0xff] %v7602_v56  ;;  %vm9653_vm12 = vcmask 1041408   ;;  %v640_v34 = vpack.c.bf16 %v5791_v35, %v5791_v35  ;;  %v788_v9 = vsel %vm776_vm11, %v757_v36, 0.0  ;;  %vm1638_vm5 = vcmp.lt.s32.totalorder %v7135_v5, 16  ;;  %vm7632_vm1 = vmand %vm7373_vm4, %vm9576_vm10 }
  0xc8   :  { %5794 = vmatprep.subr.msk.bf16.mxu1 %vm9653_vm12, %v644_v57  ;;  %vm9655_vm6 = vmmov %vm9653_vm12  ;;  %v7608_v28 = vpop.permute.xlu0 %1485  ;;  %v643_v19 = vpack.c.bf16 %v636_v44, %v636_v44  ;;  %v758_v57 = vsel %vm754_vm9, %v7323_v39, %v6730_v13  ;;  %v1516_v30 = vpack.c.bf16 %v1509_v41, %v1509_v41  ;;  %vm9579_vm11 = vcmp.lt.s32.totalorder %v7594_v14, 16 }
  0xc9   :  { %5817 = vmatprep.subr.msk.bf16.mxu0 %vm9655_vm6, %v1375_v50  ;;  %vm9656_vm12 = vmmov %vm9655_vm6  ;;  %v7620_v20 = vpop.permute.xlu1 %1626  ;;  %vm9657_vm6 = vcmask 31744   ;;  %v795_v60 = vpack.c.bf16 %v788_v9, %v788_v9  ;;  %v1491_v13 = vsel %vm9577_vm2, %v7608_v28, %v6755_v10  ;;  %v787_v35 = vsel %vm775_vm8, %v758_v57, 0.0 }
  0xca   :  { %v1382_v50 = vsel %vm9656_vm12, %v1374_v32, 0  ;;  %vm9583_vm12 = vcmp.lt.s32.totalorder %v7108_v58, 2  ;;  %vm7653_vm10 = vmand %vm7195_vm14, %vm9579_vm11  ;;  %v755_v36 = vsel %vm754_vm9, %v7347_v51, %v7323_v39  ;;  %vm9664_vm8 = vcmask 31744   ;;  %v9743_v32 = vld [vmem:[#allocation7_spill] sm:$0xff] }
  0xcb   :  { %5813 = vmatmul.mubr.msk.bf16.vlgmr.msra.gmra.mrb[0].mxu0 %vm9657_vm6, %v7605_v21  ;;  %vm7645_vm6 = vmand %vm1634_vm15, %vm1638_vm5  ;;  %vm9665_vm2 = vcmask 1041408   ;;  %v1508_v23 = vsel %vm7632_vm1, %v1491_v13, 0.0  ;;  %vm9580_vm14 = vcmp.lt.s32.totalorder %v7624_v33, 16  ;;  %vm1637_vm1 = vcmp.lt.s32.totalorder %v7141_v7, 16 }
  0xcc   :  { %1394 = vmatpush1.bf16.msra.mxu0 %v1382_v50  ;;  %1425 = vmatprep.mubr.bf16.mxu0 %v9651_v0  ;;  %v6759_v3 = vpop.permute.xlu0 %6758  ;;  %v655_v44 = vsel %vm9665_vm2, %v643_v19, 0  ;;  %vm9666_vm15 = vmmov %vm9665_vm2  ;;  %v794_v50 = vpack.c.bf16 %v787_v35, %v787_v35  ;;  %v790_v19 = vsel %vm7653_vm10, %v755_v36, 0.0  ;;  %v6735_v35 = vunpack.i.l.bf16 %v7340_v45 }
  0xcd   :  { %5793 = vmatmul.mubr.msk.bf16.vlgmr.msra.gmra.mrb[0].mxu1 %vm9664_vm8, %v640_v34  ;;  %5822 = vmatprep.subr.msk.bf16.mxu0 %vm9666_vm15, %v1516_v30  ;;  %v6761_v41 = vunpack.i.h.bf16 %v6759_v3  ;;  %v6760_v9 = vunpack.i.l.bf16 %v6759_v3  ;;  %v7664_v57 = vpop.permute.xlu1 %6763  ;;  %vm9667_vm5 = vmmov %vm9665_vm2  ;;  %vm1633_vm8 = vcmp.ge.s32.totalorder %v7141_v7, 0  ;;  %vm9668_vm2 = vcmp.ge.s32.totalorder %v7191_v22, 0  ;;  %v5816_v30 = vld [vmem:[%s9542_s3 + $0x40] sm:$0xff] }
  0xce   :  { %702 = vmatpush1.bf16.msra.mxu1 %v655_v44  ;;  %733 = vmatprep.mubr.bf16.mxu1 %v9651_v0  ;;  %vm1646_vm15 = vmand %vm7645_vm6, %vm9668_vm2  ;;  %v6766_v25 = vunpack.i.h.bf16 %v7664_v57  ;;  %v1515_v3 = vpack.c.bf16 %v1508_v23, %v1508_v23  ;;  %vm907_vm10 = vcmp.lt.s32.totalorder %v7108_v58, 18  ;;  %v915_v44 = vadd.s32 4294967295, %v7139_v6 }
  0xcf   :  { %5797 = vmatprep.subr.msk.bf16.mxu1 %vm9667_vm5, %v795_v60  ;;  %v1631_v39 = vsel %vm9583_vm12, %v6760_v9, %v6761_v41  ;;  %vm1781_vm5 = vcmp.lt.s32.totalorder %v7108_v58, 1  ;;  %vm777_vm2 = vmand %vm7160_vm3, %vm9580_vm14  ;;  %v797_v13 = vpack.c.bf16 %v790_v19, %v790_v19  ;;  %vm9677_vm3 = vcmask 31744  }
  0xd0   :  { %v7684_v60 = vpop.permute.xlu0 %1624  ;;  %v1662_v56 = vsel %vm1646_vm15, %v1631_v39, 0.0  ;;  %vm9674_vm15 = vcmask 1041408   ;;  %vm7720_vm11 = vmand %vm1633_vm8, %vm1637_vm1  ;;  %vm923_vm8 = vcmp.lt.s32.totalorder %v915_v44, 16 }
  0xd1   :  { %v7693_v10 = vsel %vm9583_vm12, %v6761_v41, %v7684_v60  ;;  %v7695_v36 = vpop.permute.xlu1 %1777  ;;  %v9672_v41 = vunpack.i.h.bf16 %v7333_v55  ;;  %v802_v39 = vsel %vm9674_vm15, %v794_v50, 0  ;;  %vm9678_vm14 = vmmov %vm9674_vm15 }
  0xd2   :  { %9669 = vst [vmem:[#allocation10_spill] sm:$0xff] %v7693_v10  ;;  %9670 = vst [vmem:[#allocation11_spill] sm:$0xff] %v7695_v36  ;;  %v7702_v21 = vsel %vm1781_vm5, %v6766_v25, %v7695_v36  ;;  %v7713_v10 = vpack.c.bf16 %v5816_v30, %v5816_v30  ;;  %v1523_v55 = vsel %vm9678_vm14, %v1515_v3, 0  ;;  %v1669_v30 = vpack.c.bf16 %v1662_v56, %v1662_v56 }
  0xd3   :  { %9671 = vst [vmem:[#allocation12_spill] sm:$0xff] %v7702_v21  ;;  %v756_v23 = vsel %vm754_vm9, %v9672_v41, %v7347_v51  ;;  %v9679_v51 = vunpack.i.h.bf16 %v7340_v45  ;;  %vm9680_vm9 = vcmp.ge.s32.totalorder %v7191_v22, 0  ;;  %vm919_vm14 = vcmp.ge.s32.totalorder %v915_v44, 0  ;;  %vm9683_vm1 = vmmov %vm9677_vm3 }
  0xd4   :  { %9673 = vst [vmem:[#allocation13_spill] sm:$0xff] %v7713_v10  ;;  %v7724_v15 = vpop.permute.xlu0 %1779  ;;  %vm7736_vm15 = vmand %vm7367_vm0, %vm9680_vm9  ;;  %v789_v36 = vsel %vm777_vm2, %v756_v23, 0.0  ;;  %vm9684_vm0 = vcmask 1041408   ;;  %v1632_v56 = vsel %vm9583_vm12, %v7620_v20, %v6760_v9  ;;  %v6765_v3 = vunpack.i.l.bf16 %v7664_v57 }
  0xd5   :  { %5795 = vmatmul.mubr.msk.bf16.vlgmr.msra.gmra.mrb[4].mxu1 %vm9677_vm3, %v640_v34  ;;  %v910_v19 = vsel %vm907_vm10, %v6735_v35, %v9679_v51  ;;  %v7740_v41 = vpop.permute.xlu1 %2026  ;;  %v5796_v34 = vld [vmem:[%s9542_s3 + $0x20] sm:$0xff]  ;;  %vm9685_vm3 = vcmp.ge.s32.totalorder %v7207_v26, 0  ;;  %v914_v23 = vadd.s32 4294967295, %v7125_v63  ;;  %v796_v51 = vpack.c.bf16 %v789_v36, %v789_v36 }
  0xd6   :  { %814 = vmatpush1.bf16.msra.mxu1 %v802_v39  ;;  %845 = vmatprep.mubr.bf16.mxu1 %v9651_v0  ;;  %vm7753_vm9 = vmand %vm7720_vm11, %vm9685_vm3  ;;  %v911_v9 = vsel %vm907_vm10, %v7365_v4, %v6735_v35  ;;  %v793_v57 = vpack.c.bf16 %v5796_v34, %v5796_v34  ;;  %v1784_v50 = vsel %vm1781_vm5, %v6765_v3, %v6766_v25 }
  0xd7   :  { %5818 = vmatmul.mubr.msk.bf16.vlgmr.msra.gmra.mrb[0].mxu0 %vm9683_vm1, %v7713_v10  ;;  %5799 = vmatprep.subr.msk.bf16.mxu1 %vm9684_vm0, %v797_v13  ;;  %v945_v13 = vsel %vm7736_vm15, %v910_v19, 0.0  ;;  %vm9688_vm2 = vmmov %vm9685_vm3  ;;  %v1661_v36 = vsel %vm7753_vm9, %v1632_v56, 0.0  ;;  %vm9593_vm9 = vcmp.lt.s32.totalorder %v7108_v58, 127  ;;  %v908_v25 = vsel %vm907_vm10, %v7353_v61, %v7365_v4 }
  0xd8   :  { %1535 = vmatpush1.bf16.msra.mxu0 %v1523_v55  ;;  %1566 = vmatprep.mubr.bf16.mxu0 %v9651_v0  ;;  %v7765_v39 = vpop.permute.xlu0 %6768  ;;  %vm928_vm1 = vmand %vm7373_vm4, %vm9688_vm2  ;;  %v952_v24 = vpack.c.bf16 %v945_v13, %v945_v13  ;;  %vm9691_vm4 = vcmp.ge.s32.totalorder %v7166_v16, 0  ;;  %vm9695_vm2 = vcmp.ge.s32.totalorder %v7264_v47, 0  ;;  %v1668_v56 = vpack.c.bf16 %v1661_v36, %v1661_v36 }
  0xd9   :  { %5827 = vmatprep.subr.msk.bf16.mxu0 %vm9684_vm0, %v1669_v30  ;;  %v7775_v55 = vpop.permute.xlu1 %6773  ;;  %vm7779_vm15 = vmand %vm919_vm14, %vm923_vm8  ;;  %v944_v44 = vsel %vm928_vm1, %v911_v9, 0.0  ;;  %vm918_vm14 = vcmp.ge.s32.totalorder %v914_v23, 0  ;;  %vm922_vm8 = vcmp.lt.s32.totalorder %v914_v23, 16  ;;  %v5821_v30 = vld [vmem:[%s9542_s3 + $0x48] sm:$0xff]  ;;  %vm9696_vm1 = vcmask 31744  }
  0xda   :  { %vm7791_vm3 = vmand %vm7645_vm6, %vm9691_vm4  ;;  %vm9697_vm4 = vcmask 1041408   ;;  %v951_v4 = vpack.c.bf16 %v944_v44, %v944_v44  ;;  %v7828_v36 = vpack.c.bf16 %v5821_v30, %v5821_v30  ;;  %v9708_v44 = vunpack.i.h.bf16 %v7340_v45 }
  0xdb   :  { %vm931_vm0 = vmand %vm7779_vm15, %vm9695_vm2  ;;  %v808_v12 = vsel %vm9697_vm4, %v796_v51, 0  ;;  %v1803_v10 = vsel %vm7791_vm3, %v1784_v50, 0.0  ;;  %vm9705_vm3 = vcmp.ge.s32.totalorder %v7285_v11, 0 }
  0xdc   :  { %v7799_v34 = vpop.permute.xlu0 %2028  ;;  %vm7824_vm2 = vmand %vm918_vm14, %vm922_vm8  ;;  %v1810_v35 = vpack.c.bf16 %v1803_v10, %v1803_v10  ;;  %v909_v10 = vsel %vm907_vm10, %v9708_v44, %v7353_v61  ;;  %vm9712_vm10 = vcmp.ge.s32.totalorder %v7171_v17, 0 }
  0xdd   :  { %9694 = vst [vmem:[#allocation14_spill] sm:$0xff] %v7799_v34  ;;  %5798 = vmatmul.mubr.msk.bf16.vlgmr.msra.gmra.mrb[0].mxu1 %vm9696_vm1, %v793_v57  ;;  %v7815_v13 = vsel %vm9593_vm9, %v7740_v41, %v7799_v34  ;;  %v7817_v9 = vpop.permute.xlu1 %2169  ;;  %vm9702_vm1 = vmmov %vm9697_vm4  ;;  %vm9596_vm4 = vcmp.lt.s32.totalorder %v7108_v58, 126 }
  0xde   :  { %9698 = vst [vmem:[#allocation15_spill] sm:$0xff] %v7815_v13  ;;  %9699 = vst [vmem:[#allocation16_spill] sm:$0xff] %v7817_v9  ;;  %855 = vmatpush1.bf16.msra.mxu1 %v808_v12  ;;  %886 = vmatprep.mubr.bf16.mxu1 %v9651_v0  ;;  %v947_v13 = vsel %vm931_vm0, %v908_v25, 0.0  ;;  %vm9711_vm0 = vcmp.ge.s32.totalorder %v7175_v18, 0 }
  0xdf   :  { %5802 = vmatprep.subr.msk.bf16.mxu1 %vm9702_vm1, %v952_v24  ;;  %vm9703_vm12 = vmmov %vm9702_vm1  ;;  %v954_v30 = vpack.c.bf16 %v947_v13, %v947_v13  ;;  %v9718_v24 = vunpack.i.h.bf16 %v7393_v29 }
  0xe0   :  { %v7832_v12 = vpop.permute.xlu0 %2167  ;;  %v1676_v34 = vsel %vm9703_vm12, %v1668_v56, 0  ;;  %vm7847_vm14 = vmand %vm7824_vm2, %vm9705_vm3  ;;  %vm9709_vm12 = vcmask 31744   ;;  %v1785_v56 = vsel %vm1781_vm5, %v7724_v15, %v6765_v3  ;;  %v5801_v3 = vld [vmem:[%s9542_s3 + $0x28] sm:$0xff] }
  0xe1   :  { %v7839_v23 = vsel %vm9596_vm4, %v7832_v12, %v7817_v9  ;;  %v7841_v50 = vpop.permute.xlu1 %2308  ;;  %vm9710_vm8 = vmmov %vm9702_vm1  ;;  %v946_v13 = vsel %vm7847_vm14, %v909_v10, 0.0  ;;  %v950_v44 = vpack.c.bf16 %v5801_v3, %v5801_v3  ;;  %v1918_v9 = vpack.c.bf16 %v7020_v54, %v7020_v54 }
  0xe2   :  { %9704 = vst [vmem:[#allocation17_spill] sm:$0xff] %v7839_v23  ;;  %v959_v25 = vsel %vm9710_vm8, %v951_v4, 0  ;;  %vm1786_vm1 = vmand %vm7720_vm11, %vm9711_vm0  ;;  %vm9714_vm8 = vcmask 31744   ;;  %vm9715_vm0 = vcmask 1041408   ;;  %v953_v23 = vpack.c.bf16 %v946_v13, %v946_v13 }
  0xe3   :  { %5823 = vmatmul.mubr.msk.bf16.vlgmr.msra.gmra.mrb[0].mxu0 %vm9709_vm12, %v7828_v36  ;;  %vm1072_vm3 = vmand %vm7779_vm15, %vm9712_vm10  ;;  %vm9713_vm12 = vcmp.lt.s32.totalorder %v7108_v58, 17  ;;  %v1802_v4 = vsel %vm1786_vm1, %v1785_v56, 0.0  ;;  %vm9719_vm1 = vcmp.lt.s32.totalorder %v7108_v58, 17 }
  0xe4   :  { %1688 = vmatpush1.bf16.msra.mxu0 %v1676_v34  ;;  %1719 = vmatprep.mubr.bf16.mxu0 %v9651_v0  ;;  %v7867_v45 = vpop.permute.xlu0 %6778  ;;  %v1065_v61 = vsel %vm9713_vm12, %v7439_v1, %v7377_v27  ;;  %vm9716_vm10 = vmmov %vm9715_vm0  ;;  %vm2312_vm12 = vcmp.lt.s32.totalorder %v7108_v58, 114  ;;  %v1066_v10 = vsel %vm9719_vm1, %v9718_v24, %v7439_v1 }
  0xe5   :  { %5800 = vmatmul.mubr.msk.bf16.vlgmr.msra.gmra.mrb[4].mxu1 %vm9714_vm8, %v793_v57  ;;  %5832 = vmatprep.subr.msk.bf16.mxu0 %vm9715_vm0, %v1810_v35  ;;  %v7882_v34 = vpop.permute.xlu1 %6783  ;;  %v1088_v27 = vsel %vm1072_vm3, %v1065_v61, 0.0  ;;  %v5826_v57 = vld [vmem:[%s9542_s3 + $0x50] sm:$0xff]  ;;  %vm9717_vm8 = vcmp.ge.s32.totalorder %v7144_v8, 0  ;;  %vm2469_vm3 = vcmp.lt.s32.totalorder %v7108_v58, 113  ;;  %vm9721_vm0 = vcmp.lt.s32.totalorder %v7108_v58, 16 }
  0xe6   :  { %971 = vmatpush1.bf16.msra.mxu1 %v959_v25  ;;  %1002 = vmatprep.mubr.bf16.mxu1 %v9651_v0  ;;  %vm1071_vm14 = vmand %vm7824_vm2, %vm9717_vm8  ;;  %v1095_v61 = vpack.c.bf16 %v1088_v27, %v1088_v27  ;;  %v7911_v3 = vpack.c.bf16 %v5826_v57, %v5826_v57  ;;  %v1206_v1 = vsel %vm9721_vm0, %v7453_v31, %v7470_v40  ;;  %vm9723_vm8 = vcmask 1041408  }
  0xe7   :  { %5804 = vmatprep.subr.msk.bf16.mxu1 %vm9716_vm10, %v954_v30  ;;  %v1809_v30 = vpack.c.bf16 %v1802_v4, %v1802_v4  ;;  %v1087_v13 = vsel %vm1071_vm14, %v1066_v10, 0.0  ;;  %vm9722_vm10 = vcmask 31744   ;;  %v965_v4 = vsel %vm9723_vm8, %v953_v23, 0  ;;  %vm9724_vm1 = vmmov %vm9723_vm8 }
  0xe8   :  { %v7892_v35 = vpop.permute.xlu0 %2310  ;;  %v1094_v24 = vpack.c.bf16 %v1087_v13, %v1087_v13  ;;  %vm9726_vm14 = vmmov %vm9722_vm10  ;;  %v6771_v40 = vunpack.i.h.bf16 %v7765_v39  ;;  %v1229_v31 = vsel %vm7779_vm15, %v1206_v1, 0.0  ;;  %v5831_v1 = vld [vmem:[%s9542_s3 + $0x58] sm:$0xff] }
  0xe9   :  { %v7907_v25 = vsel %vm2312_vm12, %v7841_v50, %v7892_v35  ;;  %v7909_v56 = vpop.permute.xlu1 %2467  ;;  %v1817_v27 = vsel %vm9724_vm1, %v1809_v30, 0  ;;  %vm9727_vm0 = vmmov %vm9724_vm1  ;;  %v1236_v30 = vpack.c.bf16 %v1229_v31, %v1229_v31  ;;  %vm9730_vm1 = vcmp.lt.s32.totalorder %v7357_v62, 16 }
  0xea   :  { %9720 = vst [vmem:[#allocation18_spill] sm:$0xff] %v7909_v56  ;;  %vm9729_vm8 = vmmov %vm9727_vm0  ;;  %v7972_v31 = vpack.c.bf16 %v5831_v1, %v5831_v1 }
  0xeb   :  { %v1106_v13 = vsel %vm9729_vm8, %v1094_v24, 0 }
  0xec   :  { %v7916_v29 = vpop.permute.xlu0 %2465 }
  0xed   :  { %5803 = vmatmul.mubr.msk.bf16.vlgmr.msra.gmra.mrb[0].mxu1 %vm9722_vm10, %v950_v44  ;;  %v7929_v54 = vsel %vm2469_vm3, %v7916_v29, %v7909_v56  ;;  %v7931_v57 = vpop.permute.xlu1 %2606  ;;  %vm9728_vm10 = vmmov %vm9727_vm0 }
  0xee   :  { %9725 = vst [vmem:[#allocation19_spill] sm:$0xff] %v7929_v54  ;;  %1012 = vmatpush1.bf16.msra.mxu1 %v965_v4  ;;  %1043 = vmatprep.mubr.bf16.mxu1 %v9651_v0  ;;  %v1917_v4 = vpack.c.bf16 %v7014_v52, %v7014_v52  ;;  %v1228_v52 = vsel %vm7824_vm2, %v7464_v43, 0.0  ;;  %v9595_v54 = vunpack.i.l.bf16 %v7775_v55 }
  0xef   :  { %5828 = vmatmul.mubr.msk.bf16.vlgmr.msra.gmra.mrb[0].mxu0 %vm9726_vm14, %v7911_v3  ;;  %5809 = vmatprep.subr.msk.bf16.mxu1 %vm9727_vm0, %v1095_v61  ;;  %vm2040_vm14 = vmand %vm7645_vm6, %vm9730_vm1  ;;  %v2032_v61 = vsel %vm9593_vm9, %v6771_v40, %v7740_v41  ;;  %vm9587_vm0 = vcmp.lt.s32.totalorder %v7108_v58, 112  ;;  %vm9606_vm1 = vcmp.lt.s32.totalorder %v7108_v58, 111  ;;  %v1235_v1 = vpack.c.bf16 %v1228_v52, %v1228_v52 }
  0xf0   :  { %1829 = vmatpush1.bf16.msra.mxu0 %v1817_v27  ;;  %1860 = vmatprep.mubr.bf16.mxu0 %v9651_v0  ;;  %v7941_v23 = vpop.permute.xlu0 %6788  ;;  %v2052_v24 = vsel %vm2040_vm14, %v2032_v61, 0.0  ;;  %vm9736_vm14 = vmmov %vm9729_vm8 }
  0xf1   :  { %5837 = vmatprep.subr.msk.bf16.mxu0 %vm9728_vm10, %v1918_v9  ;;  %v7944_v10 = vpop.permute.xlu1 %6793  ;;  %vm9732_vm10 = vcmask 31744   ;;  %v2059_v61 = vpack.c.bf16 %v2052_v24, %v2052_v24 }
  0xf4   :  { %v7958_v9 = vpop.permute.xlu0 %2608 }
  0xf5   :  { %9731 = vst [vmem:[#allocation20_spill] sm:$0xff] %v7958_v9  ;;  %5805 = vmatmul.mubr.msk.bf16.vlgmr.msra.gmra.mrb[4].mxu1 %vm9732_vm10, %v950_v44  ;;  %v7967_v27 = vsel %vm9587_vm0, %v7931_v57, %v7958_v9  ;;  %v7969_v41 = vpop.permute.xlu1 %2749  ;;  %v9588_v44 = vunpack.i.l.bf16 %v7765_v39  ;;  %vm9735_vm10 = vcmp.lt.s32.totalorder %v7422_v46, 16 }
  0xf6   :  { %9733 = vst [vmem:[#allocation21_spill] sm:$0xff] %v7967_v27  ;;  %9734 = vst [vmem:[#allocation22_spill] sm:$0xff] %v7969_v41  ;;  %1153 = vmatpush1.bf16.msra.mxu1 %v1106_v13  ;;  %1184 = vmatprep.mubr.bf16.mxu1 %v9651_v0  ;;  %v1925_v13 = vsel %vm9736_vm14, %v1917_v4, 0 }
  0xf7   :  { %5814 = vmatprep.subr.msk.bf16.mxu1 %vm9729_vm8, %v1236_v30  ;;  %vm1358_vm0 = vmand %vm7779_vm15, %vm9735_vm10  ;;  %v1347_v30 = vsel %vm1346_vm13, %v7567_v42, %v7491_v37  ;;  %vm9738_vm8 = vcmask 31744   ;;  %v2033_v27 = vsel %vm9593_vm9, %v9588_v44, %v6771_v40  ;;  %vm9739_vm13 = vcmp.lt.s32.totalorder %v7363_v2, 16  ;;  %v5836_v44 = vld [vmem:[%s9542_s3 + $0x60] sm:$0xff] }
  0xf8   :  { %v7980_v9 = vpop.permute.xlu0 %2747  ;;  %vm2039_vm10 = vmand %vm7720_vm11, %vm9739_vm13  ;;  %v6776_v37 = vunpack.i.h.bf16 %v7775_v55  ;;  %v1370_v4 = vsel %vm1358_vm0, %v1347_v30, 0.0  ;;  %vm9592_vm0 = vcmp.lt.s32.totalorder %v7108_v58, 110  ;;  %vm9749_vm9 = vcmask 1041408  }
  0xf9   :  { %v7995_v43 = vsel %vm9606_vm1, %v7980_v9, %v7969_v41  ;;  %v8008_v42 = vpop.permute.xlu1 %2888  ;;  %v2051_v52 = vsel %vm2039_vm10, %v2033_v27, 0.0  ;;  %vm2181_vm13 = vmand %vm7645_vm6, %vm9591_vm7  ;;  %v2318_v27 = vadd.s32 1, %v7135_v5  ;;  %vm9742_vm10 = vcmp.lt.s32.totalorder %v7456_v49, 16 }
  0xfa   :  { %9737 = vst [vmem:[#allocation23_spill] sm:$0xff] %v7995_v43  ;;  %v1377_v43 = vpack.c.bf16 %v1370_v4, %v1370_v4  ;;  %v2173_v30 = vsel %vm9596_vm4, %v6776_v37, %v7832_v12  ;;  %vm1357_vm6 = vmand %vm7824_vm2, %vm9742_vm10  ;;  %v2058_v12 = vpack.c.bf16 %v2051_v52, %v2051_v52  ;;  %v8044_v41 = vpack.c.bf16 %v5836_v44, %v5836_v44 }
  0xfb   :  { %5833 = vmatmul.mubr.msk.bf16.vlgmr.msra.gmra.mrb[0].mxu0 %vm9738_vm8, %v7972_v31  ;;  %vm9740_vm8 = vmmov %vm9736_vm14  ;;  %v2193_v4 = vsel %vm2181_vm13, %v2173_v30, 0.0  ;;  %v1369_v52 = vsel %vm1357_vm6, %v7579_v53, 0.0  ;;  %vm2322_vm10 = vcmp.ge.s32.totalorder %v2318_v27, 0  ;;  %vm9594_vm7 = vcmp.lt.s32.totalorder %v7108_v58, 98 }
  0xfc   :  { %1937 = vmatpush1.bf16.msra.mxu0 %v1925_v13  ;;  %1968 = vmatprep.mubr.bf16.mxu0 %v9651_v0  ;;  %v8011_v24 = vpop.permute.xlu0 %6798  ;;  %v1247_v40 = vsel %vm9740_vm8, %v1235_v1, 0  ;;  %v1376_v30 = vpack.c.bf16 %v1369_v52, %v1369_v52  ;;  %vm9751_vm6 = vcmask 31744   ;;  %v2174_v19 = vsel %vm9596_vm4, %v9595_v54, %v6776_v37 }
  0xfd   :  { %5842 = vmatprep.subr.msk.bf16.mxu0 %vm9736_vm14, %v2059_v61  ;;  %v8022_v13 = vpop.permute.xlu1 %6803  ;;  %vm9744_vm14 = vcmask 31744   ;;  %v2317_v37 = vadd.s32 1, %v7141_v7 }
 0x100   :  { %v8029_v61 = vpop.permute.xlu0 %2890 }
 0x101   :  { %9741 = vst [vmem:[#allocation24_spill] sm:$0xff] %v8029_v61  ;;  %5810 = vmatmul.mubr.msk.bf16.vlgmr.msra.gmra.mrb[4].mxu1 %vm9744_vm14, %v9743_v32  ;;  %v8041_v1 = vsel %vm9592_vm0, %v8008_v42, %v8029_v61  ;;  %v8048_v56 = vpop.permute.xlu1 %3031  ;;  %vm2326_vm14 = vcmp.lt.s32.totalorder %v2318_v27, 16  ;;  %vm9747_vm0 = vcmp.lt.s32.totalorder %v7594_v14, 16 }
 0x102   :  { %9745 = vst [vmem:[#allocation7_spill] sm:$0xff] %v8041_v1  ;;  %1294 = vmatpush1.bf16.msra.mxu1 %v1247_v40  ;;  %1325 = vmatprep.mubr.bf16.mxu1 %v9651_v0  ;;  %9746 = vst [vmem:[#allocation25_spill] sm:$0xff] %v8048_v56  ;;  %v2200_v40 = vpack.c.bf16 %v2193_v4, %v2193_v4 }
 0x103   :  { %5819 = vmatprep.subr.msk.bf16.mxu1 %vm9740_vm8, %v1377_v43  ;;  %vm1499_vm13 = vmand %vm7779_vm15, %vm9747_vm0  ;;  %vm9748_vm8 = vcmp.lt.s32.totalorder %v7108_v58, 14  ;;  %v2066_v43 = vsel %vm9749_vm9, %v2058_v12, 0  ;;  %vm9752_vm15 = vcmp.lt.s32.totalorder %v7502_v48, 16  ;;  %v3039_v12 = vadd.s32 2, %v7135_v5 }
 0x104   :  { %v8052_v32 = vpop.permute.xlu0 %3029  ;;  %v1488_v44 = vsel %vm9748_vm8, %v7589_v59, %v7608_v28  ;;  %vm2180_vm9 = vmand %vm7720_vm11, %vm9752_vm15  ;;  %v6781_v59 = vunpack.i.h.bf16 %v7867_v45  ;;  %vm9755_vm8 = vcmask 1041408   ;;  %vm1636_vm11 = vcmp.ge.s32.totalorder %v7139_v6, 0 }
 0x105   :  { %v8067_v53 = vsel %vm9594_vm7, %v8052_v32, %v8048_v56  ;;  %v1511_v28 = vsel %vm1499_vm13, %v1488_v44, 0.0  ;;  %vm8083_vm0 = vmand %vm2322_vm10, %vm2326_vm14  ;;  %v8091_v21 = vpop.permute.xlu1 %3186  ;;  %v2192_v52 = vsel %vm2180_vm9, %v2174_v19, 0.0  ;;  %vm1640_vm13 = vcmp.lt.s32.totalorder %v7139_v6, 16 }
 0x106   :  { %9750 = vst [vmem:[#allocation26_spill] sm:$0xff] %v8067_v53  ;;  %v1518_v44 = vpack.c.bf16 %v1511_v28, %v1511_v28  ;;  %vm9757_vm10 = vcmp.ge.s32.totalorder %v7191_v22, 0  ;;  %vm3190_vm15 = vcmp.lt.s32.totalorder %v7108_v58, 97  ;;  %vm9759_vm9 = vcmp.lt.s32.totalorder %v7624_v33, 16  ;;  %vm8125_vm4 = vmand %vm1636_vm11, %vm1640_vm13 }
 0x107   :  { %5838 = vmatmul.mubr.msk.bf16.vlgmr.msra.gmra.mrb[0].mxu0 %vm9751_vm6, %v8044_v41  ;;  %vm9756_vm6 = vmmov %vm9755_vm8  ;;  %v2199_v28 = vpack.c.bf16 %v2192_v52, %v2192_v52  ;;  %vm2325_vm7 = vcmp.lt.s32.totalorder %v2317_v37, 16  ;;  %vm9769_vm11 = vcmp.ge.s32.totalorder %v7264_v47, 0  ;;  %v6806_v53 = vunpack.i.h.bf16 %v8022_v13 }
 0x108   :  { %2078 = vmatpush1.bf16.msra.mxu0 %v2066_v43  ;;  %2109 = vmatprep.mubr.bf16.mxu0 %v9651_v0  ;;  %v8087_v4 = vpop.permute.xlu0 %6808  ;;  %v1388_v27 = vsel %vm9756_vm6, %v1376_v30, 0  ;;  %vm2334_vm14 = vmand %vm8083_vm0, %vm9757_vm10  ;;  %v2314_v43 = vsel %vm2312_vm12, %v6781_v59, %v7841_v50  ;;  %v9760_v30 = vld [vmem:[#allocation9_spill] sm:$0xff]  ;;  %vm9761_vm6 = vcmask 31744   ;;  %vm2321_vm10 = vcmp.ge.s32.totalorder %v2317_v37, 0 }
 0x109   :  { %5847 = vmatprep.subr.msk.bf16.mxu0 %vm9755_vm8, %v2200_v40  ;;  %v5841_v40 = vld [vmem:[%s9542_s3 + $0x68] sm:$0xff]  ;;  %vm1498_vm8 = vmand %vm7824_vm2, %vm9759_vm9  ;;  %v8121_v54 = vpop.permute.xlu1 %6813  ;;  %v2350_v51 = vsel %vm2334_vm14, %v2314_v43, 0.0  ;;  %vm9765_vm2 = vcmask 1041408   ;;  %vm9770_vm14 = vcmp.lt.s32.totalorder %v7108_v58, 2 }
 0x10a   :  { %v8130_v52 = vpack.c.bf16 %v5841_v40, %v5841_v40  ;;  %vm8135_vm9 = vmand %vm2321_vm10, %vm2325_vm7  ;;  %v2357_v43 = vpack.c.bf16 %v2350_v51, %v2350_v51  ;;  %vm1635_vm7 = vcmp.ge.s32.totalorder %v7125_v63, 0  ;;  %vm9774_vm10 = vcmask 31744  }
 0x10b   :  { %vm1648_vm13 = vmand %vm8125_vm4, %vm9769_vm11  ;;  %vm9776_vm11 = vcmp.ge.s32.totalorder %v7207_v26, 0 }
 0x10c   :  { %v8107_v19 = vpop.permute.xlu0 %3188 }
 0x10d   :  { %9758 = vst [vmem:[#allocation27_spill] sm:$0xff] %v8107_v19  ;;  %5815 = vmatmul.mubr.msk.bf16.vlgmr.msra.gmra.mrb[4].mxu1 %vm9761_vm6, %v9760_v30  ;;  %v8119_v50 = vsel %vm3190_vm15, %v8091_v21, %v8107_v19  ;;  %v9766_v30 = vld [vmem:[#allocation8_spill] sm:$0xff]  ;;  %vm9771_vm6 = vmmov %vm9765_vm2 }
 0x10e   :  { %9762 = vst [vmem:[#allocation9_spill] sm:$0xff] %v8119_v50  ;;  %1435 = vmatpush1.bf16.msra.mxu1 %v1388_v27  ;;  %1466 = vmatprep.mubr.bf16.mxu1 %v9651_v0  ;;  %v1510_v50 = vsel %vm1498_vm8, %v9766_v30, 0.0  ;;  %v1629_v27 = vsel %vm9770_vm14, %v7684_v60, %v7620_v20  ;;  %v8151_v30 = vpop.permute.xlu1 %3329  ;;  %vm1639_vm8 = vcmp.lt.s32.totalorder %v7125_v63, 16  ;;  %v9775_v20 = vunpack.i.l.bf16 %v7867_v45  ;;  %vm2333_vm14 = vmand %vm8135_vm9, %vm9776_vm11 }
 0x10f   :  { %5824 = vmatprep.subr.msk.bf16.mxu1 %vm9765_vm2, %v1518_v44  ;;  %v2207_v44 = vsel %vm9771_vm6, %v2199_v28, 0  ;;  %vm9599_vm2 = vcmp.lt.s32.totalorder %v7108_v58, 96  ;;  %9772 = vst [vmem:[#allocation8_spill] sm:$0xff] %v8151_v30  ;;  %v1517_v56 = vpack.c.bf16 %v1510_v50, %v1510_v50  ;;  %v6786_v28 = vunpack.i.h.bf16 %v7882_v34 }
 0x110   :  { %v2315_v60 = vsel %vm2312_vm12, %v9775_v20, %v6781_v59  ;;  %v1664_v51 = vsel %vm1648_vm13, %v1629_v27, 0.0  ;;  %vm9781_vm11 = vcmp.ge.s32.totalorder %v7166_v16, 0 }
 0x111   :  { %v8149_v40 = vpop.permute.xlu0 %3327  ;;  %v2349_v59 = vsel %vm2333_vm14, %v2315_v60, 0.0  ;;  %v1671_v20 = vpack.c.bf16 %v1664_v51, %v1664_v51  ;;  %vm2475_vm13 = vmand %vm8083_vm0, %vm9781_vm11  ;;  %v2471_v27 = vsel %vm2469_vm3, %v6786_v28, %v7916_v29  ;;  %vm3472_vm14 = vcmp.lt.s32.totalorder %v7108_v58, 95 }
 0x112   :  { %v8158_v37 = vsel %vm9599_vm2, %v8149_v40, %v8151_v30  ;;  %vm9780_vm2 = vmmov %vm9771_vm6  ;;  %v8198_v60 = vpop.permute.xlu1 %3468  ;;  %v2491_v29 = vsel %vm2475_vm13, %v2471_v27, 0.0  ;;  %vm9789_vm11 = vcmp.ge.s32.totalorder %v7171_v17, 0 }
 0x113   :  { %9773 = vst [vmem:[#allocation28_spill] sm:$0xff] %v8158_v37  ;;  %5843 = vmatmul.mubr.msk.bf16.vlgmr.msra.gmra.mrb[0].mxu0 %vm9774_vm10, %v8130_v52  ;;  %vm8176_vm10 = vmand %vm1635_vm7, %vm1639_vm8  ;;  %v1529_v30 = vsel %vm9780_vm2, %v1517_v56, 0  ;;  %vm9782_vm7 = vcmp.ge.s32.totalorder %v7285_v11, 0  ;;  %vm9784_vm2 = vcmask 31744   ;;  %v2356_v56 = vpack.c.bf16 %v2349_v59, %v2349_v59 }
 0x114   :  { %2219 = vmatpush1.bf16.msra.mxu0 %v2207_v44  ;;  %2250 = vmatprep.mubr.bf16.mxu0 %v9651_v0  ;;  %v5846_v44 = vld [vmem:[%s9542_s3 + $0x70] sm:$0xff]  ;;  %vm1647_vm8 = vmand %vm8176_vm10, %vm9782_vm7  ;;  %v9604_v59 = vunpack.i.l.bf16 %v7882_v34  ;;  %v6805_v37 = vunpack.i.l.bf16 %v8022_v13 }
 0x115   :  { %5852 = vmatprep.subr.msk.bf16.mxu0 %vm9771_vm6, %v2357_v43  ;;  %v8174_v50 = vpop.permute.xlu0 %6818  ;;  %v9783_v43 = vld [vmem:[#allocation13_spill] sm:$0xff]  ;;  %v8209_v61 = vpack.c.bf16 %v5846_v44, %v5846_v44  ;;  %vm1789_vm7 = vmand %vm8125_vm4, %vm9789_vm11  ;;  %v2498_v44 = vpack.c.bf16 %v2491_v29, %v2491_v29 }
 0x116   :  { %9777 = vst [vmem:[#allocation29_spill] sm:$0xff] %v8174_v50  ;;  %9785 = vst [vmem:[#allocation13_spill] sm:$0xff] %v8198_v60 }
 0x117   :  { %vm9791_vm13 = vmmov %vm9771_vm6 }
 0x119   :  { %5820 = vmatmul.mubr.msk.bf16.vlgmr.msra.gmra.mrb[4].mxu1 %vm9784_vm2, %v9783_v43  ;;  %v8200_v51 = vpop.permute.xlu0 %3470  ;;  %v9788_v43 = vld [vmem:[#allocation10_spill] sm:$0xff] }
 0x11a   :  { %9786 = vst [vmem:[#allocation30_spill] sm:$0xff] %v8200_v51  ;;  %1576 = vmatpush1.bf16.msra.mxu1 %v1529_v30  ;;  %1607 = vmatprep.mubr.bf16.mxu1 %v9651_v0  ;;  %v8207_v1 = vsel %vm3472_vm14, %v8198_v60, %v8200_v51  ;;  %v1663_v50 = vsel %vm1647_vm8, %v9788_v43, 0.0  ;;  %v9790_v30 = vld [vmem:[#allocation11_spill] sm:$0xff]  ;;  %vm9792_vm8 = vcmp.ge.s32.totalorder %v7175_v18, 0  ;;  %v6791_v43 = vunpack.i.h.bf16 %v7941_v23 }
 0x11b   :  { %9787 = vst [vmem:[#allocation31_spill] sm:$0xff] %v8207_v1  ;;  %5829 = vmatprep.subr.msk.bf16.mxu1 %vm9771_vm6, %v1671_v20  ;;  %v1782_v27 = vsel %vm1781_vm5, %v9790_v30, %v7724_v15  ;;  %v2364_v1 = vsel %vm9791_vm13, %v2356_v56, 0  ;;  %v1670_v51 = vpack.c.bf16 %v1663_v50, %v1663_v50  ;;  %v2472_v20 = vsel %vm2469_vm3, %v9604_v59, %v6786_v28  ;;  %vm2474_vm6 = vmand %vm8135_vm9, %vm9792_vm8  ;;  %v5851_v30 = vld [vmem:[%s9542_s3 + $0x78] sm:$0xff] }
 0x11c   :  { %v1805_v15 = vsel %vm1789_vm7, %v1782_v27, 0.0  ;;  %vm9793_vm5 = vmmov %vm9791_vm13  ;;  %v2490_v50 = vsel %vm2474_vm6, %v2472_v20, 0.0  ;;  %vm9795_vm13 = vcmp.lt.s32.totalorder %v7108_v58, 112  ;;  %vm9797_vm8 = vcmask 31744  }
 0x11d   :  { %v1812_v56 = vpack.c.bf16 %v1805_v15, %v1805_v15  ;;  %vm9794_vm11 = vmmov %vm9793_vm5  ;;  %v2612_v28 = vsel %vm9795_vm13, %v6791_v43, %v7931_v57  ;;  %v8252_v57 = vpack.c.bf16 %v5851_v30, %v5851_v30  ;;  %v6790_v27 = vunpack.i.l.bf16 %v7941_v23 }
 0x11e   :  { %v1682_v29 = vsel %vm9794_vm11, %v1670_v51, 0  ;;  %v2632_v51 = vsel %vm8083_vm0, %v2612_v28, 0.0  ;;  %vm9798_vm6 = vmmov %vm9793_vm5  ;;  %v9803_v28 = vld [vmem:[#allocation6_spill] sm:$0xff] }
 0x11f   :  { %5848 = vmatmul.mubr.msk.bf16.vlgmr.msra.gmra.mrb[0].mxu0 %vm9784_vm2, %v8209_v61  ;;  %vm9796_vm2 = vcmp.ge.s32.totalorder %v7144_v8, 0  ;;  %v2639_v59 = vpack.c.bf16 %v2632_v51, %v2632_v51  ;;  %vm9800_vm11 = vmmov %vm9797_vm8  ;;  %v1920_v30 = vpack.c.bf16 %v9803_v28, %v9803_v28 }
 0x120   :  { %2376 = vmatpush1.bf16.msra.mxu0 %v2364_v1  ;;  %2407 = vmatprep.mubr.bf16.mxu0 %v9651_v0  ;;  %vm1788_vm7 = vmand %vm8176_vm10, %vm9796_vm2  ;;  %v2497_v1 = vpack.c.bf16 %v2490_v50, %v2490_v50  ;;  %v6796_v50 = vunpack.i.h.bf16 %v7944_v10 }
 0x121   :  { %5857 = vmatprep.subr.msk.bf16.mxu0 %vm9793_vm5, %v2498_v44  ;;  %v9799_v44 = vld [vmem:[#allocation12_spill] sm:$0xff]  ;;  %vm9801_vm2 = vmmov %vm9793_vm5 }
 0x122   :  { %v1804_v20 = vsel %vm1788_vm7, %v9799_v44, 0.0  ;;  %v2505_v15 = vsel %vm9793_vm5, %v2497_v1, 0  ;;  %vm9802_vm7 = vmmov %vm9801_vm2  ;;  %v6795_v44 = vunpack.i.l.bf16 %v7944_v10 }
 0x123   :  { %v1811_v60 = vpack.c.bf16 %v1804_v20, %v1804_v20  ;;  %vm9805_vm5 = vmmov %vm9800_vm11  ;;  %v9809_v20 = vld [vmem:[#allocation14_spill] sm:$0xff] }
 0x124   :  { %v2754_v28 = vsel %vm9606_vm1, %v6795_v44, %v6796_v50 }
 0x125   :  { %5825 = vmatmul.mubr.msk.bf16.vlgmr.msra.gmra.mrb[4].mxu1 %vm9797_vm8, %v7828_v36  ;;  %v2613_v36 = vsel %vm9795_vm13, %v6790_v27, %v6791_v43  ;;  %vm9804_vm8 = vcmp.lt.s32.totalorder %v7357_v62, 16  ;;  %v2753_v43 = vsel %vm9606_vm1, %v6796_v50, %v7980_v9  ;;  %vm9807_vm13 = vcmp.lt.s32.totalorder %v7422_v46, 16 }
 0x126   :  { %1729 = vmatpush1.bf16.msra.mxu1 %v1682_v29  ;;  %1760 = vmatprep.mubr.bf16.mxu1 %v9651_v0  ;;  %v1823_v29 = vsel %vm9802_vm7, %v1811_v60, 0  ;;  %v9808_v9 = vunpack.i.l.bf16 %v7765_v39  ;;  %vm9810_vm7 = vcmp.lt.s32.totalorder %v7108_v58, 127  ;;  %v6801_v39 = vunpack.i.h.bf16 %v8011_v24 }
 0x127   :  { %5834 = vmatprep.subr.msk.bf16.mxu1 %vm9798_vm6, %v1812_v56  ;;  %v2631_v56 = vsel %vm8135_vm9, %v2613_v36, 0.0  ;;  %vm2761_vm6 = vmand %vm8083_vm0, %vm9804_vm8 }
 0x128   :  { %v2638_v60 = vpack.c.bf16 %v2631_v56, %v2631_v56  ;;  %v2773_v1 = vsel %vm2761_vm6, %v2753_v43, 0.0  ;;  %vm9812_vm6 = vmmov %vm9805_vm5  ;;  %v9813_v56 = vld [vmem:[#allocation5_spill] sm:$0xff] }
 0x129   :  { %v2780_v36 = vpack.c.bf16 %v2773_v1, %v2773_v1  ;;  %v5861_v1 = vld [vmem:[%s9542_s3 + $0x88] sm:$0xff] }
 0x12b   :  { %5853 = vmatmul.mubr.msk.bf16.vlgmr.msra.gmra.mrb[0].mxu0 %vm9800_vm11, %v8252_v57  ;;  %vm9806_vm11 = vmmov %vm9801_vm2 }
 0x12c   :  { %2517 = vmatpush1.bf16.msra.mxu0 %v2505_v15  ;;  %2548 = vmatprep.mubr.bf16.mxu0 %v9651_v0  ;;  %vm9811_vm8 = vmmov %vm9806_vm11 }
 0x12d   :  { %5862 = vmatprep.subr.msk.bf16.mxu0 %vm9801_vm2, %v2639_v59  ;;  %v5856_v59 = vld [vmem:[%s9542_s3 + $0x80] sm:$0xff]  ;;  %vm2042_vm2 = vmand %vm8125_vm4, %vm9807_vm13  ;;  %v2646_v15 = vsel %vm9811_vm8, %v2638_v60, 0 }
 0x12e   :  { %v8285_v51 = vpack.c.bf16 %v5856_v59, %v5856_v59  ;;  %vm9815_vm13 = vmmov %vm9811_vm8 }
 0x131   :  { %5830 = vmatmul.mubr.msk.bf16.vlgmr.msra.gmra.mrb[4].mxu1 %vm9805_vm5, %v7911_v3  ;;  %v2034_v3 = vsel %vm9810_vm7, %v9809_v20, %v9808_v9  ;;  %vm9814_vm5 = vcmp.lt.s32.totalorder %v7363_v2, 16  ;;  %vm9816_vm7 = vmmov %vm9811_vm8  ;;  %vm9817_vm8 = vcmp.lt.s32.totalorder %v7498_v38, 16 }
 0x132   :  { %1870 = vmatpush1.bf16.msra.mxu1 %v1823_v29  ;;  %1901 = vmatprep.mubr.bf16.mxu1 %v9651_v0  ;;  %v1919_v29 = vpack.c.bf16 %v9813_v56, %v9813_v56  ;;  %v9823_v56 = vunpack.i.l.bf16 %v7775_v55 }
 0x133   :  { %5839 = vmatprep.subr.msk.bf16.mxu1 %vm9806_vm11, %v1920_v30  ;;  %vm2760_vm11 = vmand %vm8135_vm9, %vm9814_vm5  ;;  %v2054_v30 = vsel %vm2042_vm2, %v2034_v3, 0.0  ;;  %vm9818_vm5 = vcmp.lt.s32.totalorder %v7108_v58, 110  ;;  %vm9819_vm2 = vcmp.lt.s32.totalorder %v7456_v49, 16  ;;  %v6800_v3 = vunpack.i.l.bf16 %v8011_v24 }
 0x134   :  { %v2772_v43 = vsel %vm2760_vm11, %v2754_v28, 0.0  ;;  %v2061_v59 = vpack.c.bf16 %v2054_v30, %v2054_v30  ;;  %v1931_v60 = vsel %vm9816_vm7, %v1919_v29, 0  ;;  %v2894_v50 = vsel %vm9818_vm5, %v6801_v39, %v8008_v42  ;;  %vm2041_vm11 = vmand %vm8176_vm10, %vm9819_vm2  ;;  %v9824_v29 = vld [vmem:[#allocation16_spill] sm:$0xff] }
 0x135   :  { %v2779_v9 = vpack.c.bf16 %v2772_v43, %v2772_v43  ;;  %v8333_v42 = vpack.c.bf16 %v5861_v1, %v5861_v1  ;;  %vm3043_vm2 = vcmp.ge.s32.totalorder %v3039_v12, 0  ;;  %v2320_v30 = vadd.s32 1, %v7139_v6 }
 0x137   :  { %5858 = vmatmul.mubr.msk.bf16.vlgmr.msra.gmra.mrb[0].mxu0 %vm9812_vm6, %v8285_v51  ;;  %vm2902_vm6 = vmand %vm8083_vm0, %vm9817_vm8  ;;  %vm9826_vm8 = vcmp.lt.s32.totalorder %v7594_v14, 16 }
 0x138   :  { %2658 = vmatpush1.bf16.msra.mxu0 %v2646_v15  ;;  %2689 = vmatprep.mubr.bf16.mxu0 %v9651_v0  ;;  %v2914_v20 = vsel %vm2902_vm6, %v2894_v50, 0.0  ;;  %vm9821_vm0 = vmmov %vm9816_vm7  ;;  %v9822_v15 = vld [vmem:[#allocation15_spill] sm:$0xff]  ;;  %vm9825_vm7 = vcmp.lt.s32.totalorder %v7108_v58, 126  ;;  %v3038_v50 = vadd.s32 2, %v7141_v7 }
 0x139   :  { %5867 = vmatprep.subr.msk.bf16.mxu0 %vm9815_vm13, %v2780_v36  ;;  %vm9820_vm13 = vcmask 31744   ;;  %v2053_v36 = vsel %vm2041_vm11, %v9822_v15, 0.0  ;;  %vm2183_vm5 = vmand %vm8125_vm4, %vm9826_vm8  ;;  %v2921_v28 = vpack.c.bf16 %v2914_v20, %v2914_v20  ;;  %vm9828_vm11 = vcmask 31744  }
 0x13a   :  { %vm9827_vm6 = vmmov %vm9821_vm0  ;;  %v2060_v43 = vpack.c.bf16 %v2053_v36, %v2053_v36 }
 0x13b   :  { %v2787_v5 = vsel %vm9827_vm6, %v2779_v9, 0  ;;  %vm9833_vm1 = vmmov %vm9827_vm6 }
 0x13c   :  { %v2072_v19 = vsel %vm9833_vm1, %v2060_v43, 0  ;;  %vm9837_vm1 = vcmask 31744  }
 0x13d   :  { %5835 = vmatmul.mubr.msk.bf16.vlgmr.msra.gmra.mrb[4].mxu1 %vm9820_vm13, %v7972_v31  ;;  %v2175_v31 = vsel %vm9825_vm7, %v9824_v29, %v9823_v56  ;;  %vm3047_vm13 = vcmp.lt.s32.totalorder %v3039_v12, 16  ;;  %vm9830_vm7 = vcmp.lt.s32.totalorder %v7502_v48, 16  ;;  %v5866_v12 = vld [vmem:[%s9542_s3 + $0x90] sm:$0xff]  ;;  %v9845_v29 = vunpack.i.l.bf16 %v7867_v45 }
 0x13e   :  { %1978 = vmatpush1.bf16.msra.mxu1 %v1931_v60  ;;  %2009 = vmatprep.mubr.bf16.mxu1 %v9651_v0  ;;  %vm2901_vm4 = vmand %vm8135_vm9, %vm9830_vm7  ;;  %vm9834_vm9 = vcmp.ge.s32.totalorder %v7191_v22, 0  ;;  %v2319_v22 = vadd.s32 1, %v7125_v63  ;;  %v8390_v15 = vpack.c.bf16 %v5866_v12, %v5866_v12  ;;  %v6811_v45 = vunpack.i.h.bf16 %v8087_v4  ;;  %v9858_v12 = vld [vmem:[#allocation18_spill] sm:$0xff] }
 0x13f   :  { %5844 = vmatprep.subr.msk.bf16.mxu1 %vm9821_vm0, %v2061_v59  ;;  %vm9829_vm0 = vcmp.lt.s32.totalorder %v7108_v58, 110  ;;  %v2195_v59 = vsel %vm2183_vm5, %v2175_v31, 0.0  ;;  %vm8361_vm8 = vmand %vm3043_vm2, %vm3047_vm13  ;;  %vm9835_vm2 = vcmp.lt.s32.totalorder %v7108_v58, 98  ;;  %vm9836_vm13 = vcmp.lt.s32.totalorder %v7624_v33, 16 }
 0x140   :  { %v2895_v55 = vsel %vm9829_vm0, %v6800_v3, %v6801_v39  ;;  %v2202_v1 = vpack.c.bf16 %v2195_v59, %v2195_v59  ;;  %vm2328_vm0 = vcmp.lt.s32.totalorder %v2320_v30, 16  ;;  %vm3055_vm5 = vmand %vm8361_vm8, %vm9834_vm9  ;;  %v3035_v9 = vsel %vm9835_vm2, %v6806_v53, %v8052_v32 }
 0x141   :  { %v2913_v39 = vsel %vm2901_vm4, %v2895_v55, 0.0  ;;  %vm2182_vm7 = vmand %vm8176_vm10, %vm9836_vm13  ;;  %vm3042_vm4 = vcmp.ge.s32.totalorder %v3038_v50, 0  ;;  %v3071_v32 = vsel %vm3055_vm5, %v3035_v9, 0.0  ;;  %vm9840_vm2 = vcmask 1041408  }
 0x142   :  { %v2920_v7 = vpack.c.bf16 %v2913_v39, %v2913_v39  ;;  %v2316_v31 = vsel %vm2312_vm12, %v7892_v35, %v9845_v29  ;;  %vm9846_vm5 = vmmov %vm9840_vm2  ;;  %vm2323_vm13 = vcmp.ge.s32.totalorder %v2319_v22, 0  ;;  %v5871_v39 = vld [vmem:[%s9542_s3 + $0x98] sm:$0xff] }
 0x143   :  { %5863 = vmatmul.mubr.msk.bf16.vlgmr.msra.gmra.mrb[0].mxu0 %vm9828_vm11, %v8333_v42  ;;  %vm2324_vm11 = vcmp.ge.s32.totalorder %v2320_v30, 0  ;;  %vm9849_vm12 = vmmov %vm9846_vm5 }
 0x144   :  { %2799 = vmatpush1.bf16.msra.mxu0 %v2787_v5  ;;  %2830 = vmatprep.mubr.bf16.mxu0 %v9651_v0  ;;  %vm8385_vm9 = vmand %vm2324_vm11, %vm2328_vm0  ;;  %vm9844_vm11 = vcmp.ge.s32.totalorder %v7264_v47, 0  ;;  %v2928_v5 = vsel %vm9846_vm5, %v2920_v7, 0 }
 0x145   :  { %5872 = vmatprep.subr.msk.bf16.mxu0 %vm9827_vm6, %v2921_v28  ;;  %vm3046_vm6 = vcmp.lt.s32.totalorder %v3038_v50, 16  ;;  %vm2336_vm0 = vmand %vm8385_vm9, %vm9844_vm11  ;;  %v3078_v28 = vpack.c.bf16 %v3071_v32, %v3071_v32 }
 0x146   :  { %vm8395_vm10 = vmand %vm3042_vm4, %vm3046_vm6  ;;  %vm9847_vm4 = vcmp.lt.s32.totalorder %v7108_v58, 98  ;;  %vm9848_vm6 = vcmp.ge.s32.totalorder %v7207_v26, 0  ;;  %v2352_v35 = vsel %vm2336_vm0, %v2316_v31, 0.0  ;;  %v3192_v26 = vsel %vm3190_vm15, %v6811_v45, %v8091_v21 }
 0x147   :  { %v3036_v43 = vsel %vm9847_vm4, %v6805_v37, %v6806_v53  ;;  %v2359_v50 = vpack.c.bf16 %v2352_v35, %v2352_v35  ;;  %vm9853_vm0 = vcmp.ge.s32.totalorder %v7285_v11, 0  ;;  %v6810_v21 = vunpack.i.l.bf16 %v8087_v4  ;;  %v9867_v35 = vld [vmem:[#allocation19_spill] sm:$0xff] }
 0x149   :  { %5840 = vmatmul.mubr.msk.bf16.vlgmr.msra.gmra.mrb[4].mxu1 %vm9837_vm1, %v8044_v41  ;;  %v9841_v41 = vld [vmem:[#allocation17_spill] sm:$0xff] }
 0x14a   :  { %2119 = vmatpush1.bf16.msra.mxu1 %v2072_v19  ;;  %2150 = vmatprep.mubr.bf16.mxu1 %v9651_v0  ;;  %v2194_v36 = vsel %vm2182_vm7, %v9841_v41, 0.0  ;;  %vm2327_vm7 = vcmp.lt.s32.totalorder %v2319_v22, 16  ;;  %v8444_v19 = vpack.c.bf16 %v5871_v39, %v5871_v39 }
 0x14b   :  { %5849 = vmatprep.subr.msk.bf16.mxu1 %vm9840_vm2, %v2202_v1  ;;  %v2201_v30 = vpack.c.bf16 %v2194_v36, %v2194_v36  ;;  %vm3054_vm2 = vmand %vm8395_vm10, %vm9848_vm6 }
 0x14c   :  { %vm8422_vm11 = vmand %vm2323_vm13, %vm2327_vm7  ;;  %v3070_v59 = vsel %vm3054_vm2, %v3036_v43, 0.0  ;;  %vm9854_vm7 = vcmask 31744   ;;  %vm9856_vm2 = vcmp.ge.s32.totalorder %v7171_v17, 0 }
 0x14d   :  { %v2213_v53 = vsel %vm9846_vm5, %v2201_v30, 0  ;;  %vm2335_vm13 = vmand %vm8422_vm11, %vm9853_vm0 }
 0x14e   :  { %vm9855_vm6 = vmmov %vm9846_vm5  ;;  %v2351_v9 = vsel %vm2335_vm13, %v7907_v25, 0.0  ;;  %v3193_v25 = vsel %vm3190_vm15, %v6810_v21, %v6811_v45  ;;  %v6815_v45 = vunpack.i.l.bf16 %v8121_v54 }
 0x14f   :  { %5868 = vmatmul.mubr.msk.bf16.vlgmr.msra.gmra.mrb[0].mxu0 %vm9837_vm1, %v8390_v15  ;;  %vm9852_vm1 = vcmp.ge.s32.totalorder %v7166_v16, 0  ;;  %v3077_v16 = vpack.c.bf16 %v3070_v59, %v3070_v59  ;;  %v2358_v41 = vpack.c.bf16 %v2351_v9, %v2351_v9 }
 0x150   :  { %2940 = vmatpush1.bf16.msra.mxu0 %v2928_v5  ;;  %2971 = vmatprep.mubr.bf16.mxu0 %v9651_v0  ;;  %vm3196_vm4 = vmand %vm8361_vm8, %vm9852_vm1 }
 0x151   :  { %5877 = vmatprep.subr.msk.bf16.mxu0 %vm9849_vm12, %v3078_v28  ;;  %v3212_v1 = vsel %vm3196_vm4, %v3192_v26, 0.0  ;;  %vm2477_vm12 = vmand %vm8385_vm9, %vm9856_vm2  ;;  %v3085_v22 = vsel %vm9846_vm5, %v3077_v16, 0  ;;  %vm9860_vm4 = vcmp.ge.s32.totalorder %v7175_v18, 0  ;;  %v5876_v18 = vld [vmem:[%s9542_s3 + $0xa0] sm:$0xff] }
 0x152   :  { %v3219_v32 = vpack.c.bf16 %v3212_v1, %v3212_v1  ;;  %vm9859_vm1 = vmmov %vm9854_vm7  ;;  %v9873_v1 = vld [vmem:[#allocation29_spill] sm:$0xff] }
 0x153   :  { %vm3195_vm0 = vmand %vm8395_vm10, %vm9860_vm4  ;;  %v6821_v9 = vunpack.i.h.bf16 %v9873_v1 }
 0x154   :  { %v3211_v29 = vsel %vm3195_vm0, %v3193_v25, 0.0 }
 0x155   :  { %5845 = vmatmul.mubr.msk.bf16.vlgmr.msra.gmra.mrb[4].mxu1 %vm9854_vm7, %v8130_v52  ;;  %v9857_v52 = vunpack.i.l.bf16 %v7882_v34  ;;  %v6816_v34 = vunpack.i.h.bf16 %v8121_v54  ;;  %vm9863_vm7 = vcmp.lt.s32.totalorder %v7108_v58, 96  ;;  %v3218_v30 = vpack.c.bf16 %v3211_v29, %v3211_v29  ;;  %v9932_v54 = vld [vmem:[#allocation28_spill] sm:$0xff] }
 0x156   :  { %2260 = vmatpush1.bf16.msra.mxu1 %v2213_v53  ;;  %2291 = vmatprep.mubr.bf16.mxu1 %v9651_v0 }
 0x157   :  { %5854 = vmatprep.subr.msk.bf16.mxu1 %vm9855_vm6, %v2359_v50  ;;  %v2473_v7 = vsel %vm2469_vm3, %v9858_v12, %v9857_v52  ;;  %vm9861_vm3 = vmmov %vm9846_vm5  ;;  %v3333_v28 = vsel %vm9863_vm7, %v6816_v34, %v8149_v40  ;;  %vm9864_vm6 = vcmp.ge.s32.totalorder %v7144_v8, 0  ;;  %v8488_v40 = vpack.c.bf16 %v5876_v18, %v5876_v18  ;;  %v9868_v50 = vld [vmem:[#allocation20_spill] sm:$0xff] }
 0x158   :  { %v2493_v36 = vsel %vm2477_vm12, %v2473_v7, 0.0  ;;  %vm9862_vm13 = vmmov %vm9861_vm3  ;;  %v3353_v43 = vsel %vm8361_vm8, %v3333_v28, 0.0  ;;  %v9877_v7 = vld [vmem:[#allocation13_spill] sm:$0xff] }
 0x159   :  { %v2500_v31 = vpack.c.bf16 %v2493_v36, %v2493_v36  ;;  %v2370_v5 = vsel %vm9862_vm13, %v2358_v41, 0  ;;  %vm2476_vm2 = vmand %vm8422_vm11, %vm9864_vm6  ;;  %v3360_v26 = vpack.c.bf16 %v3353_v43, %v3353_v43  ;;  %vm9876_vm6 = vcmp.lt.s32.totalorder %v7357_v62, 16  ;;  %v9880_v36 = vld [vmem:[#allocation21_spill] sm:$0xff] }
 0x15a   :  { %vm9865_vm12 = vmmov %vm9859_vm1  ;;  %v2492_v59 = vsel %vm2476_vm2, %v9867_v35, 0.0  ;;  %v2633_v29 = vsel %vm8422_vm11, %v9880_v36, 0.0  ;;  %v8558_v35 = vpop.permute.xlu0 %3609  ;;  %v9905_v36 = vld [vmem:[#allocation7_spill] sm:$0xff] }
 0x15b   :  { %5873 = vmatmul.mubr.msk.bf16.vlgmr.msra.gmra.mrb[0].mxu0 %vm9859_vm1, %v8444_v19  ;;  %vm9866_vm5 = vmmov %vm9861_vm3  ;;  %vm9869_vm1 = vcmp.lt.s32.totalorder %v7108_v58, 112  ;;  %v2499_v39 = vpack.c.bf16 %v2492_v59, %v2492_v59 }
 0x15c   :  { %3097 = vmatpush1.bf16.msra.mxu0 %v3085_v22  ;;  %3128 = vmatprep.mubr.bf16.mxu0 %v9651_v0  ;;  %vm9870_vm4 = vmmov %vm9861_vm3  ;;  %v3474_v22 = vsel %vm3472_vm14, %v6821_v9, %v9877_v7  ;;  %v3041_v7 = vadd.s32 2, %v7139_v6 }
 0x15d   :  { %5882 = vmatprep.subr.msk.bf16.mxu0 %vm9861_vm3, %v3219_v32  ;;  %v3226_v53 = vsel %vm9870_vm4, %v3218_v30, 0  ;;  %vm9871_vm0 = vmmov %vm9865_vm12  ;;  %v5881_v32 = vld [vmem:[%s9542_s3 + $0xa8] sm:$0xff]  ;;  %v2640_v30 = vpack.c.bf16 %v2633_v29, %v2633_v29 }
 0x15e   :  { %vm9872_vm3 = vmmov %vm9863_vm7  ;;  %v8526_v62 = vpack.c.bf16 %v5881_v32, %v5881_v32  ;;  %v5891_v32 = vld [vmem:[%s9542_s3 + $0xb8] sm:$0xff] }
 0x15f   :  { %v3334_v16 = vsel %vm9872_vm3, %v6815_v45, %v6816_v34  ;;  %vm9874_vm13 = vmmov %vm9870_vm4  ;;  %v6820_v34 = vunpack.i.l.bf16 %v9873_v1  ;;  %v9939_v1 = vld [vmem:[#allocation31_spill] sm:$0xff] }
 0x160   :  { %vm9875_vm7 = vmmov %vm9870_vm4 }
 0x161   :  { %5850 = vmatmul.mubr.msk.bf16.vlgmr.msra.gmra.mrb[4].mxu1 %vm9865_vm12, %v8209_v61  ;;  %v2614_v61 = vsel %vm9869_vm1, %v9868_v50, %v6790_v27  ;;  %v3352_v27 = vsel %vm8395_vm10, %v3334_v16, 0.0  ;;  %v2511_v12 = vsel %vm9875_vm7, %v2499_v39, 0  ;;  %vm3482_vm2 = vmand %vm8361_vm8, %vm9876_vm6  ;;  %vm9881_vm1 = vcmp.lt.s32.totalorder %v7422_v46, 16  ;;  %v9892_v16 = vld [vmem:[#allocation23_spill] sm:$0xff] }
 0x162   :  { %2417 = vmatpush1.bf16.msra.mxu1 %v2370_v5  ;;  %2448 = vmatprep.mubr.bf16.mxu1 %v9651_v0  ;;  %v2634_v23 = vsel %vm8385_vm9, %v2614_v61, 0.0  ;;  %vm9878_vm12 = vmmov %vm9871_vm0  ;;  %v3359_v41 = vpack.c.bf16 %v3352_v27, %v3352_v27  ;;  %v3494_v25 = vsel %vm3482_vm2, %v3474_v22, 0.0  ;;  %v3475_v43 = vsel %vm3472_vm14, %v6820_v34, %v6821_v9 }
 0x163   :  { %5859 = vmatprep.subr.msk.bf16.mxu1 %vm9866_vm5, %v2500_v31  ;;  %v2641_v52 = vpack.c.bf16 %v2634_v23, %v2634_v23  ;;  %vm9879_vm5 = vmmov %vm9870_vm4  ;;  %v8533_v31 = vpop.permute.xlu1 %6823  ;;  %v3501_v18 = vpack.c.bf16 %v3494_v25, %v3494_v25  ;;  %vm9886_vm7 = vcmp.lt.s32.totalorder %v7363_v2, 16  ;;  %vm3613_vm2 = vcmp.lt.s32.totalorder %v7108_v58, 94 }
 0x164   :  { %vm2763_vm4 = vmand %vm8385_vm9, %vm9881_vm1  ;;  %v6826_v10 = vunpack.i.h.bf16 %v8533_v31  ;;  %vm9889_vm1 = vcmp.lt.s32.totalorder %v7498_v38, 16  ;;  %v6825_v39 = vunpack.i.l.bf16 %v8533_v31  ;;  %v8623_v25 = vpack.c.bf16 %v5891_v32, %v5891_v32 }
 0x165   :  { %vm9884_vm3 = vmmov %vm9879_vm5 }
 0x166   :  { %v3367_v28 = vsel %vm9884_vm3, %v3359_v41, 0  ;;  %vm3481_vm6 = vmand %vm8395_vm10, %vm9886_vm7  ;;  %v3615_v2 = vsel %vm3613_vm2, %v6826_v10, %v8558_v35  ;;  %vm9893_vm7 = vcmp.lt.s32.totalorder %v7594_v14, 16  ;;  %v3616_v20 = vsel %vm3613_vm2, %v6825_v39, %v6826_v10 }
 0x167   :  { %5878 = vmatmul.mubr.msk.bf16.vlgmr.msra.gmra.mrb[0].mxu0 %vm9871_vm0, %v8488_v40  ;;  %vm9883_vm0 = vcmp.lt.s32.totalorder %v7108_v58, 111  ;;  %v3493_v59 = vsel %vm3481_vm6, %v3475_v43, 0.0  ;;  %vm2904_vm6 = vmand %vm8385_vm9, %vm9893_vm7  ;;  %vm9897_vm9 = vcmp.lt.s32.totalorder %v7502_v48, 16  ;;  %vm9900_vm7 = vcmp.lt.s32.totalorder %v7624_v33, 16  ;;  %v9918_v43 = vld [vmem:[#allocation26_spill] sm:$0xff] }
 0x168   :  { %3238 = vmatpush1.bf16.msra.mxu0 %v3226_v53  ;;  %3269 = vmatprep.mubr.bf16.mxu0 %v9651_v0  ;;  %v5886_v53 = vld [vmem:[%s9542_s3 + $0xb0] sm:$0xff]  ;;  %v3500_v38 = vpack.c.bf16 %v3493_v59, %v3493_v59  ;;  %v3040_v41 = vadd.s32 2, %v7125_v63 }
 0x169   :  { %5887 = vmatprep.subr.msk.bf16.mxu0 %vm9874_vm13, %v3360_v26  ;;  %vm9885_vm13 = vmmov %vm9878_vm12  ;;  %v8579_v26 = vpack.c.bf16 %v5886_v53, %v5886_v53 }
 0x16d   :  { %5855 = vmatmul.mubr.msk.bf16.vlgmr.msra.gmra.mrb[4].mxu1 %vm9878_vm12, %v8252_v57  ;;  %v9882_v57 = vld [vmem:[#allocation22_spill] sm:$0xff]  ;;  %vm9887_vm12 = vmmov %vm9884_vm3 }
 0x16e   :  { %2558 = vmatpush1.bf16.msra.mxu1 %v2511_v12  ;;  %2589 = vmatprep.mubr.bf16.mxu1 %v9651_v0  ;;  %v2755_v5 = vsel %vm9883_vm0, %v9882_v57, %v6795_v44  ;;  %vm3623_vm0 = vmand %vm8361_vm8, %vm9889_vm1 }
 0x16f   :  { %5864 = vmatprep.subr.msk.bf16.mxu1 %vm9879_vm5, %v2641_v52  ;;  %v2775_v44 = vsel %vm2763_vm4, %v2755_v5, 0.0  ;;  %vm9888_vm5 = vmmov %vm9884_vm3  ;;  %vm9890_vm4 = vcmp.lt.s32.totalorder %v7456_v49, 16  ;;  %v3635_v60 = vsel %vm3623_vm0, %v3615_v2, 0.0 }
 0x170   :  { %v2782_v50 = vpack.c.bf16 %v2775_v44, %v2775_v44  ;;  %v2652_v61 = vsel %vm9888_vm5, %v2640_v30, 0  ;;  %vm2762_vm3 = vmand %vm8422_vm11, %vm9890_vm4  ;;  %v3508_v27 = vsel %vm9888_vm5, %v3500_v38, 0  ;;  %v3642_v52 = vpack.c.bf16 %v3635_v60, %v3635_v60 }
 0x171   :  { %vm9891_vm8 = vmmov %vm9888_vm5  ;;  %v2774_v9 = vsel %vm2762_vm3, %v9892_v16, 0.0  ;;  %vm3045_vm3 = vcmp.ge.s32.totalorder %v3041_v7, 0 }
 0x172   :  { %v2781_v12 = vpack.c.bf16 %v2774_v9, %v2774_v9  ;;  %vm9896_vm1 = vmmov %vm9885_vm13 }
 0x173   :  { %5883 = vmatmul.mubr.msk.bf16.vlgmr.msra.gmra.mrb[0].mxu0 %vm9885_vm13, %v8526_v62  ;;  %vm3622_vm0 = vmand %vm8395_vm10, %vm9897_vm9  ;;  %vm9908_vm9 = vcmp.lt.s32.totalorder %v7108_v58, 98 }
 0x174   :  { %3379 = vmatpush1.bf16.msra.mxu0 %v3367_v28  ;;  %3410 = vmatprep.mubr.bf16.mxu0 %v9651_v0  ;;  %vm9898_vm4 = vmmov %vm9888_vm5  ;;  %v3634_v6 = vsel %vm3622_vm0, %v3616_v20, 0.0 }
 0x175   :  { %5892 = vmatprep.subr.msk.bf16.mxu0 %vm9887_vm12, %v3501_v18  ;;  %vm9895_vm12 = vcmp.lt.s32.totalorder %v7108_v58, 110  ;;  %vm2903_vm10 = vmand %vm8422_vm11, %vm9900_vm7  ;;  %v3641_v48 = vpack.c.bf16 %v3634_v6, %v3634_v6  ;;  %vm9906_vm11 = vcmp.ge.s32.totalorder %v7264_v47, 0  ;;  %v9911_v47 = vmov 0.0   ;;  %v5896_v18 = vld [vmem:[%s9542_s3 + $0xc0] sm:$0xff] }
 0x176   :  { %vm9904_vm5 = vmmov %vm9898_vm4  ;;  %v2915_v55 = vsel %vm2903_vm10, %v9905_v36, 0.0  ;;  %vm9915_vm10 = vcmp.ge.s32.totalorder %v7285_v11, 0  ;;  %v3640_v30 = vpack.c.bf16 %v5896_v18, %v5896_v18  ;;  %v9920_v11 = vld [vmem:[#allocation27_spill] sm:$0xff] }
 0x177   :  { %vm9909_vm0 = vmmov %vm9898_vm4  ;;  %v2922_v63 = vpack.c.bf16 %v2915_v55, %v2915_v55  ;;  %v3194_v44 = vsel %vm3190_vm15, %v9920_v11, %v6810_v21  ;;  %v9927_v21 = vld [vmem:[#allocation8_spill] sm:$0xff]  ;;  %vm9928_vm15 = vcmp.lt.s32.totalorder %v7108_v58, 96 }
 0x178   :  { %v3649_v57 = vsel %vm9909_vm0, %v3641_v48, 0  ;;  %vm9914_vm7 = vmmov %vm9909_vm0  ;;  %v3335_v2 = vsel %vm9928_vm15, %v9927_v21, %v6815_v45  ;;  %v9934_v45 = vld [vmem:[#allocation30_spill] sm:$0xff] }
 0x179   :  { %5860 = vmatmul.mubr.msk.bf16.vlgmr.msra.gmra.mrb[4].mxu1 %vm9885_vm13, %v8285_v51  ;;  %v9894_v51 = vld [vmem:[#allocation24_spill] sm:$0xff]  ;;  %vm3049_vm13 = vcmp.lt.s32.totalorder %v3041_v7, 16 }
 0x17a   :  { %2699 = vmatpush1.bf16.msra.mxu1 %v2652_v61  ;;  %2730 = vmatprep.mubr.bf16.mxu1 %v9651_v0  ;;  %v2896_v23 = vsel %vm9895_vm12, %v9894_v51, %v6800_v3  ;;  %vm8617_vm12 = vmand %vm3045_vm3, %vm3049_vm13  ;;  %vm3048_vm3 = vcmp.lt.s32.totalorder %v3040_v41, 16 }
 0x17b   :  { %5869 = vmatprep.subr.msk.bf16.mxu1 %vm9891_vm8, %v2782_v50  ;;  %v2916_v24 = vsel %vm2904_vm6, %v2896_v23, 0.0  ;;  %vm9899_vm8 = vmmov %vm9898_vm4  ;;  %v3355_v53 = vsel %vm8617_vm12, %v3335_v2, 0.0 }
 0x17c   :  { %v2923_v3 = vpack.c.bf16 %v2916_v24, %v2916_v24  ;;  %v2793_v22 = vsel %vm9899_vm8, %v2781_v12, 0  ;;  %vm9901_vm6 = vmmov %vm9896_vm1  ;;  %v3362_v38 = vpack.c.bf16 %v3355_v53, %v3355_v53 }
 0x17d   :  { %vm9910_vm13 = vmmov %vm9901_vm6 }
 0x17f   :  { %5888 = vmatmul.mubr.msk.bf16.vlgmr.msra.gmra.mrb[0].mxu0 %vm9896_vm1, %v8579_v26  ;;  %vm3057_vm1 = vmand %vm8617_vm12, %vm9906_vm11 }
 0x180   :  { %3520 = vmatpush1.bf16.msra.mxu0 %v3508_v27  ;;  %3551 = vmatprep.mubr.bf16.mxu0 %v9651_v0  ;;  %vm9917_vm11 = vmmov %vm9909_vm0 }
 0x181   :  { %5897 = vmatprep.subr.msk.bf16.mxu0 %vm9898_vm4, %v3642_v52  ;;  %vm3044_vm4 = vcmp.ge.s32.totalorder %v3040_v41, 0 }
 0x182   :  { %vm8641_vm8 = vmand %vm3044_vm4, %vm3048_vm3  ;;  %vm9923_vm3 = vcmp.ge.s32.totalorder %v7144_v8, 0 }
 0x183   :  { %vm9922_vm4 = vmmov %vm9914_vm7  ;;  %v3354_v60 = vsel %vm8641_vm8, %v9932_v54, 0.0 }
 0x184   :  { %v3361_v16 = vpack.c.bf16 %v3354_v60, %v3354_v60 }
 0x185   :  { %5865 = vmatmul.mubr.msk.bf16.vlgmr.msra.gmra.mrb[4].mxu1 %vm9901_vm6, %v8333_v42  ;;  %v9907_v42 = vld [vmem:[#allocation25_spill] sm:$0xff]  ;;  %vm3056_vm6 = vmand %vm8641_vm8, %vm9915_vm10 }
 0x186   :  { %2840 = vmatpush1.bf16.msra.mxu1 %v2793_v22  ;;  %2871 = vmatprep.mubr.bf16.mxu1 %v9651_v0  ;;  %v3037_v29 = vsel %vm9908_vm9, %v9907_v42, %v6805_v37  ;;  %v2934_v37 = vsel %vm9914_vm7, %v2922_v63, 0  ;;  %v3072_v10 = vsel %vm3056_vm6, %v9918_v43, 0.0  ;;  %vm9925_vm10 = vmmov %vm9922_vm4 }
 0x187   :  { %5874 = vmatprep.subr.msk.bf16.mxu1 %vm9904_vm5, %v2923_v3  ;;  %v3073_v5 = vsel %vm3057_vm1, %v3037_v29, 0.0  ;;  %vm9916_vm5 = vmmov %vm9910_vm13  ;;  %vm9919_vm1 = vcmp.ge.s32.totalorder %v7171_v17, 0  ;;  %v9926_v17 = vld [vmem:[#allocation9_spill] sm:$0xff] }
 0x188   :  { %v3080_v28 = vpack.c.bf16 %v3073_v5, %v3073_v5  ;;  %vm3198_vm9 = vmand %vm8617_vm12, %vm9919_vm1  ;;  %vm9933_vm1 = vcmp.lt.s32.totalorder %v7422_v46, 16  ;;  %v3612_v46 = vpop.permute.xlu1 %3611 }
 0x189   :  { %vm9921_vm0 = vmmov %vm9916_vm5  ;;  %v3214_v59 = vsel %vm3198_vm9, %v3194_v44, 0.0 }
 0x18a   :  { %v3221_v50 = vpack.c.bf16 %v3214_v59, %v3214_v59  ;;  %vm9924_vm7 = vmmov %vm9921_vm0  ;;  %v105_v59 = vld [vmem:[%s9546_s7] sm:$0xff] }
 0x18b   :  { %5893 = vmatmul.mubr.msk.bf16.vlgmr.msra.gmra.mrb[0].mxu0 %vm9910_vm13, %v8623_v25  ;;  %vm3197_vm13 = vmand %vm8641_vm8, %vm9923_vm3 }
 0x18c   :  { %3661 = vmatpush1.bf16.msra.mxu0 %v3649_v57  ;;  %3692 = vmatprep.mubr.bf16.mxu0 %v9651_v0  ;;  %v3213_v4 = vsel %vm3197_vm13, %v9926_v17, 0.0  ;;  %vm9929_vm6 = vmmov %vm9922_vm4 }
 0x18d   :  { %6117 = vmatprep.subr.bf16.mxu0 %v9911_v47  ;;  %v3220_v8 = vpack.c.bf16 %v3213_v4, %v3213_v4  ;;  %vm3484_vm9 = vmand %vm8617_vm12, %vm9933_vm1 }
 0x191   :  { %5870 = vmatmul.mubr.msk.bf16.vlgmr.msra.gmra.mrb[4].mxu1 %vm9916_vm5, %v8390_v15  ;;  %v3079_v15 = vpack.c.bf16 %v3072_v10, %v3072_v10  ;;  %vm9930_vm5 = vmmov %vm9921_vm0 }
 0x192   :  { %2981 = vmatpush1.bf16.msra.mxu1 %v2934_v37  ;;  %3012 = vmatprep.mubr.bf16.mxu1 %v9651_v0  ;;  %vm9937_vm13 = vmmov %vm9930_vm5 }
 0x193   :  { %5879 = vmatprep.subr.msk.bf16.mxu1 %vm9917_vm11, %v3080_v28  ;;  %v3091_v61 = vsel %vm9922_vm4, %v3079_v15, 0  ;;  %vm9931_vm11 = vmmov %vm9922_vm4 }
 0x197   :  { %5898 = vmatmul.mubr.msk.bf16.vlgmr.msra.gmra.mrb[0].mxu0 %vm9921_vm0, %v3640_v30  ;;  %vm9935_vm0 = vmmov %vm9922_vm4  ;;  %vm9936_vm4 = vcmp.lt.s32.totalorder %v7456_v49, 16  ;;  %v3617_v49 = vsel %vm3613_vm2, %v3612_v46, %v6825_v39 }
 0x198   :  { %v3373_v23 = vsel %vm9935_vm0, %v3361_v16, 0  ;;  %vm3483_vm3 = vmand %vm8641_vm8, %vm9936_vm4 }
 0x199   :  { %vm9941_vm15 = vmmov %vm9935_vm0 }
 0x19a   :  { %vm9945_vm1 = vmmov %vm9935_vm0 }
 0x19d   :  { %5875 = vmatmul.mubr.msk.bf16.vlgmr.msra.gmra.mrb[4].mxu1 %vm9924_vm7, %v8444_v19  ;;  %v3232_v19 = vsel %vm9929_vm6, %v3220_v8, 0  ;;  %vm9938_vm7 = vmmov %vm9935_vm0 }
 0x19e   :  { %3138 = vmatpush1.bf16.msra.mxu1 %v3091_v61  ;;  %3169 = vmatprep.mubr.bf16.mxu1 %v9651_v0  ;;  %vm9942_vm6 = vmmov %vm9930_vm5 }
 0x19f   :  { %5884 = vmatprep.subr.msk.bf16.mxu1 %vm9925_vm10, %v3221_v50 }
 0x1a9   :  { %5880 = vmatmul.mubr.msk.bf16.vlgmr.msra.gmra.mrb[4].mxu1 %vm9930_vm5, %v8488_v40  ;;  %v3476_v40 = vsel %vm3472_vm14, %v9934_v45, %v6820_v34  ;;  %v3495_v34 = vsel %vm3483_vm3, %v9939_v1, 0.0  ;;  %vm9940_vm14 = vcmp.lt.s32.totalorder %v7594_v14, 16  ;;  %vm9943_vm5 = vcmp.lt.s32.totalorder %v7624_v33, 16 }
 0x1aa   :  { %3279 = vmatpush1.bf16.msra.mxu1 %v3232_v19  ;;  %3310 = vmatprep.mubr.bf16.mxu1 %v9651_v0  ;;  %v3496_v9 = vsel %vm3484_vm9, %v3476_v40, 0.0  ;;  %vm3625_vm10 = vmand %vm8617_vm12, %vm9940_vm14  ;;  %v3502_v27 = vpack.c.bf16 %v3495_v34, %v3495_v34  ;;  %v3614_v14 = vsel %vm3613_vm2, %v8558_v35, %v3612_v46 }
 0x1ab   :  { %5889 = vmatprep.subr.msk.bf16.mxu1 %vm9931_vm11, %v3362_v38  ;;  %v3503_v51 = vpack.c.bf16 %v3496_v9, %v3496_v9  ;;  %vm3624_vm12 = vmand %vm8641_vm8, %vm9943_vm5 }
 0x1ac   :  { %v3514_v52 = vsel %vm9941_vm15, %v3502_v27, 0  ;;  %vm9944_vm11 = vmmov %vm9935_vm0  ;;  %v3636_v24 = vsel %vm3624_vm12, %v3614_v14, 0.0  ;;  %v3850_v14 = vld [vmem:[%s9548_s9 + $0x80] sm:$0xff]  ;;  %vm9952_vm15 = vcmp.lt.s32.totalorder %v7108_v58, 112 }
 0x1ad   :  { %v3643_v6 = vpack.c.bf16 %v3636_v24, %v3636_v24  ;;  %vm9946_vm9 = vmmov %vm9942_vm6 }
 0x1ae   :  { %vm9947_vm8 = vmmov %vm9942_vm6 }
 0x1b5   :  { %5885 = vmatmul.mubr.msk.bf16.vlgmr.msra.gmra.mrb[4].mxu1 %vm9937_vm13, %v8526_v62  ;;  %v3637_v62 = vsel %vm3625_vm10, %v3617_v49, 0.0  ;;  %vm9948_vm13 = vcmp.lt.s32.totalorder %v7108_v58, 127 }
 0x1b6   :  { %3420 = vmatpush1.bf16.msra.mxu1 %v3373_v23  ;;  %3451 = vmatprep.mubr.bf16.mxu1 %v9651_v0  ;;  %v3644_v12 = vpack.c.bf16 %v3637_v62, %v3637_v62 }
 0x1b7   :  { %5894 = vmatprep.subr.msk.bf16.mxu1 %vm9938_vm7, %v3503_v51  ;;  %vm9949_vm7 = vmmov %vm9948_vm13 }
 0x1b8   :  { %vm9950_vm14 = vmmov %vm9949_vm7 }
 0x1b9   :  { %vm9951_vm10 = vmmov %vm9949_vm7 }
 0x1c0   :  { %v1004_v7 = vpop.f32.mrb[0].mxu1 }
 0x1c1   :  { %v1006_v20 = vpop.f32.mrb[1].mxu1  ;;  %5890 = vmatmul.mubr.msk.bf16.vlgmr.msra.gmra.mrb[4].mxu1 %vm9942_vm6, %v8579_v26  ;;  %v3655_v26 = vsel %vm9945_vm1, %v3643_v6, 0  ;;  %v3835_v6 = vld [vmem:[%s9548_s9 + $0x8] sm:$0xff]  ;;  %vm9953_vm6 = vmmov %vm9952_vm15 }
 0x1c2   :  { %3561 = vmatpush1.bf16.msra.mxu1 %v3514_v52  ;;  %v1008_v31 = vpop.f32.mrb[2].mxu1  ;;  %3592 = vmatprep.mubr.bf16.mxu1 %v9651_v0  ;;  %vm9954_vm5 = vmmov %vm9953_vm6 }
 0x1c3   :  { %v1009_v39 = vpop.f32.mrb[3].mxu1  ;;  %5899 = vmatprep.subr.msk.bf16.mxu1 %vm9944_vm11, %v3644_v12  ;;  %v3851_v31 = vld [vmem:[%s9548_s9 + $0x88] sm:$0xff]  ;;  %vm9955_vm12 = vmmov %vm9954_vm5  ;;  %vm9609_vm11 = vmmov 0  }
 0x1c4   :  { %v3834_v39 = vld [vmem:[%s9548_s9] sm:$0xff]  ;;  %v6296_v24 = vpack.c.bf16 %v3851_v31, %v3850_v14  ;;  %6119 = vmatprep.mubr.msk.bf16.mxu0 %vm9609_vm11, %v9911_v47 }
 0x1cd   :  { %5895 = vmatmul.mubr.msk.bf16.vlgmr.msra.gmra.mrb[4].mxu1 %vm9946_vm9, %v8623_v25 }
 0x1ce   :  { %3702 = vmatpush1.bf16.msra.mxu1 %v3655_v26  ;;  %3733 = vmatprep.mubr.bf16.mxu1 %v9651_v0  ;;  %v104_v0 = vld [vmem:[%s9544_s5] sm:$0xff]  ;;  %v3852_v26 = vld [vmem:[%s9548_s9 + $0x90] sm:$0xff] }
 0x1cf   :  { %6297 = vmatprep.subr.bf16.mxu1 %v6296_v24 }
 0x1d9   :  { %5900 = vmatmul.mubr.msk.bf16.vlgmr.msra.gmra.mrb[4].mxu1 %vm9947_vm8, %v3640_v30 }
 0x26a   :  { %v3694_v33 = vpop.f32.mrb[0].mxu0 }
 0x26b   :  { %v6384_v35 = vadd.f32 %v3694_v33, %v1004_v7  ;;  %v3696_v3 = vpop.f32.mrb[1].mxu0  ;;  %v3853_v33 = vld [vmem:[%s9548_s9 + $0x98] sm:$0xff] }
 0x26c   :  { %v6385_v22 = vadd.f32 %v3696_v3, %v1006_v20  ;;  %v3698_v32 = vpop.f32.mrb[2].mxu0  ;;  %v6300_v3 = vpack.c.bf16 %v3853_v33, %v3852_v26 }
 0x26d   :  { %v3699_v48 = vpop.f32.mrb[3].mxu0  ;;  %v3837_v32 = vld [vmem:[%s9548_s9 + $0x18] sm:$0xff] }
 0x26e   :  { %v3746_v56 = vadd.f32 %v6385_v22, %v6384_v35  ;;  %v3854_v48 = vld [vmem:[%s9548_s9 + $0xa0] sm:$0xff] }
 0x2ac   :  { %v3735_v41 = vpop.f32.mrb[4].mxu1 }
 0x2ad   :  { %v3747_v36 = vadd.f32 %v3746_v56, %v3735_v41  ;;  %v3737_v55 = vpop.f32.mrb[5].mxu1  ;;  %v3855_v56 = vld [vmem:[%s9548_s9 + $0xa8] sm:$0xff] }
 0x2ae   :  { %v3739_v42 = vpop.f32.mrb[6].mxu1 }
 0x2af   :  { %v3740_v29 = vpop.f32.mrb[7].mxu1  ;;  %v3748_v57 = vadd.f32 %v3747_v36, %v3737_v55  ;;  %v6304_v36 = vpack.c.bf16 %v3855_v56, %v3854_v48  ;;  %v3839_v42 = vld [vmem:[%s9548_s9 + $0x28] sm:$0xff]  ;;  %v3885_v48 = vld [vmem:[%s9548_s9 + $0x198] sm:$0xff] }
 0x2b0   :  { %v3856_v29 = vld [vmem:[%s9548_s9 + $0xb0] sm:$0xff] }
 0x2b1   :  { %3749 = vadd.xlane.f32.xlu0 %v3748_v57  ;;  %v3857_v57 = vld [vmem:[%s9548_s9 + $0xb8] sm:$0xff] }
 0x2c7   :  { %3774 = vperm.xlu0 %6827, %v104_v0  }
 0x33e   :  { %v3750_v25 = vpop.xlane.xlu0 %3749 }
 0x33f   :  { %v3751_v63 = vmul.f32 0.001953125, %v3750_v25  ;;  %v6308_v25 = vpack.c.bf16 %v3857_v57, %v3856_v29  ;;  %v3868_v57 = vld [vmem:[%s9548_s9 + $0x110] sm:$0xff] }
 0x341   :  { %v3752_v5 = vsub.f32 %v6384_v35, %v3751_v63  ;;  %v3753_v13 = vsub.f32 %v6385_v22, %v3751_v63  ;;  %v3754_v28 = vsub.f32 %v3735_v41, %v3751_v63  ;;  %v3755_v37 = vsub.f32 %v3737_v55, %v3751_v63  ;;  %v3836_v22 = vld [vmem:[%s9548_s9 + $0x10] sm:$0xff]  ;;  %v3838_v55 = vld [vmem:[%s9548_s9 + $0x20] sm:$0xff] }
 0x342   :  { %v6298_v35 = vpack.c.bf16 %v3835_v6, %v3834_v39  ;;  %v6302_v41 = vpack.c.bf16 %v3837_v32, %v3836_v22  ;;  %v6306_v0 = vpack.c.bf16 %v3839_v42, %v3838_v55  ;;  %v3840_v63 = vld [vmem:[%s9548_s9 + $0x30] sm:$0xff]  ;;  %v3866_v22 = vld [vmem:[%s9548_s9 + $0x100] sm:$0xff] }
 0x343   :  { %v3756_v18 = vmul.f32 %v3752_v5, %v3752_v5  ;;  %v3757_v30 = vmul.f32 %v3753_v13, %v3753_v13  ;;  %v3758_v43 = vmul.f32 %v3754_v28, %v3754_v28  ;;  %v3759_v11 = vmul.f32 %v3755_v37, %v3755_v37  ;;  %v3884_v32 = vld [vmem:[%s9548_s9 + $0x190] sm:$0xff] }
 0x344   :  { %6299 = vmatpush3.bf16.msra.mxu1 %v6298_v35  ;;  %v6332_v29 = vpack.c.bf16 %v3885_v48, %v3884_v32 }
 0x345   :  { %v3760_v10 = vadd.f32 %v3757_v30, %v3756_v18  ;;  %6301 = vmatprep.subr.bf16.mxu1 %v6300_v3  ;;  %v3842_v30 = vld [vmem:[%s9548_s9 + $0x40] sm:$0xff] }
 0x346   :  { %v3775_v21 = vpop.permute.xlu0 %3774 }
 0x347   :  { %v3761_v44 = vadd.f32 %v3760_v10, %v3758_v43  ;;  %v3843_v43 = vld [vmem:[%s9548_s9 + $0x48] sm:$0xff]  ;;  %v3860_v10 = vld [vmem:[%s9548_s9 + $0xd0] sm:$0xff] }
 0x348   :  { %6303 = vmatpush3.bf16.msra.mxu1 %v6302_v41 }
 0x349   :  { %v3762_v15 = vadd.f32 %v3761_v44, %v3759_v11  ;;  %6305 = vmatprep.subr.bf16.mxu1 %v6304_v36  ;;  %v3861_v11 = vld [vmem:[%s9548_s9 + $0xd8] sm:$0xff]  ;;  %v6314_v44 = vpack.c.bf16 %v3843_v43, %v3842_v30  ;;  %v3870_v30 = vld [vmem:[%s9548_s9 + $0x120] sm:$0xff]  ;;  %v3871_v43 = vld [vmem:[%s9548_s9 + $0x128] sm:$0xff] }
 0x34b   :  { %3763 = vadd.xlane.f32.xlu1 %v3762_v15  ;;  %v6316_v15 = vpack.c.bf16 %v3861_v11, %v3860_v10  ;;  %v3888_v10 = vld [vmem:[%s9548_s9 + $0x1b0] sm:$0xff]  ;;  %v3889_v11 = vld [vmem:[%s9548_s9 + $0x1b8] sm:$0xff] }
 0x34c   :  { %6307 = vmatpush3.bf16.msra.mxu1 %v6306_v0  ;;  %v3869_v0 = vld [vmem:[%s9548_s9 + $0x118] sm:$0xff] }
 0x34d   :  { %6309 = vmatprep.subr.bf16.mxu1 %v6308_v25  ;;  %v3886_v25 = vld [vmem:[%s9548_s9 + $0x1a0] sm:$0xff] }
 0x35c   :  { %3783 = vperm.xlu1 %6828, %v105_v59   ;;  %v3844_v59 = vld [vmem:[%s9548_s9 + $0x50] sm:$0xff] }
 0x3d8   :  { %v3764_v50 = vpop.xlane.xlu1 %3763 }
 0x3d9   :  { %v3765_v61 = vmul.f32 0.001953125, %v3764_v50  ;;  %v3845_v50 = vld [vmem:[%s9548_s9 + $0x58] sm:$0xff] }
 0x3db   :  { %v3766_v17 = vadd.f32 1e-05, %v3765_v61  ;;  %v3862_v61 = vld [vmem:[%s9548_s9 + $0xe0] sm:$0xff] }
 0x3dc   :  { %v3784_v19 = vpop.permute.xlu1 %3783 }
 0x3dd   :  { %6844 = vrsqrt.f32 %v3766_v17  ;;  %v3863_v17 = vld [vmem:[%s9548_s9 + $0xe8] sm:$0xff] }
 0x3e7   :  { %v6845_v4 = vpop.eup %6844 }
 0x3e8   :  { %v3768_v2 = vmul.f32 %v6845_v4, %v3752_v5  ;;  %v3769_v8 = vmul.f32 %v6845_v4, %v3753_v13  ;;  %v3770_v53 = vmul.f32 %v6845_v4, %v3754_v28  ;;  %v3771_v38 = vmul.f32 %v6845_v4, %v3755_v37  ;;  %v3841_v5 = vld [vmem:[%s9548_s9 + $0x38] sm:$0xff]  ;;  %v3858_v13 = vld [vmem:[%s9548_s9 + $0xc0] sm:$0xff]  ;;  %v3859_v28 = vld [vmem:[%s9548_s9 + $0xc8] sm:$0xff] }
 0x3e9   :  { %v6310_v37 = vpack.c.bf16 %v3841_v5, %v3840_v63  ;;  %v6312_v18 = vpack.c.bf16 %v3859_v28, %v3858_v13  ;;  %v6318_v4 = vpack.c.bf16 %v3845_v50, %v3844_v59  ;;  %v3887_v63 = vld [vmem:[%s9548_s9 + $0x1a8] sm:$0xff]  ;;  %v6334_v28 = vpack.c.bf16 %v3869_v0, %v3868_v57  ;;  %v3872_v59 = vld [vmem:[%s9548_s9 + $0x130] sm:$0xff]  ;;  %v3873_v50 = vld [vmem:[%s9548_s9 + $0x138] sm:$0xff] }
 0x3ea   :  { %v3777_v54 = vmul.f32 %v3775_v21, %v3768_v2  ;;  %v3778_v60 = vmul.f32 %v3775_v21, %v3769_v8  ;;  %v3779_v45 = vmul.f32 %v3775_v21, %v3770_v53  ;;  %v3780_v40 = vmul.f32 %v3775_v21, %v3771_v38  ;;  %v3846_v2 = vld [vmem:[%s9548_s9 + $0x60] sm:$0xff]  ;;  %v3847_v8 = vld [vmem:[%s9548_s9 + $0x68] sm:$0xff]  ;;  %v3864_v38 = vld [vmem:[%s9548_s9 + $0xf0] sm:$0xff] }
 0x3eb   :  { %6311 = vmatpush3.bf16.msra.mxu1 %v6310_v37  ;;  %v6320_v21 = vpack.c.bf16 %v3863_v17, %v3862_v61  ;;  %v6322_v53 = vpack.c.bf16 %v3847_v8, %v3846_v2  ;;  %v3890_v61 = vld [vmem:[%s9548_s9 + $0x1c0] sm:$0xff]  ;;  %v3891_v17 = vld [vmem:[%s9548_s9 + $0x1c8] sm:$0xff] }
 0x3ec   :  { %v3786_v16 = vadd.f32 %v3784_v19, %v3777_v54  ;;  %v3787_v9 = vadd.f32 %v3784_v19, %v3778_v60  ;;  %v3788_v51 = vadd.f32 %v3784_v19, %v3779_v45  ;;  %v3789_v23 = vadd.f32 %v3784_v19, %v3780_v40  ;;  %6313 = vmatprep.subr.bf16.mxu1 %v6312_v18  ;;  %v3865_v19 = vld [vmem:[%s9548_s9 + $0xf8] sm:$0xff]  ;;  %v3848_v54 = vld [vmem:[%s9548_s9 + $0x70] sm:$0xff]  ;;  %v3874_v2 = vld [vmem:[%s9548_s9 + $0x140] sm:$0xff] }
 0x3ed   :  { %v6324_v45 = vpack.c.bf16 %v3865_v19, %v3864_v38  ;;  %v3849_v40 = vld [vmem:[%s9548_s9 + $0x78] sm:$0xff]  ;;  %v6336_v18 = vpack.c.bf16 %v3887_v63, %v3886_v25  ;;  %v3875_v8 = vld [vmem:[%s9548_s9 + $0x148] sm:$0xff] }
 0x3ee   :  { %vm3791_vm2 = vcmp.gt.f32.partialorder %v3787_v9, 0.0  ;;  %vm3792_vm0 = vcmp.gt.f32.partialorder %v3788_v51, 0.0  ;;  %v3795_v46 = vmul.f32 0.2, %v3787_v9  ;;  %v3796_v1 = vmul.f32 0.2, %v3788_v51 }
 0x3ef   :  { %vm3790_vm4 = vcmp.gt.f32.partialorder %v3786_v16, 0.0  ;;  %vm3793_vm3 = vcmp.gt.f32.partialorder %v3789_v23, 0.0  ;;  %v3794_v34 = vmul.f32 0.2, %v3786_v16  ;;  %v3797_v49 = vmul.f32 0.2, %v3789_v23  ;;  %6315 = vmatpush3.bf16.msra.mxu1 %v6314_v44 }
 0x3f0   :  { %v8743_v27 = vsel %vm3791_vm2, %v3787_v9, %v3795_v46  ;;  %v8745_v62 = vsel %vm3792_vm0, %v3788_v51, %v3796_v1  ;;  %6317 = vmatprep.subr.bf16.mxu1 %v6316_v15  ;;  %v6326_v51 = vpack.c.bf16 %v3849_v40, %v3848_v54  ;;  %v3883_v46 = vld [vmem:[%s9548_s9 + $0x188] sm:$0xff]  ;;  %v6338_v44 = vpack.c.bf16 %v3871_v43, %v3870_v30  ;;  %v3893_v38 = vld [vmem:[%s9548_s9 + $0x1d8] sm:$0xff]  ;;  %v3894_v40 = vld [vmem:[%s9548_s9 + $0x1e0] sm:$0xff] }
 0x3f1   :  { %v6829_v52 = vpack.i.bf16 %v8745_v62, %v8743_v27  ;;  %v8749_v12 = vsel %vm3790_vm4, %v3786_v16, %v3794_v34  ;;  %v8751_v7 = vsel %vm3793_vm3, %v3789_v23, %v3797_v49  ;;  %v3882_v23 = vld [vmem:[%s9548_s9 + $0x180] sm:$0xff]  ;;  %v6340_v15 = vpack.c.bf16 %v3889_v11, %v3888_v10  ;;  %v5906_v11 = vld [vmem:[%s9543_s4 + $0x28] sm:$0xff] }
 0x3f2   :  { %v6834_v20 = vpack.i.bf16 %v8749_v12, %v8751_v7  ;;  %v6328_v34 = vpack.c.bf16 %v3883_v46, %v3882_v23  ;;  %v6346_v19 = vpack.c.bf16 %v3875_v8, %v3874_v2  ;;  %v3878_v23 = vld [vmem:[%s9548_s9 + $0x160] sm:$0xff]  ;;  %v3879_v46 = vld [vmem:[%s9548_s9 + $0x168] sm:$0xff]  ;;  %vm4082_vm4 = vcmask 1043456  }
 0x3f3   :  { %6830 = vrot.lane.b32.xlu1 %v6829_v52, %s6892_s14  ;;  %6319 = vmatpush3.bf16.msra.mxu1 %v6318_v4  ;;  %v6342_v4 = vpack.c.bf16 %v3873_v50, %v3872_v59  ;;  %vm4078_vm3 = vcmask 64512   ;;  %v5905_v10 = vld [vmem:[%s9543_s4 + $0x20] sm:$0xff] }
 0x3f4   :  { %6321 = vmatprep.subr.bf16.mxu1 %v6320_v21  ;;  %v6344_v21 = vpack.c.bf16 %v3891_v17, %v3890_v61  ;;  %v4186_v50 = vpack.c.bf16 %v5906_v11, %v5905_v10  ;;  %v5938_v61 = vld [vmem:[%s9543_s4 + $0xd0] sm:$0xff] }
 0x3f7   :  { %6835 = vrot.lane.b32.xlu1 %v6834_v20, %s6892_s14  ;;  %6323 = vmatpush3.bf16.msra.mxu1 %v6322_v53  ;;  %v3892_v53 = vld [vmem:[%s9548_s9 + $0x1d0] sm:$0xff] }
 0x3f8   :  { %6325 = vmatprep.subr.bf16.mxu1 %v6324_v45  ;;  %v6348_v54 = vpack.c.bf16 %v3893_v38, %v3892_v53  ;;  %v3877_v45 = vld [vmem:[%s9548_s9 + $0x158] sm:$0xff] }
 0x3fb   :  { %6327 = vmatpush3.bf16.msra.mxu1 %v6326_v51 }
 0x3fc   :  { %6329 = vmatprep.subr.bf16.mxu1 %v6328_v34  ;;  %v3897_v34 = vld [vmem:[%s9548_s9 + $0x1f8] sm:$0xff] }
 0x465   :  { %v6831_v60 = vpop.permute.xlu1 %6830 }
 0x466   :  { %v6833_v16 = vunpack.i.h.bf16 %v6831_v60  ;;  %v6832_v9 = vunpack.i.l.bf16 %v6831_v60  ;;  %v3876_v60 = vld [vmem:[%s9548_s9 + $0x150] sm:$0xff] }
 0x468   :  { %v3811_v49 = vsel %vm9948_vm13, %v6832_v9, %v6833_v16 }
 0x469   :  { %v6836_v1 = vpop.permute.xlu1 %6835  ;;  %v3815_v31 = vmax.f32 %v8743_v27, %v3811_v49  ;;  %v6354_v49 = vpack.c.bf16 %v3879_v46, %v3878_v23 }
 0x46a   :  { %v6837_v52 = vunpack.i.l.bf16 %v6836_v1  ;;  %v6838_v20 = vunpack.i.h.bf16 %v6836_v1  ;;  %v3896_v1 = vld [vmem:[%s9548_s9 + $0x1f0] sm:$0xff] }
 0x46c   :  { %v3810_v14 = vsel %vm9949_vm7, %v6833_v16, %v6837_v52  ;;  %v3812_v6 = vsel %vm9950_vm14, %v6838_v20, %v6832_v9  ;;  %v3813_v33 = vsel %vm9951_vm10, %v6837_v52, %v6838_v20  ;;  %v3895_v16 = vld [vmem:[%s9548_s9 + $0x1e8] sm:$0xff]  ;;  %v6350_v9 = vpack.c.bf16 %v3877_v45, %v3876_v60  ;;  %v3880_v20 = vld [vmem:[%s9548_s9 + $0x170] sm:$0xff] }
 0x46d   :  { %v8865_v39 = vmax.f32 %v8745_v62, %v3810_v14  ;;  %v3814_v26 = vmax.f32 %v8749_v12, %v3812_v6  ;;  %v3817_v35 = vmax.f32 %v8751_v7, %v3813_v33  ;;  %v3867_v12 = vld [vmem:[%s9548_s9 + $0x108] sm:$0xff]  ;;  %v6352_v51 = vpack.c.bf16 %v3895_v16, %v3894_v40  ;;  %v3881_v14 = vld [vmem:[%s9548_s9 + $0x178] sm:$0xff]  ;;  %s6905_s9 = smov 9   ;;  %v5908_v40 = vld [vmem:[%s9543_s4 + $0x30] sm:$0xff] }
 0x46e   :  { %v6330_v55 = vpack.c.bf16 %v3867_v12, %v3866_v22  ;;  %v6356_v52 = vpack.c.bf16 %v3897_v34, %v3896_v1  ;;  %v5909_v16 = vld [vmem:[%s9543_s4 + $0x38] sm:$0xff]  ;;  %v5956_v60 = vld [vmem:[%s9543_s4 + $0x130] sm:$0xff]  ;;  %v5972_v34 = vld [vmem:[%s9543_s4 + $0x188] sm:$0xff] }
 0x46f   :  { %v6839_v24 = vpack.i.bf16 %v8865_v39, %v3815_v31  ;;  %v4250_v23 = vpack.c.bf16 %v5909_v16, %v5908_v40 }
 0x471   :  { %6840 = vrot.lane.b32.xlu1 %v6839_v24, %s6896_s18 }
 0x475   :  { %3818 = vrot.lane.b32.xlu1 %v3814_v26, %s6896_s18 }
 0x479   :  { %3824 = vrot.lane.b32.xlu1 %v3817_v35, %s6896_s18 }
 0x4e3   :  { %v8877_v27 = vpop.permute.xlu1 %6840 }
 0x4e4   :  { %v6843_v62 = vunpack.i.h.bf16 %v8877_v27  ;;  %v6842_v3 = vunpack.i.l.bf16 %v8877_v27 }
 0x4e6   :  { %v3827_v7 = vsel %vm9952_vm15, %v6842_v3, %v6843_v62 }
 0x4e7   :  { %v3819_v56 = vpop.permute.xlu1 %3818  ;;  %v3831_v41 = vmax.f32 %v3815_v31, %v3827_v7  ;;  %v6358_v31 = vpack.c.bf16 %v3881_v14, %v3880_v20  ;;  %v4042_v7 = vand.u32 7, %v7108_v58 }
 0x4e8   :  { %v3828_v36 = vsel %vm9953_vm6, %v3819_v56, %v6842_v3 }
 0x4e9   :  { %v3830_v42 = vmax.f32 %v3814_v26, %v3828_v36  ;;  %3962 = vmatprep.mubr.f32.mxu1 %v3831_v41  ;;  %v9032_v48 = vadd.s32 4294967294, %v4042_v7  ;;  %v9051_v0 = vadd.s32 1, %v4042_v7  ;;  %v9069_v43 = vadd.s32 4294967295, %v4042_v7 }
 0x4eb   :  { %v3825_v5 = vpop.permute.xlu1 %3824  ;;  %3963 = vmatmul.mubr.f32.vlgmr.msra.gmra.mrb[8].mxu1 %v3830_v42  ;;  %vm4052_vm2 = vcmp.ge.s32.totalorder %v9032_v48, 0  ;;  %v4059_v42 = vld [vmem:[%s9543_s4] sm:$0xff]  ;;  %vm4242_vm13 = vcmp.lt.s32.totalorder %v9051_v0, 8  ;;  %vm4066_vm15 = vcmp.ge.s32.totalorder %v9069_v43, 0  ;;  %v5944_v48 = vld [vmem:[%s9543_s4 + $0xf0] sm:$0xff] }
 0x4ec   :  { %v3829_v13 = vsel %vm9954_vm5, %v3825_v5, %v3819_v56  ;;  %6331 = vmatpush3.bf16.msra.mxu1 %v6330_v55  ;;  %v3826_v24 = vsel %vm9955_vm12, %v6843_v62, %v3825_v5 }
 0x4ed   :  { %v3833_v37 = vmax.f32 %v3817_v35, %v3829_v13  ;;  %6333 = vmatprep.subr.bf16.mxu1 %v6332_v29  ;;  %v3832_v6 = vmax.f32 %v8865_v39, %v3826_v24  ;;  %v4043_v39 = vshra.s32 %v7108_v58, 3  ;;  %v4060_v29 = vld [vmem:[%s9543_s4 + $0x8] sm:$0xff] }
 0x4ee   :  { %v4061_v13 = vpack.c.bf16 %v4060_v29, %v4059_v42 }
 0x4ef   :  { %4032 = vmatprep.mubr.f32.mxu1 %v3833_v37  ;;  %v4044_v12 = vand.u32 7, %v4043_v39 }
 0x4f0   :  { %6335 = vmatpush3.bf16.msra.mxu1 %v6334_v28 }
 0x4f1   :  { %6337 = vmatprep.subr.bf16.mxu1 %v6336_v18  ;;  %v4047_v32 = vadd.s32 4294967294, %v4044_v12  ;;  %vm4676_vm14 = vcmp.ge.s32.totalorder %v4044_v12, 0  ;;  %vm4677_vm10 = vcmp.lt.s32.totalorder %v4044_v12, 8  ;;  %v4977_v17 = vadd.s32 1, %v4044_v12 }
 0x4f2   :  { %vm9082_vm6 = vmand %vm4676_vm14, %vm4677_vm10  ;;  %v4367_v53 = vadd.s32 4294967295, %v4044_v12 }
 0x4f3   :  { %vm4048_vm1 = vcmp.ge.s32.totalorder %v4047_v32, 0  ;;  %vm4049_vm9 = vcmp.lt.s32.totalorder %v4047_v32, 8  ;;  %vm4740_vm12 = vmand %vm9082_vm6, %vm4066_vm15 }
 0x4f4   :  { %6339 = vmatpush3.bf16.msra.mxu1 %v6338_v44  ;;  %vm9034_vm8 = vmand %vm4048_vm1, %vm4049_vm9  ;;  %v9077_v44 = vadd.s32 2, %v4042_v7  ;;  %vm4978_vm9 = vcmp.ge.s32.totalorder %v4977_v17, 0  ;;  %vm4368_vm10 = vcmp.ge.s32.totalorder %v4367_v53, 0 }
 0x4f5   :  { %6341 = vmatprep.subr.bf16.mxu1 %v6340_v15  ;;  %vm4053_vm0 = vmand %vm9034_vm8, %vm4052_vm2 }
 0x4f6   :  { %vm4243_vm7 = vmand %vm9034_vm8, %vm4242_vm13  ;;  %vm9608_vm5 = vcmp.lt.s32.totalorder %v9077_v44, 8 }
 0x4f7   :  { %vm4307_vm1 = vmand %vm9034_vm8, %vm9608_vm5 }
 0x4f8   :  { %6343 = vmatpush3.bf16.msra.mxu1 %v6342_v4 }
 0x4f9   :  { %6345 = vmatprep.subr.bf16.mxu1 %v6344_v21 }
 0x4fc   :  { %6347 = vmatpush3.bf16.msra.mxu1 %v6346_v19  ;;  %v5286_v19 = vadd.s32 2, %v4044_v12 }
 0x4fd   :  { %6349 = vmatprep.subr.bf16.mxu1 %v6348_v54 }
 0x500   :  { %6351 = vmatpush3.bf16.msra.mxu1 %v6350_v9 }
 0x501   :  { %6353 = vmatprep.subr.bf16.mxu1 %v6352_v51 }
 0x504   :  { %6355 = vmatpush3.bf16.msra.mxu1 %v6354_v49 }
 0x505   :  { %6357 = vmatprep.subr.bf16.mxu1 %v6356_v52 }
 0x508   :  { %6359 = vmatpush3.bf16.msra.mxu1 %v6358_v31 }
 0x509   :  { %6111 = vmatprep.subr.bf16.mxu1 %v9911_v47 }
 0x50b   :  { %4033 = vmatmul.mubr.f32.vlgmr.msra.gmra.mrb[10].mxu1 %v3832_v6  ;;  %v5911_v6 = vld [vmem:[%s9543_s4 + $0x40] sm:$0xff] }
 0x50c   :  { %6113 = vmatprep.mubr.msk.bf16.mxu1 %vm9609_vm11, %v9911_v47 }
 0x5be   :  { %v6006_v26 = vpop.f32.mrb[8].mxu1 }
 0x5bf   :  { %v6007_v33 = vpop.f32.mrb[9].mxu1 }
 0x5c0   :  { %v6008_v35 = vadd.f32 %v6007_v33, %v6006_v26  ;;  %v5912_v26 = vld [vmem:[%s9543_s4 + $0x48] sm:$0xff] }
 0x5de   :  { %v6041_v27 = vpop.f32.mrb[10].mxu1 }
 0x5df   :  { %v6042_v3 = vpop.f32.mrb[11].mxu1 }
 0x5e0   :  { %v6043_v22 = vadd.f32 %v6042_v3, %v6041_v27  ;;  %v4314_v27 = vpack.c.bf16 %v5912_v26, %v5911_v6 }
 0x5e2   :  { %v8989_v62 = vadd.f32 %v6043_v22, %v6008_v35 }
 0x5e4   :  { %4174 = vrot.lane.b32.xlu0 %v8989_v62, %s6887_s27  ;;  %4045 = vrot.lane.b32.xlu1 %v8989_v62, %s6885_s25  ;;  %s6909_s25 = smov 6   ;;  %s6910_s27 = smov 122   ;;  %v4803_v6 = vpack.c.bf16 %v8989_v62, %v8989_v62 }
 0x5e6   :  { %v4808_v26 = vsel %vm4082_vm4, %v4803_v6, 0 }
 0x5e8   :  { %4301 = vrot.lane.b32.xlu0 %v8989_v62, %s6889_s29  ;;  %4237 = vrot.lane.b32.xlu1 %v8989_v62, %s6888_s28  ;;  %s6911_s28 = smov 120   ;;  %s6912_s29 = smov 121  }
 0x5ec   :  { %4430 = vrot.lane.b32.xlu0 %v8989_v62, %s6905_s9  ;;  %4365 = vrot.lane.b32.xlu1 %v8989_v62, %s6906_s24 }
 0x5f0   :  { %4552 = vrot.lane.b32.xlu0 %v8989_v62, %s6907_s19  ;;  %4491 = vrot.lane.b32.xlu1 %v8989_v62, %s6908_s26 }
 0x5f4   :  { %4674 = vrot.lane.b32.xlu0 %v8989_v62, %s6890_s30  ;;  %4613 = vrot.lane.b32.xlu1 %v8989_v62, %s6909_s25  ;;  %s6913_s30 = smov 118  }
 0x5f8   :  { %4853 = vrot.lane.b32.xlu0 %v8989_v62, %s6892_s14  ;;  %4738 = vrot.lane.b32.xlu1 %v8989_v62, %s6891_s13  ;;  %s9956_s13 = smov 17  }
 0x5fc   :  { %4975 = vrot.lane.b32.xlu0 %v8989_v62, %s6910_s27  ;;  %4914 = vrot.lane.b32.xlu1 %v8989_v62, %s6893_s15 }
 0x600   :  { %5101 = vrot.lane.b32.xlu0 %v8989_v62, %s6911_s28  ;;  %5040 = vrot.lane.b32.xlu1 %v8989_v62, %s6912_s29 }
 0x604   :  { %5223 = vrot.lane.b32.xlu0 %v8989_v62, %s6913_s30  ;;  %5162 = vrot.lane.b32.xlu1 %v8989_v62, %s6914_s20 }
 0x608   :  { %5349 = vrot.lane.b32.xlu0 %v8989_v62, %s6895_s17  ;;  %5284 = vrot.lane.b32.xlu1 %v8989_v62, %s6894_s16 }
 0x60c   :  { %5471 = vrot.lane.b32.xlu0 %v8989_v62, %s6897_s1  ;;  %5410 = vrot.lane.b32.xlu1 %v8989_v62, %s6896_s18 }
 0x610   :  { %5532 = vrot.lane.b32.xlu0 %v8989_v62, %s6898_s2  ;;  %4063 = vrot.lane.b32.xlu1 %v8989_v62, %s9956_s13  ;;  %v5935_v62 = vld [vmem:[%s9543_s4 + $0xc0] sm:$0xff] }
 0x656   :  { %v4175_v41 = vpop.permute.xlu0 %4174  ;;  %v4046_v36 = vpop.permute.xlu1 %4045 }
 0x657   :  { %v4182_v58 = vsel %vm9034_vm8, %v4175_v41, 0.0  ;;  %v4058_v55 = vsel %vm4053_vm0, %v4046_v36, 0.0  ;;  %vm4979_vm0 = vcmp.lt.s32.totalorder %v4977_v17, 8  ;;  %v5914_v41 = vld [vmem:[%s9543_s4 + $0x50] sm:$0xff]  ;;  %v5915_v36 = vld [vmem:[%s9543_s4 + $0x58] sm:$0xff]  ;;  %v5923_v17 = vld [vmem:[%s9543_s4 + $0x80] sm:$0xff] }
 0x658   :  { %v4062_v57 = vpack.c.bf16 %v4058_v55, %v4058_v55  ;;  %v4187_v25 = vpack.c.bf16 %v4182_v58, %v4182_v58  ;;  %vm9106_vm14 = vmand %vm4978_vm9, %vm4979_vm0  ;;  %vm5287_vm9 = vcmp.ge.s32.totalorder %v5286_v19, 0  ;;  %vm5288_vm0 = vcmp.lt.s32.totalorder %v5286_v19, 8  ;;  %v5926_v19 = vld [vmem:[%s9543_s4 + $0x90] sm:$0xff] }
 0x659   :  { %v4379_v55 = vpack.c.bf16 %v5915_v36, %v5914_v41 }
 0x65a   :  { %v4131_v63 = vsel %vm4082_vm4, %v4062_v57, 0  ;;  %v4238_v5 = vpop.permute.xlu1 %4237  ;;  %v4192_v28 = vsel %vm4082_vm4, %v4187_v25, 0  ;;  %v4302_v8 = vpop.permute.xlu0 %4301  ;;  %v5917_v57 = vld [vmem:[%s9543_s4 + $0x60] sm:$0xff]  ;;  %v5918_v25 = vld [vmem:[%s9543_s4 + $0x68] sm:$0xff] }
 0x65b   :  { %6118 = vmatpush3.bf16.msra.mxu0 %v4131_v63  ;;  %v4246_v30 = vsel %vm4243_vm7, %v4238_v5, 0.0  ;;  %vm4917_vm7 = vmand %vm9082_vm6, %vm9608_vm5  ;;  %v4310_v54 = vsel %vm4307_vm1, %v4302_v8, 0.0  ;;  %v4440_v5 = vpack.c.bf16 %v5918_v25, %v5917_v57  ;;  %v5942_v57 = vld [vmem:[%s9543_s4 + $0xe8] sm:$0xff] }
 0x65c   :  { %6123 = vmatprep.subr.bf16.mxu0 %v9911_v47  ;;  %v4251_v15 = vpack.c.bf16 %v4246_v30, %v4246_v30  ;;  %vm5042_vm1 = vmand %vm9106_vm14, %vm4066_vm15  ;;  %v4315_v9 = vpack.c.bf16 %v4310_v54, %v4310_v54  ;;  %v5921_v30 = vld [vmem:[%s9543_s4 + $0x78] sm:$0xff] }
 0x65d   :  { %vm5165_vm5 = vmand %vm9106_vm14, %vm4242_vm13  ;;  %v5927_v54 = vld [vmem:[%s9543_s4 + $0x98] sm:$0xff] }
 0x65e   :  { %6120 = vmatmul.mubr.msk.bf16.vlgmr.msra.gmra.mrb[4].mxu0 %vm4078_vm3, %v4061_v13  ;;  %v9058_v37 = vpop.permute.xlu1 %4365  ;;  %v4256_v4 = vsel %vm4082_vm4, %v4251_v15, 0  ;;  %v4320_v49 = vsel %vm4082_vm4, %v4315_v9, 0  ;;  %v4431_v12 = vpop.permute.xlu0 %4430  ;;  %v4623_v16 = vpack.c.bf16 %v5927_v54, %v5926_v19  ;;  %v5954_v54 = vld [vmem:[%s9543_s4 + $0x128] sm:$0xff] }
 0x65f   :  { %6124 = vmatpush3.bf16.msra.mxu0 %v4192_v28  ;;  %6125 = vmatprep.mubr.msk.bf16.mxu0 %vm9609_vm11, %v9911_v47 }
 0x660   :  { %6129 = vmatprep.subr.bf16.mxu0 %v9911_v47 }
 0x662   :  { %v9067_v18 = vpop.permute.xlu1 %4491  ;;  %v4553_v28 = vpop.permute.xlu0 %4552 }
 0x666   :  { %v9079_v59 = vpop.permute.xlu1 %4613 }
 0x66a   :  { %6126 = vmatmul.mubr.msk.bf16.vlgmr.msra.gmra.mrb[4].mxu0 %vm4078_vm3, %v4186_v50  ;;  %v4739_v21 = vpop.permute.xlu1 %4738 }
 0x66b   :  { %6130 = vmatpush3.bf16.msra.mxu0 %v4256_v4  ;;  %v9097_v2 = vsel %vm4740_vm12, %v4739_v21, 0.0  ;;  %6131 = vmatprep.mubr.msk.bf16.mxu0 %vm9609_vm11, %v9911_v47  ;;  %vm4369_vm12 = vcmp.lt.s32.totalorder %v4367_v53, 8  ;;  %vm9132_vm11 = vmand %vm5287_vm9, %vm5288_vm0  ;;  %vm9968_vm0 = vcmp.lt.s32.totalorder %v9077_v44, 8  ;;  %v5924_v4 = vld [vmem:[%s9543_s4 + $0x88] sm:$0xff]  ;;  %v5971_v44 = vld [vmem:[%s9543_s4 + $0x180] sm:$0xff] }
 0x66c   :  { %6135 = vmatprep.subr.bf16.mxu0 %v9911_v47  ;;  %v4562_v8 = vpack.c.bf16 %v5924_v4, %v5923_v17  ;;  %v4749_v46 = vpack.c.bf16 %v9097_v2, %v9097_v2  ;;  %v5950_v4 = vld [vmem:[%s9543_s4 + $0x110] sm:$0xff] }
 0x66e   :  { %v4915_v38 = vpop.permute.xlu1 %4914 }
 0x66f   :  { %v9110_v45 = vsel %vm4917_vm7, %v4915_v38, 0.0  ;;  %vm9122_vm7 = vmand %vm4368_vm10, %vm4369_vm12  ;;  %vm9967_vm12 = vmmov 0  }
 0x670   :  { %vm4371_vm10 = vmand %vm9122_vm7, %vm4052_vm2  ;;  %v4497_v29 = vsel %vm9122_vm7, %v9067_v18, 0.0  ;;  %v5920_v18 = vld [vmem:[%s9543_s4 + $0x70] sm:$0xff]  ;;  %v4925_v36 = vpack.c.bf16 %v9110_v45, %v9110_v45 }
 0x671   :  { %v4375_v31 = vsel %vm4371_vm10, %v9058_v37, 0.0  ;;  %vm4432_vm9 = vmand %vm9122_vm7, %vm4066_vm15  ;;  %v4502_v63 = vpack.c.bf16 %v4497_v29, %v4497_v29  ;;  %v4501_v11 = vpack.c.bf16 %v5921_v30, %v5920_v18  ;;  %v5941_v29 = vld [vmem:[%s9543_s4 + $0xe0] sm:$0xff] }
 0x672   :  { %v5041_v51 = vpop.permute.xlu1 %5040  ;;  %v4380_v33 = vpack.c.bf16 %v4375_v31, %v4375_v31  ;;  %v4436_v56 = vsel %vm4432_vm9, %v4431_v12, 0.0  ;;  %vm4616_vm10 = vmand %vm9122_vm7, %vm9968_vm0  ;;  %v5933_v31 = vld [vmem:[%s9543_s4 + $0xb8] sm:$0xff] }
 0x673   :  { %v9126_v1 = vsel %vm5042_vm1, %v5041_v51, 0.0  ;;  %vm5290_vm1 = vmand %vm9132_vm11, %vm4052_vm2  ;;  %v4441_v58 = vpack.c.bf16 %v4436_v56, %v4436_v56  ;;  %v4507_v13 = vsel %vm4082_vm4, %v4502_v63, 0  ;;  %v4619_v50 = vsel %vm4616_vm10, %v9079_v59, 0.0  ;;  %v4675_v59 = vpop.permute.xlu0 %4674  ;;  %v5929_v51 = vld [vmem:[%s9543_s4 + $0xa0] sm:$0xff]  ;;  %v5902_v56 = vld [vmem:[%s9543_s4 + $0x18] sm:$0xff] }
 0x674   :  { %v4385_v3 = vsel %vm4082_vm4, %v4380_v33, 0  ;;  %v4624_v21 = vpack.c.bf16 %v4619_v50, %v4619_v50  ;;  %v4924_v63 = vpack.c.bf16 %v5942_v57, %v5941_v29  ;;  %v5542_v29 = vpack.c.bf16 %v5972_v34, %v5971_v44  ;;  %v5679_v44 = vld [vmem:[%s9550_s11 + $0x58] sm:$0xff] }
 0x675   :  { %v4446_v42 = vsel %vm4082_vm4, %v4441_v58, 0 }
 0x676   :  { %6132 = vmatmul.mubr.msk.bf16.vlgmr.msra.gmra.mrb[4].mxu0 %vm4078_vm3, %v4250_v23  ;;  %v5163_v52 = vpop.permute.xlu1 %5162  ;;  %v4629_v53 = vsel %vm4082_vm4, %v4624_v21, 0  ;;  %v5930_v23 = vld [vmem:[%s9543_s4 + $0xa8] sm:$0xff]  ;;  %v5951_v21 = vld [vmem:[%s9543_s4 + $0x118] sm:$0xff] }
 0x677   :  { %6136 = vmatpush3.bf16.msra.mxu0 %v4320_v49  ;;  %v9142_v20 = vsel %vm5165_vm5, %v5163_v52, 0.0  ;;  %6137 = vmatprep.mubr.msk.bf16.mxu0 %vm9967_vm12, %v9911_v47  ;;  %vm4067_vm5 = vmand %vm9034_vm8, %vm4066_vm15  ;;  %v4687_v49 = vpack.c.bf16 %v5930_v23, %v5929_v51  ;;  %v4754_v52 = vsel %vm4082_vm4, %v4749_v46, 0  ;;  %v4854_v33 = vpop.permute.xlu0 %4853  ;;  %v5957_v51 = vld [vmem:[%s9543_s4 + $0x138] sm:$0xff] }
 0x678   :  { %6141 = vmatprep.subr.bf16.mxu0 %v9911_v47  ;;  %vm4555_vm8 = vmand %vm9122_vm7, %vm4242_vm13  ;;  %v5233_v46 = vpack.c.bf16 %v5957_v51, %v5956_v60 }
 0x679   :  { %v4558_v37 = vsel %vm4555_vm8, %v4553_v28, 0.0  ;;  %vm4679_vm7 = vmand %vm9082_vm6, %vm4052_vm2  ;;  %v5051_v28 = vpack.c.bf16 %v9126_v1, %v9126_v1  ;;  %v5948_v1 = vld [vmem:[%s9543_s4 + $0x108] sm:$0xff] }
 0x67a   :  { %v5285_v14 = vpop.permute.xlu1 %5284  ;;  %v4563_v10 = vpack.c.bf16 %v4558_v37, %v4558_v37  ;;  %v4683_v38 = vsel %vm4679_vm7, %v4675_v59, 0.0 }
 0x67b   :  { %v9152_v24 = vsel %vm5290_vm1, %v5285_v14, 0.0  ;;  %v4688_v40 = vpack.c.bf16 %v4683_v38, %v4683_v38  ;;  %v5932_v14 = vld [vmem:[%s9543_s4 + $0xb0] sm:$0xff]  ;;  %vm4856_vm1 = vmand %vm9082_vm6, %vm4242_vm13  ;;  %v4976_v45 = vpop.permute.xlu0 %4975  ;;  %v5056_v18 = vsel %vm4082_vm4, %v5051_v28, 0 }
 0x67c   :  { %v4568_v15 = vsel %vm4082_vm4, %v4563_v10, 0  ;;  %v4748_v2 = vpack.c.bf16 %v5933_v31, %v5932_v14  ;;  %vm4981_vm6 = vmand %vm9106_vm14, %vm4052_vm2  ;;  %v5299_v23 = vpack.c.bf16 %v9152_v24, %v9152_v24  ;;  %v5959_v24 = vld [vmem:[%s9543_s4 + $0x140] sm:$0xff]  ;;  %v5960_v31 = vld [vmem:[%s9543_s4 + $0x148] sm:$0xff] }
 0x67d   :  { %v4693_v9 = vsel %vm4082_vm4, %v4688_v40, 0  ;;  %vm9969_vm2 = vmmov %vm9968_vm0  ;;  %v5298_v6 = vpack.c.bf16 %v5960_v31, %v5959_v24  ;;  %v6915_v24 = vmov 0.0|0.0  }
 0x67e   :  { %v9160_v35 = vpop.permute.xlu1 %5410 }
 0x67f   :  { %v5102_v30 = vpop.permute.xlu0 %5101  ;;  %v5416_v43 = vsel %vm9132_vm11, %v9160_v35, 0.0 }
 0x680   :  { %v5107_v10 = vsel %vm9106_vm14, %v5102_v30, 0.0  ;;  %v4039_v30 = vld [vmem:[%s9545_s6 + $0x8] sm:$0xff] }
 0x682   :  { %6138 = vmatmul.mubr.msk.bf16.vlgmr.msra.gmra.mrb[4].mxu0 %vm4078_vm3, %v4314_v27  ;;  %v4064_v22 = vpop.permute.xlu1 %4063  ;;  %v4859_v27 = vsel %vm4856_vm1, %v4854_v33, 0.0  ;;  %v5962_v33 = vld [vmem:[%s9543_s4 + $0x150] sm:$0xff] }
 0x683   :  { %6142 = vmatpush3.bf16.msra.mxu0 %v4385_v3  ;;  %v4072_v39 = vsel %vm4067_vm5, %v4064_v22, 0.0  ;;  %6143 = vmatprep.mubr.msk.bf16.mxu0 %vm9967_vm12, %v9911_v47  ;;  %v5936_v3 = vld [vmem:[%s9543_s4 + $0xc8] sm:$0xff]  ;;  %v4864_v22 = vpack.c.bf16 %v4859_v27, %v4859_v27  ;;  %vm5226_vm5 = vmand %vm9106_vm14, %vm9969_vm2  ;;  %v5224_v38 = vpop.permute.xlu0 %5223  ;;  %v5963_v27 = vld [vmem:[%s9543_s4 + $0x158] sm:$0xff] }
 0x684   :  { %v4077_v7 = vpack.c.bf16 %v4072_v39, %v4072_v39  ;;  %6147 = vmatprep.subr.bf16.mxu0 %v9911_v47  ;;  %v4802_v39 = vpack.c.bf16 %v5936_v3, %v5935_v62  ;;  %v5229_v19 = vsel %vm5226_vm5, %v5224_v38, 0.0  ;;  %vm5351_vm14 = vmand %vm9132_vm11, %vm4066_vm15  ;;  %v5421_v62 = vpack.c.bf16 %v5416_v43, %v5416_v43 }
 0x685   :  { %v4869_v12 = vsel %vm4082_vm4, %v4864_v22, 0  ;;  %v5234_v40 = vpack.c.bf16 %v5229_v19, %v5229_v19  ;;  %v5359_v3 = vpack.c.bf16 %v5963_v27, %v5962_v33  ;;  %vm5474_vm15 = vmand %vm9132_vm11, %vm4242_vm13 }
 0x686   :  { %v4084_v32 = vsel %vm4082_vm4, %v4077_v7, 0  ;;  %v5939_v7 = vld [vmem:[%s9543_s4 + $0xd8] sm:$0xff]  ;;  %v5426_v22 = vsel %vm4082_vm4, %v5421_v62, 0  ;;  %vm9970_vm13 = vmmov %vm9968_vm0 }
 0x687   :  { %6112 = vmatpush3.bf16.msra.mxu1 %v4084_v32  ;;  %v5901_v32 = vld [vmem:[%s9543_s4 + $0x10] sm:$0xff]  ;;  %v4863_v58 = vpack.c.bf16 %v5939_v7, %v5938_v61  ;;  %v5966_v61 = vld [vmem:[%s9543_s4 + $0x168] sm:$0xff]  ;;  %vm5535_vm9 = vmand %vm9132_vm11, %vm9970_vm13 }
 0x688   :  { %v4076_v41 = vpack.c.bf16 %v5902_v56, %v5901_v32  ;;  %6360 = vmatprep.subr.bf16.mxu1 %v6915_v24 }
 0x68a   :  { %6114 = vmatmul.mubr.msk.bf16.vlgmr.msra.gmra.mrb[12].mxu1 %vm4078_vm3, %v4076_v41 }
 0x68b   :  { %6293 = vmatprep.mubr.msk.f32.mxu1 %vm9967_vm12, %v9911_v47 }
 0x68e   :  { %6144 = vmatmul.mubr.msk.bf16.vlgmr.msra.gmra.mrb[4].mxu0 %vm4078_vm3, %v4379_v55  ;;  %v4930_v55 = vsel %vm4082_vm4, %v4925_v36, 0  ;;  %v5968_v36 = vld [vmem:[%s9543_s4 + $0x170] sm:$0xff] }
 0x68f   :  { %6148 = vmatpush3.bf16.msra.mxu0 %v4446_v42  ;;  %6149 = vmatprep.mubr.msk.bf16.mxu0 %vm9967_vm12, %v9911_v47  ;;  %v4985_v42 = vsel %vm4981_vm6, %v4976_v45, 0.0 }
 0x690   :  { %6153 = vmatprep.subr.bf16.mxu0 %v9911_v47  ;;  %v4990_v25 = vpack.c.bf16 %v4985_v42, %v4985_v42 }
 0x69a   :  { %6150 = vmatmul.mubr.msk.bf16.vlgmr.msra.gmra.mrb[4].mxu0 %vm4078_vm3, %v4440_v5  ;;  %v4995_v5 = vsel %vm4082_vm4, %v4990_v25, 0 }
 0x69b   :  { %6154 = vmatpush3.bf16.msra.mxu0 %v4507_v13  ;;  %6155 = vmatprep.mubr.msk.bf16.mxu0 %vm9967_vm12, %v9911_v47  ;;  %v5945_v13 = vld [vmem:[%s9543_s4 + $0xf8] sm:$0xff] }
 0x69c   :  { %6159 = vmatprep.subr.bf16.mxu0 %v9911_v47  ;;  %v4989_v37 = vpack.c.bf16 %v5945_v13, %v5944_v48 }
 0x6a6   :  { %6156 = vmatmul.mubr.msk.bf16.vlgmr.msra.gmra.mrb[4].mxu0 %vm4078_vm3, %v4501_v11  ;;  %v5947_v11 = vld [vmem:[%s9543_s4 + $0x100] sm:$0xff] }
 0x6a7   :  { %6160 = vmatpush3.bf16.msra.mxu0 %v4568_v15  ;;  %6161 = vmatprep.mubr.msk.bf16.mxu0 %vm9967_vm12, %v9911_v47  ;;  %v5112_v15 = vpack.c.bf16 %v5107_v10, %v5107_v10  ;;  %v5050_v50 = vpack.c.bf16 %v5948_v1, %v5947_v11  ;;  %v4038_v10 = vld [vmem:[%s9545_s6] sm:$0xff] }
 0x6a8   :  { %6165 = vmatprep.subr.bf16.mxu0 %v9911_v47 }
 0x6a9   :  { %v5117_v17 = vsel %vm4082_vm4, %v5112_v15, 0 }
 0x6b2   :  { %6162 = vmatmul.mubr.msk.bf16.vlgmr.msra.gmra.mrb[4].mxu0 %vm4078_vm3, %v4562_v8  ;;  %v5173_v8 = vpack.c.bf16 %v9142_v20, %v9142_v20  ;;  %v5953_v20 = vld [vmem:[%s9543_s4 + $0x120] sm:$0xff] }
 0x6b3   :  { %6166 = vmatpush3.bf16.msra.mxu0 %v4629_v53  ;;  %6167 = vmatprep.mubr.msk.bf16.mxu0 %vm9967_vm12, %v9911_v47  ;;  %v5111_v53 = vpack.c.bf16 %v5951_v21, %v5950_v4 }
 0x6b4   :  { %6171 = vmatprep.subr.bf16.mxu0 %v9911_v47  ;;  %v5178_v59 = vsel %vm4082_vm4, %v5173_v8, 0 }
 0x6be   :  { %6168 = vmatmul.mubr.msk.bf16.vlgmr.msra.gmra.mrb[4].mxu0 %vm4078_vm3, %v4623_v16  ;;  %v5172_v16 = vpack.c.bf16 %v5954_v54, %v5953_v20 }
 0x6bf   :  { %6172 = vmatpush3.bf16.msra.mxu0 %v4693_v9  ;;  %6173 = vmatprep.mubr.msk.bf16.mxu0 %vm9967_vm12, %v9911_v47  ;;  %v5239_v9 = vsel %vm4082_vm4, %v5234_v40, 0 }
 0x6c0   :  { %6177 = vmatprep.subr.bf16.mxu0 %v9911_v47 }
 0x6ca   :  { %6174 = vmatmul.mubr.msk.bf16.vlgmr.msra.gmra.mrb[4].mxu0 %vm4078_vm3, %v4687_v49  ;;  %v5304_v49 = vsel %vm4082_vm4, %v5299_v23, 0 }
 0x6cb   :  { %6178 = vmatpush3.bf16.msra.mxu0 %v4754_v52  ;;  %6179 = vmatprep.mubr.msk.bf16.mxu0 %vm9967_vm12, %v9911_v47  ;;  %v5350_v52 = vpop.permute.xlu0 %5349 }
 0x6cc   :  { %6183 = vmatprep.subr.bf16.mxu0 %v9911_v47  ;;  %v5355_v14 = vsel %vm5351_vm14, %v5350_v52, 0.0  ;;  %v5670_v52 = vld [vmem:[%s9550_s11 + $0x10] sm:$0xff] }
 0x6cf   :  { %v5472_v35 = vpop.permute.xlu0 %5471 }
 0x6d3   :  { %v5533_v0 = vpop.permute.xlu0 %5532 }
 0x6d4   :  { %v5538_v41 = vsel %vm5535_vm9, %v5533_v0, 0.0  ;;  %v5674_v0 = vld [vmem:[%s9550_s11 + $0x30] sm:$0xff] }
 0x6d6   :  { %6180 = vmatmul.mubr.msk.bf16.vlgmr.msra.gmra.mrb[4].mxu0 %vm4078_vm3, %v4748_v2  ;;  %v5360_v2 = vpack.c.bf16 %v5355_v14, %v5355_v14 }
 0x6d7   :  { %6184 = vmatpush3.bf16.msra.mxu0 %v4808_v26  ;;  %6185 = vmatprep.mubr.msk.bf16.mxu0 %vm9967_vm12, %v9911_v47 }
 0x6d8   :  { %6189 = vmatprep.subr.bf16.mxu0 %v9911_v47  ;;  %v5365_v26 = vsel %vm4082_vm4, %v5360_v2, 0  ;;  %v5671_v2 = vld [vmem:[%s9550_s11 + $0x18] sm:$0xff] }
 0x6d9   :  { %v6364_v33 = vpack.c.bf16 %v5671_v2, %v5670_v52 }
 0x6e2   :  { %6186 = vmatmul.mubr.msk.bf16.vlgmr.msra.gmra.mrb[4].mxu0 %vm4078_vm3, %v4802_v39  ;;  %v5477_v39 = vsel %vm5474_vm15, %v5472_v35, 0.0 }
 0x6e3   :  { %6190 = vmatpush3.bf16.msra.mxu0 %v4869_v12  ;;  %6191 = vmatprep.mubr.msk.bf16.mxu0 %vm9967_vm12, %v9911_v47  ;;  %v5965_v12 = vld [vmem:[%s9543_s4 + $0x160] sm:$0xff]  ;;  %v5482_v7 = vpack.c.bf16 %v5477_v39, %v5477_v39 }
 0x6e4   :  { %6195 = vmatprep.subr.bf16.mxu0 %v9911_v47  ;;  %v5420_v32 = vpack.c.bf16 %v5966_v61, %v5965_v12 }
 0x6e5   :  { %v5487_v56 = vsel %vm4082_vm4, %v5482_v7, 0 }
 0x6ee   :  { %6192 = vmatmul.mubr.msk.bf16.vlgmr.msra.gmra.mrb[4].mxu0 %vm4078_vm3, %v4863_v58  ;;  %v5969_v58 = vld [vmem:[%s9543_s4 + $0x178] sm:$0xff] }
 0x6ef   :  { %6196 = vmatpush3.bf16.msra.mxu0 %v4930_v55  ;;  %6197 = vmatprep.mubr.msk.bf16.mxu0 %vm9967_vm12, %v9911_v47  ;;  %v5543_v55 = vpack.c.bf16 %v5538_v41, %v5538_v41  ;;  %v5481_v45 = vpack.c.bf16 %v5969_v58, %v5968_v36  ;;  %v5675_v41 = vld [vmem:[%s9550_s11 + $0x38] sm:$0xff]  ;;  %v5676_v58 = vld [vmem:[%s9550_s11 + $0x40] sm:$0xff] }
 0x6f0   :  { %6201 = vmatprep.subr.bf16.mxu0 %v9911_v47  ;;  %v6370_v36 = vpack.c.bf16 %v5675_v41, %v5674_v0 }
 0x6f1   :  { %v5548_v42 = vsel %vm4082_vm4, %v5543_v55, 0  ;;  %v5677_v55 = vld [vmem:[%s9550_s11 + $0x48] sm:$0xff] }
 0x6fa   :  { %6198 = vmatmul.mubr.msk.bf16.vlgmr.msra.gmra.mrb[4].mxu0 %vm4078_vm3, %v4924_v63 }
 0x6fb   :  { %6202 = vmatpush3.bf16.msra.mxu0 %v4995_v5  ;;  %6203 = vmatprep.mubr.msk.bf16.mxu0 %vm9967_vm12, %v9911_v47 }
 0x6fc   :  { %6207 = vmatprep.subr.bf16.mxu0 %v9911_v47 }
 0x706   :  { %6204 = vmatmul.mubr.msk.bf16.vlgmr.msra.gmra.mrb[4].mxu0 %vm4078_vm3, %v4989_v37 }
 0x707   :  { %6208 = vmatpush3.bf16.msra.mxu0 %v5056_v18  ;;  %6209 = vmatprep.mubr.msk.bf16.mxu0 %vm9967_vm12, %v9911_v47 }
 0x708   :  { %6213 = vmatprep.subr.bf16.mxu0 %v9911_v47 }
 0x712   :  { %6210 = vmatmul.mubr.msk.bf16.vlgmr.msra.gmra.mrb[4].mxu0 %vm4078_vm3, %v5050_v50 }
 0x713   :  { %6214 = vmatpush3.bf16.msra.mxu0 %v5117_v17  ;;  %6215 = vmatprep.mubr.msk.bf16.mxu0 %vm9967_vm12, %v9911_v47 }
 0x714   :  { %6219 = vmatprep.subr.bf16.mxu0 %v9911_v47 }
 0x71e   :  { %6216 = vmatmul.mubr.msk.bf16.vlgmr.msra.gmra.mrb[4].mxu0 %vm4078_vm3, %v5111_v53  ;;  %v4040_v53 = vld [vmem:[%s9547_s8] sm:$0xff] }
 0x71f   :  { %6220 = vmatpush3.bf16.msra.mxu0 %v5178_v59  ;;  %6221 = vmatprep.mubr.msk.bf16.mxu0 %vm9967_vm12, %v9911_v47  ;;  %v4041_v59 = vld [vmem:[%s9547_s8 + $0x8] sm:$0xff] }
 0x720   :  { %6225 = vmatprep.subr.bf16.mxu0 %v9911_v47 }
 0x72a   :  { %6222 = vmatmul.mubr.msk.bf16.vlgmr.msra.gmra.mrb[4].mxu0 %vm4078_vm3, %v5172_v16 }
 0x72b   :  { %6226 = vmatpush3.bf16.msra.mxu0 %v5239_v9  ;;  %6227 = vmatprep.mubr.msk.bf16.mxu0 %vm9967_vm12, %v9911_v47 }
 0x72c   :  { %6231 = vmatprep.subr.bf16.mxu0 %v9911_v47 }
 0x736   :  { %6228 = vmatmul.mubr.msk.bf16.vlgmr.msra.gmra.mrb[4].mxu0 %vm4078_vm3, %v5233_v46  ;;  %v5668_v46 = vld [vmem:[%s9550_s11] sm:$0xff] }
 0x737   :  { %6232 = vmatpush3.bf16.msra.mxu0 %v5304_v49  ;;  %6233 = vmatprep.mubr.msk.bf16.mxu0 %vm9967_vm12, %v9911_v47  ;;  %v5669_v49 = vld [vmem:[%s9550_s11 + $0x8] sm:$0xff] }
 0x738   :  { %6237 = vmatprep.subr.bf16.mxu0 %v9911_v47  ;;  %v6361_v31 = vpack.c.bf16 %v5669_v49, %v5668_v46 }
 0x73a   :  { %6362 = vmatpush3.bf16.msra.mxu1 %v6361_v31 }
 0x73b   :  { %6363 = vmatprep.subr.bf16.mxu1 %v6915_v24 }
 0x73e   :  { %6365 = vmatpush3.bf16.msra.mxu1 %v6364_v33 }
 0x73f   :  { %6366 = vmatprep.subr.bf16.mxu1 %v6915_v24 }
 0x742   :  { %6234 = vmatmul.mubr.msk.bf16.vlgmr.msra.gmra.mrb[4].mxu0 %vm4078_vm3, %v5298_v6 }
 0x743   :  { %6238 = vmatpush3.bf16.msra.mxu0 %v5365_v26  ;;  %6239 = vmatprep.mubr.msk.bf16.mxu0 %vm9967_vm12, %v9911_v47 }
 0x744   :  { %6243 = vmatprep.subr.bf16.mxu0 %v9911_v47 }
 0x74e   :  { %6240 = vmatmul.mubr.msk.bf16.vlgmr.msra.gmra.mrb[4].mxu0 %vm4078_vm3, %v5359_v3  ;;  %v5672_v3 = vld [vmem:[%s9550_s11 + $0x20] sm:$0xff] }
 0x74f   :  { %6244 = vmatpush3.bf16.msra.mxu0 %v5426_v22  ;;  %6245 = vmatprep.mubr.msk.bf16.mxu0 %vm9967_vm12, %v9911_v47  ;;  %v5673_v22 = vld [vmem:[%s9550_s11 + $0x28] sm:$0xff] }
 0x750   :  { %6249 = vmatprep.subr.bf16.mxu0 %v9911_v47  ;;  %v6367_v61 = vpack.c.bf16 %v5673_v22, %v5672_v3 }
 0x752   :  { %6368 = vmatpush3.bf16.msra.mxu1 %v6367_v61 }
 0x753   :  { %6369 = vmatprep.subr.bf16.mxu1 %v6915_v24 }
 0x756   :  { %6371 = vmatpush3.bf16.msra.mxu1 %v6370_v36 }
 0x757   :  { %6372 = vmatprep.subr.bf16.mxu1 %v6915_v24 }
 0x75a   :  { %6246 = vmatmul.mubr.msk.bf16.vlgmr.msra.gmra.mrb[4].mxu0 %vm4078_vm3, %v5420_v32 }
 0x75b   :  { %6250 = vmatpush3.bf16.msra.mxu0 %v5487_v56  ;;  %6251 = vmatprep.mubr.msk.bf16.mxu0 %vm9967_vm12, %v9911_v47 }
 0x75c   :  { %6255 = vmatprep.subr.bf16.mxu0 %v9911_v47 }
 0x75d   :  { %v4120_v57 = vpop.f32.mrb[12].mxu1 }
 0x75e   :  { %v6115_v25 = vpop.f32.mrb[13].mxu1 }
 0x75f   :  { %v4123_v63 = vpop.f32.mrb[14].mxu1  ;;  %v5680_v25 = vld [vmem:[%s9550_s11 + $0x60] sm:$0xff] }
 0x760   :  { %v6116_v5 = vpop.f32.mrb[15].mxu1 }
 0x766   :  { %6252 = vmatmul.mubr.msk.bf16.vlgmr.msra.gmra.mrb[4].mxu0 %vm4078_vm3, %v5481_v45  ;;  %v6373_v45 = vpack.c.bf16 %v5677_v55, %v5676_v58 }
 0x767   :  { %6256 = vmatpush3.bf16.msra.mxu0 %v5548_v42  ;;  %6257 = vmatprep.mubr.msk.bf16.mxu0 %vm9967_vm12, %v9911_v47  ;;  %v5678_v42 = vld [vmem:[%s9550_s11 + $0x50] sm:$0xff] }
 0x768   :  { %6374 = vmatpush3.bf16.msra.mxu1 %v6373_v45  ;;  %v6376_v34 = vpack.c.bf16 %v5679_v44, %v5678_v42 }
 0x769   :  { %6375 = vmatprep.subr.bf16.mxu1 %v6915_v24 }
 0x76c   :  { %6377 = vmatpush3.bf16.msra.mxu1 %v6376_v34 }
 0x76d   :  { %6378 = vmatprep.subr.bf16.mxu1 %v6915_v24 }
 0x772   :  { %6258 = vmatmul.mubr.msk.bf16.vlgmr.msra.gmra.mrb[4].mxu0 %vm4078_vm3, %v5542_v29  ;;  %vm5760_vm3 = vcmask 8192  }
 0x845   :  { %v5584_v48 = vpop.f32.mrb[4].mxu0 }
 0x846   :  { %v6386_v13 = vadd.f32 %v5584_v48, %v4120_v57  ;;  %v6259_v28 = vpop.f32.mrb[5].mxu0 }
 0x847   :  { %v5587_v37 = vpop.f32.mrb[6].mxu0  ;;  %v5682_v28 = vld [vmem:[%s9550_s11 + $0x70] sm:$0xff] }
 0x848   :  { %v6387_v47 = vadd.f32 %v5587_v37, %v4123_v63  ;;  %5593 = vadd.xlane.f32.xlu1 %v6386_v13  ;;  %v6260_v18 = vpop.f32.mrb[7].mxu0  ;;  %v5681_v63 = vld [vmem:[%s9550_s11 + $0x68] sm:$0xff]  ;;  %v5683_v37 = vld [vmem:[%s9550_s11 + $0x78] sm:$0xff] }
 0x849   :  { %v6379_v48 = vpack.c.bf16 %v5681_v63, %v5680_v25 }
 0x84a   :  { %5595 = vadd.xlane.f32.xlu0 %v6387_v47 }
 0x84b   :  { %6380 = vmatpush3.bf16.msra.mxu1 %v6379_v48 }
 0x84c   :  { %6381 = vmatprep.subr.bf16.mxu1 %v6915_v24 }
 0x859   :  { %5622 = vperm.xlu1 %6828, %v4039_v30  }
 0x860   :  { %5617 = vperm.xlu0 %6827, %v4038_v10   ;;  %v5657_v10 = vld [vmem:[%s9549_s10] sm:$0xff] }
 0x8d5   :  { %v5594_v11 = vpop.xlane.xlu1 %5593 }
 0x8d6   :  { %v5597_v1 = vmul.f32 0.0078125, %v5594_v11  ;;  %v5658_v11 = vld [vmem:[%s9549_s10 + $0x8] sm:$0xff]  ;;  %s6916_s10 = smov [#allocation2]  }
 0x8d7   :  { %v5596_v15 = vpop.xlane.xlu0 %5595  ;;  %s5768_s11 = sshll.u32 %s6916_s10, 4  ;;  %s5769_s11 = int_to_ptr.vmem [resolvable:$true] %s5768_s11 }
 0x8d8   :  { %v5599_v50 = vsub.f32 %v6386_v13, %v5597_v1  ;;  %v5598_v17 = vmul.f32 0.0078125, %v5596_v15  ;;  %s6858_s13 = scalar_lea.vmem %s5769_s11, 32  ;;  %p6859_p1 = scmp.lt.s32.totalorder %s5769_s11, %s5769_s11 }
 0x8d9   :  { %v5623_v19 = vpop.permute.xlu1 %5622 }
 0x8da   :  { %v5600_v4 = vsub.f32 %v6387_v47, %v5598_v17  ;;  %v5601_v21 = vmul.f32 %v5599_v50, %v5599_v50  ;;  %v6382_v47 = vpack.c.bf16 %v5683_v37, %v5682_v28 }
 0x8dc   :  { %5603 = vadd.xlane.f32.xlu0 %v5601_v21  ;;  %v5602_v8 = vmul.f32 %v5600_v4, %v5600_v4  ;;  %6383 = vmatpush3.bf16.msra.mxu1 %v6382_v47 }
 0x8de   :  { %5605 = vadd.xlane.f32.xlu1 %v5602_v8 }
 0x8df   :  { %v5618_v38 = vpop.permute.xlu0 %5617 }
 0x8ef   :  { %5629 = vperm.xlu1 %6828, %v4040_v53  }
 0x8f2   :  { %5634 = vperm.xlu0 %6827, %v4041_v59  }
 0x969   :  { %v5604_v20 = vpop.xlane.xlu0 %5603 }
 0x96a   :  { %v5607_v54 = vmul.f32 0.0078125, %v5604_v20 }
 0x96b   :  { %v5606_v40 = vpop.xlane.xlu1 %5605 }
 0x96c   :  { %v5609_v16 = vadd.f32 1e-05, %v5607_v54  ;;  %v5608_v9 = vmul.f32 0.0078125, %v5606_v40 }
 0x96e   :  { %6846 = vrsqrt.f32 %v5609_v16  ;;  %v5610_v60 = vadd.f32 1e-05, %v5608_v9 }
 0x96f   :  { %v5630_v43 = vpop.permute.xlu1 %5629 }
 0x970   :  { %6848 = vrsqrt.f32 %v5610_v60 }
 0x971   :  { %v5635_v35 = vpop.permute.xlu0 %5634 }
 0x978   :  { %v6847_v51 = vpop.eup %6846 }
 0x979   :  { %v5613_v23 = vmul.f32 %v6847_v51, %v5599_v50 }
 0x97a   :  { %v6849_v14 = vpop.eup %6848 }
 0x97b   :  { %v5625_v6 = vmul.f32 %v5618_v38, %v5613_v23  ;;  %v5614_v26 = vmul.f32 %v6849_v14, %v5600_v4 }
 0x97d   :  { %v5637_v27 = vadd.f32 %v5630_v43, %v5625_v6  ;;  %v5626_v62 = vmul.f32 %v5623_v19, %v5614_v26 }
 0x97f   :  { %vm5639_vm11 = vcmp.gt.f32.partialorder %v5637_v27, 0.0  ;;  %v5641_v39 = vmul.f32 0.2, %v5637_v27  ;;  %v5638_v12 = vadd.f32 %v5635_v35, %v5626_v62 }
 0x981   :  { %vm5640_vm4 = vcmp.gt.f32.partialorder %v5638_v12, 0.0  ;;  %v5642_v7 = vmul.f32 0.2, %v5638_v12  ;;  %v5643_v32 = vsel %vm5639_vm11, %v5637_v27, %v5641_v39 }
 0x982   :  { %5645 = vrot.lane.b32.xlu1 %v5643_v32, %s6892_s14 }
 0x983   :  { %v5644_v56 = vsel %vm5640_vm4, %v5638_v12, %v5642_v7 }
 0x984   :  { %5647 = vrot.lane.b32.xlu0 %v5644_v56, %s6892_s14 }
 0x9f4   :  { %v5646_v29 = vpop.permute.xlu1 %5645 }
 0x9f5   :  { %v5649_v57 = vmax.f32 %v5643_v32, %v5646_v29 }
 0x9f6   :  { %v5648_v5 = vpop.permute.xlu0 %5647 }
 0x9f7   :  { %v5650_v13 = vmax.f32 %v5644_v56, %v5648_v5  ;;  %5651 = vrot.lane.b32.xlu1 %v5649_v57, %s6911_s28 }
 0x9f9   :  { %5653 = vrot.lane.b32.xlu0 %v5650_v13, %s6911_s28  ;;  %s6854_s28 = scalar_lea.vmem %s5769_s11, 16 }
 0x9fa   :  { %p6855_p0 = scmp.ne.s32.totalorder %s5769_s11, %s6854_s28  ;;  %p6860_p2 = scmp.lt.s32.totalorder %s6858_s13, %s6854_s28 }
 0x9fc   :  { %p6861_p3 = por %p6860_p2, %p6859_p1 }
 0x9fe   :  { %p6862_p4 = pnand %p6861_p3, %p6855_p0 }
 0xa69   :  { %v5652_v18 = vpop.permute.xlu1 %5651 }
 0xa6a   :  { %v5655_v30 = vmax.f32 %v5649_v57, %v5652_v18 }
 0xa6b   :  { %v5654_v1 = vpop.permute.xlu0 %5653 }
 0xa6c   :  { %v5656_v15 = vmax.f32 %v5650_v13, %v5654_v1  ;;  %v5659_v50 = vmul.f32 %v5657_v10, %v5655_v30 }
 0xa6e   :  { %v5660_v17 = vmul.f32 %v5658_v11, %v5656_v15 }
 0xa70   :  { %v5661_v4 = vadd.f32 %v5660_v17, %v5659_v50 }
 0xa72   :  { %v5662_v21 = vrot.slane %v5661_v4, 4 }
 0xa74   :  { %v5663_v8 = vadd.f32 %v5662_v21, %v5661_v4 }
 0xa76   :  { %v5664_v53 = vrot.slane %v5663_v8, 2 }
 0xa78   :  { %v5665_v59 = vadd.f32 %v5664_v53, %v5663_v8 }
 0xa7a   :  { %v5666_v38 = vrot.slane %v5665_v59, 1 }
 0xa7c   :  { %v5667_v19 = vadd.f32 %v5666_v38, %v5665_v59 }
 0xa7e   :  { %6294 = vmatmul.mubr.f32.vlgmr.msra.gmra.mrb[16].mxu1 %v5667_v19 }
 0xb51   :  { %v5750_v20 = vpop.f32.mrb[16].mxu1 }
 0xb52   :  { %v5754_v54 = vsub.f32 0.0, %v5750_v20  ;;  %v6295_v40 = vpop.f32.mrb[17].mxu1 }
 0xb54   :  { %v5755_v16 = vmul.f32 1.442695, %v5754_v54 }
 0xb56   :  { %6850 = vpow2.f32 %v5755_v16 }
 0xb60   :  { %v6851_v9 = vpop.eup %6850 }
 0xb61   :  { %v5757_v60 = vadd.f32 1.0, %v6851_v9 }
 0xb63   :  { %6852 = vrcp.f32 %v5757_v60 }
 0xb6d   :  { %v6853_v51 = vpop.eup %6852 }
 0xb6e   :  { %5761 = vst.msk [vmem:[#allocation2] sm:$0x1] %vm5760_vm3, %v6853_v51 }
 0xb6f   :  { %6865 = shalt.err (!%p6862_p4)
}
 0xb70   :  { %s6866_s17 = scalar_lea.hbm %s9551_s12, 16 }
 0xb71   :  { %p6867_p5 = scmp.ne.s32.totalorder %s9551_s12, %s6866_s17  ;;  %p6870_p6 = scmp.lt.u32.totalorder %s6866_s17, %s9551_s12 }
 0xb73   :  { %p6872_p7 = pnand %p6870_p6, %p6867_p5 }
 0xb75   :  { %6875 = shalt.err (!%p6872_p7)
}
 0xb76   :  { %5771 = dma.vmem_to_hbm [thread:$0]  %s5769_s11, 16, %s9551_s12, [#allocation3]  }
 0xb77   :  { %6876 = dma.done.wait [#allocation3], 16  }
 0xb78   :  { %6877 = vsyncadd [#allocation3], 4294967280 }
 0xb79   :  { %5775 = vsyncpa [#allocation3], 1 }

</bundles_post_ra>
